<compile_context>
chip_gen: v5e
topology: v5e:2x2
jax: 0.10.0
libtpu: 0.0.40
codegen_flags: <defaults>
</compile_context>

<pallas_src>
import jax
import jax.numpy as jnp
from jax import lax
from jax.experimental import pallas as pl
from jax.experimental.pallas import tpu as pltpu


def _round_up(x, m):
    return ((x + m - 1) // m) * m


def _pick_batch_block(B):
    # Largest batch block in (8,4,2) that divides B while keeping grid extent
    # >= 2 (v7x megacore); otherwise fall back to 1.
    for bb in (8, 4, 2):
        if B % bb == 0 and B // bb >= 2:
            return bb
    return 1


# ----------------------------------------------------------------------------
# Fused kernel: PointNetFeat encoder + Linear/BN/ReLU + PointGenCon decoder.
# One grid step == BB batch elements.  All tensors are channel-major (C, N).
# ----------------------------------------------------------------------------
def _make_network_kernel(n_in, chunk, batch_block, ew_dtype=jnp.bfloat16):
    n_chunks = n_in // chunk
    BB = batch_block

    def kernel(x_ref, mesh_l1_ref,
               e_w1, e_b1, e_w2, e_b2, e_w3, e_b3, e_wl, e_bl,
               d_w1f, d_b1, d_w2, d_b2, d_w3, d_b3, d_w4, d_b4,
               out_ref):
        # ---------------- encoder: shared point MLP 3 -> 64 -> 128 -> 1024
        w1, w2, w3 = e_w1[...], e_w2[...], e_w3[...]
        # Elementwise bias/ReLU in ew_dtype (bf16 on v6e/v7x); biases cast once.
        b1e = e_b1[...].astype(ew_dtype)
        b2e = e_b2[...].astype(ew_dtype)

        def point_mlp(xc):          # xc: (3, pts) f32 -> (1024, pts) f32, pre-bias
            h = jnp.dot(w1, xc.astype(jnp.bfloat16),
                        preferred_element_type=jnp.float32)
            h = jnp.maximum(h.astype(ew_dtype) + b1e, 0)
            h = jnp.dot(w2, h.astype(jnp.bfloat16),
                        preferred_element_type=jnp.float32)
            h = jnp.maximum(h.astype(ew_dtype) + b2e, 0)
            return jnp.dot(w3, h.astype(jnp.bfloat16),
                           preferred_element_type=jnp.float32)

        g_cols = []
        for bb in range(BB):
            if n_chunks == 1:
                acc = point_mlp(x_ref[bb])
            else:
                # Running elementwise max over (1024, chunk); single XLU lane
                # reduce after the loop.
                def body(c, a):
                    start = pl.multiple_of(c * chunk, chunk)
                    return jnp.maximum(a, point_mlp(x_ref[bb, :, pl.ds(start, chunk)]))
                acc = lax.fori_loop(0, n_chunks, body,
                                    jnp.full((1024, chunk), -jnp.inf, jnp.float32))
            g_cols.append(jnp.max(acc, axis=1, keepdims=True))   # (1024, 1)

        G = g_cols[0] if BB == 1 else jnp.concatenate(g_cols, axis=1)  # (1024, BB)
        G = G + e_b3[...]          # layer-3 bias AFTER the max (no ReLU on layer 3)

        # ---------------- Linear(1024, dim_pn) + BN(eval) + ReLU, batched over BB
        wl = e_wl[...]
        feat = jnp.maximum(
            jnp.dot(wl, G.astype(jnp.bfloat16),
                    preferred_element_type=jnp.float32) + e_bl[...], 0.0)  # (dim_pn, BB)

        # ---------------- folding decoder (PointGenCon); concat folded into bias1
        w1f = d_w1f[...]
        bias1 = jnp.dot(w1f, feat.astype(jnp.bfloat16),
                        preferred_element_type=jnp.float32) + d_b1[...]    # (bs_p, BB)

        mesh_l1 = mesh_l1_ref[...]                                         # (bs_p, Np)
        w2d, w3d, w4d = d_w2[...], d_w3[...], d_w4[...]
        b2d, b3d, b4d = d_b2[...], d_b3[...], d_b4[...]
        for bb in range(BB):
            h = jnp.maximum(mesh_l1 + bias1[:, bb:bb + 1], 0.0)
            h = jnp.maximum(jnp.dot(w2d, h.astype(jnp.bfloat16),
                                    preferred_element_type=jnp.float32) + b2d, 0.0)
            h = jnp.maximum(jnp.dot(w3d, h.astype(jnp.bfloat16),
                                    preferred_element_type=jnp.float32) + b3d, 0.0)
            out_ref[bb] = jnp.tanh(jnp.dot(w4d, h.astype(jnp.bfloat16),
                                           preferred_element_type=jnp.float32) + b4d)

    return kernel


# ----------------------------------------------------------------------------
# Parameters: deterministic init, channel-major (C_out, C_in), BN folded
# (eval mode), decoder channels zero-padded to sublane multiples, decoder
# layer-1 weight pre-split into grid / feature parts.
# ----------------------------------------------------------------------------
def init_params(key, dim_pn, eps=1e-5, weight_dtype=jnp.bfloat16):
    bn_scale = (1.0 + eps) ** -0.5   # (x - 0)/sqrt(1 + eps) * 1 + 0

    def lin(k, cout, cin, fold_bn=True):
        kw, kb = jax.random.split(k)
        w = jax.random.normal(kw, (cout, cin), jnp.float32) / jnp.sqrt(float(cin))
        b = jax.random.normal(kb, (cout, 1), jnp.float32) * 0.01
        if fold_bn:
            w, b = w * bn_scale, b * bn_scale
        return w, b

    def pad_rows(w, b, rows_p):
        extra = rows_p - w.shape[0]
        if extra > 0:   # zero rows + zero bias -> relu(0)=0, no pollution downstream
            w = jnp.pad(w, ((0, extra), (0, 0)))
            b = jnp.pad(b, ((0, extra), (0, 0)))
        return w, b

    def pad_cols(w, cols_p):
        extra = cols_p - w.shape[1]
        return jnp.pad(w, ((0, 0), (0, extra))) if extra > 0 else w

    ks = jax.random.split(key, 8)
    bs = 2 + dim_pn                     # PointGenCon bottleneck
    bs_p = _round_up(bs, 8)
    bs2, bs2_p = bs // 2, _round_up(bs // 2, 8)
    bs4, bs4_p = bs // 4, _round_up(bs // 4, 8)

    p = {}
    # PointNetFeat shared MLP
    p["e_w1"], p["e_b1"] = lin(ks[0], 64, 3)
    p["e_w2"], p["e_b2"] = lin(ks[1], 128, 64)
    p["e_w3"], p["e_b3"] = lin(ks[2], 1024, 128)
    # Linear(1024, dim_pn) + BN + ReLU
    p["e_wl"], p["e_bl"] = lin(ks[3], dim_pn, 1024)
    # PointGenCon decoder
    w1, b1 = lin(ks[4], bs, bs)
    w1, b1 = pad_rows(w1, b1, bs_p)
    p["d_w1g"] = w1[:, 0:2]             # acts on the 2-D mesh grid (batch-invariant)
    p["d_w1f"] = w1[:, 2:bs]            # acts on the per-batch global feature
    p["d_b1"] = b1
    w2, b2 = lin(ks[5], bs2, bs)
    w2, b2 = pad_rows(w2, b2, bs2_p)
    p["d_w2"], p["d_b2"] = pad_cols(w2, bs_p), b2
    w3, b3 = lin(ks[6], bs4, bs2)
    w3, b3 = pad_rows(w3, b3, bs4_p)
    p["d_w3"], p["d_b3"] = pad_cols(w3, bs2_p), b3
    w4, b4 = lin(ks[7], 3, bs4, fold_bn=False)   # no BN on last conv
    p["d_w4"], p["d_b4"] = pad_cols(w4, bs4_p), b4

    # bf16 weights feed the MXU; biases stay f32 (added post-accumulation).
    return {k: (v.astype(weight_dtype) if "_w" in k else v.astype(jnp.float32))
            for k, v in p.items()}


# ----------------------------------------------------------------------------
# Wrapper
# ----------------------------------------------------------------------------
def network_forward(part, params, npoints, dim_pn,
                    elementwise_dtype=jnp.bfloat16):
    """part: (B, 3, N_in) float32, matching the PyTorch NCW convention.

    elementwise_dtype: bf16 on v6e/v7x (bf16 VPU), jnp.float32 on v5e.
    """
    B, C, n_in = part.shape
    assert C == 3
    if npoints % 64 != 0:
        # Matches PyTorch: mesh would have 64*(npoints//64) points and the cat
        # with the expanded feature would fail.
        raise ValueError("npoints must be a multiple of 64")

    part = part.astype(jnp.float32)

    # Pad the cloud to a 128-lane multiple by replicating the last real point:
    # the channel-wise max is unaffected by duplicate points (zero-padding
    # would inject a spurious origin point).
    n_in_pad = _round_up(n_in, 128)
    if n_in_pad != n_in:
        last = jnp.broadcast_to(part[:, :, -1:], (B, 3, n_in_pad - n_in))
        part = jnp.concatenate([part, last], axis=2)

    # Encoder point chunk: largest of (2048,...,128) dividing the padded size
    # (always exists since n_in_pad % 128 == 0) -> the (1024, chunk) f32
    # intermediate stays <= 8 MiB regardless of cloud size.
    if n_in_pad <= 2048:
        chunk = n_in_pad
    else:
        chunk = next(c for c in (2048, 1024, 512, 256, 128) if n_in_pad % c == 0)

    BB = _pick_batch_block(B)

    # mesh grid, channel-major (2, npoints): same as the torch.meshgrid('ij')
    # construction transposed.  The batch-invariant first-layer grid term
    # W1_grid @ mesh is computed ONCE here and passed to the kernel.
    g0, g1 = jnp.meshgrid(jnp.linspace(0.0, 1.0, 64),
                          jnp.linspace(0.0, 1.0, npoints // 64), indexing="ij")
    mesh = jnp.stack([g0.reshape(-1), g1.reshape(-1)], axis=0).astype(jnp.float32)
    npoints_pad = _round_up(npoints, 128)          # lane-dense output stores
    if npoints_pad != npoints:
        mesh = jnp.pad(mesh, ((0, 0), (0, npoints_pad - npoints)))
    mesh_l1 = jnp.dot(params["d_w1g"].astype(jnp.float32), mesh)   # (bs_p, Np)

    wkeys = ("e_w1", "e_b1", "e_w2", "e_b2", "e_w3", "e_b3", "e_wl", "e_bl",
             "d_w1f", "d_b1", "d_w2", "d_b2", "d_w3", "d_b3", "d_w4", "d_b4")
    weights = [params[k] for k in wkeys]
    # Constant-index blocks: the pipeliner elides re-copies across grid steps.
    weight_specs = [pl.BlockSpec(params[k].shape, lambda b: (0, 0)) for k in wkeys]

    pcd_fold_t = pl.pallas_call(
        _make_network_kernel(n_in_pad, chunk, BB, ew_dtype=elementwise_dtype),
        out_shape=jax.ShapeDtypeStruct((B, 3, npoints_pad), jnp.float32),
        grid_spec=pltpu.PrefetchScalarGridSpec(
            num_scalar_prefetch=0,
            grid=(B // BB,),
            in_specs=[pl.BlockSpec((BB, 3, n_in_pad), lambda b: (b, 0, 0)),
                      pl.BlockSpec(mesh_l1.shape, lambda b: (0, 0))]
                     + weight_specs,
            out_specs=pl.BlockSpec((BB, 3, npoints_pad), lambda b: (b, 0, 0)),
        ),
        compiler_params=pltpu.CompilerParams(
            dimension_semantics=("parallel",),
            vmem_limit_bytes=32 * 1024 * 1024,
        ),
    )(part, mesh_l1, *weights)

    # PyTorch: pcd_fold = decoder_fold(y).transpose(1, 2)  -> (B, npoints, 3).
    # Kept outside the kernel (lane dim 3 would make the stores lane-hostile);
    # consumers that accept (B, 3, npoints) should use pcd_fold_t directly.
    pcd_fold = jnp.transpose(pcd_fold_t[:, :, :npoints], (0, 2, 1))

    output = {"softpool": [], "msn": [], "folding": [pcd_fold], "grnet": [],
              "shapegf": [], "disp3d": [], "pcn": [], "pointr": []}
    return output


# ----------------------------------------------------------------------------
if __name__ == "__main__":
    # Small shapes consistent with the forward pass:
    #   part: (B, 3, N_in) point cloud; npoints a multiple of 64.
    # N_in=200 exercises the point-replication padding; B=4 exercises BB=2
    # batch blocking with a grid extent of 2.
    B, N_in = 4, 200
    npoints, dim_pn = 128, 64

    key = jax.random.PRNGKey(0)
    k_part, k_params = jax.random.split(key)
    part = jax.random.normal(k_part, (B, 3, N_in), jnp.float32)
    params = init_params(k_params, dim_pn)

    out = network_forward(part, params, npoints=npoints, dim_pn=dim_pn)
    pcd_fold = out["folding"][0]
    jax.block_until_ready(pcd_fold)
    assert pcd_fold.shape == (B, npoints, 3), pcd_fold.shape
    assert bool(jnp.all(jnp.isfinite(pcd_fold)))
    assert bool(jnp.all(jnp.abs(pcd_fold) <= 1.0 + 1e-6))  # tanh range
    print("KERNEL_OK")
</pallas_src>

<mosaic_0001>
module attributes {stable_mosaic.version = 11 : i64} {
  func.func @kernel(%arg0: i32, %arg1: memref<2x3x256xf32, #tpu.memory_space<vmem>>, %arg2: memref<72x128xf32, #tpu.memory_space<vmem>>, %arg3: memref<64x3xbf16, #tpu.memory_space<vmem>>, %arg4: memref<64x1xf32, #tpu.memory_space<vmem>>, %arg5: memref<128x64xbf16, #tpu.memory_space<vmem>>, %arg6: memref<128x1xf32, #tpu.memory_space<vmem>>, %arg7: memref<1024x128xbf16, #tpu.memory_space<vmem>>, %arg8: memref<1024x1xf32, #tpu.memory_space<vmem>>, %arg9: memref<64x1024xbf16, #tpu.memory_space<vmem>>, %arg10: memref<64x1xf32, #tpu.memory_space<vmem>>, %arg11: memref<72x64xbf16, #tpu.memory_space<vmem>>, %arg12: memref<72x1xf32, #tpu.memory_space<vmem>>, %arg13: memref<40x72xbf16, #tpu.memory_space<vmem>>, %arg14: memref<40x1xf32, #tpu.memory_space<vmem>>, %arg15: memref<16x40xbf16, #tpu.memory_space<vmem>>, %arg16: memref<16x1xf32, #tpu.memory_space<vmem>>, %arg17: memref<3x16xbf16, #tpu.memory_space<vmem>>, %arg18: memref<3x1xf32, #tpu.memory_space<vmem>>, %arg19: memref<2x3x128xf32, #tpu.memory_space<vmem>>) attributes {dimension_semantics = [#tpu.dimension_semantics<parallel>], iteration_bounds = array<i64: 2>, scalar_prefetch = 0 : i64, scratch_operands = 0 : i64, tpu.core_type = #tpu.core_type<tc>, window_params = [{transform_indices = @transform_0, window_bounds = array<i64: 2, 3, 256>}, {pipeline_mode = #tpu.pipeline_mode<synchronous>, transform_indices = @transform_1, window_bounds = array<i64: 72, 128>}, {pipeline_mode = #tpu.pipeline_mode<synchronous>, transform_indices = @transform_2, window_bounds = array<i64: 64, 3>}, {pipeline_mode = #tpu.pipeline_mode<synchronous>, transform_indices = @transform_3, window_bounds = array<i64: 64, 1>}, {pipeline_mode = #tpu.pipeline_mode<synchronous>, transform_indices = @transform_4, window_bounds = array<i64: 128, 64>}, {pipeline_mode = #tpu.pipeline_mode<synchronous>, transform_indices = @transform_5, window_bounds = array<i64: 128, 1>}, {pipeline_mode = #tpu.pipeline_mode<synchronous>, transform_indices = @transform_6, window_bounds = array<i64: 1024, 128>}, {pipeline_mode = #tpu.pipeline_mode<synchronous>, transform_indices = @transform_7, window_bounds = array<i64: 1024, 1>}, {pipeline_mode = #tpu.pipeline_mode<synchronous>, transform_indices = @transform_8, window_bounds = array<i64: 64, 1024>}, {pipeline_mode = #tpu.pipeline_mode<synchronous>, transform_indices = @transform_9, window_bounds = array<i64: 64, 1>}, {pipeline_mode = #tpu.pipeline_mode<synchronous>, transform_indices = @transform_10, window_bounds = array<i64: 72, 64>}, {pipeline_mode = #tpu.pipeline_mode<synchronous>, transform_indices = @transform_11, window_bounds = array<i64: 72, 1>}, {pipeline_mode = #tpu.pipeline_mode<synchronous>, transform_indices = @transform_12, window_bounds = array<i64: 40, 72>}, {pipeline_mode = #tpu.pipeline_mode<synchronous>, transform_indices = @transform_13, window_bounds = array<i64: 40, 1>}, {pipeline_mode = #tpu.pipeline_mode<synchronous>, transform_indices = @transform_14, window_bounds = array<i64: 16, 40>}, {pipeline_mode = #tpu.pipeline_mode<synchronous>, transform_indices = @transform_15, window_bounds = array<i64: 16, 1>}, {pipeline_mode = #tpu.pipeline_mode<synchronous>, transform_indices = @transform_16, window_bounds = array<i64: 3, 16>}, {pipeline_mode = #tpu.pipeline_mode<synchronous>, transform_indices = @transform_17, window_bounds = array<i64: 3, 1>}, {transform_indices = @transform_18, window_bounds = array<i64: 2, 3, 128>}]} {
    %c0 = arith.constant 0 : index
    %c0_0 = arith.constant 0 : index
    %0 = vector.load %arg3[%c0, %c0_0] : memref<64x3xbf16, #tpu.memory_space<vmem>>, vector<64x3xbf16>
    %c0_1 = arith.constant 0 : index
    %c0_2 = arith.constant 0 : index
    %1 = vector.load %arg5[%c0_1, %c0_2] : memref<128x64xbf16, #tpu.memory_space<vmem>>, vector<128x64xbf16>
    %c0_3 = arith.constant 0 : index
    %c0_4 = arith.constant 0 : index
    %2 = vector.load %arg7[%c0_3, %c0_4] : memref<1024x128xbf16, #tpu.memory_space<vmem>>, vector<1024x128xbf16>
    %c0_5 = arith.constant 0 : index
    %c0_6 = arith.constant 0 : index
    %3 = vector.load %arg4[%c0_5, %c0_6] : memref<64x1xf32, #tpu.memory_space<vmem>>, vector<64x1xf32>
    %4 = arith.truncf %3 : vector<64x1xf32> to vector<64x1xbf16>
    %c0_7 = arith.constant 0 : index
    %c0_8 = arith.constant 0 : index
    %5 = vector.load %arg6[%c0_7, %c0_8] : memref<128x1xf32, #tpu.memory_space<vmem>>, vector<128x1xf32>
    %6 = arith.truncf %5 : vector<128x1xf32> to vector<128x1xbf16>
    %c0_9 = arith.constant 0 : index
    %c0_10 = arith.constant 0 : index
    %c0_11 = arith.constant 0 : index
    %7 = vector.load %arg1[%c0_9, %c0_10, %c0_11] : memref<2x3x256xf32, #tpu.memory_space<vmem>>, vector<1x3x256xf32>
    %8 = vector.shape_cast %7 : vector<1x3x256xf32> to vector<3x256xf32>
    %9 = arith.truncf %8 : vector<3x256xf32> to vector<3x256xbf16>
    %cst = arith.constant dense<0.000000e+00> : vector<64x256xf32>
    %10 = tpu.matmul %0, %9, %cst {dimension_numbers = #tpu.dot_dimension_numbers<[1], [0], [0], [1], [0, 0, 1, 1], [], []>} : vector<64x3xbf16>, vector<3x256xbf16>, vector<64x256xf32> -> vector<64x256xf32>
    %11 = arith.truncf %10 : vector<64x256xf32> to vector<64x256xbf16>
    %12 = vector.broadcast %4 : vector<64x1xbf16> to vector<64x256xbf16>
    %13 = arith.addf %11, %12 : vector<64x256xbf16>
    %cst_12 = arith.constant 0.000000e+00 : bf16
    %14 = vector.broadcast %cst_12 : bf16 to vector<64x256xbf16>
    %15 = arith.maximumf %13, %14 : vector<64x256xbf16>
    %cst_13 = arith.constant dense<0.000000e+00> : vector<128x256xf32>
    %16 = tpu.matmul %1, %15, %cst_13 {dimension_numbers = #tpu.dot_dimension_numbers<[1], [0], [0], [1], [0, 0, 1, 1], [], []>} : vector<128x64xbf16>, vector<64x256xbf16>, vector<128x256xf32> -> vector<128x256xf32>
    %17 = arith.truncf %16 : vector<128x256xf32> to vector<128x256xbf16>
    %18 = vector.broadcast %6 : vector<128x1xbf16> to vector<128x256xbf16>
    %19 = arith.addf %17, %18 : vector<128x256xbf16>
    %cst_14 = arith.constant 0.000000e+00 : bf16
    %20 = vector.broadcast %cst_14 : bf16 to vector<128x256xbf16>
    %21 = arith.maximumf %19, %20 : vector<128x256xbf16>
    %cst_15 = arith.constant dense<0.000000e+00> : vector<1024x256xf32>
    %22 = tpu.matmul %2, %21, %cst_15 {dimension_numbers = #tpu.dot_dimension_numbers<[1], [0], [0], [1], [0, 0, 1, 1], [], []>} : vector<1024x128xbf16>, vector<128x256xbf16>, vector<1024x256xf32> -> vector<1024x256xf32>
    %cst_16 = arith.constant dense<0xFF800000> : vector<1024xf32>
    %23 = vector.multi_reduction <maximumf>, %22, %cst_16 [1] : vector<1024x256xf32> to vector<1024xf32>
    %24 = vector.shape_cast %23 : vector<1024xf32> to vector<1024x1xf32>
    %c1 = arith.constant 1 : index
    %c0_17 = arith.constant 0 : index
    %c0_18 = arith.constant 0 : index
    %25 = vector.load %arg1[%c1, %c0_17, %c0_18] : memref<2x3x256xf32, #tpu.memory_space<vmem>>, vector<1x3x256xf32>
    %26 = vector.shape_cast %25 : vector<1x3x256xf32> to vector<3x256xf32>
    %27 = arith.truncf %26 : vector<3x256xf32> to vector<3x256xbf16>
    %cst_19 = arith.constant dense<0.000000e+00> : vector<64x256xf32>
    %28 = tpu.matmul %0, %27, %cst_19 {dimension_numbers = #tpu.dot_dimension_numbers<[1], [0], [0], [1], [0, 0, 1, 1], [], []>} : vector<64x3xbf16>, vector<3x256xbf16>, vector<64x256xf32> -> vector<64x256xf32>
    %29 = arith.truncf %28 : vector<64x256xf32> to vector<64x256xbf16>
    %30 = vector.broadcast %4 : vector<64x1xbf16> to vector<64x256xbf16>
    %31 = arith.addf %29, %30 : vector<64x256xbf16>
    %cst_20 = arith.constant 0.000000e+00 : bf16
    %32 = vector.broadcast %cst_20 : bf16 to vector<64x256xbf16>
    %33 = arith.maximumf %31, %32 : vector<64x256xbf16>
    %cst_21 = arith.constant dense<0.000000e+00> : vector<128x256xf32>
    %34 = tpu.matmul %1, %33, %cst_21 {dimension_numbers = #tpu.dot_dimension_numbers<[1], [0], [0], [1], [0, 0, 1, 1], [], []>} : vector<128x64xbf16>, vector<64x256xbf16>, vector<128x256xf32> -> vector<128x256xf32>
    %35 = arith.truncf %34 : vector<128x256xf32> to vector<128x256xbf16>
    %36 = vector.broadcast %6 : vector<128x1xbf16> to vector<128x256xbf16>
    %37 = arith.addf %35, %36 : vector<128x256xbf16>
    %cst_22 = arith.constant 0.000000e+00 : bf16
    %38 = vector.broadcast %cst_22 : bf16 to vector<128x256xbf16>
    %39 = arith.maximumf %37, %38 : vector<128x256xbf16>
    %cst_23 = arith.constant dense<0.000000e+00> : vector<1024x256xf32>
    %40 = tpu.matmul %2, %39, %cst_23 {dimension_numbers = #tpu.dot_dimension_numbers<[1], [0], [0], [1], [0, 0, 1, 1], [], []>} : vector<1024x128xbf16>, vector<128x256xbf16>, vector<1024x256xf32> -> vector<1024x256xf32>
    %cst_24 = arith.constant dense<0xFF800000> : vector<1024xf32>
    %41 = vector.multi_reduction <maximumf>, %40, %cst_24 [1] : vector<1024x256xf32> to vector<1024xf32>
    %42 = vector.shape_cast %41 : vector<1024xf32> to vector<1024x1xf32>
    %43 = tpu.concatenate %24, %42 in 1 : vector<1024x1xf32>, vector<1024x1xf32> -> vector<1024x2xf32>
    %c0_25 = arith.constant 0 : index
    %c0_26 = arith.constant 0 : index
    %44 = vector.load %arg8[%c0_25, %c0_26] : memref<1024x1xf32, #tpu.memory_space<vmem>>, vector<1024x1xf32>
    %45 = vector.broadcast %44 : vector<1024x1xf32> to vector<1024x2xf32>
    %46 = arith.addf %43, %45 : vector<1024x2xf32>
    %c0_27 = arith.constant 0 : index
    %c0_28 = arith.constant 0 : index
    %47 = vector.load %arg9[%c0_27, %c0_28] : memref<64x1024xbf16, #tpu.memory_space<vmem>>, vector<64x1024xbf16>
    %48 = arith.truncf %46 : vector<1024x2xf32> to vector<1024x2xbf16>
    %cst_29 = arith.constant dense<0.000000e+00> : vector<64x2xf32>
    %49 = tpu.matmul %47, %48, %cst_29 {dimension_numbers = #tpu.dot_dimension_numbers<[1], [0], [0], [1], [0, 0, 1, 1], [], []>} : vector<64x1024xbf16>, vector<1024x2xbf16>, vector<64x2xf32> -> vector<64x2xf32>
    %c0_30 = arith.constant 0 : index
    %c0_31 = arith.constant 0 : index
    %50 = vector.load %arg10[%c0_30, %c0_31] : memref<64x1xf32, #tpu.memory_space<vmem>>, vector<64x1xf32>
    %51 = vector.broadcast %50 : vector<64x1xf32> to vector<64x2xf32>
    %52 = arith.addf %49, %51 : vector<64x2xf32>
    %cst_32 = arith.constant 0.000000e+00 : f32
    %53 = vector.broadcast %cst_32 : f32 to vector<64x2xf32>
    %54 = arith.maximumf %52, %53 : vector<64x2xf32>
    %c0_33 = arith.constant 0 : index
    %c0_34 = arith.constant 0 : index
    %55 = vector.load %arg11[%c0_33, %c0_34] : memref<72x64xbf16, #tpu.memory_space<vmem>>, vector<72x64xbf16>
    %56 = arith.truncf %54 : vector<64x2xf32> to vector<64x2xbf16>
    %cst_35 = arith.constant dense<0.000000e+00> : vector<72x2xf32>
    %57 = tpu.matmul %55, %56, %cst_35 {dimension_numbers = #tpu.dot_dimension_numbers<[1], [0], [0], [1], [0, 0, 1, 1], [], []>} : vector<72x64xbf16>, vector<64x2xbf16>, vector<72x2xf32> -> vector<72x2xf32>
    %c0_36 = arith.constant 0 : index
    %c0_37 = arith.constant 0 : index
    %58 = vector.load %arg12[%c0_36, %c0_37] : memref<72x1xf32, #tpu.memory_space<vmem>>, vector<72x1xf32>
    %59 = vector.broadcast %58 : vector<72x1xf32> to vector<72x2xf32>
    %60 = arith.addf %57, %59 : vector<72x2xf32>
    %c0_38 = arith.constant 0 : index
    %c0_39 = arith.constant 0 : index
    %61 = vector.load %arg2[%c0_38, %c0_39] : memref<72x128xf32, #tpu.memory_space<vmem>>, vector<72x128xf32>
    %c0_40 = arith.constant 0 : index
    %c0_41 = arith.constant 0 : index
    %62 = vector.load %arg13[%c0_40, %c0_41] : memref<40x72xbf16, #tpu.memory_space<vmem>>, vector<40x72xbf16>
    %c0_42 = arith.constant 0 : index
    %c0_43 = arith.constant 0 : index
    %63 = vector.load %arg15[%c0_42, %c0_43] : memref<16x40xbf16, #tpu.memory_space<vmem>>, vector<16x40xbf16>
    %c0_44 = arith.constant 0 : index
    %c0_45 = arith.constant 0 : index
    %64 = vector.load %arg17[%c0_44, %c0_45] : memref<3x16xbf16, #tpu.memory_space<vmem>>, vector<3x16xbf16>
    %c0_46 = arith.constant 0 : index
    %c0_47 = arith.constant 0 : index
    %65 = vector.load %arg14[%c0_46, %c0_47] : memref<40x1xf32, #tpu.memory_space<vmem>>, vector<40x1xf32>
    %c0_48 = arith.constant 0 : index
    %c0_49 = arith.constant 0 : index
    %66 = vector.load %arg16[%c0_48, %c0_49] : memref<16x1xf32, #tpu.memory_space<vmem>>, vector<16x1xf32>
    %c0_50 = arith.constant 0 : index
    %c0_51 = arith.constant 0 : index
    %67 = vector.load %arg18[%c0_50, %c0_51] : memref<3x1xf32, #tpu.memory_space<vmem>>, vector<3x1xf32>
    %68 = vector.extract_strided_slice %60 {offsets = [0, 0], sizes = [72, 1], strides = [1, 1]} : vector<72x2xf32> to vector<72x1xf32>
    %69 = vector.broadcast %68 : vector<72x1xf32> to vector<72x128xf32>
    %70 = arith.addf %61, %69 : vector<72x128xf32>
    %cst_52 = arith.constant 0.000000e+00 : f32
    %71 = vector.broadcast %cst_52 : f32 to vector<72x128xf32>
    %72 = arith.maximumf %70, %71 : vector<72x128xf32>
    %73 = arith.truncf %72 : vector<72x128xf32> to vector<72x128xbf16>
    %cst_53 = arith.constant dense<0.000000e+00> : vector<40x128xf32>
    %74 = tpu.matmul %62, %73, %cst_53 {dimension_numbers = #tpu.dot_dimension_numbers<[1], [0], [0], [1], [0, 0, 1, 1], [], []>} : vector<40x72xbf16>, vector<72x128xbf16>, vector<40x128xf32> -> vector<40x128xf32>
    %75 = vector.broadcast %65 : vector<40x1xf32> to vector<40x128xf32>
    %76 = arith.addf %74, %75 : vector<40x128xf32>
    %cst_54 = arith.constant 0.000000e+00 : f32
    %77 = vector.broadcast %cst_54 : f32 to vector<40x128xf32>
    %78 = arith.maximumf %76, %77 : vector<40x128xf32>
    %79 = arith.truncf %78 : vector<40x128xf32> to vector<40x128xbf16>
    %cst_55 = arith.constant dense<0.000000e+00> : vector<16x128xf32>
    %80 = tpu.matmul %63, %79, %cst_55 {dimension_numbers = #tpu.dot_dimension_numbers<[1], [0], [0], [1], [0, 0, 1, 1], [], []>} : vector<16x40xbf16>, vector<40x128xbf16>, vector<16x128xf32> -> vector<16x128xf32>
    %81 = vector.broadcast %66 : vector<16x1xf32> to vector<16x128xf32>
    %82 = arith.addf %80, %81 : vector<16x128xf32>
    %cst_56 = arith.constant 0.000000e+00 : f32
    %83 = vector.broadcast %cst_56 : f32 to vector<16x128xf32>
    %84 = arith.maximumf %82, %83 : vector<16x128xf32>
    %85 = arith.truncf %84 : vector<16x128xf32> to vector<16x128xbf16>
    %cst_57 = arith.constant dense<0.000000e+00> : vector<3x128xf32>
    %86 = tpu.matmul %64, %85, %cst_57 {dimension_numbers = #tpu.dot_dimension_numbers<[1], [0], [0], [1], [0, 0, 1, 1], [], []>} : vector<3x16xbf16>, vector<16x128xbf16>, vector<3x128xf32> -> vector<3x128xf32>
    %87 = vector.broadcast %67 : vector<3x1xf32> to vector<3x128xf32>
    %88 = arith.addf %86, %87 : vector<3x128xf32>
    %89 = math.tanh %88 : vector<3x128xf32>
    %c0_58 = arith.constant 0 : index
    %c0_59 = arith.constant 0 : index
    %c0_60 = arith.constant 0 : index
    %90 = vector.load %arg19[%c0_58, %c0_59, %c0_60] : memref<2x3x128xf32, #tpu.memory_space<vmem>>, vector<1x3x128xf32>
    %91 = vector.shape_cast %90 : vector<1x3x128xf32> to vector<3x128xf32>
    %92 = vector.shape_cast %89 : vector<3x128xf32> to vector<1x3x128xf32>
    tpu.vector_store %arg19[%c0_58, %c0_59, %c0_60], %92 {strides = array<i32>} : memref<2x3x128xf32, #tpu.memory_space<vmem>>, vector<1x3x128xf32>,
    %93 = vector.extract_strided_slice %60 {offsets = [0, 1], sizes = [72, 1], strides = [1, 1]} : vector<72x2xf32> to vector<72x1xf32>
    %94 = vector.broadcast %93 : vector<72x1xf32> to vector<72x128xf32>
    %95 = arith.addf %61, %94 : vector<72x128xf32>
    %cst_61 = arith.constant 0.000000e+00 : f32
    %96 = vector.broadcast %cst_61 : f32 to vector<72x128xf32>
    %97 = arith.maximumf %95, %96 : vector<72x128xf32>
    %98 = arith.truncf %97 : vector<72x128xf32> to vector<72x128xbf16>
    %cst_62 = arith.constant dense<0.000000e+00> : vector<40x128xf32>
    %99 = tpu.matmul %62, %98, %cst_62 {dimension_numbers = #tpu.dot_dimension_numbers<[1], [0], [0], [1], [0, 0, 1, 1], [], []>} : vector<40x72xbf16>, vector<72x128xbf16>, vector<40x128xf32> -> vector<40x128xf32>
    %100 = vector.broadcast %65 : vector<40x1xf32> to vector<40x128xf32>
    %101 = arith.addf %99, %100 : vector<40x128xf32>
    %cst_63 = arith.constant 0.000000e+00 : f32
    %102 = vector.broadcast %cst_63 : f32 to vector<40x128xf32>
    %103 = arith.maximumf %101, %102 : vector<40x128xf32>
    %104 = arith.truncf %103 : vector<40x128xf32> to vector<40x128xbf16>
    %cst_64 = arith.constant dense<0.000000e+00> : vector<16x128xf32>
    %105 = tpu.matmul %63, %104, %cst_64 {dimension_numbers = #tpu.dot_dimension_numbers<[1], [0], [0], [1], [0, 0, 1, 1], [], []>} : vector<16x40xbf16>, vector<40x128xbf16>, vector<16x128xf32> -> vector<16x128xf32>
    %106 = vector.broadcast %66 : vector<16x1xf32> to vector<16x128xf32>
    %107 = arith.addf %105, %106 : vector<16x128xf32>
    %cst_65 = arith.constant 0.000000e+00 : f32
    %108 = vector.broadcast %cst_65 : f32 to vector<16x128xf32>
    %109 = arith.maximumf %107, %108 : vector<16x128xf32>
    %110 = arith.truncf %109 : vector<16x128xf32> to vector<16x128xbf16>
    %cst_66 = arith.constant dense<0.000000e+00> : vector<3x128xf32>
    %111 = tpu.matmul %64, %110, %cst_66 {dimension_numbers = #tpu.dot_dimension_numbers<[1], [0], [0], [1], [0, 0, 1, 1], [], []>} : vector<3x16xbf16>, vector<16x128xbf16>, vector<3x128xf32> -> vector<3x128xf32>
    %112 = vector.broadcast %67 : vector<3x1xf32> to vector<3x128xf32>
    %113 = arith.addf %111, %112 : vector<3x128xf32>
    %114 = math.tanh %113 : vector<3x128xf32>
    %c1_67 = arith.constant 1 : index
    %c0_68 = arith.constant 0 : index
    %c0_69 = arith.constant 0 : index
    %115 = vector.load %arg19[%c1_67, %c0_68, %c0_69] : memref<2x3x128xf32, #tpu.memory_space<vmem>>, vector<1x3x128xf32>
    %116 = vector.shape_cast %115 : vector<1x3x128xf32> to vector<3x128xf32>
    %117 = vector.shape_cast %114 : vector<3x128xf32> to vector<1x3x128xf32>
    tpu.vector_store %arg19[%c1_67, %c0_68, %c0_69], %117 {strides = array<i32>} : memref<2x3x128xf32, #tpu.memory_space<vmem>>, vector<1x3x128xf32>,
    return
  }
  func.func @transform_0(%arg0: i32) -> (i32, i32, i32) {
    %c0_i32 = arith.constant 0 : i32
    %c0_i32_0 = arith.constant 0 : i32
    %c0_i32_1 = arith.constant 0 : i32
    return %arg0, %c0_i32, %c0_i32_0 : i32, i32, i32
  }
  func.func @transform_1(%arg0: i32) -> (i32, i32) {
    %c0_i32 = arith.constant 0 : i32
    %c0_i32_0 = arith.constant 0 : i32
    %c0_i32_1 = arith.constant 0 : i32
    return %c0_i32, %c0_i32_0 : i32, i32
  }
  func.func @transform_2(%arg0: i32) -> (i32, i32) {
    %c0_i32 = arith.constant 0 : i32
    %c0_i32_0 = arith.constant 0 : i32
    %c0_i32_1 = arith.constant 0 : i32
    return %c0_i32, %c0_i32_0 : i32, i32
  }
  func.func @transform_3(%arg0: i32) -> (i32, i32) {
    %c0_i32 = arith.constant 0 : i32
    %c0_i32_0 = arith.constant 0 : i32
    %c0_i32_1 = arith.constant 0 : i32
    return %c0_i32, %c0_i32_0 : i32, i32
  }
  func.func @transform_4(%arg0: i32) -> (i32, i32) {
    %c0_i32 = arith.constant 0 : i32
    %c0_i32_0 = arith.constant 0 : i32
    %c0_i32_1 = arith.constant 0 : i32
    return %c0_i32, %c0_i32_0 : i32, i32
  }
  func.func @transform_5(%arg0: i32) -> (i32, i32) {
    %c0_i32 = arith.constant 0 : i32
    %c0_i32_0 = arith.constant 0 : i32
    %c0_i32_1 = arith.constant 0 : i32
    return %c0_i32, %c0_i32_0 : i32, i32
  }
  func.func @transform_6(%arg0: i32) -> (i32, i32) {
    %c0_i32 = arith.constant 0 : i32
    %c0_i32_0 = arith.constant 0 : i32
    %c0_i32_1 = arith.constant 0 : i32
    return %c0_i32, %c0_i32_0 : i32, i32
  }
  func.func @transform_7(%arg0: i32) -> (i32, i32) {
    %c0_i32 = arith.constant 0 : i32
    %c0_i32_0 = arith.constant 0 : i32
    %c0_i32_1 = arith.constant 0 : i32
    return %c0_i32, %c0_i32_0 : i32, i32
  }
  func.func @transform_8(%arg0: i32) -> (i32, i32) {
    %c0_i32 = arith.constant 0 : i32
    %c0_i32_0 = arith.constant 0 : i32
    %c0_i32_1 = arith.constant 0 : i32
    return %c0_i32, %c0_i32_0 : i32, i32
  }
  func.func @transform_9(%arg0: i32) -> (i32, i32) {
    %c0_i32 = arith.constant 0 : i32
    %c0_i32_0 = arith.constant 0 : i32
    %c0_i32_1 = arith.constant 0 : i32
    return %c0_i32, %c0_i32_0 : i32, i32
  }
  func.func @transform_10(%arg0: i32) -> (i32, i32) {
    %c0_i32 = arith.constant 0 : i32
    %c0_i32_0 = arith.constant 0 : i32
    %c0_i32_1 = arith.constant 0 : i32
    return %c0_i32, %c0_i32_0 : i32, i32
  }
  func.func @transform_11(%arg0: i32) -> (i32, i32) {
    %c0_i32 = arith.constant 0 : i32
    %c0_i32_0 = arith.constant 0 : i32
    %c0_i32_1 = arith.constant 0 : i32
    return %c0_i32, %c0_i32_0 : i32, i32
  }
  func.func @transform_12(%arg0: i32) -> (i32, i32) {
    %c0_i32 = arith.constant 0 : i32
    %c0_i32_0 = arith.constant 0 : i32
    %c0_i32_1 = arith.constant 0 : i32
    return %c0_i32, %c0_i32_0 : i32, i32
  }
  func.func @transform_13(%arg0: i32) -> (i32, i32) {
    %c0_i32 = arith.constant 0 : i32
    %c0_i32_0 = arith.constant 0 : i32
    %c0_i32_1 = arith.constant 0 : i32
    return %c0_i32, %c0_i32_0 : i32, i32
  }
  func.func @transform_14(%arg0: i32) -> (i32, i32) {
    %c0_i32 = arith.constant 0 : i32
    %c0_i32_0 = arith.constant 0 : i32
    %c0_i32_1 = arith.constant 0 : i32
    return %c0_i32, %c0_i32_0 : i32, i32
  }
  func.func @transform_15(%arg0: i32) -> (i32, i32) {
    %c0_i32 = arith.constant 0 : i32
    %c0_i32_0 = arith.constant 0 : i32
    %c0_i32_1 = arith.constant 0 : i32
    return %c0_i32, %c0_i32_0 : i32, i32
  }
  func.func @transform_16(%arg0: i32) -> (i32, i32) {
    %c0_i32 = arith.constant 0 : i32
    %c0_i32_0 = arith.constant 0 : i32
    %c0_i32_1 = arith.constant 0 : i32
    return %c0_i32, %c0_i32_0 : i32, i32
  }
  func.func @transform_17(%arg0: i32) -> (i32, i32) {
    %c0_i32 = arith.constant 0 : i32
    %c0_i32_0 = arith.constant 0 : i32
    %c0_i32_1 = arith.constant 0 : i32
    return %c0_i32, %c0_i32_0 : i32, i32
  }
  func.func @transform_18(%arg0: i32) -> (i32, i32, i32) {
    %c0_i32 = arith.constant 0 : i32
    %c0_i32_0 = arith.constant 0 : i32
    %c0_i32_1 = arith.constant 0 : i32
    return %arg0, %c0_i32, %c0_i32_0 : i32, i32, i32
  }
}

</mosaic_0001>

<bundles_post_ra>
// kernel: tpu_custom_call.1
= control target key start
LH: loop header
LB: loop body
LE: loop exit
PB: predicated region body
PF: predicated region fallthrough
CT: control target
= control target key end

     0   :  { %s7432_s27 = smov 0   ;;  %s10589_s0 = inlined_call_operand.vmem [shape: f32[4,3,256], index: 0, kind: input, shape index: {}]   ;;  %s10590_s1 = inlined_call_operand.vmem [shape: f32[72,128], index: 1, kind: input, shape index: {}]   ;;  %s10591_s2 = inlined_call_operand.vmem [shape: bf16[64,3], index: 2, kind: input, shape index: {}]   ;;  %s10592_s3 = inlined_call_operand.vmem [shape: f32[64,1], index: 3, kind: input, shape index: {}]   ;;  %s10593_s4 = inlined_call_operand.vmem [shape: bf16[128,64], index: 4, kind: input, shape index: {}]   ;;  %s10594_s5 = inlined_call_operand.vmem [shape: f32[128,1], index: 5, kind: input, shape index: {}]   ;;  %s10595_s6 = inlined_call_operand.vmem [shape: bf16[1024,128], index: 6, kind: input, shape index: {}]   ;;  %s10596_s7 = inlined_call_operand.vmem [shape: f32[1024,1], index: 7, kind: input, shape index: {}]   ;;  %s10597_s8 = inlined_call_operand.vmem [shape: bf16[64,1024], index: 8, kind: input, shape index: {}]   ;;  %s10598_s9 = inlined_call_operand.vmem [shape: f32[64,1], index: 9, kind: input, shape index: {}]   ;;  %s10599_s10 = inlined_call_operand.vmem [shape: bf16[72,64], index: 10, kind: input, shape index: {}]   ;;  %s10600_s11 = inlined_call_operand.vmem [shape: f32[72,1], index: 11, kind: input, shape index: {}]   ;;  %s10601_s12 = inlined_call_operand.vmem [shape: bf16[40,72], index: 12, kind: input, shape index: {}]   ;;  %s10602_s13 = inlined_call_operand.vmem [shape: f32[40,1], index: 13, kind: input, shape index: {}]   ;;  %s10603_s14 = inlined_call_operand.vmem [shape: bf16[16,40], index: 14, kind: input, shape index: {}]   ;;  %s10604_s15 = inlined_call_operand.vmem [shape: f32[16,1], index: 15, kind: input, shape index: {}]   ;;  %s10605_s16 = inlined_call_operand.vmem [shape: bf16[3,16], index: 16, kind: input, shape index: {}]   ;;  %s10606_s17 = inlined_call_operand.vmem [shape: f32[3,1], index: 17, kind: input, shape index: {}]   ;;  %s10607_s18 = inlined_call_operand.vmem [shape: f32[4,3,128], index: 18, kind: output, shape index: {}]  }
   0x1   :  { %10660 = sst [smem:[#allocation91_spill]] %s10589_s0 }
   0x2   :  { %10661 = sst [smem:[#allocation92_spill]] %s10590_s1 }
   0x3   :  { %10662 = sst [smem:[#allocation93_spill]] %s10591_s2 }
   0x4 LB: > { %s6595_s28 = sadd.s32 4294967295, %s7331_s27   ;;  %p6599_p0 = scmp.ge.s32.totalorder %s7331_s27, 1  ;;  %s7331_s27 = sphi %s7432_s27, %s28_s27  }
   0x5   : > { %p514_p1 = scmp.lt.s32.totalorder %s7331_s27, 3 }
   0x7   : > { %p515_p2 = pnand %p6599_p0, %p514_p1 }
   0x9   : > { %518 = sbr.rel (%p515_p2) target bundleno = 3544 (0xdd8), region = 92 }
   0xe   : > { %v741_v0 = vld [vmem:[%s10592_s3 + $0x30] sm:$0xff]  ;;  %v739_v1 = vld [vmem:[%s10592_s3 + $0x20] sm:$0xff]  ;;  %s6600_s21 = sshll.u32 %s6595_s28, 1  ;;  %v10610_v3 = vmov 0   ;;  %v742_v7 = vld [vmem:[%s10592_s3 + $0x38] sm:$0xff]  ;;  %s10663_s0 = sld [smem:[#allocation91_spill]] }
   0xf   : > { %v737_v2 = vld [vmem:[%s10592_s3 + $0x10] sm:$0xff]  ;;  %7262 = vset.pattern.permute.xlu2 %v10610_v3  ;;  %7261 = vset.pattern.permute.xlu1 %v10610_v3  ;;  %v749_v4 = vpack.c.bf16 %v741_v0, %v741_v0  ;;  %v747_v5 = vpack.c.bf16 %v739_v1, %v739_v1  ;;  %p570_p3 = scmp.lt.s32.totalorder %s6600_s21, 3  ;;  %v740_v8 = vld [vmem:[%s10592_s3 + $0x28] sm:$0xff]  ;;  %v738_v9 = vld [vmem:[%s10592_s3 + $0x18] sm:$0xff]  ;;  %v750_v10 = vpack.c.bf16 %v742_v7, %v742_v7  ;;  %vm825_vm0 = vcmask 1040384  }
  0x10   : > { %v745_v6 = vpack.c.bf16 %v737_v2, %v737_v2  ;;  %7260 = vset.pattern.permute.xlu0 %v10610_v3  ;;  %v748_v11 = vpack.c.bf16 %v740_v8, %v740_v8  ;;  %v746_v13 = vpack.c.bf16 %v738_v9, %v738_v9  ;;  %vm826_vm1 = vcmask 1041408   ;;  %v736_v16 = vld [vmem:[%s10592_s3 + $0x8] sm:$0xff]  ;;  %v735_v17 = vld [vmem:[%s10592_s3] sm:$0xff]  ;;  %v765_v18 = vld [vmem:[%s10594_s5 + $0x70] sm:$0xff] }
  0x11   : > { %957 = vperm.xlu0 %7260, %v749_v4   ;;  %939 = vperm.xlu1 %7261, %v747_v5   ;;  %s11094_s21 = smov (!%p570_p3, %s6600_s21), 3  ;;  %v7334_v14 = vmov 65535   ;;  %v744_v21 = vpack.c.bf16 %v736_v16, %v736_v16  ;;  %v743_v22 = vpack.c.bf16 %v735_v17, %v735_v17  ;;  %v781_v25 = vpack.c.bf16 %v765_v18, %v765_v18  ;;  %v763_v31 = vld [vmem:[%s10594_s5 + $0x60] sm:$0xff]  ;;  %v766_v32 = vld [vmem:[%s10594_s5 + $0x78] sm:$0xff]  ;;  %v764_v33 = vld [vmem:[%s10594_s5 + $0x68] sm:$0xff] }
  0x12   : > { %921 = vperm.xlu2 %7262, %v745_v6   ;;  %s7132_s28 = sshll.u32 %s11094_s21, 3  ;;  %v827_v15 = vsel %vm825_vm0, 4294967295, %v7334_v14  ;;  %vm812_vm2 = vcmask 23552   ;;  %v779_v34 = vpack.c.bf16 %v763_v31, %v763_v31  ;;  %v782_v35 = vpack.c.bf16 %v766_v32, %v766_v32  ;;  %v762_v37 = vld [vmem:[%s10594_s5 + $0x58] sm:$0xff]  ;;  %v761_v38 = vld [vmem:[%s10594_s5 + $0x50] sm:$0xff]  ;;  %v759_v39 = vld [vmem:[%s10594_s5 + $0x40] sm:$0xff] }
  0x13   : > { %v7476_v20 = vsel %vm826_vm1, %v827_v15, 0  ;;  %v780_v36 = vpack.c.bf16 %v764_v33, %v764_v33  ;;  %v778_v40 = vpack.c.bf16 %v762_v37, %v762_v37  ;;  %v777_v41 = vpack.c.bf16 %v761_v38, %v761_v38  ;;  %v757_v44 = vld [vmem:[%s10594_s5 + $0x30] sm:$0xff]  ;;  %v760_v45 = vld [vmem:[%s10594_s5 + $0x48] sm:$0xff]  ;;  %v758_v46 = vld [vmem:[%s10594_s5 + $0x38] sm:$0xff]  ;;  %s6604_s30 = sshll.u32 %s11094_s21, 2 }
  0x14   : > { %s574_s19 = scalar_lea.vmem %s10663_s0, %s7132_s28  ;;  %s10664_s28 = sld [smem:[#allocation93_spill]]  ;;  %v775_v42 = vpack.c.bf16 %v759_v39, %v759_v39  ;;  %v773_v47 = vpack.c.bf16 %v757_v44, %v757_v44  ;;  %v776_v48 = vpack.c.bf16 %v760_v45, %v760_v45  ;;  %v774_v49 = vpack.c.bf16 %v758_v46, %v758_v46  ;;  %v756_v50 = vld [vmem:[%s10594_s5 + $0x28] sm:$0xff]  ;;  %v755_v51 = vld [vmem:[%s10594_s5 + $0x20] sm:$0xff]  ;;  %v753_v52 = vld [vmem:[%s10594_s5 + $0x10] sm:$0xff] }
  0x15   : > { %v783_v12 = vld [vmem:[%s574_s19] sm:$0x77]  ;;  %v6933_v19 = vld [vmem:[%s574_s19 + $0x8] sm:$0x77]  ;;  %v772_v53 = vpack.c.bf16 %v756_v50, %v756_v50  ;;  %v771_v54 = vpack.c.bf16 %v755_v51, %v755_v51  ;;  %v769_v55 = vpack.c.bf16 %v753_v52, %v753_v52  ;;  %v754_v58 = vld [vmem:[%s10594_s5 + $0x18] sm:$0xff]  ;;  %vm1101_vm3 = vcmask 523264   ;;  %s580_s20 = scalar_lea.vmem %s10607_s18, %s6604_s30 }
  0x16   : > { %785 = vst [vmem:[#allocation1] ss:$2 sm:$0xff] %v783_v12  ;;  %v751_v57 = vld [vmem:[%s10594_s5] sm:$0xff]  ;;  %v752_v59 = vld [vmem:[%s10594_s5 + $0x8] sm:$0xff]  ;;  %v770_v61 = vpack.c.bf16 %v754_v58, %v754_v58  ;;  %v4607_v63 = vld [vmem:[%s10596_s7 + $0x70] sm:$0xff]  ;;  %vm4464_vm4 = vcmask 7168  }
  0x17   : > { %v767_v60 = vpack.c.bf16 %v751_v57, %v751_v57  ;;  %v768_v62 = vpack.c.bf16 %v752_v59, %v752_v59  ;;  %v4623_v0 = vld [vmem:[%s10596_s7 + $0xf0] sm:$0xff]  ;;  %v4608_v1 = vld [vmem:[%s10596_s7 + $0x78] sm:$0xff]  ;;  %v4605_v5 = vld [vmem:[%s10596_s7 + $0x60] sm:$0xff]  ;;  %s11092_s0 = sld [smem:[#allocation92_spill]]  ;;  %vm6312_vm5 = vcmask 1043456   ;;  %vm6302_vm6 = vcmask 588800  }
  0x18   : > { %v4624_v4 = vld [vmem:[%s10596_s7 + $0xf8] sm:$0xff]  ;;  %v4622_v6 = vld [vmem:[%s10596_s7 + $0xe8] sm:$0xff]  ;;  %v4621_v7 = vld [vmem:[%s10596_s7 + $0xe0] sm:$0xff]  ;;  %vm6362_vm7 = vcmask 326656   ;;  %vm6391_vm8 = vcmask 130048  }
  0x19   : > { %966 = vperm.xlu0 %7260, %v750_v10   ;;  %948 = vperm.xlu1 %7261, %v748_v11   ;;  %v4606_v8 = vld [vmem:[%s10596_s7 + $0x68] sm:$0xff]  ;;  %v4603_v9 = vld [vmem:[%s10596_s7 + $0x50] sm:$0xff]  ;;  %v4604_v11 = vld [vmem:[%s10596_s7 + $0x58] sm:$0xff] }
  0x1a   : > { %930 = vperm.xlu2 %7262, %v746_v13   ;;  %v7483_v30 = vld [vmem:[%s10664_s28] sm:$0xff]  ;;  %v7510_v43 = vld [vmem:[%s10664_s28 + $0x8] sm:$0xff]  ;;  %v7537_v56 = vld [vmem:[%s10664_s28 + $0x10] sm:$0xff] }
  0x1b   : > { %v7564_v2 = vld [vmem:[%s10664_s28 + $0x18] sm:$0xff]  ;;  %v4619_v10 = vld [vmem:[%s10596_s7 + $0xd0] sm:$0xff]  ;;  %v4602_v14 = vld [vmem:[%s10596_s7 + $0x48] sm:$0xff] }
  0x1c   : > { %v4620_v12 = vld [vmem:[%s10596_s7 + $0xd8] sm:$0xff]  ;;  %v4599_v13 = vld [vmem:[%s10596_s7 + $0x30] sm:$0xff]  ;;  %v4601_v15 = vld [vmem:[%s10596_s7 + $0x40] sm:$0xff] }
  0x1d   : > { %v786_v23 = vld.sshfl [vmem:[#allocation1] sm:$0xff pattern:$0x75316420]  ;;  %v787_v24 = vld.sshfl [vmem:[#allocation1 + $0x8] sm:$0xff pattern:$0x75316420] }
  0x1e   : > { %v790_v26 = vpack.c.bf16 %v786_v23, %v786_v23  ;;  %v791_v27 = vpack.c.bf16 %v787_v24, %v787_v24  ;;  %2989 = vst [vmem:[#allocation1] ss:$2 sm:$0xff] %v6933_v19  ;;  %v4600_v16 = vld [vmem:[%s10596_s7 + $0x38] sm:$0xff]  ;;  %v4615_v17 = vld [vmem:[%s10596_s7 + $0xb0] sm:$0xff]  ;;  %v4617_v18 = vld [vmem:[%s10596_s7 + $0xc0] sm:$0xff] }
  0x1f   : > { %v4616_v19 = vld [vmem:[%s10596_s7 + $0xb8] sm:$0xff]  ;;  %v4595_v23 = vld [vmem:[%s10596_s7 + $0x10] sm:$0xff]  ;;  %v4613_v24 = vld [vmem:[%s10596_s7 + $0xa0] sm:$0xff] }
  0x20   : > { %v830_v28 = vand.u32 %v7476_v20, %v790_v26  ;;  %v833_v29 = vand.u32 %v7476_v20, %v791_v27  ;;  %v4596_v26 = vld [vmem:[%s10596_s7 + $0x18] sm:$0xff]  ;;  %v4611_v27 = vld [vmem:[%s10596_s7 + $0x90] sm:$0xff]  ;;  %v4637_v39 = vld [vmem:[%s10596_s7 + $0x160] sm:$0xff] }
  0x21   : > { %912 = vperm.xlu1 %7261, %v744_v21   ;;  %903 = vperm.xlu0 %7260, %v743_v22   ;;  %v4598_v21 = vld [vmem:[%s10596_s7 + $0x28] sm:$0xff]  ;;  %v4639_v31 = vld [vmem:[%s10596_s7 + $0x170] sm:$0xff]  ;;  %v4612_v32 = vld [vmem:[%s10596_s7 + $0x98] sm:$0xff] }
  0x22   : > { %1368 = vperm.xlu2 %7262, %v781_v25   ;;  %842 = vmatpush.bf16.msra.mxu0 %v830_v28  ;;  %v4618_v22 = vld [vmem:[%s10596_s7 + $0xc8] sm:$0xff]  ;;  %v4597_v25 = vld [vmem:[%s10596_s7 + $0x20] sm:$0xff]  ;;  %v4656_v33 = vld [vmem:[%s10596_s7 + $0x1f8] sm:$0xff] }
  0x23   : > { %871 = vmatpush.bf16.msra.mxu1 %v833_v29  ;;  %v4614_v28 = vld [vmem:[%s10596_s7 + $0xa8] sm:$0xff]  ;;  %v4636_v45 = vld [vmem:[%s10596_s7 + $0x158] sm:$0xff]  ;;  %v4651_v46 = vld [vmem:[%s10596_s7 + $0x1d0] sm:$0xff] }
  0x24   : > { %v4610_v29 = vld [vmem:[%s10596_s7 + $0x88] sm:$0xff]  ;;  %v4652_v50 = vld [vmem:[%s10596_s7 + $0x1d8] sm:$0xff]  ;;  %v4649_v51 = vld [vmem:[%s10596_s7 + $0x1c0] sm:$0xff] }
  0x25   : > { %6621 = vmatmul.msk.bf16.vlgmr.msra.gmra.mxu0 %vm812_vm2, %v7483_v30  ;;  %v4640_v52 = vld [vmem:[%s10596_s7 + $0x178] sm:$0xff]  ;;  %v4655_v58 = vld [vmem:[%s10596_s7 + $0x1f0] sm:$0xff] }
  0x26   : > { %6625 = vmatmul.msk.bf16.vlgmr.msra.gmra.mxu1 %vm812_vm2, %v7483_v30  ;;  %v4648_v57 = vld [vmem:[%s10596_s7 + $0x1b8] sm:$0xff] }
  0x29   : > { %1350 = vperm.xlu1 %7261, %v779_v34   ;;  %1377 = vperm.xlu0 %7260, %v782_v35   ;;  %v4638_v34 = vld [vmem:[%s10596_s7 + $0x168] sm:$0xff]  ;;  %v4593_v35 = vld [vmem:[%s10596_s7] sm:$0xff] }
  0x2a   : > { %1359 = vperm.xlu2 %7262, %v780_v36  }
  0x31   : > { %1341 = vperm.xlu1 %7261, %v778_v40   ;;  %1332 = vperm.xlu0 %7260, %v777_v41   ;;  %v4653_v40 = vld [vmem:[%s10596_s7 + $0x1e0] sm:$0xff]  ;;  %v4594_v41 = vld [vmem:[%s10596_s7 + $0x8] sm:$0xff] }
  0x32   : > { %1314 = vperm.xlu2 %7262, %v775_v42  }
  0x35   : > { %6622 = vmatmul.msk.bf16.gmra.mxu0 %vm812_vm2, %v7510_v43 }
  0x36   : > { %6626 = vmatmul.msk.bf16.gmra.mxu1 %vm812_vm2, %v7510_v43 }
  0x39   : > { %1296 = vperm.xlu1 %7261, %v773_v47   ;;  %1323 = vperm.xlu0 %7260, %v776_v48   ;;  %v4609_v47 = vld [vmem:[%s10596_s7 + $0x80] sm:$0xff] }
  0x3a   : > { %1305 = vperm.xlu2 %7262, %v774_v49  }
  0x41   : > { %1287 = vperm.xlu1 %7261, %v772_v53   ;;  %1278 = vperm.xlu0 %7260, %v771_v54  }
  0x42   : > { %1260 = vperm.xlu2 %7262, %v769_v55   ;;  %v4650_v55 = vld [vmem:[%s10596_s7 + $0x1c8] sm:$0xff] }
  0x45   : > { %6623 = vmatmul.msk.bf16.gmra.mxu0 %vm812_vm2, %v7537_v56 }
  0x46   : > { %6627 = vmatmul.msk.bf16.gmra.mxu1 %vm812_vm2, %v7537_v56 }
  0x49   : > { %1242 = vperm.xlu1 %7261, %v767_v60   ;;  %1269 = vperm.xlu0 %7260, %v770_v61   ;;  %v4647_v61 = vld [vmem:[%s10596_s7 + $0x1b0] sm:$0xff] }
  0x4a   : > { %1251 = vperm.xlu2 %7262, %v768_v62   ;;  %v4646_v62 = vld [vmem:[%s10596_s7 + $0x1a8] sm:$0xff] }
  0x51   : > { %4793 = vperm.xlu1 %7261, %v4607_v63   ;;  %4873 = vperm.xlu0 %7260, %v4623_v0   ;;  %v4654_v63 = vld [vmem:[%s10596_s7 + $0x1e8] sm:$0xff] }
  0x52   : > { %4798 = vperm.xlu2 %7262, %v4608_v1  }
  0x55   : > { %6624 = vmatmul.msk.bf16.gmra.mxu0 %vm812_vm2, %v7564_v2 }
  0x56   : > { %6628 = vmatmul.msk.bf16.gmra.mxu1 %vm812_vm2, %v7564_v2 }
  0x59   : > { %4878 = vperm.xlu1 %7261, %v4624_v4   ;;  %4783 = vperm.xlu0 %7260, %v4605_v5  }
  0x5a   : > { %4868 = vperm.xlu2 %7262, %v4622_v6  }
  0x61   : > { %4863 = vperm.xlu1 %7261, %v4621_v7   ;;  %4788 = vperm.xlu0 %7260, %v4606_v8   ;;  %v4627_v7 = vld [vmem:[%s10596_s7 + $0x110] sm:$0xff]  ;;  %v4628_v8 = vld [vmem:[%s10596_s7 + $0x118] sm:$0xff] }
  0x62   : > { %4773 = vperm.xlu2 %7262, %v4603_v9   ;;  %v4635_v9 = vld [vmem:[%s10596_s7 + $0x150] sm:$0xff] }
  0x69   : > { %4853 = vperm.xlu1 %7261, %v4619_v10   ;;  %4778 = vperm.xlu0 %7260, %v4604_v11   ;;  %v7335_v10 = vmov 839922192  }
  0x6a   : > { %4858 = vperm.xlu2 %7262, %v4620_v12   ;;  %v907_v11 = vunpack.c.l.s4 %v7335_v10 }
  0x6c   : > { %v922_v6 = vpop.permute.xlu2 %921 }
  0x71   : > { %4753 = vperm.xlu1 %7261, %v4599_v13   ;;  %4768 = vperm.xlu0 %7260, %v4602_v14   ;;  %v7724_v14 = vunpack.c.0.s8 %v907_v11 }
  0x72   : > { %4763 = vperm.xlu2 %7262, %v4601_v15  }
  0x79   : > { %4758 = vperm.xlu1 %7261, %v4600_v16   ;;  %4833 = vperm.xlu0 %7260, %v4615_v17   ;;  %v931_v17 = vpop.permute.xlu2 %930 }
  0x7a   : > { %4843 = vperm.xlu2 %7262, %v4617_v18  }
  0x81   : > { %4838 = vperm.xlu1 %7261, %v4616_v19   ;;  %4748 = vperm.xlu0 %7260, %v4598_v21   ;;  %v4641_v21 = vld [vmem:[%s10596_s7 + $0x180] sm:$0xff] }
  0x82   : > { %4848 = vperm.xlu2 %7262, %v4618_v22   ;;  %v4626_v22 = vld [vmem:[%s10596_s7 + $0x108] sm:$0xff] }
  0x83   : > { %v958_v0 = vpop.permute.xlu0 %957  ;;  %v940_v1 = vpop.permute.xlu1 %939 }
  0x84   : > { %v963_v18 = vperm.slane %v958_v0, %v7724_v14 }
  0x89   : > { %4733 = vperm.xlu1 %7261, %v4595_v23   ;;  %4823 = vperm.xlu0 %7260, %v4613_v24   ;;  %v927_v23 = vperm.slane %v922_v6, %v7724_v14  ;;  %v936_v24 = vperm.slane %v931_v17, %v7724_v14 }
  0x8a   : > { %4743 = vperm.xlu2 %7262, %v4597_v25   ;;  %v945_v25 = vperm.slane %v940_v1, %v7724_v14  ;;  %v4634_v1 = vld [vmem:[%s10596_s7 + $0x148] sm:$0xff] }
  0x8b   : > { %v967_v15 = vpop.permute.xlu0 %966  ;;  %v949_v16 = vpop.permute.xlu1 %948 }
  0x91   : > { %4738 = vperm.xlu1 %7261, %v4596_v26   ;;  %4813 = vperm.xlu0 %7260, %v4611_v27   ;;  %v4633_v26 = vld [vmem:[%s10596_s7 + $0x140] sm:$0xff]  ;;  %v954_v27 = vperm.slane %v949_v16, %v7724_v14 }
  0x92   : > { %4828 = vperm.xlu2 %7262, %v4614_v28  }
  0x99   : > { %4808 = vperm.xlu1 %7261, %v4610_v29   ;;  %4953 = vperm.xlu0 %7260, %v4639_v31   ;;  %v972_v29 = vperm.slane %v967_v15, %v7724_v14 }
  0x9a   : > { %4818 = vperm.xlu2 %7262, %v4612_v32   ;;  %v7741_v32 = vunpack.c.l.bf16 %v963_v18 }
  0xa1   : > { %5038 = vperm.xlu1 %7261, %v4656_v33   ;;  %4948 = vperm.xlu0 %7260, %v4638_v34  }
  0xa2   : > { %4723 = vperm.xlu2 %7262, %v4593_v35   ;;  %v844_v36 = vpop.f32.mrf.mxu0 }
  0xa3   : > { %v873_v37 = vpop.f32.mrf.mxu1 }
  0xa4   : > { %v7660_v38 = vpack.c.bf16 %v873_v37, %v844_v36  ;;  %v7743_v36 = vunpack.c.l.bf16 %v927_v23  ;;  %v7745_v37 = vunpack.c.l.bf16 %v936_v24 }
  0xa9   : > { %4943 = vperm.xlu1 %7261, %v4637_v39   ;;  %5023 = vperm.xlu0 %7260, %v4653_v40   ;;  %v7747_v39 = vunpack.c.l.bf16 %v945_v25 }
  0xaa   : > { %4728 = vperm.xlu2 %7262, %v4594_v41   ;;  %v7671_v42 = vpop.f32.mrf.mxu0  ;;  %v7749_v41 = vunpack.c.l.bf16 %v954_v27 }
  0xab   : > { %v7673_v44 = vpop.f32.mrf.mxu1 }
  0xb1   : > { %4938 = vperm.xlu1 %7261, %v4636_v45   ;;  %5013 = vperm.xlu0 %7260, %v4651_v46  }
  0xb2   : > { %4803 = vperm.xlu2 %7262, %v4609_v47   ;;  %v7684_v48 = vpop.f32.mrf.mxu0 }
  0xb3   : > { %v7686_v49 = vpop.f32.mrf.mxu1 }
  0xb9   : > { %5018 = vperm.xlu1 %7261, %v4652_v50   ;;  %5003 = vperm.xlu0 %7260, %v4649_v51   ;;  %v7751_v50 = vunpack.c.l.bf16 %v972_v29  ;;  %v895_v51 = vpack.c.bf16 %v7686_v49, %v7684_v48 }
  0xba   : > { %4958 = vperm.xlu2 %7262, %v4640_v52   ;;  %v851_v53 = vpop.f32.mrf.mxu0 }
  0xbb   : > { %v880_v54 = vpop.f32.mrf.mxu1  ;;  %v978_v17 = vunpack.c.h.bf16 %v895_v51 }
  0xbc   : > { %v896_v45 = vpack.c.bf16 %v880_v54, %v851_v53  ;;  %v4671_v53 = vld [vmem:[%s10596_s7 + $0x270] sm:$0xff] }
  0xc1   : > { %5008 = vperm.xlu1 %7261, %v4650_v55   ;;  %4998 = vperm.xlu0 %7260, %v4648_v57   ;;  %v913_v57 = vpop.permute.xlu1 %912 }
  0xc2   : > { %5033 = vperm.xlu2 %7262, %v4655_v58   ;;  %v854_v59 = vpop.f32.mrf.mxu0  ;;  %v904_v58 = vpop.permute.xlu0 %903  ;;  %v918_v48 = vperm.slane %v913_v57, %v7724_v14 }
  0xc3   : > { %v883_v60 = vpop.f32.mrf.mxu1  ;;  %v909_v49 = vperm.slane %v904_v58, %v7724_v14 }
  0xc4   : > { %v897_v31 = vpack.c.bf16 %v883_v60, %v854_v59  ;;  %v7775_v15 = vunpack.c.l.bf16 %v918_v48  ;;  %v4632_v48 = vld [vmem:[%s10596_s7 + $0x138] sm:$0xff] }
  0xc5   : > { %v7780_v27 = vunpack.c.l.bf16 %v909_v49 }
  0xc6   : > { %v981_v52 = vunpack.c.l.bf16 %v897_v31  ;;  %v982_v0 = vunpack.c.h.bf16 %v897_v31 }
  0xc8   : > { %v1005_v10 = vadd.f32 %v7747_v39, %v981_v52  ;;  %v1006_v18 = vadd.f32 %v7747_v39, %v982_v0 }
  0xc9   : > { %4993 = vperm.xlu1 %7261, %v4647_v61   ;;  %4988 = vperm.xlu0 %7260, %v4646_v62   ;;  %v4687_v61 = vld [vmem:[%s10596_s7 + $0x2f0] sm:$0xff] }
  0xca   : > { %5028 = vperm.xlu2 %7262, %v4654_v63   ;;  %v856_v4 = vpop.f32.mrf.mxu0  ;;  %v894_v63 = vpack.c.bf16 %v7673_v44, %v7671_v42  ;;  %v1045_v29 = vmax.f32 %v1005_v10, 0.0  ;;  %v4644_v10 = vld [vmem:[%s10596_s7 + $0x198] sm:$0xff] }
  0xcb   : > { %v885_v5 = vpop.f32.mrf.mxu1 }
  0xcc   : > { %v898_v28 = vpack.c.bf16 %v885_v5, %v856_v4  ;;  %v979_v4 = vunpack.c.l.bf16 %v896_v45  ;;  %v975_v16 = vunpack.c.l.bf16 %v894_v63  ;;  %v976_v24 = vunpack.c.h.bf16 %v894_v63 }
  0xce   : > { %v983_v46 = vunpack.c.l.bf16 %v898_v28  ;;  %v984_v55 = vunpack.c.h.bf16 %v898_v28  ;;  %v1003_v23 = vadd.f32 %v7745_v37, %v979_v4  ;;  %v973_v28 = vunpack.c.l.bf16 %v7660_v38  ;;  %v4629_v4 = vld [vmem:[%s10596_s7 + $0x120] sm:$0xff] }
  0xd0   : > { %v1008_v42 = vadd.f32 %v7749_v41, %v984_v55  ;;  %v1000_v55 = vadd.f32 %v7775_v15, %v976_v24 }
  0xd1   : > { %4893 = vperm.xlu1 %7261, %v4627_v7   ;;  %4898 = vperm.xlu0 %7260, %v4628_v8   ;;  %v1007_v7 = vadd.f32 %v7749_v41, %v983_v46  ;;  %v977_v8 = vunpack.c.l.bf16 %v895_v51  ;;  %v1043_v46 = vmax.f32 %v1003_v23, 0.0 }
  0xd2   : > { %4933 = vperm.xlu2 %7262, %v4635_v9   ;;  %v859_v12 = vpop.f32.mrf.mxu0  ;;  %v980_v9 = vunpack.c.h.bf16 %v896_v45  ;;  %v1048_v25 = vmax.f32 %v1008_v42, 0.0  ;;  %v4625_v42 = vld [vmem:[%s10596_s7 + $0x100] sm:$0xff] }
  0xd3   : > { %v888_v13 = vpop.f32.mrf.mxu1  ;;  %v1001_v31 = vadd.f32 %v7743_v36, %v977_v8  ;;  %v4643_v8 = vld [vmem:[%s10596_s7 + $0x190] sm:$0xff] }
  0xd4   : > { %v899_v19 = vpack.c.bf16 %v888_v13, %v859_v12 }
  0xd5   : > { %v1041_v57 = vmax.f32 %v1001_v31, 0.0 }
  0xd6   : > { %v985_v33 = vunpack.c.l.bf16 %v899_v19  ;;  %v986_v34 = vunpack.c.h.bf16 %v899_v19 }
  0xd8   : > { %v1009_v54 = vadd.f32 %v7741_v32, %v985_v33  ;;  %v1010_v62 = vadd.f32 %v7741_v32, %v986_v34  ;;  %v974_v33 = vunpack.c.h.bf16 %v7660_v38  ;;  %v4631_v34 = vld [vmem:[%s10596_s7 + $0x130] sm:$0xff]  ;;  %v997_v38 = vadd.f32 %v7780_v27, %v973_v28 }
  0xd9   : > { %4963 = vperm.xlu1 %7261, %v4641_v21   ;;  %4888 = vperm.xlu0 %7260, %v4626_v22   ;;  %v1047_v22 = vmax.f32 %v1007_v7, 0.0  ;;  %v4645_v7 = vld [vmem:[%s10596_s7 + $0x1a0] sm:$0xff] }
  0xda   : > { %4923 = vperm.xlu2 %7262, %v4633_v26   ;;  %v861_v35 = vpop.f32.mrf.mxu0  ;;  %v1049_v44 = vmax.f32 %v1009_v54, 0.0  ;;  %v1050_v12 = vmax.f32 %v1010_v62, 0.0  ;;  %v1004_v26 = vadd.f32 %v7745_v37, %v980_v9  ;;  %v1040_v54 = vmax.f32 %v1000_v55, 0.0  ;;  %v7829_v9 = vld [vmem:[%s10593_s4 + $0x10] sm:$0xff] }
  0xdb   : > { %v890_v40 = vpop.f32.mrf.mxu1  ;;  %v1057_v45 = vpack.c.bf16 %v1047_v22, %v1045_v29  ;;  %v1037_v62 = vmax.f32 %v997_v38, 0.0  ;;  %10665 = vst [vmem:[#allocation2_spill] sm:$0xff] %v7829_v9 }
  0xdc   : > { %v900_v47 = vpack.c.bf16 %v890_v40, %v861_v35  ;;  %v1046_v35 = vmax.f32 %v1006_v18, 0.0  ;;  %v1002_v40 = vadd.f32 %v7743_v36, %v978_v17  ;;  %v1044_v52 = vmax.f32 %v1004_v26, 0.0  ;;  %v7871_v17 = vld [vmem:[%s10593_s4 + $0x28] sm:$0xff]  ;;  %v2990_v18 = vld.sshfl [vmem:[#allocation1] sm:$0xff pattern:$0x75316420] }
  0xdd   : > { %10668 = vst [vmem:[#allocation5_spill] sm:$0xff] %v7871_v17  ;;  %v7891_v26 = vld [vmem:[%s10593_s4 + $0x38] sm:$0xff] }
  0xde   : > { %v987_v59 = vunpack.c.l.bf16 %v900_v47  ;;  %v988_v60 = vunpack.c.h.bf16 %v900_v47  ;;  %v999_v47 = vadd.f32 %v7775_v15, %v975_v16  ;;  %v1058_v51 = vpack.c.bf16 %v1048_v25, %v1046_v35  ;;  %v4688_v16 = vld [vmem:[%s10596_s7 + $0x2f8] sm:$0xff]  ;;  %v7882_v25 = vld [vmem:[%s10593_s4 + $0x30] sm:$0xff]  ;;  %10670 = vst [vmem:[#allocation7_spill] sm:$0xff] %v7891_v26 }
  0xdf   : > { %v1042_v58 = vmax.f32 %v1002_v40, 0.0  ;;  %10669 = vst [vmem:[#allocation6_spill] sm:$0xff] %v7882_v25 }
  0xe0   : > { %v1011_v5 = vadd.f32 %v7751_v50, %v987_v59  ;;  %v1012_v6 = vadd.f32 %v7751_v50, %v988_v60  ;;  %v998_v59 = vadd.f32 %v7780_v27, %v974_v33  ;;  %v1055_v60 = vpack.c.bf16 %v1043_v46, %v1041_v57 }
  0xe1   : > { %5193 = vperm.xlu1 %7261, %v4687_v61   ;;  %5113 = vperm.xlu0 %7260, %v4671_v53   ;;  %v1039_v61 = vmax.f32 %v999_v47, 0.0  ;;  %v1056_v53 = vpack.c.bf16 %v1044_v52, %v1042_v58 }
  0xe2   : > { %4928 = vperm.xlu2 %7262, %v4634_v1   ;;  %v1051_v11 = vmax.f32 %v1011_v5, 0.0  ;;  %v1052_v13 = vmax.f32 %v1012_v6, 0.0  ;;  %v1038_v49 = vmax.f32 %v998_v59, 0.0  ;;  %v7799_v1 = vld [vmem:[%s10593_s4] sm:$0xff]  ;;  %v4630_v5 = vld [vmem:[%s10596_s7 + $0x128] sm:$0xff] }
  0xe3   : > { %v1053_v63 = vpack.c.bf16 %v1039_v61, %v1037_v62  ;;  %v7814_v6 = vld [vmem:[%s10593_s4 + $0x8] sm:$0xff] }
  0xe4   : > { %v1059_v19 = vpack.c.bf16 %v1051_v11, %v1049_v44  ;;  %v1060_v21 = vpack.c.bf16 %v1052_v13, %v1050_v12  ;;  %v1054_v0 = vpack.c.bf16 %v1040_v54, %v1038_v49  ;;  %v7844_v44 = vld [vmem:[%s10593_s4 + $0x18] sm:$0xff]  ;;  %v4642_v11 = vld [vmem:[%s10596_s7 + $0x188] sm:$0xff]  ;;  %v7859_v13 = vld [vmem:[%s10593_s4 + $0x20] sm:$0xff] }
  0xe5   : > { %10666 = vst [vmem:[#allocation3_spill] sm:$0xff] %v7844_v44  ;;  %v4672_v12 = vld [vmem:[%s10596_s7 + $0x278] sm:$0xff] }
  0xe6   : > { %1130 = vmatpush.bf16.msra.mxu2 %v1059_v19  ;;  %1179 = vmatpush.bf16.msra.mxu3 %v1060_v21  ;;  %10667 = vst [vmem:[#allocation4_spill] sm:$0xff] %v7859_v13  ;;  %v2991_v19 = vld.sshfl [vmem:[#allocation1 + $0x8] sm:$0xff pattern:$0x75316420]  ;;  %v2994_v21 = vpack.c.bf16 %v2990_v18, %v2990_v18 }
  0xe7   : > { %v2995_v22 = vpack.c.bf16 %v2991_v19, %v2991_v19 }
  0xe8   : > { %v2997_v23 = vand.u32 %v2994_v21, %v7476_v20 }
  0xe9   : > { %v3000_v24 = vand.u32 %v2995_v22, %v7476_v20 }
  0xea   : > { %4913 = vperm.xlu2 %7262, %v4631_v34   ;;  %1131 = vmatpush.bf16.msra.mxu2 %v1057_v45 }
  0xeb   : > { %1180 = vmatpush.bf16.msra.mxu3 %v1058_v51 }
  0xee   : > { %1132 = vmatpush.bf16.msra.mxu2 %v1055_v60 }
  0xef   : > { %1181 = vmatpush.bf16.msra.mxu3 %v1056_v53  ;;  %v1369_v53 = vpop.permute.xlu2 %1368 }
  0xf2   : > { %4918 = vperm.xlu2 %7262, %v4632_v48   ;;  %1133 = vmatpush.bf16.msra.mxu2 %v1053_v63 }
  0xf3   : > { %1182 = vmatpush.bf16.msra.mxu3 %v1054_v0 }
  0xf5   : > { %6661 = vmatmul.msk.bf16.vlgmr.msra.gmra.mxu2 %vm1101_vm3, %v7799_v1 }
  0xf6   : > { %6669 = vmatmul.msk.bf16.vlgmr.msra.gmra.mxu3 %vm1101_vm3, %v7799_v1  ;;  %3009 = vmatpush.bf16.msrb.mxu2 %v2997_v23 }
  0xf7   : > { %3038 = vmatpush.bf16.msrb.mxu3 %v3000_v24  ;;  %v1360_v48 = vpop.permute.xlu2 %1359  ;;  %v1374_v24 = vperm.slane %v1369_v53, %v7724_v14 }
  0xf9   : > { %v7948_v3 = vunpack.c.l.bf16 %v1374_v24 }
  0xfa   : > { %4903 = vperm.xlu2 %7262, %v4629_v4  }
  0xfb   : > { %10671 = vst [vmem:[#allocation8_spill] sm:$0xff] %v7948_v3 }
  0xff   : > { %v1315_v0 = vpop.permute.xlu2 %1314 }
 0x102   : > { %4908 = vperm.xlu2 %7262, %v4630_v5   ;;  %v1351_v5 = vpop.permute.xlu1 %1350 }
 0x105   : > { %6662 = vmatmul.msk.bf16.gmra.mxu2 %vm1101_vm3, %v7814_v6 }
 0x106   : > { %6670 = vmatmul.msk.bf16.gmra.mxu3 %vm1101_vm3, %v7814_v6 }
 0x10a   : > { %4983 = vperm.xlu2 %7262, %v4645_v7   ;;  %v1378_v7 = vpop.permute.xlu0 %1377 }
 0x112   : > { %4973 = vperm.xlu2 %7262, %v4643_v8  }
 0x115   : > { %6663 = vmatmul.msk.bf16.gmra.mxu2 %vm1101_vm3, %v7829_v9 }
 0x116   : > { %6671 = vmatmul.msk.bf16.gmra.mxu3 %vm1101_vm3, %v7829_v9 }
 0x11a   : > { %4978 = vperm.xlu2 %7262, %v4644_v10  }
 0x122   : > { %4883 = vperm.xlu2 %7262, %v4625_v42   ;;  %v1306_v42 = vpop.permute.xlu2 %1305 }
 0x125   : > { %6664 = vmatmul.msk.bf16.gmra.mxu2 %vm1101_vm3, %v7844_v44 }
 0x126   : > { %6672 = vmatmul.msk.bf16.gmra.mxu3 %vm1101_vm3, %v7844_v44 }
 0x12a   : > { %4968 = vperm.xlu2 %7262, %v4642_v11   ;;  %v1342_v11 = vpop.permute.xlu1 %1341  ;;  %v1261_v19 = vpop.permute.xlu2 %1260 }
 0x132   : > { %5118 = vperm.xlu2 %7262, %v4672_v12   ;;  %v1333_v12 = vpop.permute.xlu0 %1332  ;;  %v1297_v21 = vpop.permute.xlu1 %1296 }
 0x133   : > { %v1302_v53 = vperm.slane %v1297_v21, %v7724_v14 }
 0x135   : > { %6665 = vmatmul.msk.bf16.gmra.mxu2 %vm1101_vm3, %v7859_v13 }
 0x136   : > { %6673 = vmatmul.msk.bf16.gmra.mxu3 %vm1101_vm3, %v7859_v13 }
 0x13a   : > { %5198 = vperm.xlu2 %7262, %v4688_v16   ;;  %v1324_v22 = vpop.permute.xlu0 %1323 }
 0x145   : > { %6666 = vmatmul.msk.bf16.gmra.mxu2 %vm1101_vm3, %v7871_v17 }
 0x146   : > { %6674 = vmatmul.msk.bf16.gmra.mxu3 %vm1101_vm3, %v7871_v17  ;;  %v1279_v17 = vpop.permute.xlu0 %1278 }
 0x155   : > { %6667 = vmatmul.msk.bf16.gmra.mxu2 %vm1101_vm3, %v7882_v25 }
 0x156   : > { %6675 = vmatmul.msk.bf16.gmra.mxu3 %vm1101_vm3, %v7882_v25 }
 0x165   : > { %6668 = vmatmul.msk.bf16.gmra.mxu2 %vm1101_vm3, %v7891_v26 }
 0x166   : > { %6676 = vmatmul.msk.bf16.gmra.mxu3 %vm1101_vm3, %v7891_v26 }
 0x175   : > { %6934 = vmatmul.msk.bf16.vlgmr.msrb.gmra.mxu2 %vm812_vm2, %v7483_v30 }
 0x176   : > { %6938 = vmatmul.msk.bf16.vlgmr.msrb.gmra.mxu3 %vm812_vm2, %v7483_v30 }
 0x178   : > { %v1135_v20 = vpop.f32.mrf.mxu2 }
 0x179   : > { %v1184_v28 = vpop.f32.mrf.mxu3 }
 0x17a   : > { %v7901_v29 = vpack.c.bf16 %v1184_v28, %v1135_v20  ;;  %v1365_v28 = vperm.slane %v1360_v48, %v7724_v14  ;;  %v1329_v48 = vperm.slane %v1324_v22, %v7724_v14 }
 0x17c   : > { %v7952_v26 = vunpack.c.l.bf16 %v1365_v28  ;;  %v7972_v28 = vunpack.c.l.bf16 %v1302_v53 }
 0x17e   : > { %10672 = vst [vmem:[#allocation9_spill] sm:$0xff] %v7952_v26 }
 0x180   : > { %v7903_v31 = vpop.f32.mrf.mxu2 }
 0x181   : > { %v7905_v33 = vpop.f32.mrf.mxu3 }
 0x185   : > { %6935 = vmatmul.msk.bf16.gmra.mxu2 %vm812_vm2, %v7510_v43 }
 0x186   : > { %6939 = vmatmul.msk.bf16.gmra.mxu3 %vm812_vm2, %v7510_v43 }
 0x188   : > { %v1140_v34 = vpop.f32.mrf.mxu2 }
 0x189   : > { %v1189_v35 = vpop.f32.mrf.mxu3 }
 0x18a   : > { %v7911_v40 = vpack.c.bf16 %v1189_v35, %v1140_v34  ;;  %v1320_v34 = vperm.slane %v1315_v0, %v7724_v14  ;;  %v1311_v35 = vperm.slane %v1306_v42, %v7724_v14 }
 0x18c   : > { %v7954_v42 = vunpack.c.l.bf16 %v1320_v34  ;;  %v7974_v34 = vunpack.c.l.bf16 %v1329_v48 }
 0x190   : > { %v7913_v45 = vpop.f32.mrf.mxu2 }
 0x191   : > { %v7915_v30 = vpop.f32.mrf.mxu3 }
 0x195   : > { %6936 = vmatmul.msk.bf16.gmra.mxu2 %vm812_vm2, %v7537_v56 }
 0x196   : > { %6940 = vmatmul.msk.bf16.gmra.mxu3 %vm812_vm2, %v7537_v56 }
 0x198   : > { %v1145_v46 = vpop.f32.mrf.mxu2 }
 0x199   : > { %v1194_v47 = vpop.f32.mrf.mxu3 }
 0x19a   : > { %v7921_v51 = vpack.c.bf16 %v1194_v47, %v1145_v46  ;;  %v1356_v46 = vperm.slane %v1351_v5, %v7724_v14  ;;  %v1266_v47 = vperm.slane %v1261_v19, %v7724_v14  ;;  %v7956_v5 = vunpack.c.l.bf16 %v1311_v35  ;;  %v1288_v35 = vpop.permute.xlu1 %1287 }
 0x19b   : > { %v1293_v25 = vperm.slane %v1288_v35, %v7724_v14 }
 0x19c   : > { %v7958_v19 = vunpack.c.l.bf16 %v1356_v46 }
 0x1a0   : > { %v7923_v52 = vpop.f32.mrf.mxu2 }
 0x1a1   : > { %v7925_v43 = vpop.f32.mrf.mxu3 }
 0x1a5   : > { %6937 = vmatmul.msk.bf16.gmra.mxu2 %vm812_vm2, %v7564_v2 }
 0x1a6   : > { %6941 = vmatmul.msk.bf16.gmra.mxu3 %vm812_vm2, %v7564_v2 }
 0x1a8   : > { %v1150_v55 = vpop.f32.mrf.mxu2 }
 0x1a9   : > { %v1199_v57 = vpop.f32.mrf.mxu3 }
 0x1aa   : > { %v7931_v38 = vpack.c.bf16 %v1199_v57, %v1150_v55  ;;  %v1383_v55 = vperm.slane %v1378_v7, %v7724_v14  ;;  %v1347_v57 = vperm.slane %v1342_v11, %v7724_v14  ;;  %v7960_v7 = vpop.permute.xlu2 %1251  ;;  %v7962_v11 = vunpack.c.l.bf16 %v1266_v47 }
 0x1ac   : > { %v7968_v22 = vunpack.c.l.bf16 %v1347_v57  ;;  %v1284_v57 = vperm.slane %v1279_v17, %v7724_v14 }
 0x1b0   : > { %v7933_v58 = vpop.f32.mrf.mxu2 }
 0x1b1   : > { %v7935_v56 = vpop.f32.mrf.mxu3 }
 0x1b8   : > { %v1155_v59 = vpop.f32.mrf.mxu2 }
 0x1b9   : > { %v1204_v60 = vpop.f32.mrf.mxu3 }
 0x1ba   : > { %v7937_v61 = vpack.c.bf16 %v1204_v60, %v1155_v59  ;;  %v1338_v59 = vperm.slane %v1333_v12, %v7724_v14  ;;  %v7964_v12 = vunpack.c.l.bf16 %v1383_v55 }
 0x1bc   : > { %10673 = vst [vmem:[#allocation10_spill] sm:$0xff] %v7964_v12 }
 0x1c0   : > { %v1157_v54 = vpop.f32.mrf.mxu2 }
 0x1c1   : > { %v1206_v62 = vpop.f32.mrf.mxu3 }
 0x1c2   : > { %v1233_v21 = vpack.c.bf16 %v1206_v62, %v1157_v54 }
 0x1c4   : > { %v1402_v62 = vunpack.c.l.bf16 %v1233_v21 }
 0x1c8   : > { %v1160_v49 = vpop.f32.mrf.mxu2 }
 0x1c9   : > { %v1209_v63 = vpop.f32.mrf.mxu3 }
 0x1d0   : > { %v1162_v2 = vpop.f32.mrf.mxu2 }
 0x1d1   : > { %v1211_v4 = vpop.f32.mrf.mxu3 }
 0x1d2   : > { %v1235_v46 = vpack.c.bf16 %v1211_v4, %v1162_v2  ;;  %v1231_v2 = vpack.c.bf16 %v7935_v56, %v7933_v58 }
 0x1d4   : > { %v1406_v4 = vunpack.c.l.bf16 %v1235_v46  ;;  %v1407_v35 = vunpack.c.h.bf16 %v1235_v46 }
 0x1d8   : > { %v1165_v8 = vpop.f32.mrf.mxu2 }
 0x1d9   : > { %v1214_v10 = vpop.f32.mrf.mxu3 }
 0x1e0   : > { %v1167_v16 = vpop.f32.mrf.mxu2 }
 0x1e1   : > { %v1216_v18 = vpop.f32.mrf.mxu3 }
 0x1e2   : > { %v1237_v0 = vpack.c.bf16 %v1216_v18, %v1167_v16  ;;  %v7970_v16 = vunpack.c.l.bf16 %v1338_v59  ;;  %v1234_v59 = vpack.c.bf16 %v1209_v63, %v1160_v49 }
 0x1e4   : > { %v1410_v47 = vunpack.c.l.bf16 %v1237_v0  ;;  %v1404_v63 = vunpack.c.l.bf16 %v1234_v59 }
 0x1e6   : > { %v1458_v54 = vadd.f32 %v7952_v26, %v1410_v47 }
 0x1e8   : > { %v1170_v23 = vpop.f32.mrf.mxu2 }
 0x1e9   : > { %v1219_v20 = vpop.f32.mrf.mxu3 }
 0x1ea   : > { %v1238_v60 = vpack.c.bf16 %v1219_v20, %v1170_v23  ;;  %v1236_v23 = vpack.c.bf16 %v1214_v10, %v1165_v8  ;;  %v1411_v8 = vunpack.c.h.bf16 %v1237_v0 }
 0x1ec   : > { %v1412_v18 = vunpack.c.l.bf16 %v1238_v60  ;;  %v1413_v24 = vunpack.c.h.bf16 %v1238_v60  ;;  %v1408_v13 = vunpack.c.l.bf16 %v1236_v23  ;;  %v1409_v60 = vunpack.c.h.bf16 %v1236_v23 }
 0x1ed   : > { %v1459_v49 = vadd.f32 %v7952_v26, %v1411_v8  ;;  %v1405_v23 = vunpack.c.h.bf16 %v1234_v59 }
 0x1ee   : > { %v1460_v48 = vadd.f32 %v7948_v3, %v1412_v18  ;;  %v1461_v9 = vadd.f32 %v7948_v3, %v1413_v24  ;;  %v1456_v18 = vadd.f32 %v7958_v19, %v1408_v13  ;;  %v1457_v24 = vadd.f32 %v7958_v19, %v1409_v60 }
 0x1ef   : > { %v1538_v3 = vmax.f32 %v1458_v54, 0.0  ;;  %v1539_v26 = vmax.f32 %v1459_v49, 0.0  ;;  %v7992_v13 = vunpack.c.l.bf16 %v1293_v25  ;;  %v1229_v60 = vpack.c.bf16 %v7925_v43, %v7923_v52 }
 0x1f0   : > { %v1172_v20 = vpop.f32.mrf.mxu2  ;;  %v1541_v56 = vmax.f32 %v1461_v9, 0.0  ;;  %v1400_v9 = vunpack.c.l.bf16 %v7937_v61  ;;  %v1453_v54 = vadd.f32 %v7970_v16, %v1405_v23  ;;  %v1450_v25 = vadd.f32 %v7974_v34, %v1402_v62 }
 0x1f1   : > { %v1221_v55 = vpop.f32.mrf.mxu3 }
 0x1f2   : > { %v1239_v10 = vpack.c.bf16 %v1221_v55, %v1172_v20  ;;  %v1540_v55 = vmax.f32 %v1460_v48, 0.0  ;;  %v1536_v48 = vmax.f32 %v1456_v18, 0.0  ;;  %v1396_v18 = vunpack.c.l.bf16 %v7931_v38 }
 0x1f3   : > { %v1533_v23 = vmax.f32 %v1453_v54, 0.0 }
 0x1f4   : > { %v1414_v44 = vunpack.c.l.bf16 %v1239_v10  ;;  %v1415_v53 = vunpack.c.h.bf16 %v1239_v10  ;;  %v1403_v10 = vunpack.c.h.bf16 %v1233_v21  ;;  %v1401_v21 = vunpack.c.h.bf16 %v7937_v61 }
 0x1f5   : > { %v1227_v61 = vpack.c.bf16 %v7915_v30, %v7913_v45 }
 0x1f6   : > { %v1462_v0 = vadd.f32 %v7964_v12, %v1414_v44  ;;  %v1463_v17 = vadd.f32 %v7964_v12, %v1415_v53  ;;  %v1454_v44 = vadd.f32 %v7968_v22, %v1406_v4  ;;  %v1455_v53 = vadd.f32 %v7968_v22, %v1407_v35 }
 0x1f7   : > { %v1537_v4 = vmax.f32 %v1457_v24, 0.0  ;;  %v1452_v35 = vadd.f32 %v7970_v16, %v1404_v63  ;;  %v1451_v49 = vadd.f32 %v7974_v34, %v1403_v10  ;;  %v1397_v63 = vunpack.c.h.bf16 %v7931_v38 }
 0x1f8   : > { %v3011_v20 = vpop.f32.mrf.mxu2  ;;  %v1542_v58 = vmax.f32 %v1462_v0, 0.0  ;;  %v1543_v46 = vmax.f32 %v1463_v17, 0.0  ;;  %v1398_v0 = vunpack.c.l.bf16 %v1231_v2  ;;  %v1399_v17 = vunpack.c.h.bf16 %v1231_v2 }
 0x1f9   : > { %v3040_v47 = vpop.f32.mrf.mxu3  ;;  %v1557_v52 = vpack.c.bf16 %v1539_v26, %v1537_v4  ;;  %v1534_v43 = vmax.f32 %v1454_v44, 0.0  ;;  %v1532_v62 = vmax.f32 %v1452_v35, 0.0  ;;  %v1449_v26 = vadd.f32 %v7954_v42, %v1401_v21 }
 0x1fa   : > { %v7990_v12 = vpack.c.bf16 %v3040_v47, %v3011_v20  ;;  %v1558_v8 = vpack.c.bf16 %v1542_v58, %v1540_v55  ;;  %v1559_v59 = vpack.c.bf16 %v1543_v46, %v1541_v56  ;;  %v1556_v20 = vpack.c.bf16 %v1538_v3, %v1536_v48  ;;  %v1270_v46 = vpop.permute.xlu0 %1269 }
 0x1fb   : > { %v1535_v55 = vmax.f32 %v1455_v53, 0.0  ;;  %v8002_v58 = vunpack.c.l.bf16 %v1284_v57  ;;  %v1448_v3 = vadd.f32 %v7954_v42, %v1400_v9  ;;  %v1394_v24 = vunpack.c.l.bf16 %v1229_v60 }
 0x1fc   : > { %1944 = vmatpush.bf16.msrb.mxu0 %v1558_v8  ;;  %2273 = vmatpush.bf16.msrb.mxu1 %v1559_v59  ;;  %v1395_v57 = vunpack.c.h.bf16 %v1229_v60  ;;  %v1446_v45 = vadd.f32 %v7956_v5, %v1398_v0  ;;  %v1447_v30 = vadd.f32 %v7956_v5, %v1399_v17  ;;  %v1554_v38 = vpack.c.bf16 %v1534_v43, %v1532_v62 }
 0x1fd   : > { %v1555_v10 = vpack.c.bf16 %v1535_v55, %v1533_v23  ;;  %v1530_v47 = vmax.f32 %v1450_v25, 0.0  ;;  %v1531_v44 = vmax.f32 %v1451_v49, 0.0  ;;  %v1275_v53 = vperm.slane %v1270_v46, %v7724_v14  ;;  %v1243_v25 = vpop.permute.xlu1 %1242 }
 0x1fe   : > { %v1225_v8 = vpack.c.bf16 %v7905_v33, %v7903_v31  ;;  %v1392_v59 = vunpack.c.l.bf16 %v7921_v51  ;;  %v1393_v60 = vunpack.c.h.bf16 %v7921_v51  ;;  %v1528_v9 = vmax.f32 %v1448_v3, 0.0 }
 0x1ff   : > { %v1529_v21 = vmax.f32 %v1449_v26, 0.0  ;;  %v1444_v48 = vadd.f32 %v7972_v28, %v1396_v18  ;;  %v1445_v4 = vadd.f32 %v7972_v28, %v1397_v63  ;;  %v1390_v35 = vunpack.c.l.bf16 %v1227_v61 }
 0x200   : > { %1945 = vmatpush.bf16.msrb.mxu0 %v1556_v20  ;;  %2274 = vmatpush.bf16.msrb.mxu1 %v1557_v52  ;;  %v8008_v2 = vpop.f32.mrf.mxu2  ;;  %v1391_v54 = vunpack.c.h.bf16 %v1227_v61  ;;  %v1442_v0 = vadd.f32 %v7992_v13, %v1394_v24  ;;  %v1443_v17 = vadd.f32 %v7992_v13, %v1395_v57  ;;  %v1552_v31 = vpack.c.bf16 %v1530_v47, %v1528_v9 }
 0x201   : > { %v8012_v56 = vpop.f32.mrf.mxu3  ;;  %v1553_v33 = vpack.c.bf16 %v1531_v44, %v1529_v21  ;;  %v1526_v49 = vmax.f32 %v1446_v45, 0.0  ;;  %v1527_v20 = vmax.f32 %v1447_v30, 0.0  ;;  %v1248_v51 = vperm.slane %v1243_v25, %v7724_v14 }
 0x202   : > { %v8026_v52 = vunpack.c.l.bf16 %v1275_v53  ;;  %v1388_v43 = vunpack.c.l.bf16 %v7911_v40  ;;  %v1389_v55 = vunpack.c.h.bf16 %v7911_v40  ;;  %v1524_v18 = vmax.f32 %v1444_v48, 0.0 }
 0x203   : > { %v1525_v63 = vmax.f32 %v1445_v4, 0.0  ;;  %v1440_v62 = vadd.f32 %v8002_v58, %v1392_v59  ;;  %v1441_v23 = vadd.f32 %v8002_v58, %v1393_v60  ;;  %v1386_v3 = vunpack.c.l.bf16 %v1225_v8 }
 0x204   : > { %1946 = vmatpush.bf16.msrb.mxu0 %v1554_v38  ;;  %2275 = vmatpush.bf16.msrb.mxu1 %v1555_v10  ;;  %v1387_v26 = vunpack.c.h.bf16 %v1225_v8  ;;  %v1438_v57 = vadd.f32 %v8026_v52, %v1390_v35  ;;  %v1439_v45 = vadd.f32 %v8026_v52, %v1391_v54  ;;  %v1550_v30 = vpack.c.bf16 %v1526_v49, %v1524_v18 }
 0x205   : > { %v1551_v40 = vpack.c.bf16 %v1527_v20, %v1525_v63  ;;  %v1522_v46 = vmax.f32 %v1442_v0, 0.0  ;;  %v1523_v38 = vmax.f32 %v1443_v17, 0.0  ;;  %v10674_v10 = vperm.slane %v7960_v7, %v7724_v14 }
 0x206   : > { %v1384_v44 = vunpack.c.l.bf16 %v7901_v29  ;;  %v1385_v53 = vunpack.c.h.bf16 %v7901_v29  ;;  %v1520_v8 = vmax.f32 %v1440_v62, 0.0  ;;  %v1521_v59 = vmax.f32 %v1441_v23, 0.0  ;;  %v8056_v23 = vld [vmem:[%s10595_s6] sm:$0xff] }
 0x207   : > { %v8041_v47 = vunpack.c.l.bf16 %v10674_v10  ;;  %v1436_v60 = vadd.f32 %v7962_v11, %v1388_v43  ;;  %v1437_v9 = vadd.f32 %v7962_v11, %v1389_v55  ;;  %v8047_v21 = vunpack.c.l.bf16 %v1248_v51 }
 0x208   : > { %1947 = vmatpush.bf16.msrb.mxu0 %v1552_v31  ;;  %2276 = vmatpush.bf16.msrb.mxu1 %v1553_v33  ;;  %v8030_v61 = vpop.f32.mrf.mxu2  ;;  %v1548_v7 = vpack.c.bf16 %v1522_v46, %v1520_v8  ;;  %v1549_v4 = vpack.c.bf16 %v1523_v38, %v1521_v59  ;;  %v1518_v35 = vmax.f32 %v1438_v57, 0.0  ;;  %v1519_v54 = vmax.f32 %v1439_v45, 0.0 }
 0x209   : > { %v8034_v24 = vpop.f32.mrf.mxu3  ;;  %v1434_v48 = vadd.f32 %v8041_v47, %v1386_v3  ;;  %v1435_v14 = vadd.f32 %v8041_v47, %v1387_v26  ;;  %v1516_v0 = vmax.f32 %v1436_v60, 0.0  ;;  %v1517_v17 = vmax.f32 %v1437_v9, 0.0 }
 0x20a   : > { %v1432_v25 = vadd.f32 %v8047_v21, %v1384_v44  ;;  %v1433_v31 = vadd.f32 %v8047_v21, %v1385_v53 }
 0x20b   : > { %v1546_v49 = vpack.c.bf16 %v1518_v35, %v1516_v0  ;;  %v1547_v20 = vpack.c.bf16 %v1519_v54, %v1517_v17  ;;  %v1514_v51 = vmax.f32 %v1434_v48, 0.0  ;;  %v1515_v43 = vmax.f32 %v1435_v14, 0.0 }
 0x20c   : > { %1948 = vmatpush.bf16.msrb.mxu0 %v1550_v30  ;;  %2277 = vmatpush.bf16.msrb.mxu1 %v1551_v40  ;;  %v1512_v55 = vmax.f32 %v1432_v25, 0.0  ;;  %v1513_v18 = vmax.f32 %v1433_v31, 0.0  ;;  %v8063_v30 = vld [vmem:[%s10595_s6 + $0x8] sm:$0xff] }
 0x20d   : > { %10675 = vst [vmem:[#allocation11_spill] sm:$0xff] %v8063_v30 }
 0x20e   : > { %v1544_v63 = vpack.c.bf16 %v1514_v51, %v1512_v55  ;;  %v1545_v62 = vpack.c.bf16 %v1515_v43, %v1513_v18 }
 0x210   : > { %1949 = vmatpush.bf16.msrb.mxu0 %v1548_v7  ;;  %2278 = vmatpush.bf16.msrb.mxu1 %v1549_v4  ;;  %v3018_v29 = vpop.f32.mrf.mxu2  ;;  %v3062_v4 = vpack.c.bf16 %v8034_v24, %v8030_v61 }
 0x211   : > { %v3047_v33 = vpop.f32.mrf.mxu3 }
 0x212   : > { %v3063_v60 = vpack.c.bf16 %v3047_v33, %v3018_v29  ;;  %v3072_v24 = vunpack.c.l.bf16 %v3062_v4  ;;  %v3073_v55 = vunpack.c.h.bf16 %v3062_v4 }
 0x214   : > { %1950 = vmatpush.bf16.msrb.mxu0 %v1546_v49  ;;  %2279 = vmatpush.bf16.msrb.mxu1 %v1547_v20  ;;  %v3061_v49 = vpack.c.bf16 %v8012_v56, %v8008_v2  ;;  %v3074_v20 = vunpack.c.l.bf16 %v3063_v60  ;;  %v3075_v29 = vunpack.c.h.bf16 %v3063_v60  ;;  %v8082_v2 = vld [vmem:[%s10595_s6 + $0x10] sm:$0xff] }
 0x215   : > { %10676 = vst [vmem:[#allocation12_spill] sm:$0xff] %v8082_v2 }
 0x218   : > { %1951 = vmatpush.bf16.msrb.mxu0 %v1544_v63  ;;  %2280 = vmatpush.bf16.msrb.mxu1 %v1545_v62  ;;  %v3021_v3 = vpop.f32.mrf.mxu2 }
 0x219   : > { %v3050_v26 = vpop.f32.mrf.mxu3 }
 0x21a   : > { %v3064_v44 = vpack.c.bf16 %v3050_v26, %v3021_v3  ;;  %v3071_v26 = vunpack.c.h.bf16 %v3061_v49 }
 0x21b   : > { %1952 = vmatmul.bf16.vlgmr.msrb.gmra.mxu0 %v8056_v23  ;;  %2281 = vmatmul.bf16.vlgmr.msrb.gmra.mxu1 %v8056_v23 }
 0x21c   : > { %v3076_v35 = vunpack.c.l.bf16 %v3064_v44  ;;  %v3077_v54 = vunpack.c.h.bf16 %v3064_v44  ;;  %v3088_v44 = vadd.f32 %v3072_v24, %v7743_v36  ;;  %v3087_v60 = vadd.f32 %v3071_v26, %v7775_v15  ;;  %v8154_v24 = vld [vmem:[%s10595_s6 + $0x40] sm:$0xff] }
 0x21e   : > { %v3092_v18 = vadd.f32 %v3076_v35, %v7747_v39  ;;  %v3128_v35 = vmax.f32 %v3088_v44, 0.0  ;;  %v10688_v44 = vld [vmem:[#allocation7_spill] sm:$0xff] }
 0x220   : > { %v3023_v57 = vpop.f32.mrf.mxu2 }
 0x221   : > { %v3052_v45 = vpop.f32.mrf.mxu3 }
 0x222   : > { %v3065_v10 = vpack.c.bf16 %v3052_v45, %v3023_v57  ;;  %v3090_v57 = vadd.f32 %v3074_v20, %v7745_v37 }
 0x224   : > { %v3078_v48 = vunpack.c.l.bf16 %v3065_v10  ;;  %v3079_v14 = vunpack.c.h.bf16 %v3065_v10  ;;  %v3069_v10 = vunpack.c.h.bf16 %v7990_v12 }
 0x226   : > { %v3094_v33 = vadd.f32 %v3078_v48, %v7749_v41  ;;  %v3095_v51 = vadd.f32 %v3079_v14, %v7749_v41  ;;  %v3070_v41 = vunpack.c.l.bf16 %v3061_v49  ;;  %v3130_v14 = vmax.f32 %v3090_v57, 0.0 }
 0x227   : > { %v3085_v4 = vadd.f32 %v3069_v10, %v7780_v27 }
 0x228   : > { %v3026_v40 = vpop.f32.mrf.mxu2 }
 0x229   : > { %v3055_v46 = vpop.f32.mrf.mxu3  ;;  %v3125_v49 = vmax.f32 %v3085_v4, 0.0 }
 0x22a   : > { %v3066_v38 = vpack.c.bf16 %v3055_v46, %v3026_v40  ;;  %v3134_v46 = vmax.f32 %v3094_v33, 0.0  ;;  %v8121_v33 = vld [vmem:[%s10595_s6 + $0x28] sm:$0xff] }
 0x22b   : > { %1957 = vmatmul.bf16.gmra.mxu0 %v8063_v30  ;;  %2286 = vmatmul.bf16.gmra.mxu1 %v8063_v30  ;;  %10679 = vst [vmem:[#allocation15_spill] sm:$0xff] %v8121_v33 }
 0x22c   : > { %v3080_v53 = vunpack.c.l.bf16 %v3066_v38  ;;  %v3081_v8 = vunpack.c.h.bf16 %v3066_v38  ;;  %v3135_v38 = vmax.f32 %v3095_v51, 0.0  ;;  %v8132_v51 = vld [vmem:[%s10595_s6 + $0x30] sm:$0xff] }
 0x22e   : > { %v3096_v0 = vadd.f32 %v3080_v53, %v7741_v32  ;;  %v3097_v17 = vadd.f32 %v3081_v8, %v7741_v32  ;;  %v3093_v32 = vadd.f32 %v3077_v54, %v7747_v39  ;;  %v3068_v39 = vunpack.c.l.bf16 %v7990_v12 }
 0x22f   : > { %v3089_v53 = vadd.f32 %v3073_v55, %v7743_v36  ;;  %v3132_v8 = vmax.f32 %v3092_v18, 0.0  ;;  %v3142_v36 = vpack.c.bf16 %v3130_v14, %v3128_v35  ;;  %v8203_v35 = vpop.permute.xlu2 %4798 }
 0x230   : > { %v3028_v59 = vpop.f32.mrf.mxu2  ;;  %v3136_v56 = vmax.f32 %v3096_v0, 0.0  ;;  %v3137_v63 = vmax.f32 %v3097_v17, 0.0  ;;  %10691 = vst [vmem:[#allocation7_spill] sm:$0xff] %v8203_v35 }
 0x231   : > { %v3057_v9 = vpop.f32.mrf.mxu3  ;;  %v3129_v54 = vmax.f32 %v3089_v53, 0.0 }
 0x232   : > { %v3067_v7 = vpack.c.bf16 %v3057_v9, %v3028_v59  ;;  %v3133_v59 = vmax.f32 %v3093_v32, 0.0  ;;  %v3144_v9 = vpack.c.bf16 %v3134_v46, %v3132_v8  ;;  %v7155_v46 = vld [vmem:[%s10595_s6 + $0x50] sm:$0xff] }
 0x234   : > { %v3082_v25 = vunpack.c.l.bf16 %v3067_v7  ;;  %v3083_v31 = vunpack.c.h.bf16 %v3067_v7  ;;  %v3145_v48 = vpack.c.bf16 %v3135_v38, %v3133_v59  ;;  %v3084_v7 = vadd.f32 %v3068_v39, %v7780_v27  ;;  %v8110_v27 = vld [vmem:[%s10595_s6 + $0x20] sm:$0xff]  ;;  %v7156_v59 = vld [vmem:[%s10595_s6 + $0x58] sm:$0xff] }
 0x235   : > { %10678 = vst [vmem:[#allocation14_spill] sm:$0xff] %v8110_v27 }
 0x236   : > { %v3098_v43 = vadd.f32 %v3082_v25, %v7751_v50  ;;  %v3099_v61 = vadd.f32 %v3083_v31, %v7751_v50  ;;  %v3091_v50 = vadd.f32 %v3075_v29, %v7745_v37  ;;  %v3086_v37 = vadd.f32 %v3070_v41, %v7775_v15  ;;  %v8099_v29 = vld [vmem:[%s10595_s6 + $0x18] sm:$0xff] }
 0x237   : > { %v3127_v25 = vmax.f32 %v3087_v60, 0.0  ;;  %v3124_v31 = vmax.f32 %v3084_v7, 0.0  ;;  %10677 = vst [vmem:[#allocation13_spill] sm:$0xff] %v8099_v29 }
 0x238   : > { %v3138_v62 = vmax.f32 %v3098_v43, 0.0  ;;  %v3139_v3 = vmax.f32 %v3099_v61, 0.0  ;;  %v3131_v12 = vmax.f32 %v3091_v50, 0.0  ;;  %v3126_v17 = vmax.f32 %v3086_v37, 0.0  ;;  %v8143_v43 = vld [vmem:[%s10595_s6 + $0x38] sm:$0xff]  ;;  %v10687_v50 = vld [vmem:[#allocation6_spill] sm:$0xff] }
 0x239   : > { %v3141_v20 = vpack.c.bf16 %v3127_v25, %v3125_v49  ;;  %v10684_v61 = vld [vmem:[#allocation4_spill] sm:$0xff]  ;;  %v8218_v49 = vpop.permute.xlu2 %4868 }
 0x23a   : > { %v3146_v45 = vpack.c.bf16 %v3138_v62, %v3136_v56  ;;  %v3147_v40 = vpack.c.bf16 %v3139_v3, %v3137_v63  ;;  %v3143_v0 = vpack.c.bf16 %v3131_v12, %v3129_v54  ;;  %v3140_v15 = vpack.c.bf16 %v3126_v17, %v3124_v31  ;;  %10685 = vst [vmem:[#allocation4_spill] sm:$0xff] %v8154_v24  ;;  %v10686_v56 = vld [vmem:[#allocation5_spill] sm:$0xff]  ;;  %v7154_v3 = vld [vmem:[%s10595_s6 + $0x48] sm:$0xff] }
 0x23b   : > { %1962 = vmatmul.bf16.gmra.mxu0 %v8082_v2  ;;  %2291 = vmatmul.bf16.gmra.mxu1 %v8082_v2  ;;  %10692 = vst [vmem:[#allocation16_spill] sm:$0xff] %v8218_v49 }
 0x23c   : > { %3152 = vmatpush.bf16.msra.mxu2 %v3146_v45  ;;  %3201 = vmatpush.bf16.msra.mxu3 %v3147_v40 }
 0x240   : > { %3153 = vmatpush.bf16.msra.mxu2 %v3144_v9  ;;  %3202 = vmatpush.bf16.msra.mxu3 %v3145_v48 }
 0x244   : > { %3154 = vmatpush.bf16.msra.mxu2 %v3142_v36  ;;  %3203 = vmatpush.bf16.msra.mxu3 %v3143_v0  ;;  %v7157_v0 = vld [vmem:[%s10595_s6 + $0x60] sm:$0xff] }
 0x248   : > { %3155 = vmatpush.bf16.msra.mxu2 %v3140_v15  ;;  %3204 = vmatpush.bf16.msra.mxu3 %v3141_v20 }
 0x24b   : > { %1967 = vmatmul.bf16.gmra.mxu0 %v8099_v29  ;;  %2296 = vmatmul.bf16.gmra.mxu1 %v8099_v29 }
 0x24c   : > { %6942 = vmatmul.msk.bf16.vlgmr.msra.gmra.mxu2 %vm1101_vm3, %v7799_v1  ;;  %6950 = vmatmul.msk.bf16.vlgmr.msra.gmra.mxu3 %vm1101_vm3, %v7799_v1  ;;  %v10680_v1 = vld [vmem:[#allocation2_spill] sm:$0xff] }
 0x24d   : > { %10681 = vst [vmem:[#allocation2_spill] sm:$0xff] %v8132_v51 }
 0x25b   : > { %1972 = vmatmul.bf16.gmra.mxu0 %v8110_v27  ;;  %2301 = vmatmul.bf16.gmra.mxu1 %v8110_v27 }
 0x25c   : > { %6943 = vmatmul.msk.bf16.gmra.mxu2 %vm1101_vm3, %v7814_v6  ;;  %6951 = vmatmul.msk.bf16.gmra.mxu3 %vm1101_vm3, %v7814_v6  ;;  %v10682_v6 = vld [vmem:[#allocation3_spill] sm:$0xff] }
 0x25d   : > { %10683 = vst [vmem:[#allocation3_spill] sm:$0xff] %v8143_v43 }
 0x26b   : > { %1977 = vmatmul.bf16.gmra.mxu0 %v8121_v33  ;;  %2306 = vmatmul.bf16.gmra.mxu1 %v8121_v33 }
 0x26c   : > { %6944 = vmatmul.msk.bf16.gmra.mxu2 %vm1101_vm3, %v10680_v1  ;;  %6952 = vmatmul.msk.bf16.gmra.mxu3 %vm1101_vm3, %v10680_v1 }
 0x27b   : > { %1982 = vmatmul.bf16.gmra.mxu0 %v8132_v51  ;;  %2311 = vmatmul.bf16.gmra.mxu1 %v8132_v51 }
 0x27c   : > { %6945 = vmatmul.msk.bf16.gmra.mxu2 %vm1101_vm3, %v10682_v6  ;;  %6953 = vmatmul.msk.bf16.gmra.mxu3 %vm1101_vm3, %v10682_v6 }
 0x28b   : > { %1987 = vmatmul.bf16.gmra.mxu0 %v8143_v43  ;;  %2316 = vmatmul.bf16.gmra.mxu1 %v8143_v43 }
 0x28c   : > { %6946 = vmatmul.msk.bf16.gmra.mxu2 %vm1101_vm3, %v10684_v61  ;;  %6954 = vmatmul.msk.bf16.gmra.mxu3 %vm1101_vm3, %v10684_v61 }
 0x298   : > { %v1953_v55 = vpop.f32.mrf.mxu0  ;;  %v2282_v18 = vpop.f32.mrf.mxu1 }
 0x299   : > { %v2602_v32 = vmax.f32 %v1953_v55, %v2282_v18  ;;  %v8226_v55 = vpop.permute.xlu2 %4773 }
 0x29a   : > { %10695 = vst [vmem:[#allocation19_spill] sm:$0xff] %v8226_v55 }
 0x29b   : > { %1992 = vmatmul.bf16.gmra.mxu0 %v8154_v24  ;;  %2321 = vmatmul.bf16.gmra.mxu1 %v8154_v24 }
 0x29c   : > { %6947 = vmatmul.msk.bf16.gmra.mxu2 %vm1101_vm3, %v10686_v56  ;;  %6955 = vmatmul.msk.bf16.gmra.mxu3 %vm1101_vm3, %v10686_v56  ;;  %v7158_v56 = vld [vmem:[%s10595_s6 + $0x68] sm:$0xff] }
 0x29d   : > { %2603 = vmax.xlane.f32.xlu0 %v2602_v32 }
 0x2a0   : > { %v8162_v63 = vpop.f32.mrf.mxu0  ;;  %v8164_v62 = vpop.f32.mrf.mxu1 }
 0x2a8   : > { %v1958_v41 = vpop.f32.mrf.mxu0  ;;  %v2287_v26 = vpop.f32.mrf.mxu1 }
 0x2a9   : > { %v2608_v57 = vmax.f32 %v1958_v41, %v2287_v26 }
 0x2ab   : > { %1997 = vmatmul.bf16.gmra.mxu0 %v7154_v3  ;;  %2326 = vmatmul.bf16.gmra.mxu1 %v7154_v3 }
 0x2ac   : > { %6948 = vmatmul.msk.bf16.gmra.mxu2 %vm1101_vm3, %v10687_v50  ;;  %6956 = vmatmul.msk.bf16.gmra.mxu3 %vm1101_vm3, %v10687_v50 }
 0x2ad   : > { %2609 = vmax.xlane.f32.xlu2 %v2608_v57 }
 0x2b0   : > { %v8173_v45 = vpop.f32.mrf.mxu0  ;;  %v8175_v40 = vpop.f32.mrf.mxu1 }
 0x2b8   : > { %v1963_v38 = vpop.f32.mrf.mxu0  ;;  %v2292_v39 = vpop.f32.mrf.mxu1 }
 0x2b9   : > { %v2614_v10 = vmax.f32 %v1963_v38, %v2292_v39 }
 0x2bb   : > { %2002 = vmatmul.bf16.gmra.mxu0 %v7155_v46  ;;  %2331 = vmatmul.bf16.gmra.mxu1 %v7155_v46 }
 0x2bc   : > { %6949 = vmatmul.msk.bf16.gmra.mxu2 %vm1101_vm3, %v10688_v44  ;;  %6957 = vmatmul.msk.bf16.gmra.mxu3 %vm1101_vm3, %v10688_v44 }
 0x2bd   : > { %2615 = vmax.xlane.f32.xlu0 %v2614_v10  ;;  %v8247_v10 = vpop.permute.xlu2 %4858 }
 0x2be   : > { %10700 = vst [vmem:[#allocation24_spill] sm:$0xff] %v8247_v10 }
 0x2c0   : > { %v8184_v53 = vpop.f32.mrf.mxu0  ;;  %v8186_v8 = vpop.f32.mrf.mxu1 }
 0x2c8   : > { %v8191_v37 = vpop.f32.mrf.mxu0  ;;  %v8193_v60 = vpop.f32.mrf.mxu1 }
 0x2cb   : > { %2007 = vmatmul.bf16.gmra.mxu0 %v7156_v59  ;;  %2336 = vmatmul.bf16.gmra.mxu1 %v7156_v59 }
 0x2cf   : > { %v3157_v48 = vpop.f32.mrf.mxu2  ;;  %v3206_v14 = vpop.f32.mrf.mxu3 }
 0x2d0   : > { %v8197_v12 = vpack.c.bf16 %v3206_v14, %v3157_v48  ;;  %v8199_v7 = vpop.f32.mrf.mxu0  ;;  %v8201_v4 = vpop.f32.mrf.mxu1  ;;  %v7159_v48 = vld [vmem:[%s10595_s6 + $0x70] sm:$0xff] }
 0x2d1   : > { %10689 = vst [vmem:[#allocation5_spill] sm:$0xff] %v8199_v7 }
 0x2d2   : > { %10690 = vst [vmem:[#allocation6_spill] sm:$0xff] %v8201_v4 }
 0x2d7   : > { %v8205_v54 = vpop.f32.mrf.mxu2  ;;  %v8207_v36 = vpop.f32.mrf.mxu3 }
 0x2d8   : > { %v8212_v17 = vpop.f32.mrf.mxu0  ;;  %v8214_v25 = vpop.f32.mrf.mxu1 }
 0x2db   : > { %2012 = vmatmul.bf16.gmra.mxu0 %v7157_v0  ;;  %2341 = vmatmul.bf16.gmra.mxu1 %v7157_v0 }
 0x2df   : > { %v3162_v15 = vpop.f32.mrf.mxu2  ;;  %v3211_v20 = vpop.f32.mrf.mxu3 }
 0x2e0   : > { %v8220_v1 = vpack.c.bf16 %v3211_v20, %v3162_v15  ;;  %v8222_v6 = vpop.f32.mrf.mxu0  ;;  %v8224_v61 = vpop.f32.mrf.mxu1 }
 0x2e1   : > { %10693 = vst [vmem:[#allocation17_spill] sm:$0xff] %v8222_v6  ;;  %v8262_v20 = vpop.permute.xlu2 %4763 }
 0x2e2   : > { %10694 = vst [vmem:[#allocation18_spill] sm:$0xff] %v8224_v61 }
 0x2e3   : > { %10703 = vst [vmem:[#allocation27_spill] sm:$0xff] %v8262_v20 }
 0x2e7   : > { %v8228_v18 = vpop.f32.mrf.mxu2  ;;  %v8230_v32 = vpop.f32.mrf.mxu3 }
 0x2e8   : > { %v8235_v3 = vpop.f32.mrf.mxu0  ;;  %v8237_v41 = vpop.f32.mrf.mxu1 }
 0x2e9   : > { %10696 = vst [vmem:[#allocation20_spill] sm:$0xff] %v8235_v3  ;;  %v8270_v9 = vpop.permute.xlu2 %4843 }
 0x2ea   : > { %10697 = vst [vmem:[#allocation21_spill] sm:$0xff] %v8237_v41 }
 0x2eb   : > { %2017 = vmatmul.bf16.gmra.mxu0 %v7158_v56  ;;  %2346 = vmatmul.bf16.gmra.mxu1 %v7158_v56  ;;  %10706 = vst [vmem:[#allocation30_spill] sm:$0xff] %v8270_v9 }
 0x2ef   : > { %v3167_v57 = vpop.f32.mrf.mxu2  ;;  %v3216_v50 = vpop.f32.mrf.mxu3 }
 0x2f0   : > { %v8241_v46 = vpack.c.bf16 %v3216_v50, %v3167_v57  ;;  %v8243_v38 = vpop.f32.mrf.mxu0  ;;  %v8245_v39 = vpop.f32.mrf.mxu1 }
 0x2f1   : > { %10698 = vst [vmem:[#allocation22_spill] sm:$0xff] %v8243_v38  ;;  %v8291_v43 = vpop.permute.xlu2 %4848 }
 0x2f2   : > { %10699 = vst [vmem:[#allocation23_spill] sm:$0xff] %v8245_v39 }
 0x2f3   : > { %10711 = vst [vmem:[#allocation35_spill] sm:$0xff] %v8291_v43 }
 0x2f7   : > { %v8249_v44 = vpop.f32.mrf.mxu2  ;;  %v8251_v59 = vpop.f32.mrf.mxu3 }
 0x2f8   : > { %v8256_v14 = vpop.f32.mrf.mxu0  ;;  %v8258_v0 = vpop.f32.mrf.mxu1 }
 0x2f9   : > { %10701 = vst [vmem:[#allocation25_spill] sm:$0xff] %v8256_v14  ;;  %v7163_v14 = vld [vmem:[%s10595_s6 + $0x90] sm:$0xff] }
 0x2fa   : > { %10702 = vst [vmem:[#allocation26_spill] sm:$0xff] %v8258_v0 }
 0x2fb   : > { %2022 = vmatmul.bf16.gmra.mxu0 %v7159_v48  ;;  %2351 = vmatmul.bf16.gmra.mxu1 %v7159_v48  ;;  %v7160_v48 = vld [vmem:[%s10595_s6 + $0x78] sm:$0xff] }
 0x2ff   : > { %v3172_v56 = vpop.f32.mrf.mxu2  ;;  %v3221_v57 = vpop.f32.mrf.mxu3 }
 0x300   : > { %v8264_v50 = vpack.c.bf16 %v3221_v57, %v3172_v56  ;;  %v8266_v26 = vpop.f32.mrf.mxu0  ;;  %v8268_v31 = vpop.f32.mrf.mxu1  ;;  %v7161_v56 = vld [vmem:[%s10595_s6 + $0x80] sm:$0xff] }
 0x301   : > { %10704 = vst [vmem:[#allocation28_spill] sm:$0xff] %v8266_v26 }
 0x302   : > { %10705 = vst [vmem:[#allocation29_spill] sm:$0xff] %v8268_v31 }
 0x307   : > { %v8272_v10 = vpop.f32.mrf.mxu2  ;;  %v8274_v49 = vpop.f32.mrf.mxu3 }
 0x308   : > { %v8279_v15 = vpop.f32.mrf.mxu0  ;;  %v8281_v20 = vpop.f32.mrf.mxu1 }
 0x309   : > { %10707 = vst [vmem:[#allocation31_spill] sm:$0xff] %v8279_v15 }
 0x30a   : > { %10708 = vst [vmem:[#allocation32_spill] sm:$0xff] %v8281_v20  ;;  %v7162_v20 = vld [vmem:[%s10595_s6 + $0x88] sm:$0xff] }
 0x30b   : > { %2027 = vmatmul.bf16.gmra.mxu0 %v7160_v48  ;;  %2356 = vmatmul.bf16.gmra.mxu1 %v7160_v48 }
 0x30f   : > { %v3177_v57 = vpop.f32.mrf.mxu2  ;;  %v3226_v55 = vpop.f32.mrf.mxu3 }
 0x310   : > { %v8285_v9 = vpack.c.bf16 %v3226_v55, %v3177_v57  ;;  %v8287_v35 = vpop.f32.mrf.mxu0  ;;  %v8289_v24 = vpop.f32.mrf.mxu1 }
 0x311   : > { %10709 = vst [vmem:[#allocation33_spill] sm:$0xff] %v8287_v35  ;;  %v8306_v57 = vpop.permute.xlu2 %4743 }
 0x312   : > { %10710 = vst [vmem:[#allocation34_spill] sm:$0xff] %v8289_v24 }
 0x313   : > { %10714 = vst [vmem:[#allocation38_spill] sm:$0xff] %v8306_v57 }
 0x317   : > { %v8293_v51 = vpop.f32.mrf.mxu2  ;;  %v8295_v33 = vpop.f32.mrf.mxu3 }
 0x318   : > { %v8300_v27 = vpop.f32.mrf.mxu0  ;;  %v8302_v48 = vpop.f32.mrf.mxu1 }
 0x319   : > { %10712 = vst [vmem:[#allocation36_spill] sm:$0xff] %v8300_v27  ;;  %v8312_v24 = vpop.permute.xlu2 %4828 }
 0x31a   : > { %10713 = vst [vmem:[#allocation37_spill] sm:$0xff] %v8302_v48 }
 0x31b   : > { %2032 = vmatmul.bf16.gmra.mxu0 %v7161_v56  ;;  %2361 = vmatmul.bf16.gmra.mxu1 %v7161_v56  ;;  %10717 = vst [vmem:[#allocation41_spill] sm:$0xff] %v8312_v24  ;;  %v8338_v56 = vpop.permute.xlu0 %4873 }
 0x31c   : > { %10725 = vst [vmem:[#allocation49_spill] sm:$0xff] %v8338_v56 }
 0x31f   : > { %v3182_v43 = vpop.f32.mrf.mxu2  ;;  %v3231_v29 = vpop.f32.mrf.mxu3 }
 0x320   : > { %v8308_v2 = vpop.f32.mrf.mxu0  ;;  %v8310_v35 = vpop.f32.mrf.mxu1 }
 0x321   : > { %10715 = vst [vmem:[#allocation39_spill] sm:$0xff] %v8308_v2  ;;  %v8327_v2 = vpop.permute.xlu2 %4818 }
 0x322   : > { %10716 = vst [vmem:[#allocation40_spill] sm:$0xff] %v8310_v35 }
 0x323   : > { %10722 = vst [vmem:[#allocation46_spill] sm:$0xff] %v8327_v2  ;;  %v8346_v39 = vpop.permute.xlu0 %4783 }
 0x324   : > { %10729 = vst [vmem:[#allocation53_spill] sm:$0xff] %v8346_v39 }
 0x327   : > { %v3184_v26 = vpop.f32.mrf.mxu2  ;;  %v3233_v31 = vpop.f32.mrf.mxu3 }
 0x328   : > { %v8317_v15 = vpop.f32.mrf.mxu0  ;;  %v8319_v55 = vpop.f32.mrf.mxu1  ;;  %v3257_v56 = vpack.c.bf16 %v3233_v31, %v3184_v26  ;;  %v10733_v31 = vld [vmem:[#allocation8_spill] sm:$0xff] }
 0x329   : > { %10718 = vst [vmem:[#allocation42_spill] sm:$0xff] %v8317_v15 }
 0x32a   : > { %10719 = vst [vmem:[#allocation43_spill] sm:$0xff] %v8319_v55  ;;  %v3285_v39 = vunpack.c.h.bf16 %v3257_v56 }
 0x32b   : > { %2037 = vmatmul.bf16.gmra.mxu0 %v7162_v20  ;;  %2366 = vmatmul.bf16.gmra.mxu1 %v7162_v20 }
 0x32f   : > { %v3187_v57 = vpop.f32.mrf.mxu2  ;;  %v3236_v48 = vpop.f32.mrf.mxu3 }
 0x330   : > { %v8323_v27 = vpop.f32.mrf.mxu0  ;;  %v8325_v24 = vpop.f32.mrf.mxu1  ;;  %v3258_v6 = vpack.c.bf16 %v3236_v48, %v3187_v57 }
 0x331   : > { %10720 = vst [vmem:[#allocation44_spill] sm:$0xff] %v8323_v27  ;;  %v8340_v27 = vpop.permute.xlu2 %4723 }
 0x332   : > { %10721 = vst [vmem:[#allocation45_spill] sm:$0xff] %v8325_v24 }
 0x333   : > { %10726 = vst [vmem:[#allocation50_spill] sm:$0xff] %v8340_v27  ;;  %v7164_v27 = vld [vmem:[%s10595_s6 + $0x98] sm:$0xff] }
 0x337   : > { %v3189_v35 = vpop.f32.mrf.mxu2  ;;  %v3238_v0 = vpop.f32.mrf.mxu3 }
 0x338   : > { %v8332_v41 = vpop.f32.mrf.mxu0  ;;  %v8334_v3 = vpop.f32.mrf.mxu1  ;;  %v3259_v38 = vpack.c.bf16 %v3238_v0, %v3189_v35  ;;  %v3286_v35 = vunpack.c.l.bf16 %v3258_v6  ;;  %v3287_v0 = vunpack.c.h.bf16 %v3258_v6 }
 0x339   : > { %10723 = vst [vmem:[#allocation47_spill] sm:$0xff] %v8332_v41  ;;  %v8348_v61 = vpop.permute.xlu2 %4728 }
 0x33a   : > { %10724 = vst [vmem:[#allocation48_spill] sm:$0xff] %v8334_v3  ;;  %v3288_v7 = vunpack.c.l.bf16 %v3259_v38 }
 0x33b   : > { %2042 = vmatmul.bf16.gmra.mxu0 %v7163_v14  ;;  %2371 = vmatmul.bf16.gmra.mxu1 %v7163_v14  ;;  %10730 = vst [vmem:[#allocation54_spill] sm:$0xff] %v8348_v61 }
 0x33f   : > { %v3192_v2 = vpop.f32.mrf.mxu2  ;;  %v3241_v24 = vpop.f32.mrf.mxu3 }
 0x340   : > { %v8342_v55 = vpop.f32.mrf.mxu0  ;;  %v8344_v15 = vpop.f32.mrf.mxu1  ;;  %v3260_v30 = vpack.c.bf16 %v3241_v24, %v3192_v2  ;;  %v3256_v24 = vpack.c.bf16 %v3231_v29, %v3182_v43  ;;  %v10734_v29 = vld [vmem:[#allocation9_spill] sm:$0xff] }
 0x341   : > { %10727 = vst [vmem:[#allocation51_spill] sm:$0xff] %v8342_v55  ;;  %v3289_v55 = vunpack.c.h.bf16 %v3259_v38  ;;  %v3253_v38 = vpack.c.bf16 %v8274_v49, %v8272_v10  ;;  %v3320_v43 = vadd.f32 %v3288_v7, %v10734_v29  ;;  %v3319_v49 = vadd.f32 %v3287_v0, %v7958_v19  ;;  %v8379_v0 = vpop.permute.xlu1 %4793 }
 0x342   : > { %10728 = vst [vmem:[#allocation52_spill] sm:$0xff] %v8344_v15  ;;  %v3290_v20 = vunpack.c.l.bf16 %v3260_v30  ;;  %v3291_v3 = vunpack.c.h.bf16 %v3260_v30  ;;  %v10735_v30 = vld [vmem:[#allocation10_spill] sm:$0xff] }
 0x343   : > { %v3321_v6 = vadd.f32 %v3289_v55, %v10734_v29 }
 0x344   : > { %v3322_v26 = vadd.f32 %v3290_v20, %v10733_v31  ;;  %v3323_v48 = vadd.f32 %v3291_v3, %v10733_v31  ;;  %v3282_v31 = vunpack.c.l.bf16 %v3256_v24 }
 0x346   : > { %v3402_v10 = vmax.f32 %v3322_v26, 0.0  ;;  %v8381_v26 = vpop.permute.xlu2 %4803 }
 0x347   : > { %v3194_v41 = vpop.f32.mrf.mxu2  ;;  %v3243_v14 = vpop.f32.mrf.mxu3  ;;  %10736 = vst [vmem:[#allocation8_spill] sm:$0xff] %v8381_v26 }
 0x348   : > { %v3261_v4 = vpack.c.bf16 %v3243_v14, %v3194_v41  ;;  %v8353_v15 = vpop.f32.mrf.mxu0  ;;  %v8355_v2 = vpop.f32.mrf.mxu1  ;;  %v3255_v41 = vpack.c.bf16 %v8295_v33, %v8293_v51  ;;  %v3284_v14 = vunpack.c.l.bf16 %v3257_v56  ;;  %v3403_v33 = vmax.f32 %v3323_v48, 0.0 }
 0x349   : > { %10731 = vst [vmem:[#allocation55_spill] sm:$0xff] %v8353_v15  ;;  %v8371_v15 = vpop.permute.xlu0 %4788  ;;  %v3251_v48 = vpack.c.bf16 %v8251_v59, %v8249_v44 }
 0x34a   : > { %10732 = vst [vmem:[#allocation56_spill] sm:$0xff] %v8355_v2  ;;  %v3292_v57 = vunpack.c.l.bf16 %v3261_v4  ;;  %v3293_v61 = vunpack.c.h.bf16 %v3261_v4  ;;  %v3283_v4 = vunpack.c.h.bf16 %v3256_v24  ;;  %v3318_v2 = vadd.f32 %v3286_v35, %v7958_v19 }
 0x34b   : > { %2047 = vmatmul.bf16.gmra.mxu0 %v7164_v27  ;;  %2376 = vmatmul.bf16.gmra.mxu1 %v7164_v27  ;;  %v3280_v27 = vunpack.c.l.bf16 %v3255_v41  ;;  %v3281_v7 = vunpack.c.h.bf16 %v3255_v41  ;;  %v3316_v55 = vadd.f32 %v3284_v14, %v7968_v22  ;;  %v3401_v19 = vmax.f32 %v3321_v6, 0.0 }
 0x34c   : > { %v3324_v20 = vadd.f32 %v3292_v57, %v10735_v30  ;;  %v3325_v3 = vadd.f32 %v3293_v61, %v10735_v30  ;;  %v3317_v57 = vadd.f32 %v3285_v39, %v7968_v22  ;;  %v3400_v30 = vmax.f32 %v3320_v43, 0.0 }
 0x34d   : > { %v3278_v41 = vunpack.c.l.bf16 %v8285_v9  ;;  %v3279_v14 = vunpack.c.h.bf16 %v8285_v9  ;;  %v3314_v22 = vadd.f32 %v3282_v31, %v7970_v16  ;;  %v3315_v39 = vadd.f32 %v3283_v4, %v7970_v16 }
 0x34e   : > { %v3404_v51 = vmax.f32 %v3324_v20, 0.0  ;;  %v3405_v56 = vmax.f32 %v3325_v3, 0.0  ;;  %v3398_v20 = vmax.f32 %v3318_v2, 0.0  ;;  %v3399_v3 = vmax.f32 %v3319_v49, 0.0 }
 0x34f   : > { %v3276_v43 = vunpack.c.l.bf16 %v3253_v38  ;;  %v3277_v6 = vunpack.c.h.bf16 %v3253_v38  ;;  %v3396_v59 = vmax.f32 %v3316_v55, 0.0  ;;  %v3249_v9 = vpack.c.bf16 %v8230_v32, %v8228_v18  ;;  %v7165_v18 = vld [vmem:[%s10595_s6 + $0xa0] sm:$0xff] }
 0x350   : > { %v8375_v29 = vpop.f32.mrf.mxu0  ;;  %v8377_v61 = vpop.f32.mrf.mxu1  ;;  %v3420_v24 = vpack.c.bf16 %v3404_v51, %v3402_v10  ;;  %v3421_v35 = vpack.c.bf16 %v3405_v56, %v3403_v33  ;;  %v3312_v10 = vadd.f32 %v3280_v27, %v7974_v34  ;;  %v3313_v33 = vadd.f32 %v3281_v7, %v7974_v34 }
 0x351   : > { %v3418_v51 = vpack.c.bf16 %v3400_v30, %v3398_v20  ;;  %v3419_v44 = vpack.c.bf16 %v3401_v19, %v3399_v3  ;;  %v3397_v56 = vmax.f32 %v3317_v57, 0.0  ;;  %v3274_v31 = vunpack.c.l.bf16 %v8264_v50  ;;  %v8406_v30 = vpop.permute.xlu0 %4778  ;;  %v8416_v3 = vpop.permute.xlu1 %4878 }
 0x352   : > { %3422 = vmatpush.bf16.msrb.mxu2 %v3420_v24  ;;  %3751 = vmatpush.bf16.msrb.mxu3 %v3421_v35  ;;  %v3275_v16 = vunpack.c.h.bf16 %v8264_v50  ;;  %v3310_v2 = vadd.f32 %v3278_v41, %v7954_v42  ;;  %v3311_v4 = vadd.f32 %v3279_v14, %v7954_v42  ;;  %v3394_v38 = vmax.f32 %v3314_v22, 0.0 }
 0x353   : > { %v3395_v49 = vmax.f32 %v3315_v39, 0.0  ;;  %v3272_v34 = vunpack.c.l.bf16 %v3251_v48  ;;  %v3273_v27 = vunpack.c.h.bf16 %v3251_v48  ;;  %v3308_v7 = vadd.f32 %v3276_v43, %v7956_v5  ;;  %v8418_v43 = vpop.permute.xlu2 %4958 }
 0x354   : > { %v3309_v55 = vadd.f32 %v3277_v6, %v7956_v5  ;;  %v3416_v57 = vpack.c.bf16 %v3396_v59, %v3394_v38  ;;  %v3392_v24 = vmax.f32 %v3312_v10, 0.0  ;;  %v3393_v35 = vmax.f32 %v3313_v33, 0.0  ;;  %10737 = vst [vmem:[#allocation9_spill] sm:$0xff] %v8418_v43 }
 0x355   : > { %v3417_v42 = vpack.c.bf16 %v3397_v56, %v3395_v49  ;;  %v3247_v19 = vpack.c.bf16 %v8207_v36, %v8205_v54  ;;  %v3270_v48 = vunpack.c.l.bf16 %v8241_v46  ;;  %v3271_v5 = vunpack.c.h.bf16 %v8241_v46 }
 0x356   : > { %3423 = vmatpush.bf16.msrb.mxu2 %v3418_v51  ;;  %3752 = vmatpush.bf16.msrb.mxu3 %v3419_v44  ;;  %v3306_v14 = vadd.f32 %v3274_v31, %v7972_v28  ;;  %v3307_v22 = vadd.f32 %v3275_v16, %v7972_v28  ;;  %v3390_v39 = vmax.f32 %v3310_v2, 0.0  ;;  %v3391_v20 = vmax.f32 %v3311_v4, 0.0 }
 0x357   : > { %v3268_v54 = vunpack.c.l.bf16 %v3249_v9  ;;  %v3269_v36 = vunpack.c.h.bf16 %v3249_v9  ;;  %v3304_v6 = vadd.f32 %v3272_v34, %v7992_v13  ;;  %v3305_v46 = vadd.f32 %v3273_v27, %v7992_v13 }
 0x358   : > { %v8402_v32 = vpop.f32.mrf.mxu0  ;;  %v8404_v50 = vpop.f32.mrf.mxu1  ;;  %v3414_v10 = vpack.c.bf16 %v3392_v24, %v3390_v39  ;;  %v3415_v33 = vpack.c.bf16 %v3393_v35, %v3391_v20  ;;  %v3388_v51 = vmax.f32 %v3308_v7, 0.0  ;;  %v3389_v28 = vmax.f32 %v3309_v55, 0.0 }
 0x359   : > { %v2674_v41 = vmax.f32 %v8402_v32, %v8404_v50  ;;  %v3266_v44 = vunpack.c.l.bf16 %v8220_v1  ;;  %v3267_v59 = vunpack.c.h.bf16 %v8220_v1  ;;  %v3302_v56 = vadd.f32 %v3270_v48, %v8002_v58 }
 0x35a   : > { %3424 = vmatpush.bf16.msrb.mxu2 %v3416_v57  ;;  %3753 = vmatpush.bf16.msrb.mxu3 %v3417_v42  ;;  %v3303_v31 = vadd.f32 %v3271_v5, %v8002_v58  ;;  %v3386_v16 = vmax.f32 %v3306_v14, 0.0  ;;  %v3387_v9 = vmax.f32 %v3307_v22, 0.0  ;;  %v3264_v2 = vunpack.c.l.bf16 %v3247_v19 }
 0x35b   : > { %2052 = vmatmul.bf16.gmra.mxu0 %v7165_v18  ;;  %2381 = vmatmul.bf16.gmra.mxu1 %v7165_v18  ;;  %v3265_v13 = vunpack.c.h.bf16 %v3247_v19  ;;  %v3300_v4 = vadd.f32 %v3268_v54, %v8026_v52  ;;  %v3301_v38 = vadd.f32 %v3269_v36, %v8026_v52  ;;  %v3384_v7 = vmax.f32 %v3304_v6, 0.0  ;;  %v8438_v19 = vpop.permute.xlu0 %4768 }
 0x35c   : > { %v3412_v27 = vpack.c.bf16 %v3388_v51, %v3386_v16  ;;  %v3413_v1 = vpack.c.bf16 %v3389_v28, %v3387_v9  ;;  %v3385_v55 = vmax.f32 %v3305_v46, 0.0  ;;  %v3262_v58 = vunpack.c.l.bf16 %v8197_v12 }
 0x35d   : > { %v3263_v18 = vunpack.c.h.bf16 %v8197_v12  ;;  %v2605_v57 = vmax.f32 %v8162_v63, %v8164_v62  ;;  %v3298_v42 = vadd.f32 %v3266_v44, %v7962_v11  ;;  %v3299_v24 = vadd.f32 %v3267_v59, %v7962_v11  ;;  %v8442_v63 = vpop.permute.xlu1 %4863  ;;  %v8444_v62 = vpop.permute.xlu2 %5033 }
 0x35e   : > { %3425 = vmatpush.bf16.msrb.mxu2 %v3414_v10  ;;  %3754 = vmatpush.bf16.msrb.mxu3 %v3415_v33  ;;  %v3382_v52 = vmax.f32 %v3302_v56, 0.0  ;;  %v3383_v35 = vmax.f32 %v3303_v31, 0.0  ;;  %v3296_v48 = vadd.f32 %v3264_v2, %v8041_v47  ;;  %v3297_v5 = vadd.f32 %v3265_v13, %v8041_v47  ;;  %10738 = vst [vmem:[#allocation10_spill] sm:$0xff] %v8444_v62  ;;  %v7166_v47 = vld [vmem:[%s10595_s6 + $0xa8] sm:$0xff] }
 0x35f   : > { %2606 = vmax.xlane.f32.xlu1 %v2605_v57  ;;  %v3380_v22 = vmax.f32 %v3300_v4, 0.0  ;;  %v3381_v39 = vmax.f32 %v3301_v38, 0.0  ;;  %v3294_v11 = vadd.f32 %v3262_v58, %v8047_v21  ;;  %v3295_v20 = vadd.f32 %v3263_v18, %v8047_v21  ;;  %v10748_v18 = vld [vmem:[#allocation23_spill] sm:$0xff]  ;;  %v10749_v57 = vld [vmem:[#allocation22_spill] sm:$0xff] }
 0x360   : > { %v8428_v49 = vpop.f32.mrf.mxu0  ;;  %v8430_v34 = vpop.f32.mrf.mxu1  ;;  %v3410_v14 = vpack.c.bf16 %v3384_v7, %v3382_v52  ;;  %v3411_v12 = vpack.c.bf16 %v3385_v55, %v3383_v35  ;;  %v3378_v54 = vmax.f32 %v3298_v42, 0.0  ;;  %v3379_v36 = vmax.f32 %v3299_v24, 0.0  ;;  %v10747_v55 = vld [vmem:[#allocation17_spill] sm:$0xff] }
 0x361   : > { %v3376_v51 = vmax.f32 %v3296_v48, 0.0  ;;  %v3377_v28 = vmax.f32 %v3297_v5, 0.0  ;;  %v3374_v44 = vmax.f32 %v3294_v11, 0.0  ;;  %v3375_v59 = vmax.f32 %v3295_v20, 0.0  ;;  %v10751_v48 = vld [vmem:[#allocation11_spill] sm:$0xff]  ;;  %v10756_v11 = vld [vmem:[#allocation25_spill] sm:$0xff] }
 0x362   : > { %3426 = vmatpush.bf16.msrb.mxu2 %v3412_v27  ;;  %3755 = vmatpush.bf16.msrb.mxu3 %v3413_v1  ;;  %v3408_v10 = vpack.c.bf16 %v3380_v22, %v3378_v54  ;;  %v3409_v33 = vpack.c.bf16 %v3381_v39, %v3379_v36  ;;  %v2611_v21 = vmax.f32 %v8173_v45, %v8175_v40  ;;  %v10754_v22 = vld [vmem:[#allocation21_spill] sm:$0xff]  ;;  %v10757_v20 = vld [vmem:[#allocation26_spill] sm:$0xff]  ;;  %v10759_v36 = vld [vmem:[#allocation31_spill] sm:$0xff] }
 0x363   : > { %v2617_v56 = vmax.f32 %v8184_v53, %v8186_v8  ;;  %v3406_v31 = vpack.c.bf16 %v3376_v51, %v3374_v44  ;;  %v3407_v16 = vpack.c.bf16 %v3377_v28, %v3375_v59  ;;  %v8459_v9 = vpop.permute.xlu0 %4833  ;;  %v10741_v45 = vmax.f32 %v8191_v37, %v8193_v60  ;;  %v7167_v8 = vld [vmem:[%s10595_s6 + $0xb0] sm:$0xff]  ;;  %v10744_v37 = vld [vmem:[#allocation6_spill] sm:$0xff]  ;;  %v10745_v60 = vld [vmem:[#allocation5_spill] sm:$0xff] }
 0x364   : > { %10739 = vst [vmem:[#allocation57_spill] sm:$0xff] %v8459_v9  ;;  %2612 = vmax.xlane.f32.xlu2 %v2611_v21  ;;  %v10742_v40 = vmax.f32 %v8212_v17, %v8214_v25  ;;  %v2623_v17 = vmax.f32 %v10745_v60, %v10744_v37  ;;  %v10746_v25 = vld [vmem:[#allocation18_spill] sm:$0xff]  ;;  %v2635_v42 = vmax.f32 %v10749_v57, %v10748_v18  ;;  %v10763_v59 = vld [vmem:[#allocation29_spill] sm:$0xff]  ;;  %v10764_v21 = vld [vmem:[#allocation28_spill] sm:$0xff] }
 0x365   : > { %v8461_v2 = vpop.permute.xlu1 %4853  ;;  %v8463_v13 = vpop.permute.xlu2 %5028  ;;  %v2629_v58 = vmax.f32 %v10747_v55, %v10746_v25  ;;  %v10758_v54 = vmax.f32 %v10756_v11, %v10757_v20  ;;  %v10773_v57 = vld [vmem:[#allocation36_spill] sm:$0xff]  ;;  %v10779_v11 = vld [vmem:[#allocation47_spill] sm:$0xff] }
 0x366   : > { %3427 = vmatpush.bf16.msrb.mxu2 %v3410_v14  ;;  %3756 = vmatpush.bf16.msrb.mxu3 %v3411_v12  ;;  %10740 = vst [vmem:[#allocation58_spill] sm:$0xff] %v8463_v13  ;;  %v10753_v12 = vld [vmem:[#allocation20_spill] sm:$0xff] }
 0x367   : > { %2618 = vmax.xlane.f32.xlu1 %v2617_v56  ;;  %2624 = vmax.xlane.f32.xlu0 %v2623_v17  ;;  %v10755_v39 = vmax.f32 %v10753_v12, %v10754_v22  ;;  %v2641_v56 = vmax.f32 %v10764_v21, %v10763_v59  ;;  %v10776_v12 = vld [vmem:[#allocation42_spill] sm:$0xff]  ;;  %v10777_v22 = vld [vmem:[#allocation43_spill] sm:$0xff]  ;;  %v10780_v20 = vld [vmem:[#allocation48_spill] sm:$0xff] }
 0x368   : > { %v8451_v6 = vpop.f32.mrf.mxu0  ;;  %v8453_v46 = vpop.f32.mrf.mxu1  ;;  %v10783_v21 = vld [vmem:[#allocation45_spill] sm:$0xff] }
 0x36a   : > { %3428 = vmatpush.bf16.msrb.mxu2 %v3408_v10  ;;  %3757 = vmatpush.bf16.msrb.mxu3 %v3409_v33  ;;  %v7168_v33 = vld [vmem:[%s10595_s6 + $0xb8] sm:$0xff] }
 0x36b   : > { %2057 = vmatmul.bf16.gmra.mxu0 %v7166_v47  ;;  %2386 = vmatmul.bf16.gmra.mxu1 %v7166_v47  ;;  %v8477_v53 = vpop.permute.xlu0 %4748  ;;  %v10760_v47 = vld [vmem:[#allocation32_spill] sm:$0xff] }
 0x36c   : > { %2621 = vmax.xlane.f32.xlu2 %v10741_v45  ;;  %v10761_v10 = vmax.f32 %v10759_v36, %v10760_v47 }
 0x36d   : > { %v8486_v7 = vpop.permute.xlu1 %4753 }
 0x36e   : > { %3429 = vmatpush.bf16.msrb.mxu2 %v3406_v31  ;;  %3758 = vmatpush.bf16.msrb.mxu3 %v3407_v16  ;;  %v10765_v31 = vld [vmem:[#allocation34_spill] sm:$0xff]  ;;  %v10766_v16 = vld [vmem:[#allocation33_spill] sm:$0xff] }
 0x36f   : > { %2627 = vmax.xlane.f32.xlu1 %v10742_v40  ;;  %2633 = vmax.xlane.f32.xlu0 %v10755_v39  ;;  %v2647_v45 = vmax.f32 %v10766_v16, %v10765_v31  ;;  %v10767_v40 = vld [vmem:[#allocation40_spill] sm:$0xff]  ;;  %v10778_v39 = vmax.f32 %v10776_v12, %v10777_v22  ;;  %v10789_v12 = vld [vmem:[#allocation13_spill] sm:$0xff]  ;;  %v2680_v22 = vmax.f32 %v8451_v6, %v8453_v46 }
 0x370   : > { %v8465_v4 = vpop.f32.mrf.mxu0  ;;  %v8467_v38 = vpop.f32.mrf.mxu1  ;;  %v10785_v16 = vld [vmem:[#allocation52_spill] sm:$0xff]  ;;  %v2677_v46 = vmax.f32 %v8428_v49, %v8430_v34 }
 0x371   : > { %3430 = vmatmul.bf16.vlgmr.msrb.gmra.mxu2 %v8056_v23  ;;  %3759 = vmatmul.bf16.vlgmr.msrb.gmra.mxu3 %v8056_v23  ;;  %v8488_v23 = vpop.permute.xlu2 %4933  ;;  %v2683_v32 = vmax.f32 %v8465_v4, %v8467_v38 }
 0x372   : > { %10743 = vst [vmem:[#allocation59_spill] sm:$0xff] %v8488_v23 }
 0x373   : > { %v8500_v35 = vpop.permute.xlu0 %4823 }
 0x374   : > { %2630 = vmax.xlane.f32.xlu2 %v2629_v58  ;;  %10750 = vst [vmem:[#allocation6_spill] sm:$0xff] %v8500_v35  ;;  %v10771_v58 = vld [vmem:[#allocation12_spill] sm:$0xff] }
 0x375   : > { %v8504_v5 = vpop.permute.xlu1 %4758 }
 0x377   : > { %2636 = vmax.xlane.f32.xlu1 %v2635_v42  ;;  %2642 = vmax.xlane.f32.xlu0 %v2641_v56  ;;  %v10774_v42 = vld [vmem:[#allocation37_spill] sm:$0xff]  ;;  %v10784_v56 = vld [vmem:[#allocation44_spill] sm:$0xff] }
 0x378   : > { %v8482_v27 = vpop.f32.mrf.mxu0  ;;  %v8484_v1 = vpop.f32.mrf.mxu1  ;;  %v2659_v31 = vmax.f32 %v10784_v56, %v10783_v21 }
 0x379   : > { %v8506_v14 = vpop.permute.xlu2 %4923 }
 0x37a   : > { %10752 = vst [vmem:[#allocation5_spill] sm:$0xff] %v8506_v14  ;;  %v7279_v14 = vld [vmem:[%s10595_s6 + $0x70] sm:$0xff] }
 0x37b   : > { %2062 = vmatmul.bf16.gmra.mxu0 %v7167_v8  ;;  %2391 = vmatmul.bf16.gmra.mxu1 %v7167_v8  ;;  %v8524_v44 = vpop.permute.xlu0 %4813  ;;  %v10768_v8 = vld [vmem:[#allocation39_spill] sm:$0xff] }
 0x37c   : > { %2639 = vmax.xlane.f32.xlu2 %v10758_v54  ;;  %10762 = vst [vmem:[#allocation18_spill] sm:$0xff] %v8524_v44  ;;  %v2653_v37 = vmax.f32 %v10768_v8, %v10767_v40  ;;  %v10781_v54 = vmax.f32 %v10779_v11, %v10780_v20  ;;  %v2671_v8 = vmax.f32 %v8375_v29, %v8377_v61  ;;  %v10791_v29 = vld [vmem:[#allocation56_spill] sm:$0xff]  ;;  %v7170_v11 = vld [vmem:[%s10595_s6 + $0xc8] sm:$0xff] }
 0x37d   : > { %v8532_v60 = vpop.permute.xlu1 %4838 }
 0x37e   : > { %10769 = vst [vmem:[#allocation17_spill] sm:$0xff] %v8532_v60 }
 0x37f   : > { %2645 = vmax.xlane.f32.xlu1 %v10761_v10  ;;  %v7169_v10 = vld [vmem:[%s10595_s6 + $0xc0] sm:$0xff] }
 0x380   : > { %v8496_v24 = vpop.f32.mrf.mxu0  ;;  %v8498_v52 = vpop.f32.mrf.mxu1 }
 0x381   : > { %3435 = vmatmul.bf16.gmra.mxu2 %v10751_v48  ;;  %3764 = vmatmul.bf16.gmra.mxu3 %v10751_v48  ;;  %v8534_v17 = vpop.permute.xlu2 %4928  ;;  %v10775_v48 = vmax.f32 %v10773_v57, %v10774_v42  ;;  %v2689_v50 = vmax.f32 %v8496_v24, %v8498_v52 }
 0x382   : > { %10770 = vst [vmem:[#allocation23_spill] sm:$0xff] %v8534_v17 }
 0x383   : > { %v8542_v18 = vpop.permute.xlu0 %4953  ;;  %2651 = vmax.xlane.f32.xlu0 %v10775_v48 }
 0x384   : > { %2648 = vmax.xlane.f32.xlu2 %v2647_v45  ;;  %10772 = vst [vmem:[#allocation22_spill] sm:$0xff] %v8542_v18  ;;  %v10786_v45 = vld [vmem:[#allocation51_spill] sm:$0xff] }
 0x385   : > { %v8553_v36 = vpop.permute.xlu1 %4733  ;;  %v2665_v40 = vmax.f32 %v10786_v45, %v10785_v16  ;;  %v10796_v45 = vld [vmem:[#allocation14_spill] sm:$0xff] }
 0x387   : > { %2654 = vmax.xlane.f32.xlu1 %v2653_v37 }
 0x388   : > { %v8520_v51 = vpop.f32.mrf.mxu0  ;;  %v8522_v28 = vpop.f32.mrf.mxu1 }
 0x389   : > { %v8555_v47 = vpop.permute.xlu2 %4913  ;;  %v2692_v16 = vmax.f32 %v8520_v51, %v8522_v28 }
 0x38a   : > { %10782 = vst [vmem:[#allocation11_spill] sm:$0xff] %v8555_v47 }
 0x38b   : > { %2067 = vmatmul.bf16.gmra.mxu0 %v7168_v33  ;;  %2396 = vmatmul.bf16.gmra.mxu1 %v7168_v33  ;;  %v8566_v37 = vpop.permute.xlu0 %4948 }
 0x38c   : > { %2657 = vmax.xlane.f32.xlu2 %v10778_v39  ;;  %2660 = vmax.xlane.f32.xlu0 %v2659_v31  ;;  %10787 = vst [vmem:[#allocation20_spill] sm:$0xff] %v8566_v37  ;;  %v10790_v39 = vld [vmem:[#allocation55_spill] sm:$0xff]  ;;  %v2686_v31 = vmax.f32 %v8482_v27, %v8484_v1 }
 0x38d   : > { %v8568_v42 = vpop.permute.xlu1 %4738  ;;  %v10792_v61 = vmax.f32 %v10790_v39, %v10791_v29  ;;  %v7171_v27 = vld [vmem:[%s10595_s6 + $0xd0] sm:$0xff] }
 0x38f   : > { %2663 = vmax.xlane.f32.xlu1 %v10781_v54 }
 0x390   : > { %v8536_v25 = vpop.f32.mrf.mxu0  ;;  %v8538_v55 = vpop.f32.mrf.mxu1 }
 0x391   : > { %3440 = vmatmul.bf16.gmra.mxu2 %v10771_v58  ;;  %3769 = vmatmul.bf16.gmra.mxu3 %v10771_v58  ;;  %v8570_v48 = vpop.permute.xlu2 %4918  ;;  %v2695_v51 = vmax.f32 %v8536_v25, %v8538_v55  ;;  %v7172_v55 = vld [vmem:[%s10595_s6 + $0xd8] sm:$0xff] }
 0x392   : > { %10788 = vst [vmem:[#allocation21_spill] sm:$0xff] %v8570_v48 }
 0x394   : > { %2666 = vmax.xlane.f32.xlu2 %v2665_v40  ;;  %2669 = vmax.xlane.f32.xlu0 %v10792_v61 }
 0x395   : > { %v8587_v21 = vpop.permute.xlu1 %4808 }
 0x396   : > { %10794 = vst [vmem:[#allocation26_spill] sm:$0xff] %v8587_v21 }
 0x397   : > { %2672 = vmax.xlane.f32.xlu1 %v2671_v8 }
 0x398   : > { %v2033_v33 = vpop.f32.mrf.mxu0  ;;  %v2362_v59 = vpop.f32.mrf.mxu1 }
 0x399   : > { %v8589_v6 = vpop.permute.xlu2 %4903  ;;  %v2698_v49 = vmax.f32 %v2033_v33, %v2362_v59 }
 0x39a   : > { %10795 = vst [vmem:[#allocation31_spill] sm:$0xff] %v8589_v6 }
 0x39b   : > { %2072 = vmatmul.bf16.gmra.mxu0 %v7169_v10  ;;  %2401 = vmatmul.bf16.gmra.mxu1 %v7169_v10  ;;  %v8585_v10 = vpop.permute.xlu0 %5023 }
 0x39c   : > { %2675 = vmax.xlane.f32.xlu2 %v2674_v41  ;;  %10793 = vst [vmem:[#allocation25_spill] sm:$0xff] %v8585_v10  ;;  %2678 = vmax.xlane.f32.xlu0 %v2677_v46 }
 0x39d   : > { %v8605_v4 = vpop.permute.xlu1 %5038 }
 0x39e   : > { %10798 = vst [vmem:[#allocation29_spill] sm:$0xff] %v8605_v4 }
 0x39f   : > { %2681 = vmax.xlane.f32.xlu1 %v2680_v22 }
 0x3a0   : > { %v2035_v58 = vpop.f32.mrf.mxu0  ;;  %v2364_v57 = vpop.f32.mrf.mxu1 }
 0x3a1   : > { %3445 = vmatmul.bf16.gmra.mxu2 %v10789_v12  ;;  %3774 = vmatmul.bf16.gmra.mxu3 %v10789_v12  ;;  %v8607_v38 = vpop.permute.xlu2 %4908  ;;  %v2701_v52 = vmax.f32 %v2035_v58, %v2364_v57  ;;  %v10803_v58 = vld [vmem:[#allocation15_spill] sm:$0xff] }
 0x3a2   : > { %10799 = vst [vmem:[#allocation28_spill] sm:$0xff] %v8607_v38 }
 0x3a3   : > { %v8603_v34 = vpop.permute.xlu0 %5013 }
 0x3a4   : > { %2684 = vmax.xlane.f32.xlu2 %v2683_v32  ;;  %10797 = vst [vmem:[#allocation32_spill] sm:$0xff] %v8603_v34  ;;  %2687 = vmax.xlane.f32.xlu0 %v2686_v31 }
 0x3a5   : > { %v8616_v59 = vpop.permute.xlu1 %4943 }
 0x3a6   : > { %10801 = vst [vmem:[#allocation33_spill] sm:$0xff] %v8616_v59  ;;  %v7280_v59 = vld [vmem:[%s10595_s6 + $0x78] sm:$0xff] }
 0x3a7   : > { %2690 = vmax.xlane.f32.xlu1 %v2689_v50 }
 0x3a8   : > { %v2038_v20 = vpop.f32.mrf.mxu0  ;;  %v2367_v54 = vpop.f32.mrf.mxu1 }
 0x3a9   : > { %v8618_v40 = vpop.permute.xlu2 %4983  ;;  %v2704_v22 = vmax.f32 %v2038_v20, %v2367_v54 }
 0x3aa   : > { %10802 = vst [vmem:[#allocation40_spill] sm:$0xff] %v8618_v40 }
 0x3ab   : > { %2077 = vmatmul.bf16.gmra.mxu0 %v7170_v11  ;;  %2406 = vmatmul.bf16.gmra.mxu1 %v7170_v11  ;;  %v8614_v33 = vpop.permute.xlu0 %5003 }
 0x3ac   : > { %2693 = vmax.xlane.f32.xlu2 %v2692_v16  ;;  %10800 = vst [vmem:[#allocation34_spill] sm:$0xff] %v8614_v33  ;;  %2696 = vmax.xlane.f32.xlu0 %v2695_v51 }
 0x3ad   : > { %v8627_v61 = vpop.permute.xlu1 %4938 }
 0x3ae   : > { %10805 = vst [vmem:[#allocation12_spill] sm:$0xff] %v8627_v61 }
 0x3af   : > { %2699 = vmax.xlane.f32.xlu1 %v2698_v49 }
 0x3b0   : > { %v2040_v41 = vpop.f32.mrf.mxu0  ;;  %v2369_v56 = vpop.f32.mrf.mxu1 }
 0x3b1   : > { %3450 = vmatmul.bf16.gmra.mxu2 %v10796_v45  ;;  %3779 = vmatmul.bf16.gmra.mxu3 %v10796_v45  ;;  %v2707_v28 = vmax.f32 %v2040_v41, %v2369_v56  ;;  %v8629_v11 = vpop.permute.xlu2 %4973  ;;  %v10808_v56 = vld [vmem:[#allocation2_spill] sm:$0xff]  ;;  %v7173_v45 = vld [vmem:[%s10595_s6 + $0xe0] sm:$0xff] }
 0x3b2   : > { %10806 = vst [vmem:[#allocation36_spill] sm:$0xff] %v8629_v11 }
 0x3b3   : > { %v8622_v25 = vpop.permute.xlu0 %4998 }
 0x3b4   : > { %2702 = vmax.xlane.f32.xlu2 %v2701_v52  ;;  %2705 = vmax.xlane.f32.xlu0 %v2704_v22  ;;  %10804 = vst [vmem:[#allocation39_spill] sm:$0xff] %v8622_v25 }
 0x3b5   : > { %v8635_v31 = vpop.permute.xlu1 %5018 }
 0x3b6   : > { %10809 = vst [vmem:[#allocation42_spill] sm:$0xff] %v8635_v31 }
 0x3b7   : > { %2708 = vmax.xlane.f32.xlu1 %v2707_v28 }
 0x3b8   : > { %v2043_v1 = vpop.f32.mrf.mxu0  ;;  %v2372_v24 = vpop.f32.mrf.mxu1 }
 0x3b9   : > { %v2710_v39 = vmax.f32 %v2043_v1, %v2372_v24  ;;  %v8637_v16 = vpop.permute.xlu2 %4978 }
 0x3ba   : > { %10810 = vst [vmem:[#allocation43_spill] sm:$0xff] %v8637_v16 }
 0x3bb   : > { %2082 = vmatmul.bf16.gmra.mxu0 %v7171_v27  ;;  %2411 = vmatmul.bf16.gmra.mxu1 %v7171_v27  ;;  %v8631_v50 = vpop.permute.xlu0 %4988 }
 0x3bc   : > { %2711 = vmax.xlane.f32.xlu2 %v2710_v39  ;;  %10807 = vst [vmem:[#allocation37_spill] sm:$0xff] %v8631_v50 }
 0x3bd   : > { %v8644_v52 = vpop.permute.xlu1 %5008 }
 0x3be   : > { %10812 = vst [vmem:[#allocation48_spill] sm:$0xff] %v8644_v52 }
 0x3c0   : > { %v2045_v8 = vpop.f32.mrf.mxu0  ;;  %v2374_v12 = vpop.f32.mrf.mxu1 }
 0x3c1   : > { %3455 = vmatmul.bf16.gmra.mxu2 %v10803_v58  ;;  %3784 = vmatmul.bf16.gmra.mxu3 %v10803_v58  ;;  %v2713_v54 = vmax.f32 %v2045_v8, %v2374_v12  ;;  %v8646_v51 = vpop.permute.xlu2 %4883  ;;  %v10814_v12 = vld [vmem:[#allocation3_spill] sm:$0xff] }
 0x3c2   : > { %10813 = vst [vmem:[#allocation45_spill] sm:$0xff] %v8646_v51 }
 0x3c3   : > { %2714 = vmax.xlane.f32.xlu0 %v2713_v54  ;;  %v8642_v24 = vpop.permute.xlu0 %4898 }
 0x3c4   : > { %10811 = vst [vmem:[#allocation47_spill] sm:$0xff] %v8642_v24 }
 0x3c5   : > { %v8652_v58 = vpop.permute.xlu1 %4993 }
 0x3c6   : > { %10816 = vst [vmem:[#allocation52_spill] sm:$0xff] %v8652_v58 }
 0x3c8   : > { %v2048_v57 = vpop.f32.mrf.mxu0  ;;  %v2377_v29 = vpop.f32.mrf.mxu1 }
 0x3c9   : > { %v2716_v20 = vmax.f32 %v2048_v57, %v2377_v29  ;;  %v7174_v57 = vld [vmem:[%s10595_s6 + $0xe8] sm:$0xff] }
 0x3cb   : > { %2087 = vmatmul.bf16.gmra.mxu0 %v7172_v55  ;;  %2416 = vmatmul.bf16.gmra.mxu1 %v7172_v55  ;;  %v8650_v39 = vpop.permute.xlu0 %4888  ;;  %v8654_v55 = vpop.permute.xlu2 %4968 }
 0x3cc   : > { %2717 = vmax.xlane.f32.xlu1 %v2716_v20  ;;  %10815 = vst [vmem:[#allocation44_spill] sm:$0xff] %v8650_v39 }
 0x3cd   : > { %10817 = vst [vmem:[#allocation51_spill] sm:$0xff] %v8654_v55 }
 0x3d0   : > { %v2050_v46 = vpop.f32.mrf.mxu0  ;;  %v2379_v32 = vpop.f32.mrf.mxu1 }
 0x3d1   : > { %v2719_v41 = vmax.f32 %v2050_v46, %v2379_v32  ;;  %3460 = vmatmul.bf16.gmra.mxu2 %v10808_v56  ;;  %3789 = vmatmul.bf16.gmra.mxu3 %v10808_v56  ;;  %v8661_v56 = vpop.permute.xlu1 %4893 }
 0x3d2   : > { %10819 = vst [vmem:[#allocation55_spill] sm:$0xff] %v8661_v56  ;;  %v7278_v56 = vld [vmem:[%s10595_s6 + $0x68] sm:$0xff] }
 0x3d3   : > { %2720 = vmax.xlane.f32.xlu2 %v2719_v41  ;;  %v8659_v46 = vpop.permute.xlu0 %5113 }
 0x3d4   : > { %10818 = vst [vmem:[#allocation13_spill] sm:$0xff] %v8659_v46 }
 0x3d8   : > { %v2053_v49 = vpop.f32.mrf.mxu0  ;;  %v2382_v27 = vpop.f32.mrf.mxu1 }
 0x3d9   : > { %v2722_v1 = vmax.f32 %v2053_v49, %v2382_v27  ;;  %v10821_v49 = vld [vmem:[#allocation4_spill] sm:$0xff] }
 0x3db   : > { %2092 = vmatmul.bf16.gmra.mxu0 %v7173_v45  ;;  %2421 = vmatmul.bf16.gmra.mxu1 %v7173_v45  ;;  %v8663_v45 = vpop.permute.xlu2 %5118 }
 0x3dc   : > { %2723 = vmax.xlane.f32.xlu0 %v2722_v1  ;;  %10820 = vst [vmem:[#allocation56_spill] sm:$0xff] %v8663_v45 }
 0x3e0   : > { %v2055_v28 = vpop.f32.mrf.mxu0  ;;  %v2384_v8 = vpop.f32.mrf.mxu1 }
 0x3e1   : > { %3465 = vmatmul.bf16.gmra.mxu2 %v10814_v12  ;;  %3794 = vmatmul.bf16.gmra.mxu3 %v10814_v12  ;;  %v2725_v22 = vmax.f32 %v2055_v28, %v2384_v8  ;;  %v8667_v12 = vpop.xlane.xlu0 %2603 }
 0x3e3   : > { %2726 = vmax.xlane.f32.xlu1 %v2725_v22  ;;  %v7175_v22 = vld [vmem:[%s10595_s6 + $0xf0] sm:$0xff] }
 0x3e8   : > { %v2058_v29 = vpop.f32.mrf.mxu0  ;;  %v2387_v20 = vpop.f32.mrf.mxu1 }
 0x3e9   : > { %v2728_v54 = vmax.f32 %v2058_v29, %v2387_v20  ;;  %v8672_v20 = vpop.permute.xlu1 %4963 }
 0x3ea   : > { %10822 = vst [vmem:[#allocation14_spill] sm:$0xff] %v8672_v20 }
 0x3eb   : > { %2097 = vmatmul.bf16.gmra.mxu0 %v7174_v57  ;;  %2426 = vmatmul.bf16.gmra.mxu1 %v7174_v57 }
 0x3ec   : > { %2729 = vmax.xlane.f32.xlu2 %v2728_v54  ;;  %v8674_v54 = vpop.permute.xlu2 %5198 }
 0x3ed   : > { %10823 = vst [vmem:[#allocation15_spill] sm:$0xff] %v8674_v54 }
 0x3f0   : > { %v2060_v32 = vpop.f32.mrf.mxu0  ;;  %v2389_v41 = vpop.f32.mrf.mxu1 }
 0x3f1   : > { %3470 = vmatmul.bf16.gmra.mxu2 %v10821_v49  ;;  %3799 = vmatmul.bf16.gmra.mxu3 %v10821_v49  ;;  %v2731_v27 = vmax.f32 %v2060_v32, %v2389_v41  ;;  %v8683_v54 = vpop.permute.xlu1 %5193 }
 0x3f2   : > { %10824 = vst [vmem:[#allocation2_spill] sm:$0xff] %v8683_v54 }
 0x3f3   : > { %2732 = vmax.xlane.f32.xlu0 %v2731_v27  ;;  %v8676_v27 = vpop.xlane.xlu0 %2615 }
 0x3f4   : > { %v3431_v1 = vpop.f32.mrf.mxu2  ;;  %v3760_v28 = vpop.f32.mrf.mxu3 }
 0x3f5   : > { %v4080_v8 = vmax.f32 %v3431_v1, %v3760_v28  ;;  %v8681_v46 = vpop.xlane.xlu2 %2609 }
 0x3f7   : > { %4081 = vmax.xlane.f32.xlu1 %v4080_v8  ;;  %v7274_v8 = vld [vmem:[%s10595_s6 + $0x48] sm:$0xff] }
 0x3f8   : > { %v2063_v57 = vpop.f32.mrf.mxu0  ;;  %v2392_v29 = vpop.f32.mrf.mxu1 }
 0x3f9   : > { %v2734_v45 = vmax.f32 %v2063_v57, %v2392_v29 }
 0x3fb   : > { %2102 = vmatmul.bf16.gmra.mxu0 %v7175_v22  ;;  %2431 = vmatmul.bf16.gmra.mxu1 %v7175_v22  ;;  %v8688_v20 = vpop.xlane.xlu0 %2624 }
 0x3fc   : > { %v3433_v32 = vpop.f32.mrf.mxu2  ;;  %v3762_v41 = vpop.f32.mrf.mxu3 }
 0x3fd   : > { %v4083_v49 = vmax.f32 %v3433_v32, %v3762_v41  ;;  %v8692_v11 = vpop.xlane.xlu2 %2612 }
 0x3ff   : > { %4084 = vmax.xlane.f32.xlu2 %v4083_v49  ;;  %2735 = vmax.xlane.f32.xlu1 %v2734_v45  ;;  %v7176_v45 = vld [vmem:[%s10595_s6 + $0xf8] sm:$0xff] }
 0x400   : > { %v2065_v1 = vpop.f32.mrf.mxu0  ;;  %v2394_v28 = vpop.f32.mrf.mxu1 }
 0x401   : > { %3475 = vmatmul.bf16.gmra.mxu2 %v7274_v8  ;;  %3804 = vmatmul.bf16.gmra.mxu3 %v7274_v8  ;;  %v2737_v57 = vmax.f32 %v2065_v1, %v2394_v28  ;;  %v8690_v28 = vpop.xlane.xlu1 %2606 }
 0x404   : > { %v3436_v29 = vpop.f32.mrf.mxu2  ;;  %v3765_v22 = vpop.f32.mrf.mxu3 }
 0x405   : > { %v4086_v32 = vmax.f32 %v3436_v29, %v3765_v22  ;;  %v8701_v50 = vpop.xlane.xlu2 %2621 }
 0x407   : > { %4087 = vmax.xlane.f32.xlu0 %v4086_v32  ;;  %2738 = vmax.xlane.f32.xlu2 %v2737_v57  ;;  %v7275_v57 = vld [vmem:[%s10595_s6 + $0x50] sm:$0xff] }
 0x408   : > { %v2068_v41 = vpop.f32.mrf.mxu0  ;;  %v2397_v49 = vpop.f32.mrf.mxu1 }
 0x409   : > { %v2740_v55 = vmax.f32 %v2068_v41, %v2397_v49  ;;  %v8697_v41 = vpop.xlane.xlu0 %2633  ;;  %v8699_v16 = vpop.xlane.xlu1 %2618 }
 0x40b   : > { %2107 = vmatmul.bf16.gmra.mxu0 %v7176_v45  ;;  %2436 = vmatmul.bf16.gmra.mxu1 %v7176_v45 }
 0x40c   : > { %v3438_v8 = vpop.f32.mrf.mxu2  ;;  %v3767_v1 = vpop.f32.mrf.mxu3 }
 0x40d   : > { %v4089_v29 = vmax.f32 %v3438_v8, %v3767_v1 }
 0x40f   : > { %4090 = vmax.xlane.f32.xlu1 %v4089_v29  ;;  %2741 = vmax.xlane.f32.xlu0 %v2740_v55  ;;  %v7177_v55 = vld [vmem:[%s10595_s6 + $0x100] sm:$0xff] }
 0x410   : > { %v2070_v22 = vpop.f32.mrf.mxu0  ;;  %v2399_v32 = vpop.f32.mrf.mxu1 }
 0x411   : > { %3480 = vmatmul.bf16.gmra.mxu2 %v7275_v57  ;;  %3809 = vmatmul.bf16.gmra.mxu3 %v7275_v57  ;;  %v2743_v45 = vmax.f32 %v2070_v22, %v2399_v32  ;;  %v8706_v58 = vpop.xlane.xlu0 %2642  ;;  %v8708_v25 = vpop.xlane.xlu1 %2627 }
 0x414   : > { %v3441_v49 = vpop.f32.mrf.mxu2  ;;  %v3770_v54 = vpop.f32.mrf.mxu3 }
 0x415   : > { %v4092_v40 = vmax.f32 %v3441_v49, %v3770_v54  ;;  %v8710_v49 = vpop.xlane.xlu2 %2630 }
 0x417   : > { %4093 = vmax.xlane.f32.xlu2 %v4092_v40  ;;  %2744 = vmax.xlane.f32.xlu1 %v2743_v45  ;;  %v7276_v45 = vld [vmem:[%s10595_s6 + $0x58] sm:$0xff] }
 0x418   : > { %v2073_v8 = vpop.f32.mrf.mxu0  ;;  %v2402_v1 = vpop.f32.mrf.mxu1 }
 0x419   : > { %v2746_v29 = vmax.f32 %v2073_v8, %v2402_v1  ;;  %v8720_v52 = vpop.xlane.xlu1 %2636 }
 0x41b   : > { %2112 = vmatmul.bf16.gmra.mxu0 %v7177_v55  ;;  %2441 = vmatmul.bf16.gmra.mxu1 %v7177_v55 }
 0x41c   : > { %v3443_v57 = vpop.f32.mrf.mxu2  ;;  %v3772_v22 = vpop.f32.mrf.mxu3 }
 0x41d   : > { %v4095_v32 = vmax.f32 %v3443_v57, %v3772_v22  ;;  %v8715_v22 = vpop.xlane.xlu0 %2651  ;;  %v8722_v34 = vpop.xlane.xlu2 %2639 }
 0x41e   : > { %10825 = vst [vmem:[#allocation3_spill] sm:$0xff] %v8715_v22 }
 0x41f   : > { %4096 = vmax.xlane.f32.xlu0 %v4095_v32  ;;  %2747 = vmax.xlane.f32.xlu2 %v2746_v29  ;;  %v7178_v29 = vld [vmem:[%s10595_s6 + $0x108] sm:$0xff] }
 0x420   : > { %v2075_v40 = vpop.f32.mrf.mxu0  ;;  %v2404_v54 = vpop.f32.mrf.mxu1 }
 0x421   : > { %3485 = vmatmul.bf16.gmra.mxu2 %v7276_v45  ;;  %3814 = vmatmul.bf16.gmra.mxu3 %v7276_v45  ;;  %v2749_v55 = vmax.f32 %v2075_v40, %v2404_v54  ;;  %v8729_v10 = vpop.xlane.xlu1 %2645 }
 0x424   : > { %v3446_v8 = vpop.f32.mrf.mxu2  ;;  %v3775_v1 = vpop.f32.mrf.mxu3 }
 0x425   : > { %v4098_v57 = vmax.f32 %v3446_v8, %v3775_v1  ;;  %v8731_v13 = vpop.xlane.xlu2 %2648 }
 0x427   : > { %4099 = vmax.xlane.f32.xlu1 %v4098_v57  ;;  %2750 = vmax.xlane.f32.xlu0 %v2749_v55  ;;  %v7277_v55 = vld [vmem:[%s10595_s6 + $0x60] sm:$0xff]  ;;  %v8727_v57 = vpop.xlane.xlu0 %2660 }
 0x428   : > { %v2078_v32 = vpop.f32.mrf.mxu0  ;;  %v2407_v33 = vpop.f32.mrf.mxu1  ;;  %10826 = vst [vmem:[#allocation4_spill] sm:$0xff] %v8727_v57  ;;  %v7286_v57 = vld [vmem:[%s10595_s6 + $0xa8] sm:$0xff] }
 0x429   : > { %v2752_v31 = vmax.f32 %v2078_v32, %v2407_v33 }
 0x42b   : > { %2117 = vmatmul.bf16.gmra.mxu0 %v7178_v29  ;;  %2446 = vmatmul.bf16.gmra.mxu1 %v7178_v29 }
 0x42c   : > { %v3448_v40 = vpop.f32.mrf.mxu2  ;;  %v3777_v54 = vpop.f32.mrf.mxu3 }
 0x42d   : > { %v4101_v45 = vmax.f32 %v3448_v40, %v3777_v54  ;;  %v8740_v51 = vpop.xlane.xlu2 %2657 }
 0x42e   : > { %10829 = vst [vmem:[#allocation62_spill] sm:$0xff] %v8740_v51 }
 0x42f   : > { %4102 = vmax.xlane.f32.xlu2 %v4101_v45  ;;  %2753 = vmax.xlane.f32.xlu1 %v2752_v31  ;;  %v7179_v31 = vld [vmem:[%s10595_s6 + $0x110] sm:$0xff]  ;;  %v8736_v4 = vpop.xlane.xlu0 %2669 }
 0x430   : > { %v2080_v8 = vpop.f32.mrf.mxu0  ;;  %v2409_v1 = vpop.f32.mrf.mxu1  ;;  %10827 = vst [vmem:[#allocation60_spill] sm:$0xff] %v8736_v4 }
 0x431   : > { %3490 = vmatmul.bf16.gmra.mxu2 %v7277_v55  ;;  %3819 = vmatmul.bf16.gmra.mxu3 %v7277_v55  ;;  %v2755_v33 = vmax.f32 %v2080_v8, %v2409_v1  ;;  %v8738_v8 = vpop.xlane.xlu1 %2654 }
 0x432   : > { %10828 = vst [vmem:[#allocation61_spill] sm:$0xff] %v8738_v8 }
 0x434   : > { %v3451_v32 = vpop.f32.mrf.mxu2  ;;  %v3780_v29 = vpop.f32.mrf.mxu3 }
 0x435   : > { %v4104_v1 = vmax.f32 %v3451_v32, %v3780_v29  ;;  %v7180_v29 = vld [vmem:[%s10595_s6 + $0x118] sm:$0xff]  ;;  %v8752_v38 = vpop.xlane.xlu2 %2666 }
 0x436   : > { %10831 = vst [vmem:[#allocation64_spill] sm:$0xff] %v8752_v38 }
 0x437   : > { %2756 = vmax.xlane.f32.xlu2 %v2755_v33 }
 0x438   : > { %v2083_v40 = vpop.f32.mrf.mxu0  ;;  %v2412_v54 = vpop.f32.mrf.mxu1 }
 0x439   : > { %v2758_v45 = vmax.f32 %v2083_v40, %v2412_v54  ;;  %v8747_v32 = vpop.xlane.xlu1 %2663 }
 0x43a   : > { %10830 = vst [vmem:[#allocation63_spill] sm:$0xff] %v8747_v32 }
 0x43b   : > { %2122 = vmatmul.bf16.gmra.mxu0 %v7179_v31  ;;  %2451 = vmatmul.bf16.gmra.mxu1 %v7179_v31 }
 0x43c   : > { %v3453_v55 = vpop.f32.mrf.mxu2  ;;  %v3782_v62 = vpop.f32.mrf.mxu3  ;;  %2759 = vmax.xlane.f32.xlu0 %v2758_v45 }
 0x43d   : > { %v4107_v54 = vmax.f32 %v3453_v55, %v3782_v62  ;;  %v8745_v45 = vpop.xlane.xlu0 %2678 }
 0x43f   : > { %4105 = vmax.xlane.f32.xlu2 %v4104_v1 }
 0x440   : > { %v2085_v33 = vpop.f32.mrf.mxu0  ;;  %v2414_v39 = vpop.f32.mrf.mxu1 }
 0x441   : > { %3495 = vmatmul.bf16.gmra.mxu2 %v7278_v56  ;;  %3824 = vmatmul.bf16.gmra.mxu3 %v7278_v56  ;;  %v2761_v40 = vmax.f32 %v2085_v33, %v2414_v39 }
 0x443   : > { %2762 = vmax.xlane.f32.xlu1 %v2761_v40 }
 0x444   : > { %v3456_v31 = vpop.f32.mrf.mxu2  ;;  %v3785_v24 = vpop.f32.mrf.mxu3  ;;  %4108 = vmax.xlane.f32.xlu0 %v4107_v54 }
 0x445   : > { %v4110_v56 = vmax.f32 %v3456_v31, %v3785_v24  ;;  %v8754_v55 = vpop.xlane.xlu0 %2687  ;;  %v8756_v54 = vpop.xlane.xlu1 %2672 }
 0x446   : > { %v8761_v24 = vpop.xlane.xlu2 %2675 }
 0x448   : > { %v2088_v1 = vpop.f32.mrf.mxu0  ;;  %v2417_v6 = vpop.f32.mrf.mxu1 }
 0x449   : > { %v2764_v47 = vmax.f32 %v2088_v1, %v2417_v6 }
 0x44b   : > { %2127 = vmatmul.bf16.gmra.mxu0 %v7180_v29  ;;  %2456 = vmatmul.bf16.gmra.mxu1 %v7180_v29 }
 0x44c   : > { %v3458_v62 = vpop.f32.mrf.mxu2  ;;  %v3787_v39 = vpop.f32.mrf.mxu3  ;;  %4111 = vmax.xlane.f32.xlu0 %v4110_v56  ;;  %2765 = vmax.xlane.f32.xlu2 %v2764_v47  ;;  %v7181_v47 = vld [vmem:[%s10595_s6 + $0x120] sm:$0xff] }
 0x44d   : > { %v4113_v6 = vmax.f32 %v3458_v62, %v3787_v39  ;;  %v8768_v23 = vpop.xlane.xlu1 %2681 }
 0x44e   : > { %v8770_v39 = vpop.xlane.xlu2 %2684 }
 0x450   : > { %v2090_v33 = vpop.f32.mrf.mxu0  ;;  %v2419_v40 = vpop.f32.mrf.mxu1 }
 0x451   : > { %v2767_v48 = vmax.f32 %v2090_v33, %v2419_v40  ;;  %3500 = vmatmul.bf16.gmra.mxu2 %v7279_v14  ;;  %3829 = vmatmul.bf16.gmra.mxu3 %v7279_v14  ;;  %v8766_v33 = vpop.xlane.xlu0 %2696 }
 0x454   : > { %v3461_v31 = vpop.f32.mrf.mxu2  ;;  %v3790_v29 = vpop.f32.mrf.mxu3  ;;  %4114 = vmax.xlane.f32.xlu2 %v4113_v6  ;;  %2768 = vmax.xlane.f32.xlu0 %v2767_v48 }
 0x455   : > { %v4116_v17 = vmax.f32 %v3461_v31, %v3790_v29 }
 0x458   : > { %v2093_v1 = vpop.f32.mrf.mxu0  ;;  %v2422_v56 = vpop.f32.mrf.mxu1 }
 0x459   : > { %v2770_v40 = vmax.f32 %v2093_v1, %v2422_v56  ;;  %v8775_v29 = vpop.xlane.xlu0 %2705  ;;  %v8779_v56 = vpop.xlane.xlu2 %2693 }
 0x45a   : > { %10832 = vst [vmem:[#allocation65_spill] sm:$0xff] %v8775_v29 }
 0x45b   : > { %2132 = vmatmul.bf16.gmra.mxu0 %v7181_v47  ;;  %2461 = vmatmul.bf16.gmra.mxu1 %v7181_v47 }
 0x45c   : > { %v3463_v14 = vpop.f32.mrf.mxu2  ;;  %v3792_v62 = vpop.f32.mrf.mxu3  ;;  %4117 = vmax.xlane.f32.xlu0 %v4116_v17  ;;  %2771 = vmax.xlane.f32.xlu1 %v2770_v40  ;;  %v7182_v40 = vld [vmem:[%s10595_s6 + $0x128] sm:$0xff] }
 0x45d   : > { %v4119_v31 = vmax.f32 %v3463_v14, %v3792_v62  ;;  %v8777_v17 = vpop.xlane.xlu1 %2690 }
 0x460   : > { %v2095_v48 = vpop.f32.mrf.mxu0  ;;  %v2424_v6 = vpop.f32.mrf.mxu1 }
 0x461   : > { %v2773_v61 = vmax.f32 %v2095_v48, %v2424_v6  ;;  %3505 = vmatmul.bf16.gmra.mxu2 %v7280_v59  ;;  %3834 = vmatmul.bf16.gmra.mxu3 %v7280_v59  ;;  %v8788_v26 = vpop.xlane.xlu2 %2702 }
 0x462   : > { %10835 = vst [vmem:[#allocation68_spill] sm:$0xff] %v8788_v26 }
 0x463   : > { %2774 = vmax.xlane.f32.xlu2 %v2773_v61  ;;  %v8784_v61 = vpop.xlane.xlu0 %2714 }
 0x464   : > { %v3466_v47 = vpop.f32.mrf.mxu2  ;;  %v3795_v1 = vpop.f32.mrf.mxu3  ;;  %4120 = vmax.xlane.f32.xlu0 %v4119_v31  ;;  %10833 = vst [vmem:[#allocation66_spill] sm:$0xff] %v8784_v61 }
 0x465   : > { %v4122_v37 = vmax.f32 %v3466_v47, %v3795_v1  ;;  %v8786_v31 = vpop.xlane.xlu1 %2699  ;;  %v7281_v47 = vld [vmem:[%s10595_s6 + $0x80] sm:$0xff] }
 0x466   : > { %10834 = vst [vmem:[#allocation67_spill] sm:$0xff] %v8786_v31 }
 0x468   : > { %v2098_v48 = vpop.f32.mrf.mxu0  ;;  %v2427_v6 = vpop.f32.mrf.mxu1 }
 0x469   : > { %v2776_v29 = vmax.f32 %v2098_v48, %v2427_v6  ;;  %v7183_v48 = vld [vmem:[%s10595_s6 + $0x130] sm:$0xff]  ;;  %v8800_v31 = vpop.xlane.xlu2 %2711 }
 0x46a   : > { %10838 = vst [vmem:[#allocation71_spill] sm:$0xff] %v8800_v31 }
 0x46b   : > { %2137 = vmatmul.bf16.gmra.mxu0 %v7182_v40  ;;  %2466 = vmatmul.bf16.gmra.mxu1 %v7182_v40  ;;  %v8793_v61 = vpop.xlane.xlu0 %2723 }
 0x46c   : > { %v3468_v59 = vpop.f32.mrf.mxu2  ;;  %v3797_v14 = vpop.f32.mrf.mxu3  ;;  %4123 = vmax.xlane.f32.xlu0 %v4122_v37  ;;  %10836 = vst [vmem:[#allocation69_spill] sm:$0xff] %v8793_v61 }
 0x46d   : > { %v4125_v62 = vmax.f32 %v3468_v59, %v3797_v14  ;;  %v8798_v14 = vpop.xlane.xlu1 %2708 }
 0x46e   : > { %10837 = vst [vmem:[#allocation70_spill] sm:$0xff] %v8798_v14  ;;  %v7282_v14 = vld [vmem:[%s10595_s6 + $0x88] sm:$0xff] }
 0x46f   : > { %4126 = vmax.xlane.f32.xlu1 %v4125_v62 }
 0x470   : > { %v2100_v43 = vpop.f32.mrf.mxu0  ;;  %v2429_v18 = vpop.f32.mrf.mxu1 }
 0x471   : > { %3510 = vmatmul.bf16.gmra.mxu2 %v7281_v47  ;;  %3839 = vmatmul.bf16.gmra.mxu3 %v7281_v47  ;;  %v2779_v1 = vmax.f32 %v2100_v43, %v2429_v18 }
 0x473   : > { %v8802_v61 = vpop.xlane.xlu0 %2732 }
 0x474   : > { %v3471_v40 = vpop.f32.mrf.mxu2  ;;  %v3800_v37 = vpop.f32.mrf.mxu3  ;;  %2777 = vmax.xlane.f32.xlu0 %v2776_v29  ;;  %10839 = vst [vmem:[#allocation72_spill] sm:$0xff] %v8802_v61 }
 0x475   : > { %v4128_v29 = vmax.f32 %v3471_v40, %v3800_v37  ;;  %v7184_v40 = vld [vmem:[%s10595_s6 + $0x138] sm:$0xff] }
 0x477   : > { %2780 = vmax.xlane.f32.xlu1 %v2779_v1 }
 0x478   : > { %v2103_v6 = vpop.f32.mrf.mxu0  ;;  %v2432_v59 = vpop.f32.mrf.mxu1 }
 0x479   : > { %v2782_v62 = vmax.f32 %v2103_v6, %v2432_v59  ;;  %v8807_v6 = vpop.xlane.xlu1 %2717 }
 0x47a   : > { %10840 = vst [vmem:[#allocation73_spill] sm:$0xff] %v8807_v6 }
 0x47b   : > { %2142 = vmatmul.bf16.gmra.mxu0 %v7183_v48  ;;  %2471 = vmatmul.bf16.gmra.mxu1 %v7183_v48 }
 0x47c   : > { %v3473_v43 = vpop.f32.mrf.mxu2  ;;  %v3802_v18 = vpop.f32.mrf.mxu3  ;;  %2783 = vmax.xlane.f32.xlu2 %v2782_v62 }
 0x47d   : > { %v4131_v47 = vmax.f32 %v3473_v43, %v3802_v18  ;;  %v8809_v62 = vpop.xlane.xlu2 %2720 }
 0x47e   : > { %10841 = vst [vmem:[#allocation74_spill] sm:$0xff] %v8809_v62 }
 0x47f   : > { %4132 = vmax.xlane.f32.xlu0 %v4131_v47  ;;  %4129 = vmax.xlane.f32.xlu1 %v4128_v29  ;;  %v8814_v29 = vpop.xlane.xlu0 %4087 }
 0x480   : > { %v2105_v1 = vpop.f32.mrf.mxu0  ;;  %v2434_v26 = vpop.f32.mrf.mxu1 }
 0x481   : > { %3515 = vmatmul.bf16.gmra.mxu2 %v7282_v14  ;;  %3844 = vmatmul.bf16.gmra.mxu3 %v7282_v14  ;;  %v2785_v48 = vmax.f32 %v2105_v1, %v2434_v26  ;;  %v8816_v26 = vpop.xlane.xlu1 %2726 }
 0x482   : > { %10842 = vst [vmem:[#allocation75_spill] sm:$0xff] %v8816_v26 }
 0x484   : > { %v3476_v59 = vpop.f32.mrf.mxu2  ;;  %v3805_v31 = vpop.f32.mrf.mxu3 }
 0x485   : > { %v4134_v1 = vmax.f32 %v3476_v59, %v3805_v31  ;;  %v8818_v62 = vpop.xlane.xlu2 %2729  ;;  %v7185_v31 = vld [vmem:[%s10595_s6 + $0x140] sm:$0xff] }
 0x486   : > { %10843 = vst [vmem:[#allocation76_spill] sm:$0xff] %v8818_v62 }
 0x487   : > { %2786 = vmax.xlane.f32.xlu0 %v2785_v48 }
 0x488   : > { %v2108_v37 = vpop.f32.mrf.mxu0  ;;  %v2437_v43 = vpop.f32.mrf.mxu1 }
 0x489   : > { %v2788_v18 = vmax.f32 %v2108_v37, %v2437_v43  ;;  %v7283_v37 = vld [vmem:[%s10595_s6 + $0x90] sm:$0xff]  ;;  %v8825_v26 = vpop.xlane.xlu1 %4081 }
 0x48b   : > { %2147 = vmatmul.bf16.gmra.mxu0 %v7184_v40  ;;  %2476 = vmatmul.bf16.gmra.mxu1 %v7184_v40  ;;  %v8823_v40 = vpop.xlane.xlu0 %2741 }
 0x48c   : > { %v3478_v14 = vpop.f32.mrf.mxu2  ;;  %v3807_v47 = vpop.f32.mrf.mxu3  ;;  %2789 = vmax.xlane.f32.xlu1 %v2788_v18  ;;  %10844 = vst [vmem:[#allocation77_spill] sm:$0xff] %v8823_v40 }
 0x48d   : > { %v4137_v6 = vmax.f32 %v3478_v14, %v3807_v47  ;;  %v8830_v14 = vpop.xlane.xlu2 %4084 }
 0x48f   : > { %4138 = vmax.xlane.f32.xlu2 %v4137_v6  ;;  %4135 = vmax.xlane.f32.xlu0 %v4134_v1 }
 0x490   : > { %v2110_v48 = vpop.f32.mrf.mxu0  ;;  %v2439_v61 = vpop.f32.mrf.mxu1 }
 0x491   : > { %3520 = vmatmul.bf16.gmra.mxu2 %v7283_v37  ;;  %3849 = vmatmul.bf16.gmra.mxu3 %v7283_v37  ;;  %v2791_v43 = vmax.f32 %v2110_v48, %v2439_v61  ;;  %v8834_v40 = vpop.xlane.xlu1 %2735 }
 0x492   : > { %10845 = vst [vmem:[#allocation78_spill] sm:$0xff] %v8834_v40 }
 0x493   : > { %v8832_v61 = vpop.xlane.xlu0 %4096 }
 0x494   : > { %v3481_v18 = vpop.f32.mrf.mxu2  ;;  %v3810_v21 = vpop.f32.mrf.mxu3 }
 0x495   : > { %v4140_v48 = vmax.f32 %v3481_v18, %v3810_v21  ;;  %v8836_v8 = vpop.xlane.xlu2 %2738 }
 0x496   : > { %10846 = vst [vmem:[#allocation79_spill] sm:$0xff] %v8836_v8 }
 0x497   : > { %2792 = vmax.xlane.f32.xlu2 %v2791_v43 }
 0x498   : > { %v2113_v6 = vpop.f32.mrf.mxu0  ;;  %v2442_v59 = vpop.f32.mrf.mxu1 }
 0x499   : > { %v2794_v47 = vmax.f32 %v2113_v6, %v2442_v59  ;;  %v7284_v6 = vld [vmem:[%s10595_s6 + $0x98] sm:$0xff] }
 0x49b   : > { %2152 = vmatmul.bf16.gmra.mxu0 %v7185_v31  ;;  %2481 = vmatmul.bf16.gmra.mxu1 %v7185_v31  ;;  %v8841_v21 = vpop.xlane.xlu0 %2750 }
 0x49c   : > { %v3483_v1 = vpop.f32.mrf.mxu2  ;;  %v3812_v37 = vpop.f32.mrf.mxu3  ;;  %2795 = vmax.xlane.f32.xlu0 %v2794_v47  ;;  %10847 = vst [vmem:[#allocation80_spill] sm:$0xff] %v8841_v21 }
 0x49d   : > { %v4143_v62 = vmax.f32 %v3483_v1, %v3812_v37  ;;  %v8846_v37 = vpop.xlane.xlu1 %4090  ;;  %v8848_v40 = vpop.xlane.xlu2 %4093 }
 0x49f   : > { %4144 = vmax.xlane.f32.xlu1 %v4143_v62  ;;  %4141 = vmax.xlane.f32.xlu2 %v4140_v48  ;;  %v7186_v62 = vld [vmem:[%s10595_s6 + $0x148] sm:$0xff] }
 0x4a0   : > { %v2115_v43 = vpop.f32.mrf.mxu0  ;;  %v2444_v22 = vpop.f32.mrf.mxu1 }
 0x4a1   : > { %3525 = vmatmul.bf16.gmra.mxu2 %v7284_v6  ;;  %3854 = vmatmul.bf16.gmra.mxu3 %v7284_v6  ;;  %v2797_v31 = vmax.f32 %v2115_v43, %v2444_v22 }
 0x4a4   : > { %v3486_v59 = vpop.f32.mrf.mxu2  ;;  %v3815_v47 = vpop.f32.mrf.mxu3 }
 0x4a5   : > { %v4146_v44 = vmax.f32 %v3486_v59, %v3815_v47  ;;  %v8852_v47 = vpop.xlane.xlu1 %2744 }
 0x4a6   : > { %10849 = vst [vmem:[#allocation82_spill] sm:$0xff] %v8852_v47 }
 0x4a7   : > { %4147 = vmax.xlane.f32.xlu0 %v4146_v44  ;;  %2798 = vmax.xlane.f32.xlu1 %v2797_v31  ;;  %v7285_v31 = vld [vmem:[%s10595_s6 + $0xa0] sm:$0xff] }
 0x4a8   : > { %v2118_v18 = vpop.f32.mrf.mxu0  ;;  %v2447_v1 = vpop.f32.mrf.mxu1 }
 0x4a9   : > { %v2800_v48 = vmax.f32 %v2118_v18, %v2447_v1  ;;  %v8857_v1 = vpop.xlane.xlu2 %2747 }
 0x4aa   : > { %10850 = vst [vmem:[#allocation83_spill] sm:$0xff] %v8857_v1 }
 0x4ab   : > { %2157 = vmatmul.bf16.gmra.mxu0 %v7186_v62  ;;  %2486 = vmatmul.bf16.gmra.mxu1 %v7186_v62 }
 0x4ac   : > { %v3488_v22 = vpop.f32.mrf.mxu2  ;;  %v3817_v43 = vpop.f32.mrf.mxu3  ;;  %2801 = vmax.xlane.f32.xlu2 %v2800_v48 }
 0x4ad   : > { %v4149_v18 = vmax.f32 %v3488_v22, %v3817_v43  ;;  %v8864_v51 = vpop.xlane.xlu1 %4099 }
 0x4af   : > { %v8850_v6 = vpop.xlane.xlu0 %2759 }
 0x4b0   : > { %10848 = vst [vmem:[#allocation81_spill] sm:$0xff] %v8850_v6  ;;  %v2120_v44 = vpop.f32.mrf.mxu0  ;;  %v2449_v59 = vpop.f32.mrf.mxu1 }
 0x4b1   : > { %v2803_v21 = vmax.f32 %v2120_v44, %v2449_v59  ;;  %3530 = vmatmul.bf16.gmra.mxu2 %v7285_v31  ;;  %3859 = vmatmul.bf16.gmra.mxu3 %v7285_v31  ;;  %v7187_v44 = vld [vmem:[%s10595_s6 + $0x150] sm:$0xff]  ;;  %v8866_v43 = vpop.xlane.xlu2 %4102 }
 0x4b3   : > { %2804 = vmax.xlane.f32.xlu0 %v2803_v21 }
 0x4b4   : > { %v3491_v62 = vpop.f32.mrf.mxu2  ;;  %v3820_v8 = vpop.f32.mrf.mxu3  ;;  %4150 = vmax.xlane.f32.xlu2 %v4149_v18 }
 0x4b5   : > { %v4152_v48 = vmax.f32 %v3491_v62, %v3820_v8 }
 0x4b7   : > { %v8859_v6 = vpop.xlane.xlu0 %4108  ;;  %4153 = vmax.xlane.f32.xlu1 %v4152_v48 }
 0x4b8   : > { %v2123_v59 = vpop.f32.mrf.mxu0  ;;  %v2452_v47 = vpop.f32.mrf.mxu1 }
 0x4b9   : > { %v2806_v31 = vmax.f32 %v2123_v59, %v2452_v47  ;;  %v8873_v47 = vpop.xlane.xlu1 %2753 }
 0x4ba   : > { %10851 = vst [vmem:[#allocation84_spill] sm:$0xff] %v8873_v47 }
 0x4bb   : > { %2162 = vmatmul.bf16.gmra.mxu0 %v7187_v44  ;;  %2491 = vmatmul.bf16.gmra.mxu1 %v7187_v44 }
 0x4bc   : > { %v3493_v22 = vpop.f32.mrf.mxu2  ;;  %v3822_v21 = vpop.f32.mrf.mxu3 }
 0x4bd   : > { %v4155_v18 = vmax.f32 %v3493_v22, %v3822_v21  ;;  %v8875_v22 = vpop.xlane.xlu2 %2756 }
 0x4be   : > { %10852 = vst [vmem:[#allocation85_spill] sm:$0xff] %v8875_v22 }
 0x4bf   : > { %v8868_v8 = vpop.xlane.xlu0 %4111  ;;  %4156 = vmax.xlane.f32.xlu0 %v4155_v18  ;;  %2807 = vmax.xlane.f32.xlu1 %v2806_v31  ;;  %v7188_v31 = vld [vmem:[%s10595_s6 + $0x158] sm:$0xff] }
 0x4c0   : > { %v2125_v62 = vpop.f32.mrf.mxu0  ;;  %v2454_v48 = vpop.f32.mrf.mxu1 }
 0x4c1   : > { %v2809_v1 = vmax.f32 %v2125_v62, %v2454_v48  ;;  %3535 = vmatmul.bf16.gmra.mxu2 %v7286_v57  ;;  %3864 = vmatmul.bf16.gmra.mxu3 %v7286_v57 }
 0x4c3   : > { %2810 = vmax.xlane.f32.xlu2 %v2809_v1  ;;  %v8882_v1 = vpop.xlane.xlu1 %2762 }
 0x4c4   : > { %v3496_v44 = vpop.f32.mrf.mxu2  ;;  %v3825_v59 = vpop.f32.mrf.mxu3  ;;  %10854 = vst [vmem:[#allocation87_spill] sm:$0xff] %v8882_v1 }
 0x4c5   : > { %v4158_v35 = vmax.f32 %v3496_v44, %v3825_v59  ;;  %v8884_v9 = vpop.xlane.xlu2 %4105 }
 0x4c7   : > { %v8877_v21 = vpop.xlane.xlu0 %2768  ;;  %4159 = vmax.xlane.f32.xlu1 %v4158_v35 }
 0x4c8   : > { %10853 = vst [vmem:[#allocation86_spill] sm:$0xff] %v8877_v21  ;;  %v2128_v18 = vpop.f32.mrf.mxu0  ;;  %v2457_v62 = vpop.f32.mrf.mxu1  ;;  %v7287_v21 = vld [vmem:[%s10595_s6 + $0xb0] sm:$0xff] }
 0x4c9   : > { %v2812_v48 = vmax.f32 %v2128_v18, %v2457_v62 }
 0x4cb   : > { %2167 = vmatmul.bf16.gmra.mxu0 %v7188_v31  ;;  %2496 = vmatmul.bf16.gmra.mxu1 %v7188_v31 }
 0x4cc   : > { %v3498_v57 = vpop.f32.mrf.mxu2  ;;  %v3827_v47 = vpop.f32.mrf.mxu3  ;;  %2813 = vmax.xlane.f32.xlu0 %v2812_v48 }
 0x4cd   : > { %v4161_v18 = vmax.f32 %v3498_v57, %v3827_v47  ;;  %v8894_v60 = vpop.xlane.xlu2 %2765 }
 0x4ce   : > { %10856 = vst [vmem:[#allocation89_spill] sm:$0xff] %v8894_v60  ;;  %v7288_v60 = vld [vmem:[%s10595_s6 + $0xb8] sm:$0xff] }
 0x4cf   : > { %v4118_v44 = vpop.xlane.xlu0 %4117  ;;  %v8889_v1 = vpop.xlane.xlu1 %2771 }
 0x4d0   : > { %v2130_v59 = vpop.f32.mrf.mxu0  ;;  %v2459_v22 = vpop.f32.mrf.mxu1  ;;  %10855 = vst [vmem:[#allocation88_spill] sm:$0xff] %v8889_v1 }
 0x4d1   : > { %v2815_v35 = vmax.f32 %v2130_v59, %v2459_v22  ;;  %3540 = vmatmul.bf16.gmra.mxu2 %v7287_v21  ;;  %3869 = vmatmul.bf16.gmra.mxu3 %v7287_v21  ;;  %v7189_v22 = vld [vmem:[%s10595_s6 + $0x160] sm:$0xff] }
 0x4d3   : > { %2816 = vmax.xlane.f32.xlu1 %v2815_v35 }
 0x4d4   : > { %v3501_v31 = vpop.f32.mrf.mxu2  ;;  %v3830_v62 = vpop.f32.mrf.mxu3  ;;  %4162 = vmax.xlane.f32.xlu0 %v4161_v18 }
 0x4d5   : > { %v4164_v48 = vmax.f32 %v3501_v31, %v3830_v62 }
 0x4d7   : > { %v4121_v32 = vpop.xlane.xlu0 %4120  ;;  %4165 = vmax.xlane.f32.xlu2 %v4164_v48 }
 0x4d8   : > { %v2133_v59 = vpop.f32.mrf.mxu0  ;;  %v2462_v38 = vpop.f32.mrf.mxu1 }
 0x4d9   : > { %v2818_v4 = vmax.f32 %v2133_v59, %v2462_v38  ;;  %v4478_v59 = vsel %vm4464_vm4, %v8706_v58, %v4121_v32 }
 0x4db   : > { %2172 = vmatmul.bf16.gmra.mxu0 %v7189_v22  ;;  %2501 = vmatmul.bf16.gmra.mxu1 %v7189_v22  ;;  %v4115_v22 = vpop.xlane.xlu2 %4114 }
 0x4dc   : > { %v3503_v47 = vpop.f32.mrf.mxu2  ;;  %v3832_v21 = vpop.f32.mrf.mxu3  ;;  %v4476_v58 = vsel %vm4464_vm4, %v8720_v52, %v4115_v22  ;;  %v4474_v52 = vsel %vm4464_vm4, %v8710_v49, %v8859_v6  ;;  %v10859_v22 = vld [vmem:[#allocation19_spill] sm:$0xff]  ;;  %v4472_v49 = vsel %vm4464_vm4, %v8688_v20, %v8866_v43  ;;  %v4470_v20 = vsel %vm4464_vm4, %v8699_v16, %v8832_v61  ;;  %v10861_v16 = vld [vmem:[#allocation38_spill] sm:$0xff] }
 0x4dd   : > { %v4167_v57 = vmax.f32 %v3503_v47, %v3832_v21  ;;  %v10857_v21 = vld [vmem:[#allocation7_spill] sm:$0xff] }
 0x4de   : > { %v10860_v6 = vld [vmem:[#allocation27_spill] sm:$0xff] }
 0x4df   : > { %v4124_v35 = vpop.xlane.xlu0 %4123  ;;  %4168 = vmax.xlane.f32.xlu1 %v4167_v57  ;;  %2819 = vmax.xlane.f32.xlu2 %v2818_v4 }
 0x4e0   : > { %v2135_v18 = vpop.f32.mrf.mxu0  ;;  %v2464_v31 = vpop.f32.mrf.mxu1  ;;  %v4479_v62 = vsel %vm4464_vm4, %v8729_v10, %v4124_v35 }
 0x4e1   : > { %v2821_v48 = vmax.f32 %v2135_v18, %v2464_v31  ;;  %3545 = vmatmul.bf16.gmra.mxu2 %v7288_v60  ;;  %3874 = vmatmul.bf16.gmra.mxu3 %v7288_v60  ;;  %v5375_v47 = vadd.f32 %v8379_v0, %v4479_v62  ;;  %v4477_v18 = vsel %vm4464_vm4, %v8722_v34, %v4118_v44  ;;  %v10858_v0 = vld [vmem:[#allocation53_spill] sm:$0xff] }
 0x4e2   : > { %v4127_v38 = vpop.xlane.xlu1 %4126  ;;  %v5374_v60 = vadd.f32 %v8371_v15, %v4478_v59  ;;  %v5373_v32 = vadd.f32 %v10858_v0, %v4477_v18  ;;  %v4475_v34 = vsel %vm4464_vm4, %v8697_v41, %v8868_v8  ;;  %v5372_v15 = vadd.f32 %v8406_v30, %v4476_v58 }
 0x4e3   : > { %v4480_v4 = vsel %vm4464_vm4, %v8731_v13, %v4127_v38  ;;  %2822 = vmax.xlane.f32.xlu0 %v2821_v48  ;;  %v7190_v13 = vld [vmem:[%s10595_s6 + $0x168] sm:$0xff]  ;;  %v5371_v59 = vadd.f32 %v10859_v22, %v4475_v34  ;;  %v4473_v41 = vsel %vm4464_vm4, %v8708_v25, %v8884_v9  ;;  %v5370_v30 = vadd.f32 %v8438_v19, %v4474_v52  ;;  %v7289_v19 = vld [vmem:[%s10595_s6 + $0xc0] sm:$0xff] }
 0x4e4   : > { %v5376_v10 = vadd.f32 %v10857_v21, %v4480_v4  ;;  %v3506_v57 = vpop.f32.mrf.mxu2  ;;  %v3835_v35 = vpop.f32.mrf.mxu3  ;;  %v5527_v38 = vpack.c.bf16 %v5374_v60, %v5373_v32  ;;  %v5369_v21 = vadd.f32 %v10860_v6, %v4473_v41  ;;  %v5368_v9 = vadd.f32 %v8504_v5, %v4472_v49 }
 0x4e5   : > { %v4170_v31 = vmax.f32 %v3506_v57, %v3835_v35  ;;  %v4471_v35 = vsel %vm4464_vm4, %v8701_v50, %v8864_v51  ;;  %v4469_v50 = vsel %vm4464_vm4, %v8676_v27, %v8848_v40  ;;  %v5366_v58 = vadd.f32 %v8477_v53, %v4470_v20 }
 0x4e6   : > { %v5528_v1 = vpack.c.bf16 %v5376_v10, %v5375_v47  ;;  %v5526_v47 = vpack.c.bf16 %v5372_v15, %v5371_v59  ;;  %v5525_v25 = vpack.c.bf16 %v5370_v30, %v5369_v21  ;;  %v5367_v43 = vadd.f32 %v8486_v7, %v4471_v35  ;;  %v7191_v7 = vld [vmem:[%s10595_s6 + $0x170] sm:$0xff]  ;;  %v10862_v15 = vld [vmem:[#allocation54_spill] sm:$0xff] }
 0x4e7   : > { %4171 = vmax.xlane.f32.xlu2 %v4170_v31  ;;  %v4468_v5 = vsel %vm4464_vm4, %v8692_v11, %v8846_v37  ;;  %v5365_v61 = vadd.f32 %v10861_v16, %v4469_v50  ;;  %v4467_v27 = vsel %vm4464_vm4, %v8681_v46, %v8814_v29  ;;  %v4466_v11 = vsel %vm4464_vm4, %v8690_v28, %v8830_v14  ;;  %v8961_v37 = vpop.xlane.xlu0 %2777  ;;  %v10863_v14 = vld [vmem:[#allocation50_spill] sm:$0xff] }
 0x4e8   : > { %5793 = vmatpush.bf16.msra.mxu0 %v5528_v1  ;;  %v2138_v62 = vpop.f32.mrf.mxu0  ;;  %v2467_v48 = vpop.f32.mrf.mxu1  ;;  %v5364_v53 = vadd.f32 %v8568_v42, %v4468_v5  ;;  %v4465_v46 = vsel %vm4464_vm4, %v8667_v12, %v8825_v26  ;;  %v7290_v59 = vld [vmem:[%s10595_s6 + $0xc8] sm:$0xff] }
 0x4e9   : > { %v2824_v44 = vmax.f32 %v2138_v62, %v2467_v48  ;;  %v5523_v40 = vpack.c.bf16 %v5366_v58, %v5365_v61  ;;  %v5363_v48 = vadd.f32 %v8553_v36, %v4467_v27  ;;  %v8967_v42 = vpop.xlane.xlu2 %2774  ;;  %v5361_v52 = vadd.f32 %v10863_v14, %v4465_v46  ;;  %v7193_v58 = vld [vmem:[%s10595_s6 + $0x180] sm:$0xff] }
 0x4eb   : > { %2177 = vmatmul.bf16.gmra.mxu0 %v7190_v13  ;;  %2506 = vmatmul.bf16.gmra.mxu1 %v7190_v13  ;;  %v5524_v13 = vpack.c.bf16 %v5368_v9, %v5367_v43  ;;  %v5522_v28 = vpack.c.bf16 %v5364_v53, %v5363_v48 }
 0x4ec   : > { %v3508_v4 = vpop.f32.mrf.mxu2  ;;  %v3837_v1 = vpop.f32.mrf.mxu3  ;;  %5794 = vmatpush.bf16.msra.mxu0 %v5527_v38  ;;  %2825 = vmax.xlane.f32.xlu1 %v2824_v44  ;;  %v5362_v38 = vadd.f32 %v10862_v15, %v4466_v11 }
 0x4ed   : > { %v4173_v8 = vmax.f32 %v3508_v4, %v3837_v1 }
 0x4ee   : > { %v5521_v12 = vpack.c.bf16 %v5362_v38, %v5361_v52 }
 0x4ef   : > { %4174 = vmax.xlane.f32.xlu0 %v4173_v8 }
 0x4f0   : > { %5795 = vmatpush.bf16.msra.mxu0 %v5526_v47  ;;  %v2140_v10 = vpop.f32.mrf.mxu0  ;;  %v2469_v57 = vpop.f32.mrf.mxu1  ;;  %v7192_v47 = vld [vmem:[%s10595_s6 + $0x178] sm:$0xff] }
 0x4f1   : > { %v2827_v18 = vmax.f32 %v2140_v10, %v2469_v57  ;;  %3550 = vmatmul.bf16.gmra.mxu2 %v7289_v19  ;;  %3879 = vmatmul.bf16.gmra.mxu3 %v7289_v19  ;;  %v8976_v30 = vpop.xlane.xlu2 %2783  ;;  %v8981_v10 = vpop.xlane.xlu1 %2780 }
 0x4f2   : > { %v8974_v41 = vpop.xlane.xlu0 %4132 }
 0x4f3   : > { %2828 = vmax.xlane.f32.xlu2 %v2827_v18 }
 0x4f4   : > { %v3511_v31 = vpop.f32.mrf.mxu2  ;;  %v3840_v60 = vpop.f32.mrf.mxu3  ;;  %5796 = vmatpush.bf16.msra.mxu0 %v5525_v25 }
 0x4f5   : > { %v4176_v51 = vmax.f32 %v3511_v31, %v3840_v60  ;;  %v7291_v31 = vld [vmem:[%s10595_s6 + $0xd0] sm:$0xff] }
 0x4f7   : > { %4177 = vmax.xlane.f32.xlu0 %v4176_v51 }
 0x4f8   : > { %5797 = vmatpush.bf16.msra.mxu0 %v5524_v13  ;;  %v2143_v0 = vpop.f32.mrf.mxu0  ;;  %v2472_v32 = vpop.f32.mrf.mxu1 }
 0x4f9   : > { %v2830_v62 = vmax.f32 %v2143_v0, %v2472_v32  ;;  %v8990_v51 = vpop.xlane.xlu1 %4129 }
 0x4fa   : > { %v8983_v19 = vpop.xlane.xlu0 %2786 }
 0x4fb   : > { %2182 = vmatmul.bf16.gmra.mxu0 %v7191_v7  ;;  %2511 = vmatmul.bf16.gmra.mxu1 %v7191_v7 }
 0x4fc   : > { %v3513_v34 = vpop.f32.mrf.mxu2  ;;  %v3842_v44 = vpop.f32.mrf.mxu3  ;;  %5798 = vmatpush.bf16.msra.mxu0 %v5523_v40 }
 0x4fd   : > { %v4179_v29 = vmax.f32 %v3513_v34, %v3842_v44  ;;  %v7292_v34 = vld [vmem:[%s10595_s6 + $0xd8] sm:$0xff] }
 0x4ff   : > { %4180 = vmax.xlane.f32.xlu1 %v4179_v29  ;;  %2831 = vmax.xlane.f32.xlu0 %v2830_v62 }
 0x500   : > { %5799 = vmatpush.bf16.msra.mxu0 %v5522_v28  ;;  %v2145_v22 = vpop.f32.mrf.mxu0  ;;  %v2474_v36 = vpop.f32.mrf.mxu1  ;;  %v7194_v28 = vld [vmem:[%s10595_s6 + $0x188] sm:$0xff] }
 0x501   : > { %3555 = vmatmul.bf16.gmra.mxu2 %v7290_v59  ;;  %3884 = vmatmul.bf16.gmra.mxu3 %v7290_v59  ;;  %v2833_v26 = vmax.f32 %v2145_v22, %v2474_v36  ;;  %v8999_v53 = vpop.xlane.xlu1 %2789 }
 0x502   : > { %v8985_v20 = vpop.xlane.xlu2 %4138  ;;  %v8995_v7 = vpop.xlane.xlu0 %4135 }
 0x504   : > { %v3516_v4 = vpop.f32.mrf.mxu2  ;;  %v3845_v1 = vpop.f32.mrf.mxu3  ;;  %5800 = vmatpush.bf16.msra.mxu0 %v5521_v12 }
 0x505   : > { %v4182_v8 = vmax.f32 %v3516_v4, %v3845_v1 }
 0x507   : > { %4183 = vmax.xlane.f32.xlu0 %v4182_v8  ;;  %2834 = vmax.xlane.f32.xlu1 %v2833_v26 }
 0x508   : > { %v2148_v49 = vpop.f32.mrf.mxu0  ;;  %v2477_v6 = vpop.f32.mrf.mxu1 }
 0x509   : > { %v2836_v21 = vmax.f32 %v2148_v49, %v2477_v6  ;;  %v7293_v6 = vld [vmem:[%s10595_s6 + $0xe0] sm:$0xff] }
 0x50a   : > { %v8997_v0 = vpop.xlane.xlu2 %2792 }
 0x50b   : > { %2187 = vmatmul.bf16.gmra.mxu0 %v7192_v47  ;;  %2516 = vmatmul.bf16.gmra.mxu1 %v7192_v47 }
 0x50c   : > { %v3518_v57 = vpop.f32.mrf.mxu2  ;;  %v3847_v35 = vpop.f32.mrf.mxu3  ;;  %2837 = vmax.xlane.f32.xlu2 %v2836_v21 }
 0x50d   : > { %v4185_v18 = vmax.f32 %v3518_v57, %v3847_v35 }
 0x50f   : > { %4186 = vmax.xlane.f32.xlu1 %v4185_v18  ;;  %v9001_v48 = vpop.xlane.xlu0 %2795 }
 0x510   : > { %v2150_v9 = vpop.f32.mrf.mxu0  ;;  %v2479_v25 = vpop.f32.mrf.mxu1  ;;  %10864 = vst [vmem:[#allocation7_spill] sm:$0xff] %v9001_v48 }
 0x511   : > { %v2839_v43 = vmax.f32 %v2150_v9, %v2479_v25  ;;  %3560 = vmatmul.bf16.gmra.mxu2 %v7291_v31  ;;  %3889 = vmatmul.bf16.gmra.mxu3 %v7291_v31 }
 0x512   : > { %v9006_v15 = vpop.xlane.xlu2 %4141  ;;  %v9008_v38 = vpop.xlane.xlu1 %4144 }
 0x513   : > { %2840 = vmax.xlane.f32.xlu0 %v2839_v43  ;;  %v7195_v43 = vld [vmem:[%s10595_s6 + $0x190] sm:$0xff] }
 0x514   : > { %v3521_v60 = vpop.f32.mrf.mxu2  ;;  %v3850_v50 = vpop.f32.mrf.mxu3 }
 0x515   : > { %v4188_v61 = vmax.f32 %v3521_v60, %v3850_v50 }
 0x518   : > { %v2153_v13 = vpop.f32.mrf.mxu0  ;;  %v2482_v5 = vpop.f32.mrf.mxu1 }
 0x519   : > { %v2842_v16 = vmax.f32 %v2153_v13, %v2482_v5 }
 0x51a   : > { %v9013_v36 = vpop.xlane.xlu0 %4147  ;;  %v9017_v8 = vpop.xlane.xlu1 %2798 }
 0x51b   : > { %2192 = vmatmul.bf16.gmra.mxu0 %v7193_v58  ;;  %2521 = vmatmul.bf16.gmra.mxu1 %v7193_v58  ;;  %10866 = vst [vmem:[#allocation19_spill] sm:$0xff] %v9017_v8  ;;  %v10905_v8 = vld [vmem:[#allocation72_spill] sm:$0xff] }
 0x51c   : > { %v3523_v32 = vpop.f32.mrf.mxu2  ;;  %v3852_v27 = vpop.f32.mrf.mxu3  ;;  %4189 = vmax.xlane.f32.xlu0 %v4188_v61  ;;  %2843 = vmax.xlane.f32.xlu1 %v2842_v16 }
 0x51d   : > { %v4191_v40 = vmax.f32 %v3523_v32, %v3852_v27 }
 0x51f   : > { %4192 = vmax.xlane.f32.xlu2 %v4191_v40  ;;  %v9015_v26 = vpop.xlane.xlu2 %2801 }
 0x520   : > { %v2155_v11 = vpop.f32.mrf.mxu0  ;;  %v2484_v62 = vpop.f32.mrf.mxu1  ;;  %10865 = vst [vmem:[#allocation53_spill] sm:$0xff] %v9015_v26 }
 0x521   : > { %3565 = vmatmul.bf16.gmra.mxu2 %v7292_v34  ;;  %3894 = vmatmul.bf16.gmra.mxu3 %v7292_v34  ;;  %v2845_v44 = vmax.f32 %v2155_v11, %v2484_v62  ;;  %v7294_v11 = vld [vmem:[%s10595_s6 + $0xe8] sm:$0xff] }
 0x524   : > { %v3526_v46 = vpop.f32.mrf.mxu2  ;;  %v3855_v29 = vpop.f32.mrf.mxu3 }
 0x525   : > { %v4194_v4 = vmax.f32 %v3526_v46, %v3855_v29 }
 0x526   : > { %v9022_v21 = vpop.xlane.xlu0 %2804 }
 0x527   : > { %2846 = vmax.xlane.f32.xlu2 %v2845_v44  ;;  %10867 = vst [vmem:[#allocation27_spill] sm:$0xff] %v9022_v21  ;;  %v9024_v25 = vpop.xlane.xlu2 %4150 }
 0x528   : > { %v2158_v14 = vpop.f32.mrf.mxu0  ;;  %v2487_v52 = vpop.f32.mrf.mxu1 }
 0x529   : > { %v2848_v22 = vmax.f32 %v2158_v14, %v2487_v52  ;;  %v7196_v14 = vld [vmem:[%s10595_s6 + $0x198] sm:$0xff] }
 0x52a   : > { %v9029_v50 = vpop.xlane.xlu1 %4153 }
 0x52b   : > { %2197 = vmatmul.bf16.gmra.mxu0 %v7194_v28  ;;  %2526 = vmatmul.bf16.gmra.mxu1 %v7194_v28 }
 0x52c   : > { %v3528_v59 = vpop.f32.mrf.mxu2  ;;  %v3857_v12 = vpop.f32.mrf.mxu3  ;;  %2849 = vmax.xlane.f32.xlu0 %v2848_v22 }
 0x52d   : > { %v4197_v1 = vmax.f32 %v3528_v59, %v3857_v12 }
 0x52f   : > { %4198 = vmax.xlane.f32.xlu1 %v4197_v1  ;;  %4195 = vmax.xlane.f32.xlu2 %v4194_v4 }
 0x530   : > { %v2160_v47 = vpop.f32.mrf.mxu0  ;;  %v2489_v49 = vpop.f32.mrf.mxu1 }
 0x531   : > { %3570 = vmatmul.bf16.gmra.mxu2 %v7293_v6  ;;  %3899 = vmatmul.bf16.gmra.mxu3 %v7293_v6  ;;  %v2851_v57 = vmax.f32 %v2160_v47, %v2489_v49 }
 0x532   : > { %v9031_v16 = vpop.xlane.xlu0 %4156  ;;  %v9038_v62 = vpop.xlane.xlu1 %2807 }
 0x533   : > { %10869 = vst [vmem:[#allocation54_spill] sm:$0xff] %v9038_v62 }
 0x534   : > { %v3531_v35 = vpop.f32.mrf.mxu2  ;;  %v3860_v18 = vpop.f32.mrf.mxu3 }
 0x535   : > { %v4200_v9 = vmax.f32 %v3531_v35, %v3860_v18  ;;  %v7295_v18 = vld [vmem:[%s10595_s6 + $0xf0] sm:$0xff] }
 0x536   : > { %v9033_v32 = vpop.xlane.xlu2 %2810 }
 0x537   : > { %4201 = vmax.xlane.f32.xlu2 %v4200_v9  ;;  %2852 = vmax.xlane.f32.xlu1 %v2851_v57  ;;  %10868 = vst [vmem:[#allocation38_spill] sm:$0xff] %v9033_v32 }
 0x538   : > { %v2163_v31 = vpop.f32.mrf.mxu0  ;;  %v2492_v60 = vpop.f32.mrf.mxu1 }
 0x539   : > { %v2854_v58 = vmax.f32 %v2163_v31, %v2492_v60 }
 0x53a   : > { %v4160_v47 = vpop.xlane.xlu1 %4159 }
 0x53b   : > { %2202 = vmatmul.bf16.gmra.mxu0 %v7195_v43  ;;  %2531 = vmatmul.bf16.gmra.mxu1 %v7195_v43 }
 0x53c   : > { %v3533_v13 = vpop.f32.mrf.mxu2  ;;  %v3862_v5 = vpop.f32.mrf.mxu3 }
 0x53d   : > { %v4203_v61 = vmax.f32 %v3533_v13, %v3862_v5 }
 0x53f   : > { %4204 = vmax.xlane.f32.xlu0 %v4203_v61  ;;  %2855 = vmax.xlane.f32.xlu2 %v2854_v58  ;;  %v9040_v29 = vpop.xlane.xlu0 %2813  ;;  %v7197_v61 = vld [vmem:[%s10595_s6 + $0x1a0] sm:$0xff] }
 0x540   : > { %v2165_v27 = vpop.f32.mrf.mxu0  ;;  %v2494_v40 = vpop.f32.mrf.mxu1  ;;  %10870 = vst [vmem:[#allocation50_spill] sm:$0xff] %v9040_v29 }
 0x541   : > { %3575 = vmatmul.bf16.gmra.mxu2 %v7294_v11  ;;  %3904 = vmatmul.bf16.gmra.mxu3 %v7294_v11  ;;  %v2857_v34 = vmax.f32 %v2165_v27, %v2494_v40 }
 0x544   : > { %v3536_v44 = vpop.f32.mrf.mxu2  ;;  %v3865_v46 = vpop.f32.mrf.mxu3 }
 0x545   : > { %v4206_v28 = vmax.f32 %v3536_v44, %v3865_v46 }
 0x546   : > { %v9050_v58 = vpop.xlane.xlu1 %2816 }
 0x547   : > { %4207 = vmax.xlane.f32.xlu1 %v4206_v28  ;;  %2858 = vmax.xlane.f32.xlu0 %v2857_v34  ;;  %v4163_v6 = vpop.xlane.xlu0 %4162  ;;  %10871 = vst [vmem:[#allocation90_spill] sm:$0xff] %v9050_v58 }
 0x548   : > { %v2168_v52 = vpop.f32.mrf.mxu0  ;;  %v2497_v22 = vpop.f32.mrf.mxu1 }
 0x549   : > { %v2860_v12 = vmax.f32 %v2168_v52, %v2497_v22 }
 0x54a   : > { %v4166_v59 = vpop.xlane.xlu2 %4165 }
 0x54b   : > { %2207 = vmatmul.bf16.gmra.mxu0 %v7196_v14  ;;  %2536 = vmatmul.bf16.gmra.mxu1 %v7196_v14 }
 0x54c   : > { %v3538_v4 = vpop.f32.mrf.mxu2  ;;  %v3867_v1 = vpop.f32.mrf.mxu3 }
 0x54d   : > { %v4209_v49 = vmax.f32 %v3538_v4, %v3867_v1  ;;  %v7296_v4 = vld [vmem:[%s10595_s6 + $0xf8] sm:$0xff] }
 0x54f   : > { %4210 = vmax.xlane.f32.xlu2 %v4209_v49  ;;  %2861 = vmax.xlane.f32.xlu1 %v2860_v12 }
 0x550   : > { %v2170_v57 = vpop.f32.mrf.mxu0  ;;  %v2499_v35 = vpop.f32.mrf.mxu1 }
 0x551   : > { %3580 = vmatmul.bf16.gmra.mxu2 %v7295_v18  ;;  %3909 = vmatmul.bf16.gmra.mxu3 %v7295_v18  ;;  %v2863_v9 = vmax.f32 %v2170_v57, %v2499_v35  ;;  %v10872_v18 = vld [vmem:[#allocation49_spill] sm:$0xff] }
 0x552   : > { %v9048_v43 = vpop.xlane.xlu2 %2819  ;;  %v4169_v14 = vpop.xlane.xlu1 %4168 }
 0x553   : > { %v4494_v49 = vsel %vm4464_vm4, %v8777_v17, %v4169_v14  ;;  %v4492_v17 = vsel %vm4464_vm4, %v8770_v39, %v4163_v6  ;;  %v4490_v39 = vsel %vm4464_vm4, %v8745_v45, %v9031_v16  ;;  %v4488_v45 = vsel %vm4464_vm4, %v8756_v54, %v9024_v25  ;;  %v10876_v16 = vld [vmem:[#allocation30_spill] sm:$0xff]  ;;  %v10879_v25 = vld [vmem:[#allocation64_spill] sm:$0xff] }
 0x554   : > { %v3541_v31 = vpop.f32.mrf.mxu2  ;;  %v3870_v60 = vpop.f32.mrf.mxu3 }
 0x555   : > { %v4212_v13 = vmax.f32 %v3541_v31, %v3870_v60 }
 0x556   : > { %v9052_v5 = vpop.xlane.xlu0 %2822 }
 0x557   : > { %4213 = vmax.xlane.f32.xlu0 %v4212_v13  ;;  %2864 = vmax.xlane.f32.xlu2 %v2863_v9  ;;  %v4493_v13 = vsel %vm4464_vm4, %v8754_v55, %v4166_v59  ;;  %v4491_v55 = vsel %vm4464_vm4, %v8768_v23, %v4160_v47  ;;  %v10874_v59 = vld [vmem:[#allocation24_spill] sm:$0xff]  ;;  %v10875_v47 = vld [vmem:[#allocation35_spill] sm:$0xff] }
 0x558   : > { %v2173_v27 = vpop.f32.mrf.mxu0  ;;  %v2502_v40 = vpop.f32.mrf.mxu1  ;;  %v5387_v14 = vadd.f32 %v8461_v2, %v4491_v55 }
 0x559   : > { %v2866_v11 = vmax.f32 %v2173_v27, %v2502_v40  ;;  %v10873_v27 = vld [vmem:[#allocation16_spill] sm:$0xff] }
 0x55a   : > { %v4172_v28 = vpop.xlane.xlu2 %4171  ;;  %v5390_v40 = vadd.f32 %v10873_v27, %v4494_v49 }
 0x55b   : > { %2212 = vmatmul.bf16.gmra.mxu0 %v7197_v61  ;;  %2541 = vmatmul.bf16.gmra.mxu1 %v7197_v61  ;;  %v4495_v12 = vsel %vm4464_vm4, %v8779_v56, %v4172_v28 }
 0x55c   : > { %v3543_v34 = vpop.f32.mrf.mxu2  ;;  %v3872_v44 = vpop.f32.mrf.mxu3  ;;  %v5391_v9 = vadd.f32 %v10872_v18, %v4495_v12  ;;  %v5386_v12 = vadd.f32 %v10875_v47, %v4490_v39  ;;  %v10886_v39 = vld [vmem:[#allocation46_spill] sm:$0xff] }
 0x55d   : > { %v4215_v46 = vmax.f32 %v3543_v34, %v3872_v44 }
 0x55f   : > { %4216 = vmax.xlane.f32.xlu1 %v4215_v46  ;;  %2867 = vmax.xlane.f32.xlu0 %v2866_v11  ;;  %v5388_v46 = vadd.f32 %v10874_v59, %v4492_v17  ;;  %v10883_v17 = vld [vmem:[#allocation6_spill] sm:$0xff] }
 0x560   : > { %v2175_v52 = vpop.f32.mrf.mxu0  ;;  %v2504_v22 = vpop.f32.mrf.mxu1 }
 0x561   : > { %3585 = vmatmul.bf16.gmra.mxu2 %v7296_v4  ;;  %3914 = vmatmul.bf16.gmra.mxu3 %v7296_v4  ;;  %v2869_v57 = vmax.f32 %v2175_v52, %v2504_v22  ;;  %v4489_v22 = vsel %vm4464_vm4, %v8761_v24, %v9029_v50  ;;  %v5534_v4 = vpack.c.bf16 %v5388_v46, %v5387_v14  ;;  %v7297_v24 = vld [vmem:[%s10595_s6 + $0x100] sm:$0xff]  ;;  %v10887_v14 = vld [vmem:[#allocation18_spill] sm:$0xff] }
 0x562   : > { %v4175_v1 = vpop.xlane.xlu0 %4174  ;;  %v10878_v50 = vld [vmem:[#allocation17_spill] sm:$0xff] }
 0x563   : > { %v4496_v35 = vsel %vm4464_vm4, %v8766_v33, %v4175_v1  ;;  %v7198_v33 = vld [vmem:[%s10595_s6 + $0x1a8] sm:$0xff]  ;;  %v5385_v1 = vadd.f32 %v10876_v16, %v4489_v22  ;;  %v5384_v18 = vadd.f32 %v10878_v50, %v4488_v45 }
 0x564   : > { %v5392_v31 = vadd.f32 %v8416_v3, %v4496_v35  ;;  %v3546_v60 = vpop.f32.mrf.mxu2  ;;  %v3875_v56 = vpop.f32.mrf.mxu3  ;;  %v5389_v3 = vadd.f32 %v8442_v63, %v4493_v13  ;;  %v10881_v13 = vld [vmem:[#allocation57_spill] sm:$0xff]  ;;  %v10890_v45 = vld [vmem:[#allocation26_spill] sm:$0xff] }
 0x565   : > { %v4218_v61 = vmax.f32 %v3546_v60, %v3875_v56  ;;  %v5533_v54 = vpack.c.bf16 %v5386_v12, %v5385_v1  ;;  %v10891_v1 = vld [vmem:[#allocation8_spill] sm:$0xff] }
 0x566   : > { %v5536_v11 = vpack.c.bf16 %v5392_v31, %v5391_v9  ;;  %v5535_v28 = vpack.c.bf16 %v5390_v40, %v5389_v3  ;;  %v4486_v9 = vsel %vm4464_vm4, %v10879_v25, %v9008_v38  ;;  %v10880_v31 = vld [vmem:[#allocation63_spill] sm:$0xff]  ;;  %v10882_v40 = vld [vmem:[#allocation41_spill] sm:$0xff]  ;;  %v10885_v38 = vld [vmem:[#allocation62_spill] sm:$0xff] }
 0x567   : > { %4219 = vmax.xlane.f32.xlu2 %v4218_v61  ;;  %2870 = vmax.xlane.f32.xlu1 %v2869_v57  ;;  %v10877_v57 = vld [vmem:[#allocation60_spill] sm:$0xff]  ;;  %v4485_v60 = vsel %vm4464_vm4, %v10880_v31, %v9006_v15  ;;  %v4483_v55 = vsel %vm4464_vm4, %v10885_v38, %v8995_v7  ;;  %v7199_v15 = vld [vmem:[%s10595_s6 + $0x1b0] sm:$0xff] }
 0x568   : > { %5822 = vmatpush.bf16.msra.mxu1 %v5536_v11  ;;  %v2178_v34 = vpop.f32.mrf.mxu0  ;;  %v2507_v44 = vpop.f32.mrf.mxu1  ;;  %v4487_v35 = vsel %vm4464_vm4, %v10877_v57, %v9013_v36  ;;  %v5382_v11 = vadd.f32 %v10882_v40, %v4486_v9  ;;  %v10889_v7 = vld [vmem:[#allocation3_spill] sm:$0xff]  ;;  %v7200_v31 = vld [vmem:[%s10595_s6 + $0x1b8] sm:$0xff] }
 0x569   : > { %v2872_v6 = vmax.f32 %v2178_v34, %v2507_v44  ;;  %v5383_v36 = vadd.f32 %v10881_v13, %v4487_v35  ;;  %v10884_v34 = vld [vmem:[#allocation4_spill] sm:$0xff]  ;;  %v9132_v9 = vpop.xlane.xlu2 %2828  ;;  %v7299_v38 = vld [vmem:[%s10595_s6 + $0x110] sm:$0xff] }
 0x56a   : > { %v4484_v44 = vsel %vm4464_vm4, %v10884_v34, %v8985_v20  ;;  %v10888_v20 = vld [vmem:[#allocation61_spill] sm:$0xff]  ;;  %v9130_v25 = vpop.xlane.xlu0 %4177 }
 0x56b   : > { %2217 = vmatmul.bf16.gmra.mxu0 %v7198_v33  ;;  %2546 = vmatmul.bf16.gmra.mxu1 %v7198_v33  ;;  %v5381_v33 = vadd.f32 %v10883_v17, %v4485_v60  ;;  %v5532_v3 = vpack.c.bf16 %v5384_v18, %v5383_v36  ;;  %v4482_v22 = vsel %vm4464_vm4, %v10888_v20, %v8974_v41 }
 0x56c   : > { %v3548_v52 = vpop.f32.mrf.mxu2  ;;  %v3877_v63 = vpop.f32.mrf.mxu3  ;;  %5823 = vmatpush.bf16.msra.mxu1 %v5535_v28  ;;  %v5378_v16 = vadd.f32 %v10890_v45, %v4482_v22 }
 0x56d   : > { %v4221_v23 = vmax.f32 %v3548_v52, %v3877_v63  ;;  %v5379_v52 = vadd.f32 %v10887_v14, %v4483_v55  ;;  %v5531_v63 = vpack.c.bf16 %v5382_v11, %v5381_v33 }
 0x56f   : > { %4222 = vmax.xlane.f32.xlu0 %v4221_v23  ;;  %2873 = vmax.xlane.f32.xlu2 %v2872_v6  ;;  %v5380_v6 = vadd.f32 %v10886_v39, %v4484_v44  ;;  %v4481_v23 = vsel %vm4464_vm4, %v10889_v7, %v8990_v51  ;;  %v7298_v51 = vld [vmem:[%s10595_s6 + $0x108] sm:$0xff] }
 0x570   : > { %5824 = vmatpush.bf16.msra.mxu1 %v5534_v4  ;;  %v2180_v2 = vpop.f32.mrf.mxu0  ;;  %v2509_v49 = vpop.f32.mrf.mxu1 }
 0x571   : > { %3590 = vmatmul.bf16.gmra.mxu2 %v7297_v24  ;;  %3919 = vmatmul.bf16.gmra.mxu3 %v7297_v24  ;;  %v2875_v56 = vmax.f32 %v2180_v2, %v2509_v49  ;;  %v5377_v2 = vadd.f32 %v10891_v1, %v4481_v23  ;;  %v5530_v49 = vpack.c.bf16 %v5380_v6, %v5379_v52 }
 0x572   : > { %v9139_v17 = vpop.xlane.xlu0 %2831 }
 0x573   : > { %v5529_v50 = vpack.c.bf16 %v5378_v16, %v5377_v2  ;;  %v7300_v16 = vld [vmem:[%s10595_s6 + $0x118] sm:$0xff] }
 0x574   : > { %v3551_v61 = vpop.f32.mrf.mxu2  ;;  %v3880_v27 = vpop.f32.mrf.mxu3  ;;  %5825 = vmatpush.bf16.msra.mxu1 %v5533_v54 }
 0x575   : > { %v4224_v4 = vmax.f32 %v3551_v61, %v3880_v27  ;;  %v9137_v61 = vpop.xlane.xlu1 %2825 }
 0x577   : > { %2876 = vmax.xlane.f32.xlu0 %v2875_v56 }
 0x578   : > { %5826 = vmatpush.bf16.msra.mxu1 %v5532_v3  ;;  %v2183_v59 = vpop.f32.mrf.mxu0  ;;  %v2512_v46 = vpop.f32.mrf.mxu1 }
 0x579   : > { %v2878_v28 = vmax.f32 %v2183_v59, %v2512_v46 }
 0x57a   : > { %v9151_v14 = vpop.xlane.xlu0 %4183 }
 0x57b   : > { %2222 = vmatmul.bf16.gmra.mxu0 %v7199_v15  ;;  %2551 = vmatmul.bf16.gmra.mxu1 %v7199_v15 }
 0x57c   : > { %v3553_v47 = vpop.f32.mrf.mxu2  ;;  %v3882_v12 = vpop.f32.mrf.mxu3  ;;  %5827 = vmatpush.bf16.msra.mxu1 %v5531_v63  ;;  %2879 = vmax.xlane.f32.xlu1 %v2878_v28  ;;  %v7201_v28 = vld [vmem:[%s10595_s6 + $0x1c0] sm:$0xff] }
 0x57d   : > { %v4227_v24 = vmax.f32 %v3553_v47, %v3882_v12  ;;  %v9146_v59 = vpop.xlane.xlu1 %4180 }
 0x57f   : > { %4225 = vmax.xlane.f32.xlu0 %v4224_v4  ;;  %v9141_v34 = vpop.xlane.xlu2 %2837 }
 0x580   : > { %5828 = vmatpush.bf16.msra.mxu1 %v5530_v49  ;;  %v2185_v57 = vpop.f32.mrf.mxu0  ;;  %v2514_v41 = vpop.f32.mrf.mxu1 }
 0x581   : > { %v2881_v35 = vmax.f32 %v2185_v57, %v2514_v41  ;;  %3595 = vmatmul.bf16.gmra.mxu2 %v7298_v51  ;;  %3924 = vmatmul.bf16.gmra.mxu3 %v7298_v51  ;;  %v7202_v57 = vld [vmem:[%s10595_s6 + $0x1c8] sm:$0xff] }
 0x583   : > { %2882 = vmax.xlane.f32.xlu2 %v2881_v35 }
 0x584   : > { %v3556_v18 = vpop.f32.mrf.mxu2  ;;  %v3885_v54 = vpop.f32.mrf.mxu3  ;;  %5829 = vmatpush.bf16.msra.mxu1 %v5529_v50  ;;  %4228 = vmax.xlane.f32.xlu1 %v4227_v24 }
 0x585   : > { %v4230_v36 = vmax.f32 %v3556_v18, %v3885_v54  ;;  %v9155_v23 = vpop.xlane.xlu1 %2834 }
 0x586   : > { %v9157_v4 = vpop.xlane.xlu0 %2840 }
 0x588   : > { %v2188_v60 = vpop.f32.mrf.mxu0  ;;  %v2517_v56 = vpop.f32.mrf.mxu1 }
 0x589   : > { %v2884_v13 = vmax.f32 %v2188_v60, %v2517_v56 }
 0x58b   : > { %2227 = vmatmul.bf16.gmra.mxu0 %v7200_v31  ;;  %2556 = vmatmul.bf16.gmra.mxu1 %v7200_v31 }
 0x58c   : > { %v3558_v27 = vpop.f32.mrf.mxu2  ;;  %v3887_v40 = vpop.f32.mrf.mxu3  ;;  %4231 = vmax.xlane.f32.xlu1 %v4230_v36  ;;  %2885 = vmax.xlane.f32.xlu0 %v2884_v13 }
 0x58d   : > { %v4233_v11 = vmax.f32 %v3558_v27, %v3887_v40  ;;  %v9167_v51 = vpop.xlane.xlu1 %4186  ;;  %v7301_v40 = vld [vmem:[%s10595_s6 + $0x120] sm:$0xff] }
 0x58f   : > { %4234 = vmax.xlane.f32.xlu2 %v4233_v11  ;;  %v9169_v18 = vpop.xlane.xlu0 %4189 }
 0x590   : > { %v2190_v33 = vpop.f32.mrf.mxu0  ;;  %v2519_v3 = vpop.f32.mrf.mxu1 }
 0x591   : > { %v2887_v44 = vmax.f32 %v2190_v33, %v2519_v3  ;;  %3600 = vmatmul.bf16.gmra.mxu2 %v7299_v38  ;;  %3929 = vmatmul.bf16.gmra.mxu3 %v7299_v38  ;;  %v7203_v38 = vld [vmem:[%s10595_s6 + $0x1d0] sm:$0xff] }
 0x592   : > { %v9153_v63 = vpop.xlane.xlu2 %4192 }
 0x594   : > { %v3561_v55 = vpop.f32.mrf.mxu2  ;;  %v3890_v15 = vpop.f32.mrf.mxu3  ;;  %2888 = vmax.xlane.f32.xlu1 %v2887_v44 }
 0x595   : > { %v4236_v46 = vmax.f32 %v3561_v55, %v3890_v15  ;;  %v9173_v36 = vpop.xlane.xlu1 %2843 }
 0x596   : > { %10893 = vst [vmem:[#allocation16_spill] sm:$0xff] %v9173_v36  ;;  %v10904_v36 = vld [vmem:[#allocation20_spill] sm:$0xff] }
 0x597   : > { %4237 = vmax.xlane.f32.xlu0 %v4236_v46 }
 0x598   : > { %v2193_v39 = vpop.f32.mrf.mxu0  ;;  %v2522_v6 = vpop.f32.mrf.mxu1 }
 0x599   : > { %v2890_v52 = vmax.f32 %v2193_v39, %v2522_v6 }
 0x59a   : > { %v9162_v49 = vpop.xlane.xlu2 %2846 }
 0x59b   : > { %2232 = vmatmul.bf16.gmra.mxu0 %v7201_v28  ;;  %2561 = vmatmul.bf16.gmra.mxu1 %v7201_v28  ;;  %10892 = vst [vmem:[#allocation49_spill] sm:$0xff] %v9162_v49 }
 0x59c   : > { %v3563_v20 = vpop.f32.mrf.mxu2  ;;  %v3892_v22 = vpop.f32.mrf.mxu3  ;;  %2891 = vmax.xlane.f32.xlu2 %v2890_v52 }
 0x59d   : > { %v4239_v7 = vmax.f32 %v3563_v20, %v3892_v22 }
 0x59f   : > { %4240 = vmax.xlane.f32.xlu1 %v4239_v7  ;;  %v9178_v33 = vpop.xlane.xlu0 %2849 }
 0x5a0   : > { %v2195_v47 = vpop.f32.mrf.mxu0  ;;  %v2524_v12 = vpop.f32.mrf.mxu1  ;;  %10894 = vst [vmem:[#allocation24_spill] sm:$0xff] %v9178_v33 }
 0x5a1   : > { %v2893_v45 = vmax.f32 %v2195_v47, %v2524_v12  ;;  %3605 = vmatmul.bf16.gmra.mxu2 %v7300_v16  ;;  %3934 = vmatmul.bf16.gmra.mxu3 %v7300_v16  ;;  %v7302_v16 = vld [vmem:[%s10595_s6 + $0x128] sm:$0xff] }
 0x5a2   : > { %v9171_v60 = vpop.xlane.xlu2 %4195  ;;  %v9185_v6 = vpop.xlane.xlu1 %4198 }
 0x5a3   : > { %2894 = vmax.xlane.f32.xlu0 %v2893_v45 }
 0x5a4   : > { %v3566_v1 = vpop.f32.mrf.mxu2  ;;  %v3895_v2 = vpop.f32.mrf.mxu3 }
 0x5a5   : > { %v4242_v50 = vmax.f32 %v3566_v1, %v3895_v2 }
 0x5a8   : > { %v2198_v41 = vpop.f32.mrf.mxu0  ;;  %v2527_v35 = vpop.f32.mrf.mxu1 }
 0x5a9   : > { %v2896_v24 = vmax.f32 %v2198_v41, %v2527_v35 }
 0x5aa   : > { %v9183_v46 = vpop.xlane.xlu2 %4201  ;;  %v9194_v2 = vpop.xlane.xlu1 %2852 }
 0x5ab   : > { %2237 = vmatmul.bf16.gmra.mxu0 %v7202_v57  ;;  %2566 = vmatmul.bf16.gmra.mxu1 %v7202_v57  ;;  %10896 = vst [vmem:[#allocation30_spill] sm:$0xff] %v9194_v2 }
 0x5ac   : > { %v3568_v54 = vpop.f32.mrf.mxu2  ;;  %v3897_v31 = vpop.f32.mrf.mxu3  ;;  %4243 = vmax.xlane.f32.xlu0 %v4242_v50  ;;  %2897 = vmax.xlane.f32.xlu1 %v2896_v24  ;;  %v7204_v24 = vld [vmem:[%s10595_s6 + $0x1d8] sm:$0xff] }
 0x5ad   : > { %v4245_v11 = vmax.f32 %v3568_v54, %v3897_v31 }
 0x5b0   : > { %v2200_v56 = vpop.f32.mrf.mxu0  ;;  %v2529_v13 = vpop.f32.mrf.mxu1 }
 0x5b1   : > { %v2899_v27 = vmax.f32 %v2200_v56, %v2529_v13  ;;  %3610 = vmatmul.bf16.gmra.mxu2 %v7301_v40  ;;  %3939 = vmatmul.bf16.gmra.mxu3 %v7301_v40 }
 0x5b2   : > { %v9187_v22 = vpop.xlane.xlu0 %4204  ;;  %v9189_v12 = vpop.xlane.xlu2 %2855 }
 0x5b3   : > { %2900 = vmax.xlane.f32.xlu2 %v2899_v27  ;;  %10895 = vst [vmem:[#allocation35_spill] sm:$0xff] %v9189_v12 }
 0x5b4   : > { %v3571_v3 = vpop.f32.mrf.mxu2  ;;  %v3900_v44 = vpop.f32.mrf.mxu3  ;;  %4246 = vmax.xlane.f32.xlu1 %v4245_v11 }
 0x5b5   : > { %v4248_v39 = vmax.f32 %v3571_v3, %v3900_v44 }
 0x5b8   : > { %v2203_v55 = vpop.f32.mrf.mxu0  ;;  %v2532_v15 = vpop.f32.mrf.mxu1 }
 0x5b9   : > { %v2902_v28 = vmax.f32 %v2203_v55, %v2532_v15 }
 0x5ba   : > { %v9196_v35 = vpop.xlane.xlu0 %2858  ;;  %v4208_v11 = vpop.xlane.xlu1 %4207 }
 0x5bb   : > { %2242 = vmatmul.bf16.gmra.mxu0 %v7203_v38  ;;  %2571 = vmatmul.bf16.gmra.mxu1 %v7203_v38  ;;  %10897 = vst [vmem:[#allocation60_spill] sm:$0xff] %v9196_v35 }
 0x5bc   : > { %v3573_v52 = vpop.f32.mrf.mxu2  ;;  %v3902_v20 = vpop.f32.mrf.mxu3  ;;  %4249 = vmax.xlane.f32.xlu1 %v4248_v39  ;;  %2903 = vmax.xlane.f32.xlu0 %v2902_v28  ;;  %v7303_v28 = vld [vmem:[%s10595_s6 + $0x130] sm:$0xff] }
 0x5bd   : > { %v4251_v1 = vmax.f32 %v3573_v52, %v3902_v20 }
 0x5c0   : > { %v2205_v7 = vpop.f32.mrf.mxu0  ;;  %v2534_v47 = vpop.f32.mrf.mxu1 }
 0x5c1   : > { %v2905_v45 = vmax.f32 %v2205_v7, %v2534_v47  ;;  %3615 = vmatmul.bf16.gmra.mxu2 %v7302_v16  ;;  %3944 = vmatmul.bf16.gmra.mxu3 %v7302_v16  ;;  %v9213_v16 = vld [vmem:[%s10595_s6 + $0x1e0] sm:$0xff] }
 0x5c2   : > { %v4211_v13 = vpop.xlane.xlu2 %4210  ;;  %v9206_v7 = vpop.xlane.xlu1 %2861 }
 0x5c4   : > { %v3576_v57 = vpop.f32.mrf.mxu2  ;;  %v3905_v41 = vpop.f32.mrf.mxu3  ;;  %4252 = vmax.xlane.f32.xlu0 %v4251_v1  ;;  %2906 = vmax.xlane.f32.xlu1 %v2905_v45 }
 0x5c5   : > { %v4254_v56 = vmax.f32 %v3576_v57, %v3905_v41 }
 0x5c8   : > { %v2208_v50 = vpop.f32.mrf.mxu0  ;;  %v2537_v54 = vpop.f32.mrf.mxu1 }
 0x5c9   : > { %v2908_v31 = vmax.f32 %v2208_v50, %v2537_v54 }
 0x5ca   : > { %v4214_v44 = vpop.xlane.xlu0 %4213  ;;  %v9204_v39 = vpop.xlane.xlu2 %2864 }
 0x5cb   : > { %2247 = vmatmul.bf16.gmra.mxu0 %v7204_v24  ;;  %2576 = vmatmul.bf16.gmra.mxu1 %v7204_v24 }
 0x5cc   : > { %v3578_v27 = vpop.f32.mrf.mxu2  ;;  %v3907_v40 = vpop.f32.mrf.mxu3  ;;  %4255 = vmax.xlane.f32.xlu0 %v4254_v56  ;;  %2909 = vmax.xlane.f32.xlu2 %v2908_v31 }
 0x5cd   : > { %v4257_v3 = vmax.f32 %v3578_v27, %v3907_v40 }
 0x5cf   : > { %4258 = vmax.xlane.f32.xlu1 %v4257_v3  ;;  %v10898_v3 = vld [vmem:[#allocation77_spill] sm:$0xff] }
 0x5d0   : > { %v2210_v38 = vpop.f32.mrf.mxu0  ;;  %v2539_v55 = vpop.f32.mrf.mxu1 }
 0x5d1   : > { %v2911_v15 = vmax.f32 %v2210_v38, %v2539_v55  ;;  %3620 = vmatmul.bf16.gmra.mxu2 %v7303_v28  ;;  %3949 = vmatmul.bf16.gmra.mxu3 %v7303_v28 }
 0x5d2   : > { %v9208_v45 = vpop.xlane.xlu0 %2867  ;;  %v4217_v56 = vpop.xlane.xlu1 %4216 }
 0x5d4   : > { %v3581_v52 = vpop.f32.mrf.mxu2  ;;  %v3910_v20 = vpop.f32.mrf.mxu3  ;;  %2912 = vmax.xlane.f32.xlu0 %v2911_v15  ;;  %v7304_v15 = vld [vmem:[%s10595_s6 + $0x138] sm:$0xff] }
 0x5d5   : > { %v4260_v47 = vmax.f32 %v3581_v52, %v3910_v20  ;;  %v10899_v52 = vld [vmem:[#allocation79_spill] sm:$0xff] }
 0x5d6   : > { %v4510_v20 = vsel %vm4464_vm4, %v10899_v52, %v4217_v56  ;;  %v4508_v56 = vsel %vm4464_vm4, %v10905_v8, %v4211_v13 }
 0x5d7   : > { %4261 = vmax.xlane.f32.xlu2 %v4260_v47  ;;  %v10900_v47 = vld [vmem:[#allocation82_spill] sm:$0xff] }
 0x5d8   : > { %v2213_v1 = vpop.f32.mrf.mxu0  ;;  %v2542_v57 = vpop.f32.mrf.mxu1 }
 0x5d9   : > { %v2914_v41 = vmax.f32 %v2213_v1, %v2542_v57  ;;  %v10901_v57 = vld [vmem:[#allocation22_spill] sm:$0xff] }
 0x5da   : > { %v4220_v31 = vpop.xlane.xlu2 %4219 }
 0x5db   : > { %2252 = vmatmul.bf16.gmra.mxu0 %v9213_v16  ;;  %2581 = vmatmul.bf16.gmra.mxu1 %v9213_v16  ;;  %v4511_v38 = vsel %vm4464_vm4, %v10898_v3, %v4220_v31 }
 0x5dc   : > { %v3583_v24 = vpop.f32.mrf.mxu2  ;;  %v3912_v50 = vpop.f32.mrf.mxu3  ;;  %2915 = vmax.xlane.f32.xlu1 %v2914_v41  ;;  %v5407_v41 = vadd.f32 %v10901_v57, %v4511_v38  ;;  %v10906_v38 = vld [vmem:[#allocation33_spill] sm:$0xff]  ;;  %v10908_v57 = vld [vmem:[#allocation12_spill] sm:$0xff] }
 0x5dd   : > { %v4263_v54 = vmax.f32 %v3583_v24, %v3912_v50  ;;  %v10902_v24 = vld [vmem:[#allocation9_spill] sm:$0xff] }
 0x5df   : > { %4264 = vmax.xlane.f32.xlu0 %v4263_v54 }
 0x5e0   : > { %v2215_v27 = vpop.f32.mrf.mxu0  ;;  %v2544_v40 = vpop.f32.mrf.mxu1 }
 0x5e1   : > { %v2917_v55 = vmax.f32 %v2215_v27, %v2544_v40  ;;  %3625 = vmatmul.bf16.gmra.mxu2 %v7304_v15  ;;  %3954 = vmatmul.bf16.gmra.mxu3 %v7304_v15  ;;  %v10903_v27 = vld [vmem:[#allocation78_spill] sm:$0xff]  ;;  %v5406_v15 = vadd.f32 %v10904_v36, %v4510_v20  ;;  %v5404_v36 = vadd.f32 %v10908_v57, %v4508_v56  ;;  %v7305_v57 = vld [vmem:[%s10595_s6 + $0x140] sm:$0xff] }
 0x5e2   : > { %v4223_v28 = vpop.xlane.xlu0 %4222  ;;  %v4509_v40 = vsel %vm4464_vm4, %v10903_v27, %v4214_v44 }
 0x5e3   : > { %v4512_v1 = vsel %vm4464_vm4, %v10900_v47, %v4223_v28  ;;  %2918 = vmax.xlane.f32.xlu2 %v2917_v55  ;;  %v9236_v55 = vld [vmem:[%s10595_s6 + $0x1e8] sm:$0xff]  ;;  %v5405_v28 = vadd.f32 %v10906_v38, %v4509_v40  ;;  %v10912_v40 = vld [vmem:[#allocation23_spill] sm:$0xff]  ;;  %v10914_v38 = vld [vmem:[#allocation73_spill] sm:$0xff] }
 0x5e4   : > { %v5408_v50 = vadd.f32 %v10902_v24, %v4512_v1  ;;  %v3586_v54 = vpop.f32.mrf.mxu2  ;;  %v3915_v31 = vpop.f32.mrf.mxu3  ;;  %v10907_v1 = vld [vmem:[#allocation76_spill] sm:$0xff]  ;;  %v10910_v24 = vld [vmem:[#allocation59_spill] sm:$0xff] }
 0x5e5   : > { %v4266_v3 = vmax.f32 %v3586_v54, %v3915_v31  ;;  %v4507_v44 = vsel %vm4464_vm4, %v10907_v1, %v4208_v11  ;;  %v5543_v20 = vpack.c.bf16 %v5406_v15, %v5405_v28  ;;  %v10911_v31 = vld [vmem:[#allocation69_spill] sm:$0xff]  ;;  %v4503_v28 = vsel %vm4464_vm4, %v10914_v38, %v9171_v60 }
 0x5e6   : > { %v5544_v49 = vpack.c.bf16 %v5408_v50, %v5407_v41  ;;  %v10909_v41 = vld [vmem:[#allocation75_spill] sm:$0xff]  ;;  %v5403_v50 = vadd.f32 %v10910_v24, %v4507_v44  ;;  %v4505_v11 = vsel %vm4464_vm4, %v10911_v31, %v9183_v46  ;;  %v9259_v46 = vpop.xlane.xlu1 %2870 }
 0x5e7   : > { %4267 = vmax.xlane.f32.xlu0 %v4266_v3  ;;  %v4506_v8 = vsel %vm4464_vm4, %v10909_v41, %v9187_v22  ;;  %v10913_v22 = vld [vmem:[#allocation74_spill] sm:$0xff] }
 0x5e8   : > { %5851 = vmatpush.bf16.msrb.mxu0 %v5544_v49  ;;  %v2218_v52 = vpop.f32.mrf.mxu0  ;;  %v2547_v47 = vpop.f32.mrf.mxu1  ;;  %v5402_v3 = vadd.f32 %v10912_v40, %v4506_v8  ;;  %v5542_v15 = vpack.c.bf16 %v5404_v36, %v5403_v50  ;;  %v4504_v56 = vsel %vm4464_vm4, %v10913_v22, %v9185_v6  ;;  %v10916_v6 = vld [vmem:[#allocation21_spill] sm:$0xff]  ;;  %v10918_v8 = vld [vmem:[#allocation66_spill] sm:$0xff]  ;;  %v9285_v22 = vld [vmem:[%s10595_s6 + $0x1f0] sm:$0xff] }
 0x5e9   : > { %v2920_v13 = vmax.f32 %v2218_v52, %v2547_v47  ;;  %v10915_v52 = vld [vmem:[#allocation5_spill] sm:$0xff]  ;;  %v5400_v36 = vadd.f32 %v10916_v6, %v4504_v56  ;;  %v10922_v56 = vld [vmem:[#allocation31_spill] sm:$0xff] }
 0x5ea   : > { %v5401_v47 = vadd.f32 %v10915_v52, %v4505_v11  ;;  %v10923_v52 = vld [vmem:[#allocation65_spill] sm:$0xff] }
 0x5eb   : > { %2257 = vmatmul.bf16.gmra.mxu0 %v9236_v55  ;;  %2586 = vmatmul.bf16.gmra.mxu1 %v9236_v55 }
 0x5ec   : > { %v3588_v49 = vpop.f32.mrf.mxu2  ;;  %v3917_v54 = vpop.f32.mrf.mxu3  ;;  %5852 = vmatpush.bf16.msrb.mxu0 %v5543_v20  ;;  %v10917_v20 = vld [vmem:[#allocation11_spill] sm:$0xff]  ;;  %v5541_v60 = vpack.c.bf16 %v5402_v3, %v5401_v47  ;;  %v4499_v47 = vsel %vm4464_vm4, %v10923_v52, %v9151_v14 }
 0x5ed   : > { %v4269_v27 = vmax.f32 %v3588_v49, %v3917_v54  ;;  %v5399_v41 = vadd.f32 %v10917_v20, %v4503_v28  ;;  %v10919_v54 = vld [vmem:[#allocation71_spill] sm:$0xff] }
 0x5ee   : > { %v4501_v31 = vsel %vm4464_vm4, %v10919_v54, %v9169_v18 }
 0x5ef   : > { %4270 = vmax.xlane.f32.xlu1 %v4269_v27  ;;  %2921 = vmax.xlane.f32.xlu0 %v2920_v13  ;;  %v4502_v13 = vsel %vm4464_vm4, %v10918_v8, %v9153_v63  ;;  %v10920_v27 = vld [vmem:[#allocation28_spill] sm:$0xff]  ;;  %v5540_v3 = vpack.c.bf16 %v5400_v36, %v5399_v41  ;;  %v5397_v38 = vadd.f32 %v10922_v56, %v4501_v31  ;;  %v9297_v41 = vpop.xlane.xlu1 %2879 }
 0x5f0   : > { %5853 = vmatpush.bf16.msrb.mxu0 %v5542_v15  ;;  %v2220_v1 = vpop.f32.mrf.mxu0  ;;  %v2549_v44 = vpop.f32.mrf.mxu1  ;;  %v5398_v40 = vadd.f32 %v10920_v27, %v4502_v13  ;;  %v10921_v15 = vld [vmem:[#allocation70_spill] sm:$0xff]  ;;  %v10925_v36 = vld [vmem:[#allocation68_spill] sm:$0xff] }
 0x5f1   : > { %3630 = vmatmul.bf16.gmra.mxu2 %v7305_v57  ;;  %3959 = vmatmul.bf16.gmra.mxu3 %v7305_v57  ;;  %v2923_v24 = vmax.f32 %v2220_v1, %v2549_v44  ;;  %v4500_v63 = vsel %vm4464_vm4, %v10921_v15, %v9167_v51  ;;  %v9291_v1 = vpop.xlane.xlu0 %2876  ;;  %v10924_v57 = vld [vmem:[#allocation47_spill] sm:$0xff]  ;;  %v4498_v20 = vsel %vm4464_vm4, %v10925_v36, %v9146_v59  ;;  %v10928_v31 = vld [vmem:[#allocation44_spill] sm:$0xff] }
 0x5f2   : > { %v5396_v51 = vadd.f32 %v10924_v57, %v4500_v63  ;;  %v5539_v6 = vpack.c.bf16 %v5398_v40, %v5397_v38  ;;  %v5394_v27 = vadd.f32 %v10928_v31, %v4498_v20 }
 0x5f4   : > { %v9269_v50 = vpop.f32.mrf.mxu2  ;;  %v9271_v49 = vpop.f32.mrf.mxu3  ;;  %5854 = vmatpush.bf16.msrb.mxu0 %v5541_v60  ;;  %v10926_v60 = vld [vmem:[#allocation55_spill] sm:$0xff] }
 0x5f5   : > { %v5395_v8 = vadd.f32 %v10926_v60, %v4499_v47 }
 0x5f7   : > { %2924 = vmax.xlane.f32.xlu1 %v2923_v24  ;;  %v10927_v24 = vld [vmem:[#allocation67_spill] sm:$0xff]  ;;  %v5538_v40 = vpack.c.bf16 %v5396_v51, %v5395_v8 }
 0x5f8   : > { %5855 = vmatpush.bf16.msrb.mxu0 %v5540_v3  ;;  %v2223_v18 = vpop.f32.mrf.mxu0  ;;  %v2552_v28 = vpop.f32.mrf.mxu1  ;;  %v4497_v54 = vsel %vm4464_vm4, %v10927_v24, %v9130_v25  ;;  %v10929_v3 = vld [vmem:[#allocation45_spill] sm:$0xff] }
 0x5f9   : > { %v2926_v44 = vmax.f32 %v2223_v18, %v2552_v28  ;;  %v5393_v15 = vadd.f32 %v10929_v3, %v4497_v54  ;;  %v7306_v18 = vld [vmem:[%s10595_s6 + $0x148] sm:$0xff]  ;;  %v9316_v25 = vpop.xlane.xlu0 %4225 }
 0x5fb   : > { %2262 = vmatmul.bf16.gmra.mxu0 %v9285_v22  ;;  %2591 = vmatmul.bf16.gmra.mxu1 %v9285_v22  ;;  %v5537_v28 = vpack.c.bf16 %v5394_v27, %v5393_v15  ;;  %v7307_v15 = vld [vmem:[%s10595_s6 + $0x150] sm:$0xff] }
 0x5fc   : > { %v9302_v13 = vpop.f32.mrf.mxu2  ;;  %v9304_v14 = vpop.f32.mrf.mxu3  ;;  %5856 = vmatpush.bf16.msrb.mxu0 %v5539_v6  ;;  %2927 = vmax.xlane.f32.xlu2 %v2926_v44  ;;  %v9323_v6 = vld [vmem:[%s10595_s6 + $0x1f8] sm:$0xff] }
 0x5fd   : > { %v9318_v44 = vpop.xlane.xlu1 %4228 }
 0x600   : > { %5857 = vmatpush.bf16.msrb.mxu0 %v5538_v40  ;;  %v2225_v63 = vpop.f32.mrf.mxu0  ;;  %v2554_v56 = vpop.f32.mrf.mxu1 }
 0x601   : > { %v2929_v38 = vmax.f32 %v2225_v63, %v2554_v56  ;;  %3635 = vmatmul.bf16.gmra.mxu2 %v7306_v18  ;;  %3964 = vmatmul.bf16.gmra.mxu3 %v7306_v18  ;;  %v9325_v60 = vpop.xlane.xlu0 %2885 }
 0x603   : > { %2930 = vmax.xlane.f32.xlu0 %v2929_v38 }
 0x604   : > { %v3596_v52 = vpop.f32.mrf.mxu2  ;;  %v3925_v47 = vpop.f32.mrf.mxu3  ;;  %5858 = vmatpush.bf16.msrb.mxu0 %v5537_v28 }
 0x605   : > { %v4278_v36 = vmax.f32 %v3596_v52, %v3925_v47  ;;  %v9329_v54 = vpop.xlane.xlu1 %4231 }
 0x608   : > { %v2228_v57 = vpop.f32.mrf.mxu0  ;;  %v2557_v51 = vpop.f32.mrf.mxu1 }
 0x609   : > { %v2932_v20 = vmax.f32 %v2228_v57, %v2557_v51 }
 0x60a   : > { %v9334_v38 = vpop.xlane.xlu0 %4237 }
 0x60b   : > { %4279 = vmax.xlane.f32.xlu0 %v4278_v36  ;;  %2933 = vmax.xlane.f32.xlu1 %v2932_v20 }
 0x60c   : > { %v3598_v8 = vpop.f32.mrf.mxu2  ;;  %v3927_v24 = vpop.f32.mrf.mxu3  ;;  %2596 = vmatmul.bf16.gmra.mxu1 %v9323_v6  ;;  %2267 = vmatmul.bf16.gmra.mxu0 %v9323_v6 }
 0x60d   : > { %v4281_v40 = vmax.f32 %v3598_v8, %v3927_v24  ;;  %v9336_v28 = vpop.xlane.xlu1 %2888 }
 0x610   : > { %v2230_v31 = vpop.f32.mrf.mxu0  ;;  %v2559_v27 = vpop.f32.mrf.mxu1 }
 0x611   : > { %v2935_v3 = vmax.f32 %v2230_v31, %v2559_v27  ;;  %3640 = vmatmul.bf16.gmra.mxu2 %v7307_v15  ;;  %3969 = vmatmul.bf16.gmra.mxu3 %v7307_v15 }
 0x613   : > { %4282 = vmax.xlane.f32.xlu1 %v4281_v40  ;;  %2936 = vmax.xlane.f32.xlu2 %v2935_v3  ;;  %v7308_v3 = vld [vmem:[%s10595_s6 + $0x158] sm:$0xff] }
 0x614   : > { %v3601_v63 = vpop.f32.mrf.mxu2  ;;  %v3930_v56 = vpop.f32.mrf.mxu3 }
 0x615   : > { %v4284_v18 = vmax.f32 %v3601_v63, %v3930_v56  ;;  %v9340_v27 = vpop.xlane.xlu1 %4240 }
 0x616   : > { %v9338_v20 = vpop.xlane.xlu0 %2894 }
 0x617   : > { %4285 = vmax.xlane.f32.xlu0 %v4284_v18  ;;  %10930 = vst [vmem:[#allocation17_spill] sm:$0xff] %v9338_v20  ;;  %v9345_v18 = vpop.xlane.xlu2 %2873 }
 0x618   : > { %v2233_v52 = vpop.f32.mrf.mxu0  ;;  %v2562_v47 = vpop.f32.mrf.mxu1 }
 0x619   : > { %v2938_v57 = vmax.f32 %v2233_v52, %v2562_v47 }
 0x61c   : > { %v3603_v51 = vpop.f32.mrf.mxu2  ;;  %v3932_v36 = vpop.f32.mrf.mxu3 }
 0x61d   : > { %v4287_v8 = vmax.f32 %v3603_v51, %v3932_v36 }
 0x61f   : > { %4288 = vmax.xlane.f32.xlu2 %v4287_v8  ;;  %2939 = vmax.xlane.f32.xlu0 %v2938_v57  ;;  %v9347_v52 = vpop.xlane.xlu0 %4243  ;;  %v9349_v51 = vpop.xlane.xlu1 %2897 }
 0x620   : > { %v2235_v24 = vpop.f32.mrf.mxu0  ;;  %v2564_v31 = vpop.f32.mrf.mxu1  ;;  %10931 = vst [vmem:[#allocation64_spill] sm:$0xff] %v9349_v51 }
 0x621   : > { %v2941_v40 = vmax.f32 %v2235_v24, %v2564_v31  ;;  %3645 = vmatmul.bf16.gmra.mxu2 %v7308_v3  ;;  %3974 = vmatmul.bf16.gmra.mxu3 %v7308_v3 }
 0x623   : > { %2942 = vmax.xlane.f32.xlu1 %v2941_v40 }
 0x624   : > { %v3606_v15 = vpop.f32.mrf.mxu2  ;;  %v3935_v63 = vpop.f32.mrf.mxu3 }
 0x625   : > { %v4290_v56 = vmax.f32 %v3606_v15, %v3935_v63  ;;  %v9353_v15 = vpop.xlane.xlu2 %2882  ;;  %v7309_v63 = vld [vmem:[%s10595_s6 + $0x160] sm:$0xff] }
 0x627   : > { %4291 = vmax.xlane.f32.xlu2 %v4290_v56  ;;  %v9358_v56 = vpop.xlane.xlu1 %4246 }
 0x628   : > { %v2238_v47 = vpop.f32.mrf.mxu0  ;;  %v2567_v57 = vpop.f32.mrf.mxu1 }
 0x629   : > { %v2944_v36 = vmax.f32 %v2238_v47, %v2567_v57 }
 0x62c   : > { %v3608_v8 = vpop.f32.mrf.mxu2  ;;  %v3937_v24 = vpop.f32.mrf.mxu3 }
 0x62d   : > { %v4293_v31 = vmax.f32 %v3608_v8, %v3937_v24  ;;  %v9362_v51 = vpop.xlane.xlu2 %4234 }
 0x62f   : > { %v9351_v11 = vpop.xlane.xlu0 %2903  ;;  %4294 = vmax.xlane.f32.xlu0 %v4293_v31  ;;  %2945 = vmax.xlane.f32.xlu2 %v2944_v36  ;;  %v9364_v21 = vpop.xlane.xlu1 %4249 }
 0x630   : > { %10932 = vst [vmem:[#allocation63_spill] sm:$0xff] %v9351_v11  ;;  %v2240_v40 = vpop.f32.mrf.mxu0  ;;  %v2569_v3 = vpop.f32.mrf.mxu1 }
 0x631   : > { %3650 = vmatmul.bf16.gmra.mxu2 %v7309_v63  ;;  %3979 = vmatmul.bf16.gmra.mxu3 %v7309_v63  ;;  %v2947_v47 = vmax.f32 %v2240_v40, %v2569_v3 }
 0x634   : > { %v3611_v57 = vpop.f32.mrf.mxu2  ;;  %v3940_v59 = vpop.f32.mrf.mxu3 }
 0x635   : > { %v4296_v8 = vmax.f32 %v3611_v57, %v3940_v59  ;;  %v9371_v57 = vpop.xlane.xlu2 %2891 }
 0x636   : > { %10933 = vst [vmem:[#allocation57_spill] sm:$0xff] %v9371_v57 }
 0x637   : > { %v9360_v24 = vpop.xlane.xlu0 %4252  ;;  %4297 = vmax.xlane.f32.xlu2 %v4296_v8  ;;  %2948 = vmax.xlane.f32.xlu0 %v2947_v47  ;;  %v7310_v47 = vld [vmem:[%s10595_s6 + $0x168] sm:$0xff] }
 0x638   : > { %v2243_v36 = vpop.f32.mrf.mxu0  ;;  %v2572_v31 = vpop.f32.mrf.mxu1 }
 0x639   : > { %v2950_v20 = vmax.f32 %v2243_v36, %v2572_v31  ;;  %v9373_v36 = vpop.xlane.xlu1 %2906 }
 0x63a   : > { %10934 = vst [vmem:[#allocation41_spill] sm:$0xff] %v9373_v36 }
 0x63b   : > { %2951 = vmax.xlane.f32.xlu1 %v2950_v20 }
 0x63c   : > { %v3613_v11 = vpop.f32.mrf.mxu2  ;;  %v3942_v48 = vpop.f32.mrf.mxu3 }
 0x63d   : > { %v4299_v63 = vmax.f32 %v3613_v11, %v3942_v48  ;;  %v9377_v62 = vpop.xlane.xlu2 %2900 }
 0x63e   : > { %10936 = vst [vmem:[#allocation4_spill] sm:$0xff] %v9377_v62 }
 0x63f   : > { %4300 = vmax.xlane.f32.xlu0 %v4299_v63  ;;  %v9366_v26 = vpop.xlane.xlu0 %4255 }
 0x640   : > { %v2245_v40 = vpop.f32.mrf.mxu0  ;;  %v2574_v3 = vpop.f32.mrf.mxu1 }
 0x641   : > { %v2953_v59 = vmax.f32 %v2245_v40, %v2574_v3  ;;  %3655 = vmatmul.bf16.gmra.mxu2 %v7310_v47  ;;  %3984 = vmatmul.bf16.gmra.mxu3 %v7310_v47 }
 0x642   : > { %v4259_v47 = vpop.xlane.xlu1 %4258 }
 0x643   : > { %2954 = vmax.xlane.f32.xlu2 %v2953_v59 }
 0x644   : > { %v3616_v20 = vpop.f32.mrf.mxu2  ;;  %v3945_v8 = vpop.f32.mrf.mxu3 }
 0x645   : > { %v4302_v48 = vmax.f32 %v3616_v20, %v3945_v8  ;;  %v7311_v20 = vld [vmem:[%s10595_s6 + $0x170] sm:$0xff] }
 0x647   : > { %4303 = vmax.xlane.f32.xlu0 %v4302_v48  ;;  %v9375_v63 = vpop.xlane.xlu0 %2912 }
 0x648   : > { %v2248_v11 = vpop.f32.mrf.mxu0  ;;  %v2577_v31 = vpop.f32.mrf.mxu1  ;;  %10935 = vst [vmem:[#allocation6_spill] sm:$0xff] %v9375_v63 }
 0x649   : > { %v2956_v40 = vmax.f32 %v2248_v11, %v2577_v31  ;;  %v9382_v31 = vpop.xlane.xlu2 %2909 }
 0x64a   : > { %10937 = vst [vmem:[#allocation62_spill] sm:$0xff] %v9382_v31 }
 0x64c   : > { %v3618_v3 = vpop.f32.mrf.mxu2  ;;  %v3947_v32 = vpop.f32.mrf.mxu3 }
 0x64d   : > { %v4305_v2 = vmax.f32 %v3618_v3, %v3947_v32 }
 0x64f   : > { %4306 = vmax.xlane.f32.xlu1 %v4305_v2  ;;  %2957 = vmax.xlane.f32.xlu0 %v2956_v40  ;;  %v9384_v62 = vpop.xlane.xlu1 %2915 }
 0x650   : > { %v2250_v59 = vpop.f32.mrf.mxu0  ;;  %v2579_v57 = vpop.f32.mrf.mxu1  ;;  %10938 = vst [vmem:[#allocation46_spill] sm:$0xff] %v9384_v62 }
 0x651   : > { %3660 = vmatmul.bf16.gmra.mxu2 %v7311_v20  ;;  %3989 = vmatmul.bf16.gmra.mxu3 %v7311_v20  ;;  %v2959_v8 = vmax.f32 %v2250_v59, %v2579_v57 }
 0x652   : > { %v4265_v48 = vpop.xlane.xlu0 %4264 }
 0x654   : > { %v3621_v36 = vpop.f32.mrf.mxu2  ;;  %v3950_v11 = vpop.f32.mrf.mxu3 }
 0x655   : > { %v4308_v33 = vmax.f32 %v3621_v36, %v3950_v11  ;;  %v4526_v36 = vsel %vm4464_vm4, %v8983_v19, %v4265_v48  ;;  %v4524_v19 = vsel %vm4464_vm4, %v8981_v10, %v4259_v47  ;;  %v10942_v48 = vld [vmem:[#allocation25_spill] sm:$0xff]  ;;  %v10944_v10 = vld [vmem:[#allocation32_spill] sm:$0xff] }
 0x657   : > { %2960 = vmax.xlane.f32.xlu1 %v2959_v8  ;;  %v7312_v8 = vld [vmem:[%s10595_s6 + $0x178] sm:$0xff] }
 0x658   : > { %v2253_v32 = vpop.f32.mrf.mxu0  ;;  %v2582_v2 = vpop.f32.mrf.mxu1 }
 0x659   : > { %v2962_v40 = vmax.f32 %v2253_v32, %v2582_v2  ;;  %v4262_v32 = vpop.xlane.xlu2 %4261 }
 0x65a   : > { %v4268_v29 = vpop.xlane.xlu0 %4267  ;;  %v4525_v31 = vsel %vm4464_vm4, %v8976_v30, %v4262_v32  ;;  %v10943_v30 = vld [vmem:[#allocation42_spill] sm:$0xff] }
 0x65b   : > { %2963 = vmax.xlane.f32.xlu2 %v2962_v40  ;;  %v4527_v20 = vsel %vm4464_vm4, %v8999_v53, %v4268_v29  ;;  %v10940_v40 = vld [vmem:[#allocation29_spill] sm:$0xff]  ;;  %v5420_v32 = vadd.f32 %v10943_v30, %v4524_v19 }
 0x65c   : > { %v3623_v3 = vpop.f32.mrf.mxu2  ;;  %v3952_v63 = vpop.f32.mrf.mxu3 }
 0x65d   : > { %v4311_v58 = vmax.f32 %v3623_v3, %v3952_v63 }
 0x65f   : > { %4312 = vmax.xlane.f32.xlu0 %v4311_v58  ;;  %4309 = vmax.xlane.f32.xlu1 %v4308_v33  ;;  %v10939_v33 = vld [vmem:[#allocation10_spill] sm:$0xff] }
 0x660   : > { %v2255_v57 = vpop.f32.mrf.mxu0  ;;  %v2584_v59 = vpop.f32.mrf.mxu1  ;;  %v5423_v11 = vadd.f32 %v10939_v33, %v4527_v20  ;;  %v4523_v20 = vsel %vm4464_vm4, %v8961_v37, %v9366_v26  ;;  %v10946_v37 = vld [vmem:[#allocation48_spill] sm:$0xff] }
 0x661   : > { %3665 = vmatmul.bf16.gmra.mxu2 %v7312_v8  ;;  %3994 = vmatmul.bf16.gmra.mxu3 %v7312_v8  ;;  %v2965_v63 = vmax.f32 %v2255_v57, %v2584_v59  ;;  %v10941_v8 = vld [vmem:[#allocation58_spill] sm:$0xff] }
 0x662   : > { %v4271_v2 = vpop.xlane.xlu1 %4270  ;;  %v5422_v12 = vadd.f32 %v10941_v8, %v4526_v36  ;;  %v4522_v36 = vsel %vm4464_vm4, %v8967_v42, %v9360_v24  ;;  %v10948_v42 = vld [vmem:[#allocation34_spill] sm:$0xff] }
 0x663   : > { %v4528_v58 = vsel %vm4464_vm4, %v8997_v0, %v4271_v2  ;;  %v5421_v0 = vadd.f32 %v10942_v48, %v4525_v31  ;;  %v5418_v26 = vadd.f32 %v10946_v37, %v4522_v36  ;;  %v10950_v48 = vld [vmem:[#allocation39_spill] sm:$0xff] }
 0x664   : > { %v5424_v3 = vadd.f32 %v10940_v40, %v4528_v58  ;;  %v3626_v53 = vpop.f32.mrf.mxu2  ;;  %v3955_v29 = vpop.f32.mrf.mxu3 }
 0x665   : > { %v4314_v62 = vmax.f32 %v3626_v53, %v3955_v29  ;;  %v5551_v58 = vpack.c.bf16 %v5422_v12, %v5421_v0  ;;  %v10947_v12 = vld [vmem:[#allocation86_spill] sm:$0xff]  ;;  %v10949_v29 = vld [vmem:[#allocation89_spill] sm:$0xff] }
 0x666   : > { %v5552_v35 = vpack.c.bf16 %v5424_v3, %v5423_v11  ;;  %v4520_v40 = vsel %vm4464_vm4, %v10947_v12, %v9358_v56  ;;  %v4519_v8 = vsel %vm4464_vm4, %v10949_v29, %v9347_v52  ;;  %v10962_v29 = vld [vmem:[#allocation36_spill] sm:$0xff] }
 0x667   : > { %4315 = vmax.xlane.f32.xlu2 %v4314_v62  ;;  %2966 = vmax.xlane.f32.xlu0 %v2965_v63  ;;  %v5419_v62 = vadd.f32 %v10944_v10, %v4523_v20  ;;  %v5416_v0 = vadd.f32 %v10950_v48, %v4520_v40  ;;  %v9429_v20 = vpop.xlane.xlu0 %2921 }
 0x668   : > { %5880 = vmatpush.bf16.msrb.mxu1 %v5552_v35  ;;  %v2258_v57 = vpop.f32.mrf.mxu0  ;;  %v2587_v59 = vpop.f32.mrf.mxu1  ;;  %v10945_v35 = vld [vmem:[#allocation88_spill] sm:$0xff]  ;;  %10952 = vst [vmem:[#allocation18_spill] sm:$0xff] %v9429_v20 }
 0x669   : > { %v2968_v2 = vmax.f32 %v2258_v57, %v2587_v59  ;;  %v4521_v63 = vsel %vm4464_vm4, %v10945_v35, %v9364_v21  ;;  %v5550_v11 = vpack.c.bf16 %v5420_v32, %v5419_v62  ;;  %v7313_v21 = vld [vmem:[%s10595_s6 + $0x180] sm:$0xff]  ;;  %v10951_v57 = vld [vmem:[#allocation87_spill] sm:$0xff] }
 0x66a   : > { %v5417_v24 = vadd.f32 %v10948_v42, %v4521_v63  ;;  %v4518_v59 = vsel %vm4464_vm4, %v10951_v57, %v9340_v27  ;;  %v10955_v62 = vld [vmem:[#allocation37_spill] sm:$0xff]  ;;  %v10957_v63 = vld [vmem:[#allocation40_spill] sm:$0xff] }
 0x66b   : > { %2969 = vmax.xlane.f32.xlu1 %v2968_v2  ;;  %v10953_v2 = vld [vmem:[#allocation52_spill] sm:$0xff]  ;;  %v10956_v35 = vld [vmem:[#allocation85_spill] sm:$0xff] }
 0x66c   : > { %v3628_v47 = vpop.f32.mrf.mxu2  ;;  %v3957_v31 = vpop.f32.mrf.mxu3  ;;  %5881 = vmatpush.bf16.msrb.mxu1 %v5551_v58  ;;  %v5549_v56 = vpack.c.bf16 %v5418_v26, %v5417_v24  ;;  %v5415_v30 = vadd.f32 %v10953_v2, %v4519_v8  ;;  %v10954_v58 = vld [vmem:[#allocation81_spill] sm:$0xff]  ;;  %v4516_v27 = vsel %vm4464_vm4, %v10956_v35, %v9362_v51  ;;  %v10961_v51 = vmax.f32 %v9302_v13, %v9304_v14 }
 0x66d   : > { %v4317_v33 = vmax.f32 %v3628_v47, %v3957_v31  ;;  %v4517_v36 = vsel %vm4464_vm4, %v10954_v58, %v9334_v38  ;;  %v5414_v47 = vadd.f32 %v10955_v62, %v4518_v59  ;;  %v10959_v38 = vld [vmem:[#allocation43_spill] sm:$0xff]  ;;  %v9464_v62 = vpop.xlane.xlu2 %2918 }
 0x66e   : > { %v5548_v31 = vpack.c.bf16 %v5416_v0, %v5415_v30  ;;  %v5412_v42 = vadd.f32 %v10959_v38, %v4516_v27  ;;  %v10964_v0 = vld [vmem:[#allocation51_spill] sm:$0xff]  ;;  %10967 = vst [vmem:[#allocation61_spill] sm:$0xff] %v9464_v62 }
 0x66f   : > { %4318 = vmax.xlane.f32.xlu0 %v4317_v33  ;;  %v5413_v33 = vadd.f32 %v10957_v63, %v4517_v36 }
 0x670   : > { %5882 = vmatpush.bf16.msrb.mxu1 %v5550_v11  ;;  %v2260_v3 = vpop.f32.mrf.mxu0  ;;  %v2589_v53 = vpop.f32.mrf.mxu1  ;;  %v10958_v11 = vld [vmem:[#allocation84_spill] sm:$0xff] }
 0x671   : > { %v2971_v19 = vmax.f32 %v2260_v3, %v2589_v53  ;;  %3670 = vmatmul.bf16.gmra.mxu2 %v7313_v21  ;;  %3999 = vmatmul.bf16.gmra.mxu3 %v7313_v21  ;;  %v4515_v12 = vsel %vm4464_vm4, %v10958_v11, %v9329_v54  ;;  %v5547_v24 = vpack.c.bf16 %v5414_v47, %v5413_v33  ;;  %v10960_v3 = vld [vmem:[#allocation80_spill] sm:$0xff]  ;;  %v10963_v54 = vld [vmem:[#allocation83_spill] sm:$0xff] }
 0x672   : > { %v4514_v53 = vsel %vm4464_vm4, %v10960_v3, %v9318_v44  ;;  %v5411_v8 = vadd.f32 %v10962_v29, %v4515_v12  ;;  %v4513_v48 = vsel %vm4464_vm4, %v10963_v54, %v9316_v25  ;;  %v10965_v44 = vld [vmem:[#allocation14_spill] sm:$0xff]  ;;  %v10966_v25 = vmax.f32 %v9269_v50, %v9271_v49  ;;  %v7315_v11 = vld [vmem:[%s10595_s6 + $0x190] sm:$0xff]  ;;  %v7316_v29 = vld [vmem:[%s10595_s6 + $0x198] sm:$0xff] }
 0x673   : > { %2972 = vmax.xlane.f32.xlu2 %v2971_v19  ;;  %v5409_v2 = vadd.f32 %v10965_v44, %v4513_v48 }
 0x674   : > { %v3631_v52 = vpop.f32.mrf.mxu2  ;;  %v3960_v32 = vpop.f32.mrf.mxu3  ;;  %5883 = vmatpush.bf16.msrb.mxu1 %v5549_v56  ;;  %v5410_v56 = vadd.f32 %v10964_v0, %v4514_v53  ;;  %v5546_v59 = vpack.c.bf16 %v5412_v42, %v5411_v8 }
 0x675   : > { %v4320_v10 = vmax.f32 %v3631_v52, %v3960_v32  ;;  %v7314_v52 = vld [vmem:[%s10595_s6 + $0x188] sm:$0xff] }
 0x676   : > { %v9455_v57 = vpop.xlane.xlu0 %2930  ;;  %v5545_v58 = vpack.c.bf16 %v5410_v56, %v5409_v2 }
 0x677   : > { %4321 = vmax.xlane.f32.xlu1 %v4320_v10 }
 0x678   : > { %5884 = vmatpush.bf16.msrb.mxu1 %v5548_v31  ;;  %v2263_v37 = vpop.f32.mrf.mxu0  ;;  %v2592_v26 = vpop.f32.mrf.mxu1 }
 0x679   : > { %v2974_v40 = vmax.f32 %v2263_v37, %v2592_v26  ;;  %v9468_v26 = vpop.xlane.xlu2 %2927 }
 0x67b   : > { %4276 = vmax.xlane.f32.xlu2 %v10961_v51  ;;  %2975 = vmax.xlane.f32.xlu0 %v2974_v40 }
 0x67c   : > { %v3633_v19 = vpop.f32.mrf.mxu2  ;;  %v3962_v21 = vpop.f32.mrf.mxu3  ;;  %5885 = vmatpush.bf16.msrb.mxu1 %v5547_v24 }
 0x67d   : > { %v4323_v30 = vmax.f32 %v3633_v19, %v3962_v21 }
 0x67e   : > { %v9466_v47 = vpop.xlane.xlu0 %4279 }
 0x680   : > { %5886 = vmatpush.bf16.msrb.mxu1 %v5546_v59  ;;  %v2594_v13 = vpop.f32.mrf.mxu1  ;;  %v2265_v14 = vpop.f32.mrf.mxu0 }
 0x681   : > { %3675 = vmatmul.bf16.gmra.mxu2 %v7314_v52  ;;  %4004 = vmatmul.bf16.gmra.mxu3 %v7314_v52  ;;  %v2977_v32 = vmax.f32 %v2265_v14, %v2594_v13  ;;  %v7317_v13 = vld [vmem:[%s10595_s6 + $0x1a0] sm:$0xff] }
 0x683   : > { %4324 = vmax.xlane.f32.xlu2 %v4323_v30  ;;  %4273 = vmax.xlane.f32.xlu0 %v10966_v25 }
 0x684   : > { %v3636_v36 = vpop.f32.mrf.mxu2  ;;  %v3965_v10 = vpop.f32.mrf.mxu3  ;;  %5887 = vmatpush.bf16.msrb.mxu1 %v5545_v58  ;;  %2978 = vmax.xlane.f32.xlu1 %v2977_v32 }
 0x685   : > { %v4326_v31 = vmax.f32 %v3636_v36, %v3965_v10 }
 0x686   : > { %v9477_v24 = vpop.xlane.xlu2 %2936 }
 0x689   : > { %v2268_v35 = vpop.f32.mrf.mxu0  ;;  %v2597_v27 = vpop.f32.mrf.mxu1 }
 0x68a   : > { %v2980_v50 = vmax.f32 %v2268_v35, %v2597_v27  ;;  %v9470_v49 = vpop.xlane.xlu0 %4285  ;;  %v9499_v35 = vpop.xlane.xlu1 %2924 }
 0x68b   : > { %4327 = vmax.xlane.f32.xlu2 %v4326_v31  ;;  %10971 = vst [vmem:[#allocation77_spill] sm:$0xff] %v9499_v35 }
 0x68c   : > { %v3638_v63 = vpop.f32.mrf.mxu2  ;;  %v3967_v33 = vpop.f32.mrf.mxu3 }
 0x68d   : > { %v4329_v37 = vmax.f32 %v3638_v63, %v3967_v33  ;;  %v7318_v63 = vld [vmem:[%s10595_s6 + $0x1a8] sm:$0xff] }
 0x68f   : > { %4330 = vmax.xlane.f32.xlu1 %v4329_v37 }
 0x691   : > { %3680 = vmatmul.bf16.gmra.mxu2 %v7315_v11  ;;  %4009 = vmatmul.bf16.gmra.mxu3 %v7315_v11  ;;  %v6960_v11 = vld [vmem:[%s10597_s8] sm:$0xf] }
 0x692   : > { %v9475_v42 = vpop.xlane.xlu0 %2939  ;;  %v9484_v19 = vpop.xlane.xlu2 %4288 }
 0x693   : > { %2981 = vmax.xlane.f32.xlu2 %v2980_v50  ;;  %10968 = vst [vmem:[#allocation3_spill] sm:$0xff] %v9475_v42 }
 0x694   : > { %v3641_v12 = vpop.f32.mrf.mxu2  ;;  %v3970_v40 = vpop.f32.mrf.mxu3 }
 0x695   : > { %v4332_v38 = vmax.f32 %v3641_v12, %v3970_v40  ;;  %v7213_v12 = vld [vmem:[%s10597_s8 + $0x1c] sm:$0xf0] }
 0x696   : > { %v6961_v40 = vor.u32 %v7213_v12, %v6960_v11  ;;  %v7320_v12 = vld [vmem:[%s10595_s6 + $0x1b8] sm:$0xff] }
 0x697   : > { %4333 = vmax.xlane.f32.xlu1 %v4332_v38 }
 0x698   : > { %5801 = vmatmul.bf16.vlgmr.msra.gmra.mxu0 %v6961_v40 }
 0x69a   : > { %v9488_v44 = vpop.xlane.xlu2 %4291 }
 0x69c   : > { %v3643_v3 = vpop.f32.mrf.mxu2  ;;  %v3972_v53 = vpop.f32.mrf.mxu3 }
 0x69d   : > { %v4335_v51 = vmax.f32 %v3643_v3, %v3972_v53  ;;  %v9516_v53 = vpop.xlane.xlu1 %2933 }
 0x69f   : > { %4336 = vmax.xlane.f32.xlu2 %v4335_v51 }
 0x6a1   : > { %3685 = vmatmul.bf16.gmra.mxu2 %v7316_v29  ;;  %4014 = vmatmul.bf16.gmra.mxu3 %v7316_v29 }
 0x6a2   : > { %v9482_v8 = vpop.xlane.xlu0 %4294  ;;  %v9495_v58 = vpop.xlane.xlu2 %2945 }
 0x6a3   : > { %10970 = vst [vmem:[#allocation8_spill] sm:$0xff] %v9495_v58  ;;  %v7324_v58 = vld [vmem:[%s10595_s6 + $0x1d8] sm:$0xff] }
 0x6a4   : > { %v3646_v21 = vpop.f32.mrf.mxu2  ;;  %v3975_v54 = vpop.f32.mrf.mxu3 }
 0x6a5   : > { %v4338_v48 = vmax.f32 %v3646_v21, %v3975_v54  ;;  %v7319_v54 = vld [vmem:[%s10595_s6 + $0x1b0] sm:$0xff] }
 0x6a7   : > { %4339 = vmax.xlane.f32.xlu2 %v4338_v48 }
 0x6aa   : > { %v9486_v0 = vpop.xlane.xlu0 %2948  ;;  %v9501_v27 = vpop.xlane.xlu2 %4297 }
 0x6ab   : > { %10969 = vst [vmem:[#allocation26_spill] sm:$0xff] %v9486_v0 }
 0x6ac   : > { %v3648_v56 = vpop.f32.mrf.mxu2  ;;  %v3977_v59 = vpop.f32.mrf.mxu3 }
 0x6ad   : > { %v4341_v2 = vmax.f32 %v3648_v56, %v3977_v59 }
 0x6af   : > { %4342 = vmax.xlane.f32.xlu1 %v4341_v2 }
 0x6b1   : > { %3690 = vmatmul.bf16.gmra.mxu2 %v7317_v13  ;;  %4019 = vmatmul.bf16.gmra.mxu3 %v7317_v13  ;;  %v9525_v13 = vpop.xlane.xlu1 %4282 }
 0x6b2   : > { %v9493_v32 = vpop.xlane.xlu0 %4300 }
 0x6b4   : > { %v3651_v14 = vpop.f32.mrf.mxu2  ;;  %v3980_v30 = vpop.f32.mrf.mxu3 }
 0x6b5   : > { %v4344_v52 = vmax.f32 %v3651_v14, %v3980_v30  ;;  %v2270_v30 = vpop.f32.mrf.mxu0 }
 0x6b6   : > { %v9514_v3 = vpop.xlane.xlu2 %2954 }
 0x6b7   : > { %4345 = vmax.xlane.f32.xlu2 %v4344_v52  ;;  %10973 = vst [vmem:[#allocation82_spill] sm:$0xff] %v9514_v3  ;;  %v2599_v52 = vpop.f32.mrf.mxu1 }
 0x6ba   : > { %v9497_v31 = vpop.xlane.xlu0 %4303 }
 0x6bc   : > { %v3653_v25 = vpop.f32.mrf.mxu2  ;;  %v3982_v36 = vpop.f32.mrf.mxu3 }
 0x6bd   : > { %v4347_v10 = vmax.f32 %v3653_v25, %v3982_v36  ;;  %v2983_v25 = vmax.f32 %v2270_v30, %v2599_v52 }
 0x6bf   : > { %4348 = vmax.xlane.f32.xlu1 %v4347_v10  ;;  %2984 = vmax.xlane.f32.xlu0 %v2983_v25 }
 0x6c1   : > { %3695 = vmatmul.bf16.gmra.mxu2 %v7318_v63  ;;  %4024 = vmatmul.bf16.gmra.mxu3 %v7318_v63 }
 0x6c2   : > { %v9512_v38 = vpop.xlane.xlu0 %2957 }
 0x6c3   : > { %10972 = vst [vmem:[#allocation79_spill] sm:$0xff] %v9512_v38 }
 0x6c4   : > { %v3656_v33 = vpop.f32.mrf.mxu2  ;;  %v3985_v37 = vpop.f32.mrf.mxu3 }
 0x6c5   : > { %v4350_v50 = vmax.f32 %v3656_v33, %v3985_v37  ;;  %v9529_v33 = vpop.xlane.xlu1 %2942 }
 0x6c6   : > { %10974 = vst [vmem:[#allocation22_spill] sm:$0xff] %v9529_v33 }
 0x6c7   : > { %4351 = vmax.xlane.f32.xlu2 %v4350_v50 }
 0x6cc   : > { %v3658_v51 = vpop.f32.mrf.mxu2  ;;  %v3987_v29 = vpop.f32.mrf.mxu3 }
 0x6cd   : > { %v4353_v21 = vmax.f32 %v3658_v51, %v3987_v29  ;;  %v10975_v29 = vld [vmem:[#allocation13_spill] sm:$0xff]  ;;  %v9540_v25 = vpop.xlane.xlu1 %2951 }
 0x6ce   : > { %v9523_v56 = vpop.xlane.xlu2 %2963  ;;  %10977 = vst [vmem:[#allocation9_spill] sm:$0xff] %v9540_v25 }
 0x6cf   : > { %4354 = vmax.xlane.f32.xlu1 %v4353_v21 }
 0x6d1   : > { %3700 = vmatmul.bf16.gmra.mxu2 %v7319_v54  ;;  %4029 = vmatmul.bf16.gmra.mxu3 %v7319_v54  ;;  %v10976_v54 = vld [vmem:[#allocation56_spill] sm:$0xff] }
 0x6d2   : > { %v9521_v48 = vpop.xlane.xlu0 %4312 }
 0x6d4   : > { %v3661_v59 = vpop.f32.mrf.mxu2  ;;  %v3990_v2 = vpop.f32.mrf.mxu3 }
 0x6d5   : > { %v4356_v14 = vmax.f32 %v3661_v59, %v3990_v2 }
 0x6d7   : > { %4357 = vmax.xlane.f32.xlu2 %v4356_v14 }
 0x6da   : > { %v9527_v36 = vpop.xlane.xlu0 %2966  ;;  %v4316_v50 = vpop.xlane.xlu2 %4315 }
 0x6db   : > { %v4543_v11 = vsel %vm4464_vm4, %v9141_v34, %v4316_v50 }
 0x6dc   : > { %v3663_v10 = vpop.f32.mrf.mxu2  ;;  %v3992_v63 = vpop.f32.mrf.mxu3  ;;  %v5439_v21 = vadd.f32 %v10975_v29, %v4543_v11 }
 0x6dd   : > { %v4359_v37 = vmax.f32 %v3663_v10, %v3992_v63 }
 0x6df   : > { %4360 = vmax.xlane.f32.xlu1 %v4359_v37  ;;  %v9542_v37 = vpop.xlane.xlu1 %4306 }
 0x6e1   : > { %3705 = vmatmul.bf16.gmra.mxu2 %v7320_v12  ;;  %4034 = vmatmul.bf16.gmra.mxu3 %v7320_v12 }
 0x6e2   : > { %v4319_v40 = vpop.xlane.xlu0 %4318 }
 0x6e3   : > { %v4544_v51 = vsel %vm4464_vm4, %v9157_v4, %v4319_v40  ;;  %v7321_v4 = vld [vmem:[%s10595_s6 + $0x1c0] sm:$0xff] }
 0x6e4   : > { %v5440_v59 = vadd.f32 %v10976_v54, %v4544_v51  ;;  %v3666_v2 = vpop.f32.mrf.mxu2  ;;  %v3995_v14 = vpop.f32.mrf.mxu3  ;;  %v7322_v54 = vld [vmem:[%s10595_s6 + $0x1c8] sm:$0xff] }
 0x6e5   : > { %v4362_v30 = vmax.f32 %v3666_v2, %v3995_v14 }
 0x6e6   : > { %v5560_v52 = vpack.c.bf16 %v5440_v59, %v5439_v21 }
 0x6e7   : > { %4363 = vmax.xlane.f32.xlu1 %v4362_v30  ;;  %v9547_v40 = vpop.xlane.xlu1 %2960 }
 0x6e8   : > { %5909 = vmatpush.bf16.msra.mxu0 %v5560_v52  ;;  %10978 = vst [vmem:[#allocation78_spill] sm:$0xff] %v9547_v40  ;;  %v9554_v52 = vpop.xlane.xlu2 %2972 }
 0x6e9   : > { %10979 = vst [vmem:[#allocation20_spill] sm:$0xff] %v9554_v52 }
 0x6ec   : > { %v3668_v34 = vpop.f32.mrf.mxu2  ;;  %v3997_v10 = vpop.f32.mrf.mxu3 }
 0x6ed   : > { %v4365_v63 = vmax.f32 %v3668_v34, %v3997_v10 }
 0x6ef   : > { %4366 = vmax.xlane.f32.xlu2 %v4365_v63  ;;  %v9552_v14 = vpop.xlane.xlu1 %4309 }
 0x6f1   : > { %3710 = vmatmul.bf16.gmra.mxu2 %v7321_v4  ;;  %4039 = vmatmul.bf16.gmra.mxu3 %v7321_v4  ;;  %v9558_v4 = vpop.xlane.xlu2 %4276 }
 0x6f2   : > { %10981 = vst [vmem:[#allocation33_spill] sm:$0xff] %v9558_v4 }
 0x6f4   : > { %v3671_v50 = vpop.f32.mrf.mxu2  ;;  %v4000_v11 = vpop.f32.mrf.mxu3 }
 0x6f5   : > { %v4368_v12 = vmax.f32 %v3671_v50, %v4000_v11  ;;  %v7323_v50 = vld [vmem:[%s10595_s6 + $0x1d0] sm:$0xff] }
 0x6f7   : > { %v9556_v63 = vpop.xlane.xlu1 %2969 }
 0x6f8   : > { %10980 = vst [vmem:[#allocation72_spill] sm:$0xff] %v9556_v63 }
 0x6fc   : > { %v3673_v51 = vpop.f32.mrf.mxu2  ;;  %v4002_v29 = vpop.f32.mrf.mxu3 }
 0x6fd   : > { %v4371_v21 = vmax.f32 %v3673_v51, %v4002_v29 }
 0x6ff   : > { %4372 = vmax.xlane.f32.xlu1 %v4371_v21  ;;  %v9563_v21 = vpop.xlane.xlu1 %4321 }
 0x700   : > { %10982 = vst [vmem:[#allocation76_spill] sm:$0xff] %v9563_v21 }
 0x701   : > { %3715 = vmatmul.bf16.gmra.mxu2 %v7322_v54  ;;  %4044 = vmatmul.bf16.gmra.mxu3 %v7322_v54  ;;  %v9565_v54 = vpop.xlane.xlu2 %4324 }
 0x702   : > { %10983 = vst [vmem:[#allocation12_spill] sm:$0xff] %v9565_v54 }
 0x704   : > { %v3676_v59 = vpop.f32.mrf.mxu2  ;;  %v4005_v2 = vpop.f32.mrf.mxu3 }
 0x705   : > { %v4374_v30 = vmax.f32 %v3676_v59, %v4005_v2 }
 0x707   : > { %4375 = vmax.xlane.f32.xlu0 %v4374_v30  ;;  %v9567_v0 = vpop.xlane.xlu1 %2978 }
 0x708   : > { %10984 = vst [vmem:[#allocation75_spill] sm:$0xff] %v9567_v0 }
 0x70c   : > { %v3678_v34 = vpop.f32.mrf.mxu2  ;;  %v4007_v10 = vpop.f32.mrf.mxu3 }
 0x711   : > { %3720 = vmatmul.bf16.gmra.mxu2 %v7323_v50  ;;  %4049 = vmatmul.bf16.gmra.mxu3 %v7323_v50 }
 0x714   : > { %v3681_v11 = vpop.f32.mrf.mxu2  ;;  %v4010_v51 = vpop.f32.mrf.mxu3 }
 0x715   : > { %v4380_v29 = vmax.f32 %v3681_v11, %v4010_v51  ;;  %v9572_v51 = vpop.xlane.xlu2 %4327 }
 0x717   : > { %4381 = vmax.xlane.f32.xlu2 %v4380_v29  ;;  %v9574_v29 = vpop.xlane.xlu1 %4330 }
 0x71c   : > { %v3683_v59 = vpop.f32.mrf.mxu2  ;;  %v4012_v2 = vpop.f32.mrf.mxu3 }
 0x71d   : > { %v4383_v30 = vmax.f32 %v3683_v59, %v4012_v2  ;;  %v4377_v59 = vmax.f32 %v3678_v34, %v4007_v10  ;;  %v9576_v20 = vpop.xlane.xlu2 %2981 }
 0x71e   : > { %10985 = vst [vmem:[#allocation59_spill] sm:$0xff] %v9576_v20 }
 0x71f   : > { %4384 = vmax.xlane.f32.xlu0 %v4383_v30 }
 0x721   : > { %3725 = vmatmul.bf16.gmra.mxu2 %v7324_v58  ;;  %4054 = vmatmul.bf16.gmra.mxu3 %v7324_v58  ;;  %v9580_v58 = vpop.xlane.xlu1 %4333 }
 0x724   : > { %v3686_v50 = vpop.f32.mrf.mxu2  ;;  %v4015_v33 = vpop.f32.mrf.mxu3 }
 0x725   : > { %v4386_v11 = vmax.f32 %v3686_v50, %v4015_v33 }
 0x727   : > { %4387 = vmax.xlane.f32.xlu2 %v4386_v11  ;;  %v9582_v11 = vpop.xlane.xlu2 %4336 }
 0x729   : > { %v9584_v35 = vpop.xlane.xlu1 %4342 }
 0x72c   : > { %v3688_v42 = vpop.f32.mrf.mxu2  ;;  %v4017_v62 = vpop.f32.mrf.mxu3 }
 0x72d   : > { %v4389_v2 = vmax.f32 %v3688_v42, %v4017_v62 }
 0x72f   : > { %4378 = vmax.xlane.f32.xlu2 %v4377_v59  ;;  %4390 = vmax.xlane.f32.xlu0 %v4389_v2 }
 0x731   : > { %3730 = vmatmul.bf16.gmra.mxu2 %v9213_v16  ;;  %4059 = vmatmul.bf16.gmra.mxu3 %v9213_v16  ;;  %v9588_v16 = vpop.xlane.xlu2 %4339 }
 0x732   : > { %v9590_v10 = vpop.xlane.xlu1 %4348 }
 0x734   : > { %v3691_v33 = vpop.f32.mrf.mxu2  ;;  %v4020_v30 = vpop.f32.mrf.mxu3 }
 0x735   : > { %v4392_v50 = vmax.f32 %v3691_v33, %v4020_v30  ;;  %v7209_v33 = vld [vmem:[%s10597_s8 + $0x4] sm:$0xf] }
 0x736   : > { %v6962_v30 = vld [vmem:[%s10597_s8 + $0x20] sm:$0xf0] }
 0x737   : > { %4369 = vmax.xlane.f32.xlu2 %v4368_v12  ;;  %4393 = vmax.xlane.f32.xlu0 %v4392_v50  ;;  %v6965_v50 = vor.u32 %v7209_v33, %v6962_v30 }
 0x739   : > { %5830 = vmatmul.bf16.vlgmr.msra.gmra.mxu1 %v6965_v50 }
 0x73c   : > { %v3693_v62 = vpop.f32.mrf.mxu2  ;;  %v4022_v42 = vpop.f32.mrf.mxu3 }
 0x73d   : > { %v4395_v34 = vmax.f32 %v3693_v62, %v4022_v42  ;;  %v9598_v62 = vpop.xlane.xlu2 %4345 }
 0x73f   : > { %4396 = vmax.xlane.f32.xlu2 %v4395_v34 }
 0x741   : > { %3735 = vmatmul.bf16.gmra.mxu2 %v9236_v55  ;;  %4064 = vmatmul.bf16.gmra.mxu3 %v9236_v55 }
 0x742   : > { %v9600_v55 = vpop.xlane.xlu1 %4354 }
 0x744   : > { %v3696_v59 = vpop.f32.mrf.mxu2  ;;  %v4025_v2 = vpop.f32.mrf.mxu3 }
 0x745   : > { %v4398_v12 = vmax.f32 %v3696_v59, %v4025_v2  ;;  %v9604_v59 = vpop.xlane.xlu2 %4351 }
 0x747   : > { %4399 = vmax.xlane.f32.xlu1 %v4398_v12 }
 0x74c   : > { %v3698_v42 = vpop.f32.mrf.mxu2  ;;  %v4027_v34 = vpop.f32.mrf.mxu3 }
 0x74d   : > { %v4401_v0 = vmax.f32 %v3698_v42, %v4027_v34  ;;  %v9608_v30 = vpop.xlane.xlu2 %4357 }
 0x74f   : > { %4402 = vmax.xlane.f32.xlu0 %v4401_v0 }
 0x751   : > { %3740 = vmatmul.bf16.gmra.mxu2 %v9285_v22  ;;  %4069 = vmatmul.bf16.gmra.mxu3 %v9285_v22 }
 0x752   : > { %v9606_v2 = vpop.xlane.xlu1 %4360 }
 0x754   : > { %v3701_v40 = vpop.f32.mrf.mxu2  ;;  %v4030_v33 = vpop.f32.mrf.mxu3 }
 0x755   : > { %v4404_v12 = vmax.f32 %v3701_v40, %v4030_v33  ;;  %v10986_v40 = vld [vmem:[#allocation2_spill] sm:$0xff]  ;;  %v10987_v33 = vld [vmem:[#allocation15_spill] sm:$0xff] }
 0x757   : > { %4405 = vmax.xlane.f32.xlu1 %v4404_v12 }
 0x75a   : > { %v4364_v3 = vpop.xlane.xlu1 %4363 }
 0x75b   : > { %v4559_v0 = vsel %vm4464_vm4, %v9325_v60, %v4364_v3 }
 0x75c   : > { %v3703_v50 = vpop.f32.mrf.mxu2  ;;  %v4032_v38 = vpop.f32.mrf.mxu3  ;;  %v5455_v34 = vadd.f32 %v10986_v40, %v4559_v0 }
 0x75d   : > { %v4407_v20 = vmax.f32 %v3703_v50, %v4032_v38 }
 0x75f   : > { %4408 = vmax.xlane.f32.xlu0 %v4407_v20 }
 0x761   : > { %3745 = vmatmul.bf16.gmra.mxu2 %v9323_v6  ;;  %4074 = vmatmul.bf16.gmra.mxu3 %v9323_v6 }
 0x762   : > { %v4367_v22 = vpop.xlane.xlu2 %4366 }
 0x763   : > { %v4560_v42 = vsel %vm4464_vm4, %v9336_v28, %v4367_v22 }
 0x764   : > { %v5456_v12 = vadd.f32 %v10987_v33, %v4560_v42  ;;  %v3706_v25 = vpop.f32.mrf.mxu2  ;;  %v4035_v21 = vpop.f32.mrf.mxu3 }
 0x765   : > { %v4410_v38 = vmax.f32 %v3706_v25, %v4035_v21 }
 0x766   : > { %v5568_v50 = vpack.c.bf16 %v5456_v12, %v5455_v34 }
 0x767   : > { %4411 = vmax.xlane.f32.xlu2 %v4410_v38 }
 0x768   : > { %5938 = vmatpush.bf16.msra.mxu1 %v5568_v50 }
 0x76c   : > { %v3708_v20 = vpop.f32.mrf.mxu2  ;;  %v4037_v60 = vpop.f32.mrf.mxu3 }
 0x76d   : > { %v4413_v3 = vmax.f32 %v3708_v20, %v4037_v60 }
 0x76f   : > { %4414 = vmax.xlane.f32.xlu0 %v4413_v3 }
 0x774   : > { %v3711_v54 = vpop.f32.mrf.mxu2  ;;  %v4040_v6 = vpop.f32.mrf.mxu3 }
 0x775   : > { %v4416_v4 = vmax.f32 %v3711_v54, %v4040_v6 }
 0x77c   : > { %v3713_v52 = vpop.f32.mrf.mxu2  ;;  %v4042_v63 = vpop.f32.mrf.mxu3 }
 0x77d   : > { %v4419_v28 = vmax.f32 %v3713_v52, %v4042_v63 }
 0x784   : > { %v3716_v22 = vpop.f32.mrf.mxu2  ;;  %v4045_v0 = vpop.f32.mrf.mxu3 }
 0x785   : > { %v4422_v40 = vmax.f32 %v3716_v22, %v4045_v0 }
 0x787   : > { %4423 = vmax.xlane.f32.xlu0 %v4422_v40 }
 0x78c   : > { %v3718_v42 = vpop.f32.mrf.mxu2  ;;  %v4047_v33 = vpop.f32.mrf.mxu3 }
 0x78d   : > { %v4425_v25 = vmax.f32 %v3718_v42, %v4047_v33 }
 0x78f   : > { %4426 = vmax.xlane.f32.xlu2 %v4425_v25 }
 0x794   : > { %v3721_v21 = vpop.f32.mrf.mxu2  ;;  %v4050_v34 = vpop.f32.mrf.mxu3 }
 0x795   : > { %v4428_v12 = vmax.f32 %v3721_v21, %v4050_v34 }
 0x797   : > { %4429 = vmax.xlane.f32.xlu1 %v4428_v12 }
 0x79c   : > { %v3723_v38 = vpop.f32.mrf.mxu2  ;;  %v4052_v50 = vpop.f32.mrf.mxu3 }
 0x79d   : > { %v4431_v20 = vmax.f32 %v3723_v38, %v4052_v50 }
 0x79f   : > { %4432 = vmax.xlane.f32.xlu0 %v4431_v20 }
 0x7a4   : > { %v3726_v54 = vpop.f32.mrf.mxu2  ;;  %v4055_v60 = vpop.f32.mrf.mxu3 }
 0x7a5   : > { %v4434_v3 = vmax.f32 %v3726_v54, %v4055_v60 }
 0x7a7   : > { %4435 = vmax.xlane.f32.xlu2 %v4434_v3 }
 0x7ac   : > { %v3728_v52 = vpop.f32.mrf.mxu2  ;;  %v4057_v63 = vpop.f32.mrf.mxu3 }
 0x7ad   : > { %v4437_v6 = vmax.f32 %v3728_v52, %v4057_v63 }
 0x7af   : > { %4438 = vmax.xlane.f32.xlu1 %v4437_v6 }
 0x7b4   : > { %v3731_v22 = vpop.f32.mrf.mxu2  ;;  %v4060_v0 = vpop.f32.mrf.mxu3 }
 0x7b5   : > { %v4440_v40 = vmax.f32 %v3731_v22, %v4060_v0 }
 0x7b7   : > { %4441 = vmax.xlane.f32.xlu1 %v4440_v40  ;;  %v9618_v40 = vpop.xlane.xlu0 %2975 }
 0x7b8   : > { %10988 = vst [vmem:[#allocation69_spill] sm:$0xff] %v9618_v40 }
 0x7bc   : > { %v3733_v42 = vpop.f32.mrf.mxu2  ;;  %v4062_v33 = vpop.f32.mrf.mxu3 }
 0x7bd   : > { %v4443_v25 = vmax.f32 %v3733_v42, %v4062_v33 }
 0x7bf   : > { %4444 = vmax.xlane.f32.xlu0 %v4443_v25 }
 0x7c4   : > { %v3736_v21 = vpop.f32.mrf.mxu2  ;;  %v4065_v34 = vpop.f32.mrf.mxu3 }
 0x7c5   : > { %v4446_v12 = vmax.f32 %v3736_v21, %v4065_v34  ;;  %v4684_v34 = vld [vmem:[%s10596_s7 + $0x2d8] sm:$0xff] }
 0x7c7   : > { %4447 = vmax.xlane.f32.xlu2 %v4446_v12  ;;  %4417 = vmax.xlane.f32.xlu0 %v4416_v4  ;;  %v4685_v4 = vld [vmem:[%s10596_s7 + $0x2e0] sm:$0xff] }
 0x7c8   : > { %v4669_v12 = vld [vmem:[%s10596_s7 + $0x260] sm:$0xff] }
 0x7cc   : > { %v3738_v38 = vpop.f32.mrf.mxu2  ;;  %v4067_v50 = vpop.f32.mrf.mxu3 }
 0x7cd   : > { %v4449_v20 = vmax.f32 %v3738_v38, %v4067_v50  ;;  %v4681_v38 = vld [vmem:[%s10596_s7 + $0x2c0] sm:$0xff] }
 0x7ce   : > { %v6992_v50 = vld [vmem:[%s10597_s8 + $0x40] sm:$0xf] }
 0x7cf   : > { %4450 = vmax.xlane.f32.xlu1 %v4449_v20  ;;  %v7221_v20 = vld [vmem:[%s10597_s8 + $0x5c] sm:$0xf0] }
 0x7d4   : > { %v3741_v54 = vpop.f32.mrf.mxu2  ;;  %v4070_v60 = vpop.f32.mrf.mxu3 }
 0x7d5   : > { %v4452_v3 = vmax.f32 %v3741_v54, %v4070_v60  ;;  %v6993_v60 = vor.u32 %v7221_v20, %v6992_v50  ;;  %v4665_v50 = vld [vmem:[%s10596_s7 + $0x240] sm:$0xff] }
 0x7d6   : > { %v7225_v20 = vld [vmem:[%s10597_s8 + $0x84] sm:$0xf] }
 0x7d7   : > { %4453 = vmax.xlane.f32.xlu2 %v4452_v3  ;;  %v4667_v3 = vld [vmem:[%s10596_s7 + $0x250] sm:$0xff]  ;;  %5806 = vmatmul.bf16.gmra.mxu0 %v6993_v60  ;;  %v7026_v60 = vld [vmem:[%s10597_s8 + $0xa0] sm:$0xf0] }
 0x7dc   : > { %v3743_v52 = vpop.f32.mrf.mxu2  ;;  %v4072_v63 = vpop.f32.mrf.mxu3 }
 0x7dd   : > { %v4455_v6 = vmax.f32 %v3743_v52, %v4072_v63  ;;  %v7217_v52 = vld [vmem:[%s10597_s8 + $0x44] sm:$0xf] }
 0x7de   : > { %v6994_v63 = vld [vmem:[%s10597_s8 + $0x60] sm:$0xf0] }
 0x7df   : > { %4420 = vmax.xlane.f32.xlu2 %v4419_v28  ;;  %4456 = vmax.xlane.f32.xlu0 %v4455_v6  ;;  %v9626_v28 = vpop.xlane.xlu0 %4273  ;;  %v6997_v6 = vor.u32 %v7217_v52, %v6994_v63  ;;  %v7029_v52 = vor.u32 %v7225_v20, %v7026_v60  ;;  %v4686_v63 = vld [vmem:[%s10596_s7 + $0x2e8] sm:$0xff]  ;;  %v4663_v60 = vld [vmem:[%s10596_s7 + $0x230] sm:$0xff] }
 0x7e0   : > { %10989 = vst [vmem:[#allocation23_spill] sm:$0xff] %v9626_v28 }
 0x7e1   : > { %5835 = vmatmul.bf16.gmra.mxu1 %v6997_v6  ;;  %v4675_v6 = vld [vmem:[%s10596_s7 + $0x290] sm:$0xff] }
 0x7e4   : > { %v3746_v22 = vpop.f32.mrf.mxu2  ;;  %v4075_v0 = vpop.f32.mrf.mxu3 }
 0x7e5   : > { %v4458_v42 = vmax.f32 %v3746_v22, %v4075_v0  ;;  %v9651_v22 = vpop.xlane.xlu2 %4381  ;;  %v4679_v0 = vld [vmem:[%s10596_s7 + $0x2b0] sm:$0xff] }
 0x7e6   : > { %10991 = vst [vmem:[#allocation73_spill] sm:$0xff] %v9651_v22 }
 0x7e7   : > { %4459 = vmax.xlane.f32.xlu2 %v4458_v42  ;;  %v9640_v54 = vpop.xlane.xlu0 %2984  ;;  %v4668_v42 = vld [vmem:[%s10596_s7 + $0x258] sm:$0xff] }
 0x7e8   : > { %5183 = vperm.xlu1 %7261, %v4685_v4   ;;  %10990 = vst [vmem:[#allocation74_spill] sm:$0xff] %v9640_v54 }
 0x7ec   : > { %v3748_v33 = vpop.f32.mrf.mxu2  ;;  %v4077_v25 = vpop.f32.mrf.mxu3 }
 0x7ed   : > { %v4461_v21 = vmax.f32 %v3748_v33, %v4077_v25  ;;  %v9661_v33 = vpop.xlane.xlu2 %4387  ;;  %v4670_v25 = vld [vmem:[%s10596_s7 + $0x268] sm:$0xff] }
 0x7ee   : > { %10993 = vst [vmem:[#allocation21_spill] sm:$0xff] %v9661_v33  ;;  %v7002_v33 = vld [vmem:[%s10597_s8 + $0x68] sm:$0xf0] }
 0x7ef   : > { %4462 = vmax.xlane.f32.xlu2 %v4461_v21  ;;  %v9659_v4 = vpop.xlane.xlu0 %4375  ;;  %v4678_v21 = vld [vmem:[%s10596_s7 + $0x2a8] sm:$0xff] }
 0x7f0   : > { %5178 = vperm.xlu1 %7261, %v4684_v34   ;;  %10992 = vst [vmem:[#allocation5_spill] sm:$0xff] %v9659_v4  ;;  %v7024_v34 = vld [vmem:[%s10597_s8 + $0x80] sm:$0xf] }
 0x7f1   : > { %5840 = vmatmul.bf16.gmra.mxu1 %v7029_v52  ;;  %v7233_v52 = vld [vmem:[%s10597_s8 + $0xc4] sm:$0xf] }
 0x7f3   : > { %5103 = vperm.xlu0 %7260, %v4669_v12   ;;  %v7229_v12 = vld [vmem:[%s10597_s8 + $0x9c] sm:$0xf0] }
 0x7f8   : > { %5163 = vperm.xlu1 %7261, %v4681_v38   ;;  %v7025_v38 = vor.u32 %v7229_v12, %v7024_v34  ;;  %v4674_v34 = vld [vmem:[%s10596_s7 + $0x288] sm:$0xff]  ;;  %v7056_v12 = vld [vmem:[%s10597_s8 + $0xc0] sm:$0xf] }
 0x7fa   : > { %5811 = vmatmul.bf16.gmra.mxu0 %v7025_v38  ;;  %v7237_v38 = vld [vmem:[%s10597_s8 + $0xdc] sm:$0xf0] }
 0x7fb   : > { %5093 = vperm.xlu0 %7260, %v4667_v3   ;;  %v9684_v3 = vpop.xlane.xlu0 %4384 }
 0x7fc   : > { %10994 = vst [vmem:[#allocation11_spill] sm:$0xff] %v9684_v3 }
 0x800   : > { %5153 = vperm.xlu1 %7261, %v4679_v0   ;;  %v9692_v0 = vpop.xlane.xlu2 %4378 }
 0x801   : > { %10995 = vst [vmem:[#allocation66_spill] sm:$0xff] %v9692_v0  ;;  %v6970_v0 = vld [vmem:[%s10597_s8 + $0x28] sm:$0xf0] }
 0x803   : > { %5098 = vperm.xlu0 %7260, %v4668_v42   ;;  %v4666_v42 = vld [vmem:[%s10596_s7 + $0x248] sm:$0xff] }
 0x807   : > { %5108 = vperm.xlu2 %7262, %v4670_v25   ;;  %v9697_v25 = vpop.xlane.xlu0 %4390 }
 0x808   : > { %5148 = vperm.xlu1 %7261, %v4678_v21   ;;  %10996 = vst [vmem:[#allocation71_spill] sm:$0xff] %v9697_v25  ;;  %v4683_v21 = vld [vmem:[%s10596_s7 + $0x2d0] sm:$0xff]  ;;  %v9711_v20 = vpop.xlane.xlu2 %4369  ;;  %v7218_v25 = vld [vmem:[%s10597_s8 + $0x4c] sm:$0xf] }
 0x809   : > { %10997 = vst [vmem:[#allocation28_spill] sm:$0xff] %v9711_v20  ;;  %v7210_v20 = vld [vmem:[%s10597_s8 + $0xc] sm:$0xf] }
 0x80a   : > { %v6973_v4 = vor.u32 %v7210_v20, %v6970_v0  ;;  %v4662_v0 = vld [vmem:[%s10596_s7 + $0x228] sm:$0xff] }
 0x80b   : > { %5083 = vperm.xlu0 %7260, %v4665_v50   ;;  %v7057_v50 = vor.u32 %v7237_v38, %v7056_v12  ;;  %v9730_v12 = vpop.xlane.xlu1 %4372  ;;  %v4664_v38 = vld [vmem:[%s10596_s7 + $0x238] sm:$0xff] }
 0x80c   : > { %10999 = vst [vmem:[#allocation31_spill] sm:$0xff] %v9730_v12 }
 0x80d   : > { %5816 = vmatmul.bf16.gmra.mxu0 %v7057_v50 }
 0x80f   : > { %5188 = vperm.xlu2 %7262, %v4686_v63   ;;  %v7058_v63 = vld [vmem:[%s10597_s8 + $0xe0] sm:$0xf0] }
 0x810   : > { %5133 = vperm.xlu1 %7261, %v4675_v6   ;;  %v7061_v6 = vor.u32 %v7233_v52, %v7058_v63  ;;  %v9735_v50 = vpop.xlane.xlu2 %4396  ;;  %v4680_v52 = vld [vmem:[%s10596_s7 + $0x2b8] sm:$0xff]  ;;  %v4701_v63 = vld [vmem:[%s10596_s7 + $0x360] sm:$0xff] }
 0x811   : > { %11000 = vst [vmem:[#allocation65_spill] sm:$0xff] %v9735_v50  ;;  %v7005_v50 = vor.u32 %v7218_v25, %v7002_v33  ;;  %v4660_v33 = vld [vmem:[%s10596_s7 + $0x218] sm:$0xff] }
 0x812   : > { %5845 = vmatmul.bf16.gmra.mxu1 %v7061_v6  ;;  %v6968_v6 = vld [vmem:[%s10597_s8 + $0x8] sm:$0xf] }
 0x813   : > { %5088 = vperm.xlu0 %7260, %v4666_v42   ;;  %v9722_v42 = vpop.xlane.xlu0 %4393  ;;  %v9751_v12 = vpop.xlane.xlu1 %4399 }
 0x814   : > { %10998 = vst [vmem:[#allocation70_spill] sm:$0xff] %v9722_v42 }
 0x815   : > { %11002 = vst [vmem:[#allocation68_spill] sm:$0xff] %v9751_v12  ;;  %v7226_v12 = vld [vmem:[%s10597_s8 + $0x8c] sm:$0xf] }
 0x817   : > { %5173 = vperm.xlu2 %7262, %v4683_v21   ;;  %v4682_v21 = vld [vmem:[%s10596_s7 + $0x2c8] sm:$0xff] }
 0x818   : > { %5128 = vperm.xlu1 %7261, %v4674_v34   ;;  %v4704_v34 = vld [vmem:[%s10596_s7 + $0x378] sm:$0xff]  ;;  %v9762_v22 = vpop.xlane.xlu2 %4411 }
 0x81b   : > { %5073 = vperm.xlu0 %7260, %v4663_v60   ;;  %v9737_v60 = vpop.xlane.xlu0 %4402 }
 0x81c   : > { %11001 = vst [vmem:[#allocation47_spill] sm:$0xff] %v9737_v60  ;;  %v7034_v60 = vld [vmem:[%s10597_s8 + $0xa8] sm:$0xf0] }
 0x81d   : > { %v7037_v40 = vor.u32 %v7226_v12, %v7034_v60  ;;  %v4658_v12 = vld [vmem:[%s10596_s7 + $0x208] sm:$0xff] }
 0x81f   : > { %5168 = vperm.xlu2 %7262, %v4682_v21   ;;  %v7214_v21 = vld [vmem:[%s10597_s8 + $0x24] sm:$0xf0] }
 0x820   : > { %5278 = vperm.xlu1 %7261, %v4704_v34   ;;  %v6969_v34 = vor.u32 %v7214_v21, %v6968_v6  ;;  %v4700_v6 = vld [vmem:[%s10596_s7 + $0x358] sm:$0xff]  ;;  %v9772_v21 = vpop.xlane.xlu1 %4405  ;;  %v9777_v20 = vpop.xlane.xlu2 %4426 }
 0x821   : > { %11003 = vst [vmem:[#allocation55_spill] sm:$0xff] %v9777_v20 }
 0x822   : > { %5859 = vmatmul.bf16.vlgmr.msrb.gmra.mxu0 %v6969_v34  ;;  %5888 = vmatmul.bf16.vlgmr.msrb.gmra.mxu1 %v6973_v4  ;;  %v4676_v4 = vld [vmem:[%s10596_s7 + $0x298] sm:$0xff] }
 0x823   : > { %5078 = vperm.xlu0 %7260, %v4664_v38   ;;  %v4661_v38 = vld [vmem:[%s10596_s7 + $0x220] sm:$0xff] }
 0x827   : > { %5158 = vperm.xlu2 %7262, %v4680_v52   ;;  %v9764_v52 = vpop.xlane.xlu0 %4408 }
 0x828   : > { %5263 = vperm.xlu1 %7261, %v4701_v63   ;;  %v4677_v63 = vld [vmem:[%s10596_s7 + $0x2a0] sm:$0xff]  ;;  %v9793_v3 = vpop.xlane.xlu1 %4429  ;;  %v9804_v42 = vpop.xlane.xlu2 %4435 }
 0x829   : > { %11004 = vst [vmem:[#allocation67_spill] sm:$0xff] %v9793_v3 }
 0x82a   : > { %11005 = vst [vmem:[#allocation44_spill] sm:$0xff] %v9804_v42 }
 0x82b   : > { %5063 = vperm.xlu0 %7260, %v4661_v38   ;;  %v4715_v38 = vld [vmem:[%s10596_s7 + $0x3d0] sm:$0xff] }
 0x82f   : > { %5143 = vperm.xlu2 %7262, %v4677_v63   ;;  %v9779_v34 = vpop.xlane.xlu0 %4414  ;;  %v7000_v63 = vld [vmem:[%s10597_s8 + $0x48] sm:$0xf] }
 0x830   : > { %5258 = vperm.xlu1 %7261, %v4700_v6   ;;  %v7222_v6 = vld [vmem:[%s10597_s8 + $0x64] sm:$0xf0] }
 0x831   : > { %v7001_v20 = vor.u32 %v7222_v6, %v7000_v63  ;;  %v4713_v63 = vld [vmem:[%s10596_s7 + $0x3c0] sm:$0xff]  ;;  %v9814_v6 = vpop.xlane.xlu1 %4438 }
 0x832   : > { %5893 = vmatmul.bf16.gmra.mxu1 %v7005_v50  ;;  %11007 = vst [vmem:[#allocation10_spill] sm:$0xff] %v9814_v6  ;;  %v4719_v50 = vld [vmem:[%s10596_s7 + $0x3f0] sm:$0xff] }
 0x833   : > { %5068 = vperm.xlu0 %7260, %v4662_v0   ;;  %v4659_v0 = vld [vmem:[%s10596_s7 + $0x210] sm:$0xff]  ;;  %5864 = vmatmul.bf16.gmra.mxu0 %v7001_v20 }
 0x837   : > { %5138 = vperm.xlu2 %7262, %v4676_v4   ;;  %v9806_v4 = vpop.xlane.xlu0 %4423 }
 0x838   : > { %5333 = vperm.xlu1 %7261, %v4715_v38   ;;  %11006 = vst [vmem:[#allocation45_spill] sm:$0xff] %v9806_v4  ;;  %v4703_v38 = vld [vmem:[%s10596_s7 + $0x370] sm:$0xff] }
 0x839   : > { %v9844_v6 = vpop.xlane.xlu1 %4441 }
 0x83a   : > { %v9819_v25 = vpop.xlane.xlu2 %4447 }
 0x83b   : > { %5053 = vperm.xlu0 %7260, %v4659_v0   ;;  %11008 = vst [vmem:[#allocation29_spill] sm:$0xff] %v9819_v25  ;;  %v4714_v0 = vld [vmem:[%s10596_s7 + $0x3c8] sm:$0xff] }
 0x83f   : > { %5273 = vperm.xlu2 %7262, %v4703_v38   ;;  %v9821_v20 = vpop.xlane.xlu0 %4432  ;;  %v7032_v38 = vld [vmem:[%s10597_s8 + $0x88] sm:$0xf] }
 0x840   : > { %5323 = vperm.xlu1 %7261, %v4713_v63   ;;  %11009 = vst [vmem:[#allocation58_spill] sm:$0xff] %v9821_v20  ;;  %v7230_v63 = vld [vmem:[%s10597_s8 + $0xa4] sm:$0xf0] }
 0x841   : > { %v7033_v4 = vor.u32 %v7230_v63, %v7032_v38  ;;  %v4711_v38 = vld [vmem:[%s10596_s7 + $0x3b0] sm:$0xff] }
 0x842   : > { %5898 = vmatmul.bf16.gmra.mxu1 %v7037_v40  ;;  %v9859_v60 = vpop.xlane.xlu1 %4450  ;;  %v4717_v40 = vld [vmem:[%s10596_s7 + $0x3e0] sm:$0xff] }
 0x843   : > { %5058 = vperm.xlu0 %7260, %v4660_v33   ;;  %v4657_v33 = vld [vmem:[%s10596_s7 + $0x200] sm:$0xff]  ;;  %5869 = vmatmul.bf16.gmra.mxu0 %v7033_v4  ;;  %11011 = vst [vmem:[#allocation42_spill] sm:$0xff] %v9859_v60 }
 0x847   : > { %5353 = vperm.xlu2 %7262, %v4719_v50   ;;  %v9848_v50 = vpop.xlane.xlu0 %4444 }
 0x848   : > { %5328 = vperm.xlu1 %7261, %v4714_v0   ;;  %v4702_v0 = vld [vmem:[%s10596_s7 + $0x368] sm:$0xff] }
 0x84a   : > { %v9846_v42 = vpop.xlane.xlu2 %4453 }
 0x84b   : > { %11010 = vst [vmem:[#allocation25_spill] sm:$0xff] %v9846_v42  ;;  %5043 = vperm.xlu0 %7260, %v4657_v33   ;;  %v4709_v33 = vld [vmem:[%s10596_s7 + $0x3a0] sm:$0xff]  ;;  %v7066_v42 = vld [vmem:[%s10597_s8 + $0xe8] sm:$0xf0] }
 0x84f   : > { %5268 = vperm.xlu2 %7262, %v4702_v0   ;;  %v9866_v63 = vpop.xlane.xlu0 %4417  ;;  %v7064_v0 = vld [vmem:[%s10597_s8 + $0xc8] sm:$0xf] }
 0x850   : > { %5313 = vperm.xlu1 %7261, %v4711_v38   ;;  %11013 = vst [vmem:[#allocation88_spill] sm:$0xff] %v9866_v63  ;;  %v7238_v38 = vld [vmem:[%s10597_s8 + $0xe4] sm:$0xf0]  ;;  %v7234_v63 = vld [vmem:[%s10597_s8 + $0xcc] sm:$0xf] }
 0x851   : > { %v7069_v54 = vor.u32 %v7234_v63, %v7066_v42  ;;  %v4720_v42 = vld [vmem:[%s10596_s7 + $0x3f8] sm:$0xff] }
 0x852   : > { %v9861_v4 = vpop.xlane.xlu2 %4420 }
 0x853   : > { %11012 = vst [vmem:[#allocation32_spill] sm:$0xff] %v9861_v4  ;;  %5048 = vperm.xlu0 %7260, %v4658_v12   ;;  %v7065_v12 = vor.u32 %v7238_v38, %v7064_v0  ;;  %v4673_v4 = vld [vmem:[%s10596_s7 + $0x280] sm:$0xff]  ;;  %5903 = vmatmul.bf16.gmra.mxu1 %v7069_v54  ;;  %v4710_v0 = vld [vmem:[%s10596_s7 + $0x3a8] sm:$0xff] }
 0x854   : > { %v4697_v54 = vld [vmem:[%s10596_s7 + $0x340] sm:$0xff] }
 0x855   : > { %5874 = vmatmul.bf16.gmra.mxu0 %v7065_v12  ;;  %v4691_v12 = vld [vmem:[%s10596_s7 + $0x310] sm:$0xff] }
 0x857   : > { %5343 = vperm.xlu2 %7262, %v4717_v40   ;;  %v4716_v40 = vld [vmem:[%s10596_s7 + $0x3d8] sm:$0xff] }
 0x858   : > { %5303 = vperm.xlu1 %7261, %v4709_v33   ;;  %v9891_v33 = vpop.xlane.xlu0 %4456 }
 0x859   : > { %11015 = vst [vmem:[#allocation86_spill] sm:$0xff] %v9891_v33  ;;  %v9912_v33 = vpop.f32.mrf.mxu1 }
 0x85a   : > { %v5184_v20 = vpop.permute.xlu1 %5183  ;;  %v9886_v3 = vpop.xlane.xlu2 %4459  ;;  %11018 = vst [vmem:[#allocation39_spill] sm:$0xff] %v9912_v33  ;;  %v4689_v33 = vld [vmem:[%s10596_s7 + $0x300] sm:$0xff] }
 0x85b   : > { %11014 = vst [vmem:[#allocation48_spill] sm:$0xff] %v9886_v3  ;;  %5123 = vperm.xlu0 %7260, %v4673_v4   ;;  %v4542_v3 = vsel %vm4464_vm4, %v9155_v23, %v9521_v48  ;;  %v4557_v48 = vsel %vm4464_vm4, %v9297_v41, %v9608_v30  ;;  %v4539_v41 = vsel %vm4464_vm4, %v9137_v61, %v9497_v31  ;;  %v4698_v61 = vld [vmem:[%s10596_s7 + $0x348] sm:$0xff] }
 0x85c   : > { %v4556_v31 = vsel %vm4464_vm4, %v9291_v1, %v9600_v55  ;;  %v5591_v1 = vld [vmem:[%s10598_s9 + $0x30] sm:$0xff] }
 0x85f   : > { %5338 = vperm.xlu2 %7262, %v4716_v40   ;;  %v9907_v40 = vpop.f32.mrf.mxu0 }
 0x860   : > { %5308 = vperm.xlu1 %7261, %v4710_v0   ;;  %11017 = vst [vmem:[#allocation89_spill] sm:$0xff] %v9907_v40  ;;  %v4718_v0 = vld [vmem:[%s10596_s7 + $0x3e8] sm:$0xff] }
 0x862   : > { %v5179_v63 = vpop.permute.xlu1 %5178  ;;  %v9899_v38 = vpop.xlane.xlu2 %4462 }
 0x863   : > { %11016 = vst [vmem:[#allocation34_spill] sm:$0xff] %v9899_v38  ;;  %5358 = vperm.xlu0 %7260, %v4720_v42   ;;  %v4541_v42 = vsel %vm4464_vm4, %v9139_v17, %v9552_v14  ;;  %v4699_v17 = vld [vmem:[%s10596_s7 + $0x350] sm:$0xff] }
 0x865   : > { %v5104_v4 = vpop.permute.xlu0 %5103 }
 0x867   : > { %5243 = vperm.xlu2 %7262, %v4697_v54   ;;  %v5437_v54 = vadd.f32 %v5104_v4, %v4541_v42  ;;  %v9929_v23 = vpop.f32.mrf.mxu0 }
 0x868   : > { %5213 = vperm.xlu1 %7261, %v4691_v12   ;;  %v4695_v12 = vld [vmem:[%s10596_s7 + $0x330] sm:$0xff] }
 0x86a   : > { %v5164_v38 = vpop.permute.xlu1 %5163  ;;  %v5109_v28 = vpop.permute.xlu2 %5108 }
 0x86b   : > { %v5438_v60 = vadd.f32 %v5109_v28, %v4542_v3  ;;  %5348 = vperm.xlu0 %7260, %v4718_v0   ;;  %v4558_v28 = vsel %vm4464_vm4, %v9353_v15, %v9606_v2  ;;  %v4540_v0 = vsel %vm4464_vm4, %v9132_v9, %v9542_v37  ;;  %v4705_v2 = vld [vmem:[%s10596_s7 + $0x380] sm:$0xff]  ;;  %v4555_v37 = vsel %vm4464_vm4, %v9345_v18, %v9604_v59  ;;  %v4696_v18 = vld [vmem:[%s10596_s7 + $0x338] sm:$0xff] }
 0x86c   : > { %v4553_v59 = vsel %vm4464_vm4, %v9208_v45, %v9598_v62  ;;  %v4538_v45 = vsel %vm4464_vm4, %v9052_v5, %v9493_v32  ;;  %v4551_v5 = vsel %vm4464_vm4, %v9206_v7, %v9588_v16  ;;  %v5590_v7 = vld [vmem:[%s10598_s9 + $0x28] sm:$0xff] }
 0x86d   : > { %v5559_v40 = vpack.c.bf16 %v5438_v60, %v5437_v54  ;;  %v5094_v25 = vpop.permute.xlu0 %5093  ;;  %v5453_v60 = vadd.f32 %v5184_v20, %v4557_v48 }
 0x86e   : > { %v5435_v20 = vadd.f32 %v5094_v25, %v4539_v41  ;;  %v5452_v25 = vadd.f32 %v5179_v63, %v4556_v31  ;;  %v5449_v41 = vadd.f32 %v5164_v38, %v4553_v59 }
 0x86f   : > { %5233 = vperm.xlu2 %7262, %v4695_v12   ;;  %5910 = vmatpush.bf16.msra.mxu0 %v5559_v40  ;;  %v4712_v40 = vld [vmem:[%s10596_s7 + $0x3b8] sm:$0xff]  ;;  %v9962_v48 = vpop.f32.mrf.mxu0 }
 0x870   : > { %5203 = vperm.xlu1 %7261, %v4689_v33   ;;  %v9939_v33 = vpop.f32.mrf.mxu1 }
 0x872   : > { %v9934_v14 = vpop.permute.xlu1 %5153  ;;  %v5189_v3 = vpop.permute.xlu2 %5188 }
 0x873   : > { %v5454_v4 = vadd.f32 %v5189_v3, %v4558_v28  ;;  %5253 = vperm.xlu0 %7260, %v4699_v17   ;;  %v4694_v28 = vld [vmem:[%s10596_s7 + $0x328] sm:$0xff]  ;;  %v5447_v31 = vadd.f32 %v9934_v14, %v4551_v5  ;;  %v11019_v14 = vld [vmem:[#allocation60_spill] sm:$0xff] }
 0x875   : > { %v5567_v30 = vpack.c.bf16 %v5454_v4, %v5453_v60  ;;  %v5099_v15 = vpop.permute.xlu0 %5098  ;;  %v4554_v4 = vsel %vm4464_vm4, %v9259_v46, %v9590_v10  ;;  %v5592_v46 = vld [vmem:[%s10598_s9 + $0x38] sm:$0xff] }
 0x876   : > { %v5436_v42 = vadd.f32 %v5099_v15, %v4540_v0  ;;  %v4707_v0 = vld [vmem:[%s10596_s7 + $0x390] sm:$0xff]  ;;  %v4537_v15 = vsel %vm4464_vm4, %v9048_v43, %v9501_v27  ;;  %v4693_v43 = vld [vmem:[%s10596_s7 + $0x320] sm:$0xff]  ;;  %v4552_v27 = vsel %vm4464_vm4, %v9204_v39, %v9584_v35  ;;  %v4692_v39 = vld [vmem:[%s10596_s7 + $0x318] sm:$0xff] }
 0x877   : > { %5318 = vperm.xlu2 %7262, %v4712_v40   ;;  %5939 = vmatpush.bf16.msra.mxu1 %v5567_v30  ;;  %v9995_v10 = vpop.f32.mrf.mxu0 }
 0x878   : > { %v5558_v54 = vpack.c.bf16 %v5436_v42, %v5435_v20  ;;  %5283 = vperm.xlu1 %7261, %v4705_v2   ;;  %v9970_v55 = vpop.f32.mrf.mxu1 }
 0x87a   : > { %v5149_v9 = vpop.permute.xlu1 %5148  ;;  %v5174_v12 = vpop.permute.xlu2 %5173  ;;  %5911 = vmatpush.bf16.msra.mxu0 %v5558_v54 }
 0x87b   : > { %v5451_v17 = vadd.f32 %v5174_v12, %v4555_v37  ;;  %5248 = vperm.xlu0 %7260, %v4698_v61   ;;  %v4706_v12 = vld [vmem:[%s10596_s7 + $0x388] sm:$0xff] }
 0x87d   : > { %v5566_v3 = vpack.c.bf16 %v5452_v25, %v5451_v17  ;;  %v5084_v60 = vpop.permute.xlu0 %5083 }
 0x87e   : > { %v5433_v38 = vadd.f32 %v5084_v60, %v4537_v15  ;;  %v11020_v60 = vld [vmem:[#allocation35_spill] sm:$0xff] }
 0x87f   : > { %5228 = vperm.xlu2 %7262, %v4694_v28   ;;  %5940 = vmatpush.bf16.msra.mxu1 %v5566_v3  ;;  %v10017_v16 = vpop.f32.mrf.mxu0  ;;  %v4550_v28 = vsel %vm4464_vm4, %v11019_v14, %v9582_v11  ;;  %v11022_v11 = vld [vmem:[#allocation90_spill] sm:$0xff] }
 0x880   : > { %5625 = vperm.xlu1 %7261, %v5591_v1   ;;  %v9997_v42 = vpop.f32.mrf.mxu1  ;;  %v4549_v1 = vsel %vm4464_vm4, %v11020_v60, %v9580_v58  ;;  %v5446_v59 = vadd.f32 %v5149_v9, %v4550_v28  ;;  %v4536_v15 = vsel %vm4464_vm4, %v11022_v11, %v9482_v8  ;;  %v5585_v58 = vld [vmem:[%s10598_s9] sm:$0xff] }
 0x882   : > { %v9978_v63 = vpop.permute.xlu1 %5133  ;;  %v5169_v40 = vpop.permute.xlu2 %5168 }
 0x883   : > { %v5450_v30 = vadd.f32 %v5169_v40, %v4554_v4  ;;  %5238 = vperm.xlu0 %7260, %v4696_v18   ;;  %v5587_v40 = vld [vmem:[%s10598_s9 + $0x10] sm:$0xff] }
 0x885   : > { %v5565_v2 = vpack.c.bf16 %v5450_v30, %v5449_v41  ;;  %v5089_v62 = vpop.permute.xlu0 %5088  ;;  %v11021_v41 = vld [vmem:[#allocation50_spill] sm:$0xff] }
 0x886   : > { %v5434_v20 = vadd.f32 %v5089_v62, %v4538_v45  ;;  %v4535_v30 = vsel %vm4464_vm4, %v11021_v41, %v9488_v44  ;;  %v4708_v44 = vld [vmem:[%s10596_s7 + $0x398] sm:$0xff] }
 0x887   : > { %5293 = vperm.xlu2 %7262, %v4707_v0   ;;  %5941 = vmatpush.bf16.msra.mxu1 %v5565_v2 }
 0x888   : > { %v5557_v54 = vpack.c.bf16 %v5434_v20, %v5433_v38  ;;  %5630 = vperm.xlu1 %7261, %v5592_v46   ;;  %v10022_v35 = vpop.f32.mrf.mxu1  ;;  %v10045_v46 = vpop.f32.mrf.mxu0  ;;  %v11023_v38 = vld [vmem:[#allocation24_spill] sm:$0xff] }
 0x889   : > { %v4547_v8 = vsel %vm4464_vm4, %v11023_v38, %v9572_v51  ;;  %v6052_v51 = vld [vmem:[%s10600_s11 + $0x30] sm:$0xff] }
 0x88a   : > { %v10005_v32 = vpop.permute.xlu1 %5128  ;;  %v5159_v61 = vpop.permute.xlu2 %5158  ;;  %5912 = vmatpush.bf16.msra.mxu0 %v5557_v54  ;;  %v11024_v54 = vld [vmem:[#allocation30_spill] sm:$0xff] }
 0x88b   : > { %v5448_v37 = vadd.f32 %v5159_v61, %v4552_v27  ;;  %5223 = vperm.xlu0 %7260, %v4693_v43   ;;  %v4548_v43 = vsel %vm4464_vm4, %v11024_v54, %v9574_v29  ;;  %v5443_v27 = vadd.f32 %v9978_v63, %v4547_v8  ;;  %v4690_v29 = vld [vmem:[%s10596_s7 + $0x308] sm:$0xff]  ;;  %v4576_v63 = vsel %vm4464_vm4, %v9477_v24, %v9779_v34 }
 0x88c   : > { %v11025_v24 = vld [vmem:[#allocation54_spill] sm:$0xff]  ;;  %v4574_v8 = vsel %vm4464_vm4, %v9455_v57, %v9764_v52 }
 0x88d   : > { %v5564_v25 = vpack.c.bf16 %v5448_v37, %v5447_v31  ;;  %v5074_v17 = vpop.permute.xlu0 %5073  ;;  %v5586_v37 = vld [vmem:[%s10598_s9 + $0x8] sm:$0xff]  ;;  %v4533_v34 = vsel %vm4464_vm4, %v11025_v24, %v9470_v49  ;;  %v5589_v49 = vld [vmem:[%s10598_s9 + $0x20] sm:$0xff] }
 0x88e   : > { %v5431_v9 = vadd.f32 %v5074_v17, %v4535_v30 }
 0x88f   : > { %5288 = vperm.xlu2 %7262, %v4706_v12   ;;  %5942 = vmatpush.bf16.msra.mxu1 %v5564_v25 }
 0x890   : > { %5620 = vperm.xlu1 %7261, %v5590_v7   ;;  %v10054_v31 = vpop.f32.mrf.mxu1  ;;  %v4575_v7 = vsel %vm4464_vm4, %v9516_v53, %v9762_v22  ;;  %v10077_v60 = vpop.f32.mrf.mxu0  ;;  %v11026_v53 = vld [vmem:[#allocation38_spill] sm:$0xff] }
 0x891   : > { %v4534_v22 = vsel %vm4464_vm4, %v11026_v53, %v9484_v19  ;;  %v6048_v19 = vld [vmem:[%s10600_s11 + $0x10] sm:$0xff]  ;;  %v11029_v53 = vld [vmem:[#allocation29_spill] sm:$0xff] }
 0x892   : > { %v5279_v3 = vpop.permute.xlu1 %5278  ;;  %v5144_v18 = vpop.permute.xlu2 %5143 }
 0x893   : > { %v5445_v4 = vadd.f32 %v5144_v18, %v4549_v1  ;;  %5218 = vperm.xlu0 %7260, %v4692_v39   ;;  %v10073_v14 = vadd.f32 %v5279_v3, %v4576_v63  ;;  %v6053_v1 = vld [vmem:[%s10600_s11 + $0x38] sm:$0xff] }
 0x895   : > { %v5563_v0 = vpack.c.bf16 %v5446_v59, %v5445_v4  ;;  %v5079_v2 = vpop.permute.xlu0 %5078  ;;  %v6051_v59 = vld [vmem:[%s10600_s11 + $0x28] sm:$0xff] }
 0x896   : > { %v5432_v45 = vadd.f32 %v5079_v2, %v4536_v15  ;;  %v6046_v2 = vld [vmem:[%s10600_s11] sm:$0xff] }
 0x897   : > { %5605 = vperm.xlu2 %7262, %v5587_v40   ;;  %5943 = vmatpush.bf16.msra.mxu1 %v5563_v0 }
 0x898   : > { %v5556_v62 = vpack.c.bf16 %v5432_v45, %v5431_v9  ;;  %5595 = vperm.xlu1 %7261, %v5585_v58   ;;  %v10093_v4 = vpop.f32.mrf.mxu1  ;;  %v10106_v58 = vpop.f32.mrf.mxu0  ;;  %v5588_v45 = vld [vmem:[%s10598_s9 + $0x18] sm:$0xff] }
 0x89a   : > { %v5264_v20 = vpop.permute.xlu1 %5263  ;;  %v5139_v5 = vpop.permute.xlu2 %5138  ;;  %5913 = vmatpush.bf16.msra.mxu0 %v5556_v62  ;;  %v4573_v62 = vsel %vm4464_vm4, %v9468_v26, %v9772_v21  ;;  %v11028_v26 = vld [vmem:[#allocation27_spill] sm:$0xff] }
 0x89b   : > { %v5444_v61 = vadd.f32 %v5139_v5, %v4548_v43  ;;  %5298 = vperm.xlu0 %7260, %v4708_v44   ;;  %v5469_v54 = vadd.f32 %v5264_v20, %v4573_v62  ;;  %v6047_v5 = vld [vmem:[%s10600_s11 + $0x8] sm:$0xff]  ;;  %v4532_v21 = vsel %vm4464_vm4, %v11028_v26, %v9525_v13  ;;  %v6054_v20 = vld [vmem:[%s10600_s11 + $0x40] sm:$0xff]  ;;  %v4586_v13 = vsel %vm4464_vm4, %v9527_v36, %v9848_v50  ;;  %v11030_v36 = vld [vmem:[#allocation72_spill] sm:$0xff] }
 0x89c   : > { %v4587_v50 = vsel %vm4464_vm4, %v11030_v36, %v11029_v53  ;;  %v6049_v26 = vld [vmem:[%s10600_s11 + $0x18] sm:$0xff] }
 0x89d   : > { %v5562_v12 = vpack.c.bf16 %v5444_v61, %v5443_v27  ;;  %v5064_v25 = vpop.permute.xlu0 %5063  ;;  %v11027_v27 = vld [vmem:[#allocation53_spill] sm:$0xff] }
 0x89e   : > { %v5429_v40 = vadd.f32 %v5064_v25, %v4533_v34  ;;  %v4531_v61 = vsel %vm4464_vm4, %v11027_v27, %v9466_v47  ;;  %v4585_v47 = vsel %vm4464_vm4, %v9523_v56, %v9844_v6  ;;  %v6050_v56 = vld [vmem:[%s10600_s11 + $0x20] sm:$0xff]  ;;  %v7215_v27 = vld [vmem:[%s10597_s8 + $0x2c] sm:$0xf0] }
 0x89f   : > { %5600 = vperm.xlu2 %7262, %v5586_v37   ;;  %5944 = vmatpush.bf16.msra.mxu1 %v5562_v12 }
 0x8a0   : > { %6087 = vperm.xlu1 %7261, %v6052_v51   ;;  %v10108_v9 = vpop.f32.mrf.mxu1  ;;  %v10128_v57 = vpop.f32.mrf.mxu0 }
 0x8a2   : > { %v10068_v17 = vpop.permute.xlu1 %5258  ;;  %v5274_v39 = vpop.permute.xlu2 %5273 }
 0x8a3   : > { %v10075_v28 = vadd.f32 %v5274_v39, %v4575_v7  ;;  %5208 = vperm.xlu0 %7260, %v4690_v29  }
 0x8a5   : > { %v5576_v18 = vpack.c.bf16 %v10073_v14, %v10075_v28  ;;  %v5069_v3 = vpop.permute.xlu0 %5068  ;;  %v7211_v14 = vld [vmem:[%s10597_s8 + $0x14] sm:$0xf] }
 0x8a6   : > { %v5430_v41 = vadd.f32 %v5069_v3, %v4534_v22  ;;  %v11031_v3 = vld [vmem:[#allocation42_spill] sm:$0xff]  ;;  %v6978_v28 = vld [vmem:[%s10597_s8 + $0x30] sm:$0xf0] }
 0x8a7   : > { %6092 = vperm.xlu2 %7262, %v6053_v1  }
 0x8a8   : > { %v5555_v30 = vpack.c.bf16 %v5430_v41, %v5429_v40  ;;  %6082 = vperm.xlu1 %7261, %v6051_v59   ;;  %v10133_v29 = vpop.f32.mrf.mxu1  ;;  %v10152_v6 = vpop.f32.mrf.mxu0  ;;  %v11032_v59 = vld [vmem:[#allocation20_spill] sm:$0xff] }
 0x8a9   : > { %v4588_v40 = vsel %vm4464_vm4, %v11032_v59, %v11031_v3  ;;  %v6981_v3 = vor.u32 %v7211_v14, %v6978_v28  ;;  %v11041_v59 = vld [vmem:[#allocation67_spill] sm:$0xff]  ;;  %v11052_v28 = vld [vmem:[#allocation78_spill] sm:$0xff] }
 0x8aa   : > { %v5334_v0 = vpop.permute.xlu1 %5333  ;;  %v10098_v11 = vpop.permute.xlu2 %5353  ;;  %5914 = vmatpush.bf16.msra.mxu0 %v5555_v30 }
 0x8ab   : > { %5615 = vperm.xlu0 %7260, %v5589_v49   ;;  %v10160_v30 = vadd.f32 %v5334_v0, %v4587_v50 }
 0x8ad   : > { %v5054_v15 = vpop.permute.xlu0 %5053 }
 0x8ae   : > { %v5427_v25 = vadd.f32 %v5054_v15, %v4531_v61  ;;  %v11033_v15 = vld [vmem:[#allocation23_spill] sm:$0xff] }
 0x8af   : > { %6067 = vperm.xlu2 %7262, %v6048_v19  }
 0x8b0   : > { %6057 = vperm.xlu1 %7261, %v6046_v2   ;;  %v10164_v19 = vpop.f32.mrf.mxu1  ;;  %v11034_v2 = vld [vmem:[#allocation7_spill] sm:$0xff] }
 0x8b2   : > { %v5324_v44 = vpop.permute.xlu1 %5323  ;;  %v5269_v38 = vpop.permute.xlu2 %5268 }
 0x8b3   : > { %v5470_v43 = vadd.f32 %v5269_v38, %v4574_v8  ;;  %5610 = vperm.xlu0 %7260, %v5588_v45   ;;  %v10143_v39 = vadd.f32 %v5324_v44, %v4585_v47  ;;  %v4529_v45 = vsel %vm4464_vm4, %v11034_v2, %v11033_v15  ;;  %v11035_v44 = vld [vmem:[#allocation33_spill] sm:$0xff]  ;;  %v11036_v38 = vld [vmem:[#allocation19_spill] sm:$0xff]  ;;  %v11043_v2 = vld [vmem:[#allocation58_spill] sm:$0xff] }
 0x8b4   : > { %v4530_v8 = vsel %vm4464_vm4, %v11036_v38, %v11035_v44 }
 0x8b5   : > { %v5575_v37 = vpack.c.bf16 %v5470_v43, %v5469_v54  ;;  %v5059_v12 = vpop.permute.xlu0 %5058 }
 0x8b6   : > { %v5428_v51 = vadd.f32 %v5059_v12, %v4532_v21 }
 0x8b7   : > { %6062 = vperm.xlu2 %7262, %v6047_v5   ;;  %v6976_v5 = vld [vmem:[%s10597_s8 + $0x10] sm:$0xf] }
 0x8b8   : > { %v5554_v52 = vpack.c.bf16 %v5428_v51, %v5427_v25  ;;  %v6977_v21 = vor.u32 %v7215_v27, %v6976_v5  ;;  %v10188_v51 = vpop.f32.mrf.mxu0  ;;  %v10196_v53 = vpop.f32.mrf.mxu1  ;;  %v11047_v5 = vld [vmem:[#allocation34_spill] sm:$0xff] }
 0x8b9   : > { %v11048_v27 = vld [vmem:[#allocation74_spill] sm:$0xff] }
 0x8ba   : > { %v5329_v63 = vpop.permute.xlu1 %5328  ;;  %v10141_v7 = vpop.permute.xlu2 %5343  ;;  %5915 = vmatpush.bf16.msra.mxu0 %v5554_v52  ;;  %v11037_v52 = vld [vmem:[#allocation12_spill] sm:$0xff] }
 0x8bb   : > { %v10145_v1 = vadd.f32 %v5329_v63, %v4586_v13  ;;  %6097 = vperm.xlu0 %7260, %v6054_v20   ;;  %v11038_v20 = vld [vmem:[#allocation49_spill] sm:$0xff]  ;;  %v11039_v63 = vld [vmem:[#allocation76_spill] sm:$0xff] }
 0x8bc   : > { %v4546_v47 = vsel %vm4464_vm4, %v11038_v20, %v11037_v52  ;;  %v11040_v13 = vld [vmem:[#allocation16_spill] sm:$0xff]  ;;  %v7008_v20 = vld [vmem:[%s10597_s8 + $0x50] sm:$0xf] }
 0x8bd   : > { %v5581_v24 = vpack.c.bf16 %v10145_v1, %v10143_v39  ;;  %v5044_v34 = vpop.permute.xlu0 %5043  ;;  %v5442_v36 = vadd.f32 %v10005_v32, %v4546_v47  ;;  %v7223_v47 = vld [vmem:[%s10597_s8 + $0x6c] sm:$0xf0]  ;;  %v7227_v39 = vld [vmem:[%s10597_s8 + $0x94] sm:$0xf] }
 0x8be   : > { %v5425_v43 = vadd.f32 %v5044_v34, %v4529_v45  ;;  %v4545_v34 = vsel %vm4464_vm4, %v11040_v13, %v11039_v63  ;;  %v11044_v45 = vld [vmem:[#allocation82_spill] sm:$0xff]  ;;  %v7042_v1 = vld [vmem:[%s10597_s8 + $0xb0] sm:$0xf0] }
 0x8bf   : > { %v4582_v32 = vsel %vm4464_vm4, %v11044_v45, %v11043_v2 }
 0x8c0   : > { %v10234_v63 = vpop.f32.mrf.mxu1 }
 0x8c2   : > { %v5314_v22 = vpop.permute.xlu1 %5313  ;;  %v5339_v41 = vpop.permute.xlu2 %5338 }
 0x8c3   : > { %v10162_v49 = vadd.f32 %v5339_v41, %v4588_v40  ;;  %6077 = vperm.xlu0 %7260, %v6050_v56   ;;  %v11042_v40 = vld [vmem:[#allocation9_spill] sm:$0xff] }
 0x8c4   : > { %v4581_v41 = vsel %vm4464_vm4, %v11042_v40, %v11041_v59 }
 0x8c5   : > { %v5582_v62 = vpack.c.bf16 %v10162_v49, %v10160_v30  ;;  %v5049_v54 = vpop.permute.xlu0 %5048  ;;  %v11061_v30 = vld [vmem:[#allocation70_spill] sm:$0xff] }
 0x8c6   : > { %v5426_v0 = vadd.f32 %v5049_v54, %v4530_v8  ;;  %v11045_v54 = vld [vmem:[#allocation48_spill] sm:$0xff]  ;;  %v11062_v49 = vld [vmem:[#allocation46_spill] sm:$0xff] }
 0x8c8   : > { %v5553_v61 = vpack.c.bf16 %v5426_v0, %v5425_v43 }
 0x8ca   : > { %v5304_v12 = vpop.permute.xlu1 %5303  ;;  %v10183_v25 = vpop.permute.xlu2 %5243  ;;  %5916 = vmatpush.bf16.msra.mxu0 %v5553_v61  ;;  %v4592_v61 = vsel %vm4464_vm4, %v11048_v27, %v11047_v5 }
 0x8cb   : > { %6072 = vperm.xlu0 %7260, %v6049_v26   ;;  %v10213_v38 = vadd.f32 %v5304_v12, %v4581_v41  ;;  %v11053_v41 = vld [vmem:[#allocation25_spill] sm:$0xff] }
 0x8cd   : > { %5917 = vmatmul.bf16.vlgmr.msra.gmra.mxu0 %v6977_v21  ;;  %v5124_v56 = vpop.permute.xlu0 %5123  ;;  %v10225_v21 = vpop.f32.mrf.mxu0 }
 0x8ce   : > { %5967 = vmatpush.bf16.msrb.mxu0 %v5576_v18  ;;  %v5441_v50 = vadd.f32 %v5124_v56, %v4545_v34  ;;  %v7009_v34 = vor.u32 %v7223_v47, %v7008_v20  ;;  %v11049_v56 = vld [vmem:[#allocation44_spill] sm:$0xff]  ;;  %v10259_v20 = vpop.f32.mrf.mxu1 }
 0x8d0   : > { %v5561_v18 = vpack.c.bf16 %v5442_v36, %v5441_v50  ;;  %v11050_v36 = vld [vmem:[#allocation79_spill] sm:$0xff] }
 0x8d1   : > { %v4583_v50 = vsel %vm4464_vm4, %v11050_v36, %v11049_v56  ;;  %v11059_v36 = vld [vmem:[#allocation68_spill] sm:$0xff] }
 0x8d2   : > { %5968 = vmatpush.bf16.msrb.mxu0 %v5575_v37  ;;  %v5309_v15 = vpop.permute.xlu1 %5308  ;;  %v10211_v44 = vpop.permute.xlu2 %5233  ;;  %5945 = vmatpush.bf16.msra.mxu1 %v5561_v18  ;;  %v11046_v37 = vld [vmem:[#allocation59_spill] sm:$0xff]  ;;  %v5479_v59 = vadd.f32 %v5314_v22, %v4583_v50  ;;  %v11060_v50 = vld [vmem:[#allocation18_spill] sm:$0xff] }
 0x8d3   : > { %v10215_v8 = vadd.f32 %v5309_v15, %v4582_v32  ;;  %v4591_v43 = vsel %vm4464_vm4, %v11046_v37, %v11045_v54  ;;  %v11054_v15 = vld [vmem:[#allocation69_spill] sm:$0xff]  ;;  %v11055_v32 = vld [vmem:[#allocation86_spill] sm:$0xff]  ;;  %v11056_v54 = vld [vmem:[#allocation75_spill] sm:$0xff] }
 0x8d4   : > { %v5487_v12 = vadd.f32 %v10098_v11, %v4591_v43  ;;  %v11051_v11 = vld [vmem:[#allocation10_spill] sm:$0xff]  ;;  %v4589_v2 = vsel %vm4464_vm4, %v11054_v15, %v11053_v41  ;;  %v4590_v37 = vsel %vm4464_vm4, %v11056_v54, %v11055_v32  ;;  %v7010_v22 = vld [vmem:[%s10597_s8 + $0x70] sm:$0xf0] }
 0x8d5   : > { %v5579_v0 = vpack.c.bf16 %v10215_v8, %v10213_v38  ;;  %5946 = vmatmul.bf16.vlgmr.msra.gmra.mxu1 %v6981_v3  ;;  %v5359_v26 = vpop.permute.xlu0 %5358  ;;  %v4584_v18 = vsel %vm4464_vm4, %v11052_v28, %v11051_v11  ;;  %v5485_v5 = vadd.f32 %v10141_v7, %v4589_v2  ;;  %v11057_v7 = vld [vmem:[#allocation47_spill] sm:$0xff]  ;;  %v4571_v11 = vsel %vm4464_vm4, %v11060_v50, %v11059_v36  ;;  %v11067_v36 = vld [vmem:[#allocation32_spill] sm:$0xff]  ;;  %v11068_v50 = vld [vmem:[#allocation22_spill] sm:$0xff] }
 0x8d6   : > { %v5488_v52 = vadd.f32 %v5359_v26, %v4592_v61  ;;  %v7219_v61 = vld [vmem:[%s10597_s8 + $0x54] sm:$0xf]  ;;  %v10257_v26 = vpop.f32.mrf.mxu0 }
 0x8d8   : > { %v5584_v13 = vpack.c.bf16 %v5488_v52, %v5487_v12  ;;  %v7013_v52 = vor.u32 %v7219_v61, %v7010_v22 }
 0x8da   : > { %v10239_v14 = vpop.permute.xlu1 %5213  ;;  %v5319_v3 = vpop.permute.xlu2 %5318  ;;  %5996 = vmatpush.bf16.msrb.mxu1 %v5584_v13 }
 0x8db   : > { %v5480_v40 = vadd.f32 %v5319_v3, %v4584_v18 }
 0x8dd   : > { %v5580_v45 = vpack.c.bf16 %v5480_v40, %v5479_v59  ;;  %5922 = vmatmul.bf16.gmra.mxu0 %v7009_v34  ;;  %v5349_v43 = vpop.permute.xlu0 %5348  ;;  %v11058_v34 = vld [vmem:[#allocation77_spill] sm:$0xff]  ;;  %v7040_v59 = vld [vmem:[%s10597_s8 + $0x90] sm:$0xf] }
 0x8de   : > { %v5486_v27 = vadd.f32 %v5349_v43, %v4590_v37  ;;  %v4572_v56 = vsel %vm4464_vm4, %v11058_v34, %v11057_v7  ;;  %v7231_v40 = vld [vmem:[%s10597_s8 + $0xac] sm:$0xf0]  ;;  %v10279_v2 = vpop.f32.mrf.mxu0  ;;  %v11063_v37 = vld [vmem:[#allocation65_spill] sm:$0xff] }
 0x8df   : > { %v5468_v18 = vadd.f32 %v10068_v17, %v4572_v56  ;;  %v7041_v15 = vor.u32 %v7231_v40, %v7040_v59  ;;  %v10286_v17 = vpop.f32.mrf.mxu1  ;;  %v11064_v43 = vld [vmem:[#allocation61_spill] sm:$0xff]  ;;  %v11066_v7 = vld [vmem:[#allocation3_spill] sm:$0xff]  ;;  %v11070_v40 = vld [vmem:[#allocation62_spill] sm:$0xff] }
 0x8e0   : > { %v5583_v12 = vpack.c.bf16 %v5486_v27, %v5485_v5  ;;  %v4570_v5 = vsel %vm4464_vm4, %v11064_v43, %v11063_v37  ;;  %v11069_v59 = vld [vmem:[#allocation21_spill] sm:$0xff] }
 0x8e2   : > { %v10261_v47 = vpop.permute.xlu1 %5203  ;;  %v5229_v13 = vpop.permute.xlu2 %5228  ;;  %5997 = vmatpush.bf16.msrb.mxu1 %v5583_v12  ;;  %v7045_v12 = vor.u32 %v7227_v39, %v7042_v1  ;;  %v11073_v39 = vld [vmem:[#allocation11_spill] sm:$0xff]  ;;  %v11075_v1 = vld [vmem:[#allocation73_spill] sm:$0xff] }
 0x8e5   : > { %5951 = vmatmul.bf16.gmra.mxu1 %v7013_v52  ;;  %v5254_v28 = vpop.permute.xlu0 %5253  ;;  %v11065_v52 = vld [vmem:[#allocation88_spill] sm:$0xff] }
 0x8e6   : > { %v5467_v3 = vadd.f32 %v5254_v28, %v4571_v11  ;;  %5998 = vmatpush.bf16.msrb.mxu1 %v5582_v62  ;;  %v4569_v62 = vsel %vm4464_vm4, %v11062_v49, %v11061_v30  ;;  %v4577_v34 = vsel %vm4464_vm4, %v11066_v7, %v11065_v52  ;;  %v11071_v30 = vld [vmem:[#allocation71_spill] sm:$0xff]  ;;  %v11072_v49 = vld [vmem:[#allocation6_spill] sm:$0xff] }
 0x8e7   : > { %v5465_v61 = vadd.f32 %v10183_v25, %v4569_v62  ;;  %v4578_v25 = vsel %vm4464_vm4, %v11068_v50, %v11067_v36  ;;  %v4568_v62 = vsel %vm4464_vm4, %v11072_v49, %v11071_v30  ;;  %v7074_v36 = vld [vmem:[%s10597_s8 + $0xf0] sm:$0xf0]  ;;  %v11081_v49 = vld [vmem:[#allocation45_spill] sm:$0xff] }
 0x8e8   : > { %v5574_v41 = vpack.c.bf16 %v5468_v18, %v5467_v3  ;;  %v5875_v3 = vpop.f32.mrf.mxu0 }
 0x8ea   : > { %v5284_v32 = vpop.permute.xlu1 %5283  ;;  %v10281_v54 = vpop.permute.xlu2 %5293  ;;  %5969 = vmatpush.bf16.msrb.mxu0 %v5574_v41  ;;  %5999 = vmatpush.bf16.msrb.mxu1 %v5581_v24  ;;  %v4567_v41 = vsel %vm4464_vm4, %v11070_v40, %v11069_v59 }
 0x8eb   : > { %v5473_v11 = vadd.f32 %v5284_v32, %v4577_v34  ;;  %v5463_v38 = vadd.f32 %v10211_v44, %v4567_v41  ;;  %v7239_v32 = vld [vmem:[%s10597_s8 + $0xec] sm:$0xf0] }
 0x8ed   : > { %5927 = vmatmul.bf16.gmra.mxu0 %v7041_v15  ;;  %v5249_v27 = vpop.permute.xlu0 %5248 }
 0x8ee   : > { %v5466_v22 = vadd.f32 %v5249_v27, %v4570_v5  ;;  %6000 = vmatpush.bf16.msrb.mxu1 %v5580_v45 }
 0x8f0   : > { %v5573_v24 = vpack.c.bf16 %v5466_v22, %v5465_v61 }
 0x8f2   : > { %v5626_v56 = vpop.permute.xlu1 %5625  ;;  %v5289_v45 = vpop.permute.xlu2 %5288  ;;  %5970 = vmatpush.bf16.msrb.mxu0 %v5573_v24  ;;  %6001 = vmatpush.bf16.msrb.mxu1 %v5579_v0  ;;  %v11076_v24 = vld [vmem:[#allocation63_spill] sm:$0xff] }
 0x8f3   : > { %v5818_v28 = vadd.f32 %v10077_v60, %v5626_v56  ;;  %v5474_v18 = vadd.f32 %v5289_v45, %v4578_v25  ;;  %v5904_v0 = vpop.f32.mrf.mxu1  ;;  %v7072_v60 = vld [vmem:[%s10597_s8 + $0xd0] sm:$0xf]  ;;  %v7235_v56 = vld [vmem:[%s10597_s8 + $0xd4] sm:$0xf]  ;;  %v11077_v45 = vld [vmem:[#allocation5_spill] sm:$0xff] }
 0x8f4   : > { %v7073_v22 = vor.u32 %v7239_v32, %v7072_v60  ;;  %v7077_v25 = vor.u32 %v7235_v56, %v7074_v36  ;;  %v7216_v56 = vld [vmem:[%s10597_s8 + $0x34] sm:$0xf0] }
 0x8f5   : > { %v5577_v15 = vpack.c.bf16 %v5474_v18, %v5473_v11  ;;  %5956 = vmatmul.bf16.gmra.mxu1 %v7045_v12  ;;  %v5239_v37 = vpop.permute.xlu0 %5238  ;;  %v5847_v43 = vadd.f32 %v10093_v4, %v5818_v28  ;;  %v11074_v4 = vld [vmem:[#allocation41_spill] sm:$0xff]  ;;  %v4565_v12 = vsel %vm4464_vm4, %v11076_v24, %v11075_v1  ;;  %v11078_v11 = vld [vmem:[#allocation64_spill] sm:$0xff]  ;;  %v11079_v18 = vld [vmem:[#allocation66_spill] sm:$0xff] }
 0x8f6   : > { %v5464_v8 = vadd.f32 %v5239_v37, %v4568_v62  ;;  %v4566_v44 = vsel %vm4464_vm4, %v11074_v4, %v11073_v39  ;;  %v4563_v28 = vsel %vm4464_vm4, %v11078_v11, %v11077_v45  ;;  %v11082_v62 = vld [vmem:[#allocation8_spill] sm:$0xff]  ;;  %v11086_v39 = vld [vmem:[#allocation57_spill] sm:$0xff] }
 0x8f7   : > { %v5876_v5 = vadd.f32 %v5875_v3, %v5847_v43  ;;  %v5462_v7 = vadd.f32 %v5229_v13, %v4566_v44  ;;  %v11080_v3 = vld [vmem:[#allocation4_spill] sm:$0xff]  ;;  %v5459_v40 = vadd.f32 %v10239_v14, %v4563_v28  ;;  %v4579_v37 = vsel %vm4464_vm4, %v11082_v62, %v11081_v49  ;;  %v11083_v43 = vld [vmem:[#allocation55_spill] sm:$0xff]  ;;  %v11088_v1 = vld [vmem:[#allocation17_spill] sm:$0xff] }
 0x8f8   : > { %v5572_v27 = vpack.c.bf16 %v5464_v8, %v5463_v38  ;;  %v4564_v13 = vsel %vm4464_vm4, %v11080_v3, %v11079_v18  ;;  %v11084_v38 = vld [vmem:[#allocation26_spill] sm:$0xff]  ;;  %v5475_v60 = vadd.f32 %v10281_v54, %v4579_v37  ;;  %v7212_v14 = vld [vmem:[%s10597_s8 + $0x1c] sm:$0xf]  ;;  %v11087_v44 = vld [vmem:[#allocation31_spill] sm:$0xff]  ;;  %v10398_v37 = vpop.f32.mrf.mxu0 }
 0x8f9   : > { %v10325_v61 = vadd.f32 %v5904_v0, %v5876_v5  ;;  %v4580_v8 = vsel %vm4464_vm4, %v11084_v38, %v11083_v43  ;;  %v4562_v24 = vsel %vm4464_vm4, %v11088_v1, %v11087_v44  ;;  %v7016_v45 = vld [vmem:[%s10597_s8 + $0x58] sm:$0xf]  ;;  %v7228_v3 = vld [vmem:[%s10597_s8 + $0x9c] sm:$0xf] }
 0x8fa   : > { %5971 = vmatpush.bf16.msrb.mxu0 %v5572_v27  ;;  %v6986_v27 = vld [vmem:[%s10597_s8 + $0x38] sm:$0xf0]  ;;  %v7224_v11 = vld [vmem:[%s10597_s8 + $0x74] sm:$0xf0]  ;;  %v10384_v18 = vpop.permute.xlu1 %5630 }
 0x8fb   : > { %v7017_v28 = vor.u32 %v7224_v11, %v7016_v45  ;;  %v7236_v43 = vld [vmem:[%s10597_s8 + $0xdc] sm:$0xf] }
 0x8fc   : > { %v7082_v38 = vld [vmem:[%s10597_s8 + $0xf8] sm:$0xf0] }
 0x8fd   : > { %5932 = vmatmul.bf16.gmra.mxu0 %v7073_v22  ;;  %v5224_v52 = vpop.permute.xlu0 %5223  ;;  %v11085_v22 = vld [vmem:[#allocation28_spill] sm:$0xff] }
 0x8fe   : > { %v5461_v34 = vadd.f32 %v5224_v52, %v4565_v12  ;;  %v4561_v4 = vsel %vm4464_vm4, %v11086_v39, %v11085_v22  ;;  %v6989_v12 = vor.u32 %v7212_v14, %v6986_v27  ;;  %v11090_v14 = vld [vmem:[#allocation39_spill] sm:$0xff]  ;;  %v10414_v39 = vpop.f32.mrf.mxu1 }
 0x8ff   : > { %v5457_v52 = vadd.f32 %v10261_v47, %v4561_v4  ;;  %v7018_v47 = vld [vmem:[%s10597_s8 + $0x78] sm:$0xf0] }
 0x900   : > { %v5571_v50 = vpack.c.bf16 %v5462_v7, %v5461_v34  ;;  %v6984_v34 = vld [vmem:[%s10597_s8 + $0x18] sm:$0xf] }
 0x902   : > { %5972 = vmatpush.bf16.msrb.mxu0 %v5571_v50  ;;  %v6985_v50 = vor.u32 %v7216_v56, %v6984_v34 }
 0x905   : > { %5961 = vmatmul.bf16.gmra.mxu1 %v7077_v25  ;;  %v5219_v59 = vpop.permute.xlu0 %5218  ;;  %v7220_v25 = vld [vmem:[%s10597_s8 + $0x5c] sm:$0xf] }
 0x906   : > { %v5460_v41 = vadd.f32 %v5219_v59, %v4564_v13  ;;  %v7050_v13 = vld [vmem:[%s10597_s8 + $0xb8] sm:$0xf0] }
 0x907   : > { %v7053_v59 = vor.u32 %v7228_v3, %v7050_v13 }
 0x908   : > { %v5570_v30 = vpack.c.bf16 %v5460_v41, %v5459_v40  ;;  %v5621_v40 = vpop.permute.xlu1 %5620  ;;  %v7048_v41 = vld [vmem:[%s10597_s8 + $0x98] sm:$0xf] }
 0x90a   : > { %5973 = vmatpush.bf16.msrb.mxu0 %v5570_v30  ;;  %v7232_v30 = vld [vmem:[%s10597_s8 + $0xb4] sm:$0xf0] }
 0x90b   : > { %v7049_v49 = vor.u32 %v7232_v30, %v7048_v41 }
 0x90d   : > { %v5299_v0 = vpop.permute.xlu0 %5298 }
 0x90e   : > { %v5476_v32 = vadd.f32 %v5299_v0, %v4580_v8  ;;  %v11089_v8 = vld [vmem:[#allocation89_spill] sm:$0xff] }
 0x910   : > { %v5578_v5 = vpack.c.bf16 %v5476_v32, %v5475_v60  ;;  %v5596_v62 = vpop.permute.xlu1 %5595  ;;  %v7085_v60 = vor.u32 %v7236_v43, %v7082_v38  ;;  %v7080_v32 = vld [vmem:[%s10597_s8 + $0xd8] sm:$0xf] }
 0x911   : > { %v5803_v0 = vadd.f32 %v11089_v8, %v5596_v62 }
 0x912   : > { %6002 = vmatpush.bf16.msrb.mxu1 %v5578_v5  ;;  %v7240_v5 = vld [vmem:[%s10597_s8 + $0xf4] sm:$0xf0] }
 0x913   : > { %v5832_v27 = vadd.f32 %v11090_v14, %v5803_v0  ;;  %v7081_v22 = vor.u32 %v7240_v5, %v7080_v32 }
 0x915   : > { %v5209_v54 = vpop.permute.xlu0 %5208  ;;  %v5861_v44 = vadd.f32 %v10128_v57, %v5832_v27 }
 0x916   : > { %v5458_v7 = vadd.f32 %v5209_v54, %v4562_v24  ;;  %6003 = vmatpush.bf16.msrb.mxu1 %v5577_v15  ;;  %v7021_v15 = vor.u32 %v7220_v25, %v7018_v47  ;;  %v5606_v54 = vpop.permute.xlu2 %5605 }
 0x917   : > { %v5890_v24 = vadd.f32 %v10133_v29, %v5861_v44  ;;  %v5808_v34 = vadd.f32 %v9962_v48, %v5606_v54 }
 0x918   : > { %v5569_v36 = vpack.c.bf16 %v5458_v7, %v5457_v52 }
 0x919   : > { %6004 = vmatmul.bf16.vlgmr.msrb.gmra.mxu1 %v6989_v12 }
 0x91a   : > { %5974 = vmatpush.bf16.msrb.mxu0 %v5569_v36  ;;  %v5837_v36 = vadd.f32 %v9970_v55, %v5808_v34 }
 0x91c   : > { %v5866_v57 = vadd.f32 %v10188_v51, %v5837_v36  ;;  %v5815_v51 = vadd.f32 %v10045_v46, %v5621_v40 }
 0x91d   : > { %5975 = vmatmul.bf16.vlgmr.msrb.gmra.mxu0 %v6985_v50  ;;  %v5616_v1 = vpop.permute.xlu0 %5615 }
 0x91e   : > { %v5895_v29 = vadd.f32 %v10196_v53, %v5866_v57  ;;  %v5813_v13 = vadd.f32 %v10017_v16, %v5616_v1  ;;  %v5844_v62 = vadd.f32 %v10054_v31, %v5815_v51  ;;  %v5601_v14 = vpop.permute.xlu2 %5600 }
 0x920   : > { %v5842_v55 = vadd.f32 %v10022_v35, %v5813_v13  ;;  %v5873_v8 = vadd.f32 %v10279_v2, %v5844_v62 }
 0x925   : > { %v5611_v50 = vpop.permute.xlu0 %5610 }
 0x929   : > { %6009 = vmatmul.bf16.gmra.mxu1 %v7021_v15  ;;  %v5810_v15 = vadd.f32 %v9995_v10, %v5611_v50 }
 0x92b   : > { %v5839_v45 = vadd.f32 %v9997_v42, %v5810_v15  ;;  %v5871_v42 = vadd.f32 %v10257_v26, %v5842_v55  ;;  %v5820_v55 = vadd.f32 %v10106_v58, %v10384_v18 }
 0x92d   : > { %5980 = vmatmul.bf16.gmra.mxu0 %v7017_v28  ;;  %v5868_v48 = vadd.f32 %v10225_v21, %v5839_v45  ;;  %v5900_v43 = vadd.f32 %v10259_v20, %v5871_v42  ;;  %v5805_v20 = vadd.f32 %v9929_v23, %v5601_v14 }
 0x92f   : > { %v5897_v41 = vadd.f32 %v10234_v63, %v5868_v48  ;;  %v5902_v63 = vadd.f32 %v10286_v17, %v5873_v8 }
 0x939   : > { %6014 = vmatmul.bf16.gmra.mxu1 %v7053_v59 }
 0x93d   : > { %5985 = vmatmul.bf16.gmra.mxu0 %v7049_v49 }
 0x949   : > { %6019 = vmatmul.bf16.gmra.mxu1 %v7085_v60 }
 0x94a   : > { %v5918_v4 = vpop.f32.mrf.mxu0 }
 0x94b   : > { %v5919_v12 = vadd.f32 %v5918_v4, %v5890_v24 }
 0x94d   : > { %5990 = vmatmul.bf16.gmra.mxu0 %v7081_v22  ;;  %v5834_v22 = vadd.f32 %v9939_v33, %v5805_v20 }
 0x94f   : > { %v5863_v2 = vadd.f32 %v10152_v6, %v5834_v22 }
 0x951   : > { %v5892_v1 = vadd.f32 %v10164_v19, %v5863_v2 }
 0x952   : > { %v5920_v52 = vpop.f32.mrf.mxu0  ;;  %v5947_v7 = vpop.f32.mrf.mxu1 }
 0x953   : > { %v5948_v56 = vadd.f32 %v5947_v7, %v5919_v12 }
 0x95a   : > { %v5923_v25 = vpop.f32.mrf.mxu0  ;;  %v5949_v47 = vpop.f32.mrf.mxu1 }
 0x95b   : > { %v5924_v11 = vadd.f32 %v5923_v25, %v5895_v29 }
 0x962   : > { %v5925_v28 = vpop.f32.mrf.mxu0  ;;  %v5952_v3 = vpop.f32.mrf.mxu1 }
 0x963   : > { %v5953_v59 = vadd.f32 %v5952_v3, %v5924_v11  ;;  %v5926_v30 = vadd.f32 %v5925_v28, %v5897_v41 }
 0x96a   : > { %v5928_v10 = vpop.f32.mrf.mxu0  ;;  %v5954_v49 = vpop.f32.mrf.mxu1 }
 0x96b   : > { %v5955_v53 = vadd.f32 %v5954_v49, %v5926_v30  ;;  %v5929_v16 = vadd.f32 %v5928_v10, %v5900_v43  ;;  %v5849_v49 = vadd.f32 %v10108_v9, %v5820_v55  ;;  %v7336_v55 = vmov 1  }
 0x972   : > { %v5930_v38 = vpop.f32.mrf.mxu0  ;;  %v5957_v21 = vpop.f32.mrf.mxu1 }
 0x973   : > { %v5958_v35 = vadd.f32 %v5957_v21, %v5929_v16  ;;  %v5931_v0 = vadd.f32 %v5930_v38, %v5902_v63 }
 0x97a   : > { %v5933_v60 = vpop.f32.mrf.mxu0  ;;  %v5959_v32 = vpop.f32.mrf.mxu1 }
 0x97b   : > { %v5934_v46 = vadd.f32 %v5933_v60, %v10325_v61  ;;  %v5960_v40 = vadd.f32 %v5959_v32, %v5931_v0  ;;  %v5921_v61 = vadd.f32 %v5920_v52, %v5892_v1 }
 0x97d   : > { %v5950_v12 = vadd.f32 %v5949_v47, %v5921_v61 }
 0x982   : > { %v5962_v26 = vpop.f32.mrf.mxu1  ;;  %v5935_v27 = vpop.f32.mrf.mxu0 }
 0x983   : > { %v5963_v5 = vadd.f32 %v5962_v26, %v5934_v46  ;;  %v7244_v26 = vld [vmem:[%s10599_s10 + $0x18] sm:$0xff] }
 0x98a   : > { %v5964_v31 = vpop.f32.mrf.mxu1 }
 0x996   : > { %v6005_v4 = vpop.f32.mrf.mxu1 }
 0x99a   : > { %v5976_v44 = vpop.f32.mrf.mxu0 }
 0x99b   : > { %v5977_v17 = vadd.f32 %v5976_v44, %v5948_v56 }
 0x99d   : > { %v6006_v24 = vadd.f32 %v6005_v4, %v5977_v17  ;;  %v6088_v17 = vpop.permute.xlu1 %6087 }
 0x99e   : > { %v6007_v54 = vpop.f32.mrf.mxu1 }
 0x99f   : > { %v6025_v25 = vmax.f32 %v6006_v24, 0.0 }
 0x9a2   : > { %v5978_v7 = vpop.f32.mrf.mxu0 }
 0x9a3   : > { %v5979_v34 = vadd.f32 %v5978_v7, %v5950_v12 }
 0x9a5   : > { %v6008_v36 = vadd.f32 %v6007_v54, %v5979_v34  ;;  %v6093_v54 = vpop.permute.xlu2 %6092  ;;  %v6083_v61 = vpop.permute.xlu1 %6082 }
 0x9a6   : > { %v6010_v50 = vpop.f32.mrf.mxu1 }
 0x9a7   : > { %v6026_v23 = vmax.f32 %v6008_v36, 0.0  ;;  %v6098_v36 = vpop.permute.xlu0 %6097 }
 0x9a9   : > { %v6042_v15 = vpack.c.bf16 %v6026_v23, %v6025_v25 }
 0x9aa   : > { %v5981_v57 = vpop.f32.mrf.mxu0 }
 0x9ab   : > { %v5982_v45 = vadd.f32 %v5981_v57, %v5953_v59 }
 0x9ad   : > { %v6011_v6 = vadd.f32 %v6010_v50, %v5982_v45  ;;  %v6068_v50 = vpop.permute.xlu2 %6067  ;;  %v6058_v25 = vpop.permute.xlu1 %6057 }
 0x9ae   : > { %v6012_v33 = vpop.f32.mrf.mxu1 }
 0x9af   : > { %v6027_v19 = vmax.f32 %v6011_v6, 0.0  ;;  %v6078_v45 = vpop.permute.xlu0 %6077 }
 0x9b2   : > { %v5983_v29 = vpop.f32.mrf.mxu0 }
 0x9b3   : > { %v5984_v11 = vadd.f32 %v5983_v29, %v5955_v53  ;;  %v5878_v53 = vadd.f32 %v10398_v37, %v5849_v49  ;;  %v7241_v37 = vld [vmem:[%s10599_s10] sm:$0xff] }
 0x9b5   : > { %v6013_v56 = vadd.f32 %v6012_v33, %v5984_v11  ;;  %v5907_v38 = vadd.f32 %v10414_v39, %v5878_v53  ;;  %v7242_v39 = vld [vmem:[%s10599_s10 + $0x8] sm:$0xff]  ;;  %v6063_v29 = vpop.permute.xlu2 %6062  ;;  %v6190_v11 = vld [vmem:[%s10602_s13 + $0x10] sm:$0xff]  ;;  %v10490_v53 = vld [vmem:[%s11092_s0 + $0x40] sm:$0xff] }
 0x9b6   : > { %v6015_v28 = vpop.f32.mrf.mxu1 }
 0x9b7   : > { %v6028_v3 = vmax.f32 %v6013_v56, 0.0  ;;  %v5936_v21 = vadd.f32 %v5935_v27, %v5907_v38  ;;  %v6178_v38 = vld [vmem:[%s11092_s0 + $0x38] sm:$0xff] }
 0x9b9   : > { %v6043_v13 = vpack.c.bf16 %v6028_v3, %v6027_v19  ;;  %v6191_v19 = vld [vmem:[%s10602_s13 + $0x18] sm:$0xff]  ;;  %v6188_v3 = vld [vmem:[%s10602_s13] sm:$0xff] }
 0x9ba   : > { %v5986_v52 = vpop.f32.mrf.mxu0 }
 0x9bb   : > { %v5987_v47 = vadd.f32 %v5986_v52, %v5958_v35  ;;  %v5965_v35 = vadd.f32 %v5964_v31, %v5936_v21 }
 0x9bd   : > { %v6016_v30 = vadd.f32 %v6015_v28, %v5987_v47  ;;  %v6189_v47 = vld [vmem:[%s10602_s13 + $0x8] sm:$0xff] }
 0x9be   : > { %v6017_v48 = vpop.f32.mrf.mxu1 }
 0x9bf   : > { %v6029_v51 = vmax.f32 %v6016_v30, 0.0 }
 0x9c2   : > { %v5988_v41 = vpop.f32.mrf.mxu0 }
 0x9c3   : > { %v5989_v10 = vadd.f32 %v5988_v41, %v5960_v40  ;;  %v7243_v40 = vld [vmem:[%s10599_s10 + $0x10] sm:$0xff]  ;;  %v11091_v41 = vmov 0  }
 0x9c5   : > { %v6018_v59 = vadd.f32 %v6017_v48, %v5989_v10  ;;  %v6192_v48 = vld [vmem:[%s10602_s13 + $0x20] sm:$0xff] }
 0x9c6   : > { %v6020_v43 = vpop.f32.mrf.mxu1 }
 0x9c7   : > { %v6030_v42 = vmax.f32 %v6018_v59, 0.0 }
 0x9c9   : > { %v6044_v62 = vpack.c.bf16 %v6030_v42, %v6029_v51 }
 0x9ca   : > { %v5991_v16 = vpop.f32.mrf.mxu0 }
 0x9cb   : > { %v5992_v8 = vadd.f32 %v5991_v16, %v5963_v5  ;;  %v6041_v5 = vld [vmem:[%s10599_s10 + $0x20] sm:$0xf] }
 0x9cc   : > { %v6117_v14 = vunpack.c.l.b16 %v6041_v5 }
 0x9cd   : > { %v6021_v58 = vadd.f32 %v6020_v43, %v5992_v8 }
 0x9ce   : > { %v6022_v0 = vpop.f32.mrf.mxu1  ;;  %v6122_v31 = vpack.c.b16 %v6117_v14, %v6117_v14 }
 0x9cf   : > { %v6031_v32 = vmax.f32 %v6021_v58, 0.0  ;;  %v6176_v58 = vld [vmem:[%s11092_s0 + $0x28] sm:$0xff] }
 0x9d2   : > { %v5993_v63 = vpop.f32.mrf.mxu0 }
 0x9d3   : > { %v5994_v18 = vadd.f32 %v5993_v63, %v5965_v35 }
 0x9d5   : > { %v6023_v60 = vadd.f32 %v6022_v0, %v5994_v18 }
 0x9d7   : > { %v6032_v9 = vmax.f32 %v6023_v60, 0.0  ;;  %v6175_v60 = vld [vmem:[%s11092_s0 + $0x20] sm:$0xff] }
 0x9d9   : > { %v6045_v46 = vpack.c.bf16 %v6032_v9, %v6031_v32 }
 0x9db   : > { %6142 = vmatpush.bf16.msra.mxu0 %v6045_v46 }
 0x9df   : > { %6143 = vmatpush.bf16.msra.mxu0 %v6044_v62  ;;  %v6177_v62 = vld [vmem:[%s11092_s0 + $0x30] sm:$0xff] }
 0x9e3   : > { %6144 = vmatpush.bf16.msra.mxu0 %v6043_v13  ;;  %v6073_v13 = vpop.permute.xlu0 %6072 }
 0x9e7   : > { %6145 = vmatpush.bf16.msra.mxu0 %v6042_v15 }
 0x9ea   : > { %7102 = vmatmul.msk.bf16.vlgmr.msra.gmra.mxu0 %vm1101_vm3, %v7241_v37 }
 0x9fa   : > { %7103 = vmatmul.msk.bf16.gmra.mxu0 %vm1101_vm3, %v7242_v39 }
 0xa0a   : > { %7104 = vmatmul.msk.bf16.gmra.mxu0 %vm1101_vm3, %v7243_v40 }
 0xa1a   : > { %7105 = vmatmul.msk.bf16.gmra.mxu0 %vm1101_vm3, %v7244_v26 }
 0xa2a   : > { %7106 = vmatmul.msk.bf16.gmra.mxu0 %vm1101_vm3, %v6122_v31 }
 0xa67   : > { %v6147_v20 = vpop.f32.mrf.mxu0 }
 0xa68   : > { %v6148_v15 = vadd.f32 %v6147_v20, %v6058_v25  ;;  %v6173_v20 = vld [vmem:[%s11092_s0 + $0x10] sm:$0xff] }
 0xa6f   : > { %v6149_v27 = vpop.f32.mrf.mxu0 }
 0xa70   : > { %v6150_v56 = vadd.f32 %v6149_v27, %v6063_v29  ;;  %v10529_v29 = vld [vmem:[%s10601_s12] sm:$0xff] }
 0xa77   : > { %v6152_v22 = vpop.f32.mrf.mxu0 }
 0xa78   : > { %v6153_v57 = vadd.f32 %v6152_v22, %v6068_v50  ;;  %v6171_v22 = vld [vmem:[%s11092_s0] sm:$0xff] }
 0xa7f   : > { %v6154_v4 = vpop.f32.mrf.mxu0 }
 0xa80   : > { %v6155_v52 = vadd.f32 %v6154_v4, %v6073_v13  ;;  %v6174_v4 = vld [vmem:[%s11092_s0 + $0x18] sm:$0xff] }
 0xa87   : > { %v6157_v2 = vpop.f32.mrf.mxu0 }
 0xa88   : > { %v6158_v28 = vadd.f32 %v6157_v2, %v6078_v45 }
 0xa8f   : > { %v6159_v44 = vpop.f32.mrf.mxu0 }
 0xa90   : > { %v6160_v7 = vadd.f32 %v6159_v44, %v6083_v61 }
 0xa97   : > { %v6162_v1 = vpop.f32.mrf.mxu0 }
 0xa98   : > { %v6163_v24 = vadd.f32 %v6162_v1, %v6088_v17  ;;  %v6172_v17 = vld [vmem:[%s11092_s0 + $0x8] sm:$0xff] }
 0xa9a   : > { %6228 = vperm.xlu1 %7261, %v6163_v24  }
 0xa9f   : > { %v6164_v12 = vpop.f32.mrf.mxu0 }
 0xaa0   : > { %v6165_v34 = vadd.f32 %v6164_v12, %v6093_v54 }
 0xaa2   : > { %6233 = vperm.xlu2 %7262, %v6165_v34   ;;  %6223 = vperm.xlu1 %7261, %v6160_v7  }
 0xaa7   : > { %v6167_v23 = vpop.f32.mrf.mxu0 }
 0xaa8   : > { %v6168_v33 = vadd.f32 %v6167_v23, %v6098_v36 }
 0xaaa   : > { %6208 = vperm.xlu2 %7262, %v6153_v57   ;;  %6198 = vperm.xlu1 %7261, %v6148_v15  }
 0xaab   : > { %6238 = vperm.xlu0 %7260, %v6168_v33  }
 0xaaf   : > { %v6169_v6 = vpop.f32.mrf.mxu0 }
 0xab2   : > { %6203 = vperm.xlu2 %7262, %v6150_v56   ;;  %6276 = vperm.xlu1 %7261, %v6190_v11  }
 0xab3   : > { %6218 = vperm.xlu0 %7260, %v6158_v28  }
 0xaba   : > { %6281 = vperm.xlu2 %7262, %v6191_v19   ;;  %6266 = vperm.xlu1 %7261, %v6188_v3  }
 0xabb   : > { %6213 = vperm.xlu0 %7260, %v6155_v52  }
 0xac2   : > { %6271 = vperm.xlu2 %7262, %v6189_v47   ;;  %7263 = vset.pattern.permute.xlu1 %v7336_v55 }
 0xac3   : > { %6286 = vperm.xlu0 %7260, %v6192_v48   ;;  %6435 = vperm.xlu1 %7263, %v6163_v24  }
 0xaca   : > { %7264 = vset.pattern.permute.xlu2 %v7336_v55 }
 0xacb   : > { %7265 = vset.pattern.permute.xlu0 %v7336_v55  ;;  %6439 = vperm.xlu2 %7264, %v6165_v34  }
 0xacc   : > { %6431 = vperm.xlu1 %7263, %v6160_v7   ;;  %6443 = vperm.xlu0 %7265, %v6168_v33  }
 0xad3   : > { %6419 = vperm.xlu2 %7264, %v6153_v57  }
 0xad4   : > { %6411 = vperm.xlu1 %7263, %v6148_v15   ;;  %6427 = vperm.xlu0 %7265, %v6158_v28  }
 0xadb   : > { %6415 = vperm.xlu2 %7264, %v6150_v56  }
 0xadc   : > { %6423 = vperm.xlu0 %7265, %v6155_v52   ;;  %7267 = vset.pattern.permute.xlu1 %v11091_v41 }
 0xae3   : > { %7268 = vset.pattern.permute.xlu2 %v11091_v41 }
 0xae4   : > { %7266 = vset.pattern.permute.xlu0 %v11091_v41 }
 0xafc   : > { %v6234_v30 = vpop.permute.xlu2 %6233 }
 0xafd   : > { %v6248_v63 = vadd.f32 %v6234_v30, %v6178_v38 }
 0xaff   : > { %v6257_v39 = vmax.f32 %v6248_v63, 0.0  ;;  %v6184_v63 = vld [vmem:[%s10601_s12 + $0x10] sm:$0xf] }
 0xb04   : > { %v6209_v10 = vpop.permute.xlu2 %6208 }
 0xb05   : > { %v6243_v2 = vadd.f32 %v6209_v10, %v6173_v20 }
 0xb07   : > { %v6252_v12 = vmax.f32 %v6243_v2, 0.0 }
 0xb0c   : > { %v6229_v49 = vpop.permute.xlu1 %6228  ;;  %v6204_v59 = vpop.permute.xlu2 %6203 }
 0xb0d   : > { %v6247_v8 = vadd.f32 %v6229_v49, %v6177_v62  ;;  %v6242_v7 = vadd.f32 %v6204_v59, %v6172_v17  ;;  %v7246_v49 = vld [vmem:[%s10601_s12 + $0x8] sm:$0xff] }
 0xb0f   : > { %v6256_v0 = vmax.f32 %v6247_v8, 0.0  ;;  %v6251_v25 = vmax.f32 %v6242_v7, 0.0 }
 0xb11   : > { %v6262_v5 = vpack.c.bf16 %v6257_v39, %v6256_v0 }
 0xb14   : > { %v6224_v51 = vpop.permute.xlu1 %6223  ;;  %v10485_v42 = vpop.permute.xlu2 %6281 }
 0xb15   : > { %v6246_v32 = vadd.f32 %v6224_v51, %v6176_v58 }
 0xb17   : > { %v6255_v14 = vmax.f32 %v6246_v32, 0.0 }
 0xb1c   : > { %v6199_v43 = vpop.permute.xlu1 %6198  ;;  %v10505_v9 = vpop.permute.xlu2 %6271 }
 0xb1d   : > { %v6239_v16 = vpop.permute.xlu0 %6238  ;;  %v6241_v24 = vadd.f32 %v6199_v43, %v6171_v22 }
 0xb1e   : > { %v6249_v21 = vadd.f32 %v6239_v16, %v10490_v53 }
 0xb1f   : > { %v6250_v36 = vmax.f32 %v6241_v24, 0.0 }
 0xb20   : > { %v6258_v35 = vmax.f32 %v6249_v21, 0.0 }
 0xb21   : > { %v6259_v57 = vpack.c.bf16 %v6251_v25, %v6250_v36  ;;  %v6194_v36 = vld [vmem:[%s10604_s15 + $0x8] sm:$0xff] }
 0xb22   : > { %v6263_v18 = vpack.c.bf16 %v6258_v35, %v6258_v35  ;;  %6354 = vperm.xlu1 %7267, %v6194_v36  }
 0xb24   : > { %v10507_v46 = vpop.permute.xlu1 %6276  ;;  %v6314_v37 = vsel %vm6312_vm5, %v6263_v18, 0 }
 0xb25   : > { %6319 = vmatpush.bf16.msra.mxu1 %v6314_v37  ;;  %v6219_v40 = vpop.permute.xlu0 %6218  ;;  %v6440_v54 = vpop.permute.xlu2 %6439 }
 0xb26   : > { %v6245_v26 = vadd.f32 %v6219_v40, %v6175_v60  ;;  %v6453_v23 = vadd.f32 %v6440_v54, %v6178_v38 }
 0xb28   : > { %v6254_v31 = vmax.f32 %v6245_v26, 0.0  ;;  %v6462_v11 = vmax.f32 %v6453_v23, 0.0 }
 0xb29   : > { %6320 = vmatpush.bf16.msra.mxu1 %v6262_v5 }
 0xb2a   : > { %v6261_v27 = vpack.c.bf16 %v6255_v14, %v6254_v31 }
 0xb2c   : > { %v10519_v44 = vpop.permute.xlu1 %6266 }
 0xb2d   : > { %6321 = vmatpush.bf16.msra.mxu1 %v6261_v27  ;;  %v6214_v1 = vpop.permute.xlu0 %6213  ;;  %v6420_v6 = vpop.permute.xlu2 %6419 }
 0xb2e   : > { %v6244_v61 = vadd.f32 %v6214_v1, %v6174_v4  ;;  %v6448_v21 = vadd.f32 %v6420_v6, %v6173_v20 }
 0xb30   : > { %v6253_v34 = vmax.f32 %v6244_v61, 0.0 }
 0xb32   : > { %v6260_v50 = vpack.c.bf16 %v6253_v34, %v6252_v12 }
 0xb34   : > { %6322 = vmatpush.bf16.msra.mxu1 %v6260_v50 }
 0xb35   : > { %v10524_v15 = vpop.permute.xlu0 %6286  ;;  %v6436_v33 = vpop.permute.xlu1 %6435 }
 0xb36   : > { %v6452_v45 = vadd.f32 %v6436_v33, %v6177_v62  ;;  %v6416_v13 = vpop.permute.xlu2 %6415 }
 0xb37   : > { %v6447_v52 = vadd.f32 %v6416_v13, %v6172_v17 }
 0xb38   : > { %6323 = vmatpush.bf16.msra.mxu1 %v6259_v57  ;;  %v6461_v56 = vmax.f32 %v6452_v45, 0.0  ;;  %v7247_v57 = vld [vmem:[%s10603_s14] sm:$0xff] }
 0xb39   : > { %v6456_v59 = vmax.f32 %v6447_v52, 0.0 }
 0xb3a   : > { %v10531_v28 = vpack.c.bf16 %v6462_v11, %v6461_v56 }
 0xb3b   : > { %7115 = vmatmul.msk.bf16.vlgmr.msra.gmra.mxu1 %vm6302_vm6, %v10529_v29 }
 0xb3e   : > { %v6432_v19 = vpop.permute.xlu1 %6431  ;;  %v6444_v3 = vpop.permute.xlu0 %6443 }
 0xb3f   : > { %v6451_v47 = vadd.f32 %v6432_v19, %v6176_v58  ;;  %v6457_v58 = vmax.f32 %v6448_v21, 0.0  ;;  %v6454_v27 = vadd.f32 %v6444_v3, %v10490_v53 }
 0xb41   : > { %v6460_v51 = vmax.f32 %v6451_v47, 0.0  ;;  %v6463_v54 = vmax.f32 %v6454_v27, 0.0 }
 0xb43   : > { %v6468_v50 = vpack.c.bf16 %v6463_v54, %v6463_v54 }
 0xb45   : > { %v6470_v33 = vsel %vm6312_vm5, %v6468_v50, 0 }
 0xb46   : > { %v6412_v48 = vpop.permute.xlu1 %6411  ;;  %v6428_v41 = vpop.permute.xlu0 %6427 }
 0xb47   : > { %v6446_v30 = vadd.f32 %v6412_v48, %v6171_v22  ;;  %v6450_v10 = vadd.f32 %v6428_v41, %v6175_v60  ;;  %v6298_v60 = vunpack.c.l.b16 %v6184_v63 }
 0xb49   : > { %v6455_v62 = vmax.f32 %v6446_v30, 0.0  ;;  %v6459_v43 = vmax.f32 %v6450_v10, 0.0  ;;  %v6301_v32 = vpack.c.b16 %v6298_v60, %v6298_v60 }
 0xb4b   : > { %v6464_v16 = vpack.c.bf16 %v6456_v59, %v6455_v62  ;;  %v6466_v38 = vpack.c.bf16 %v6460_v51, %v6459_v43  ;;  %7116 = vmatmul.msk.bf16.gmra.mxu1 %vm6302_vm6, %v7246_v49 }
 0xb4e   : > { %v6424_v8 = vpop.permute.xlu0 %6423 }
 0xb4f   : > { %v6449_v35 = vadd.f32 %v6424_v8, %v6174_v4  ;;  %v6193_v4 = vld [vmem:[%s10604_s15] sm:$0xff] }
 0xb50   : > { %6349 = vperm.xlu0 %7266, %v6193_v4  }
 0xb51   : > { %v6458_v18 = vmax.f32 %v6449_v35, 0.0 }
 0xb53   : > { %v6465_v0 = vpack.c.bf16 %v6458_v18, %v6457_v58 }
 0xb58   : > { %7269 = vset.pattern.permute.xlu0 %v7336_v55 }
 0xb5b   : > { %7117 = vmatmul.msk.bf16.gmra.mxu1 %vm6302_vm6, %v6301_v32 }
 0xb94   : > { %v6355_v6 = vpop.permute.xlu1 %6354 }
 0xbb8   : > { %v6325_v37 = vpop.f32.mrf.mxu1 }
 0xbb9   : > { %v6326_v61 = vadd.f32 %v6325_v37, %v10519_v44 }
 0xbbb   : > { %v6339_v25 = vmax.f32 %v6326_v61, 0.0 }
 0xbc0   : > { %v6327_v39 = vpop.f32.mrf.mxu1 }
 0xbc1   : > { %v6328_v17 = vadd.f32 %v6327_v39, %v10505_v9 }
 0xbc2   : > { %v6350_v45 = vpop.permute.xlu0 %6349 }
 0xbc3   : > { %v6340_v53 = vmax.f32 %v6328_v17, 0.0 }
 0xbc5   : > { %v6344_v23 = vpack.c.bf16 %v6340_v53, %v6339_v25 }
 0xbc8   : > { %v6330_v40 = vpop.f32.mrf.mxu1 }
 0xbc9   : > { %v6331_v22 = vadd.f32 %v6330_v40, %v10507_v46 }
 0xbcb   : > { %v6341_v12 = vmax.f32 %v6331_v22, 0.0 }
 0xbd0   : > { %v6332_v26 = vpop.f32.mrf.mxu1 }
 0xbd1   : > { %v6333_v31 = vadd.f32 %v6332_v26, %v10485_v42 }
 0xbd3   : > { %v6342_v1 = vmax.f32 %v6333_v31, 0.0 }
 0xbd5   : > { %v6345_v34 = vpack.c.bf16 %v6342_v1, %v6341_v12 }
 0xbd8   : > { %v6335_v5 = vpop.f32.mrf.mxu1 }
 0xbd9   : > { %v6336_v14 = vadd.f32 %v6335_v5, %v10524_v15 }
 0xbdb   : > { %v6343_v20 = vmax.f32 %v6336_v14, 0.0 }
 0xbdd   : > { %v6346_v2 = vpack.c.bf16 %v6343_v20, %v6343_v20 }
 0xbdf   : > { %v6367_v24 = vsel %vm6312_vm5, %v6346_v2, 0 }
 0xbe0   : > { %v6337_v7 = vpop.f32.mrf.mxu1  ;;  %6374 = vmatpush.bf16.msra.mxu2 %v6367_v24 }
 0xbe4   : > { %6375 = vmatpush.bf16.msra.mxu2 %v6345_v34 }
 0xbe8   : > { %6376 = vmatpush.bf16.msra.mxu2 %v6344_v23 }
 0xbeb   : > { %7122 = vmatmul.msk.bf16.vlgmr.msra.gmra.mxu2 %vm6362_vm7, %v7247_v57 }
 0xbec   : > { %6475 = vmatpush.bf16.msrb.mxu2 %v6470_v33 }
 0xbf0   : > { %6476 = vmatpush.bf16.msrb.mxu2 %v10531_v28  ;;  %v6187_v28 = vld [vmem:[%s10605_s16] sm:$0x3] }
 0xbf4   : > { %6477 = vmatpush.bf16.msrb.mxu2 %v6466_v38 }
 0xbf8   : > { %6478 = vmatpush.bf16.msrb.mxu2 %v6465_v0 }
 0xbfc   : > { %6479 = vmatpush.bf16.msrb.mxu2 %v6464_v16 }
 0xbff   : > { %7124 = vmatmul.msk.bf16.vlgmr.msrb.gmra.mxu2 %vm6302_vm6, %v10529_v29 }
 0xc0f   : > { %7125 = vmatmul.msk.bf16.gmra.mxu2 %vm6302_vm6, %v7246_v49 }
 0xc1f   : > { %7126 = vmatmul.msk.bf16.gmra.mxu2 %vm6302_vm6, %v6301_v32 }
 0xc6e   : > { %v6378_v55 = vpop.f32.mrf.mxu2 }
 0xc6f   : > { %v6379_v11 = vadd.f32 %v6378_v55, %v6350_v45 }
 0xc71   : > { %v6383_v13 = vmax.f32 %v6379_v11, 0.0 }
 0xc76   : > { %v6380_v56 = vpop.f32.mrf.mxu2 }
 0xc77   : > { %v6381_v19 = vadd.f32 %v6380_v56, %v6355_v6 }
 0xc79   : > { %v6384_v3 = vmax.f32 %v6381_v19, 0.0 }
 0xc7b   : > { %v6385_v52 = vpack.c.bf16 %v6384_v3, %v6383_v13 }
 0xc7d   : > { %6402 = vmatpush.bf16.msra.mxu3 %v6385_v52 }
 0xc80   : > { %7123 = vmatmul.msk.bf16.vlgmr.msra.gmra.mxu3 %vm6391_vm8, %v6187_v28 }
 0xc82   : > { %v6481_v29 = vpop.f32.mrf.mxu2 }
 0xc83   : > { %v6482_v21 = vadd.f32 %v6481_v29, %v10519_v44 }
 0xc8a   : > { %v6483_v47 = vpop.f32.mrf.mxu2 }
 0xc8b   : > { %v6484_v43 = vadd.f32 %v6483_v47, %v10505_v9 }
 0xc8d   : > { %v6496_v63 = vmax.f32 %v6484_v43, 0.0 }
 0xc92   : > { %v6486_v48 = vpop.f32.mrf.mxu2 }
 0xc93   : > { %v6487_v51 = vadd.f32 %v6486_v48, %v10507_v46 }
 0xc95   : > { %v6497_v8 = vmax.f32 %v6487_v51, 0.0 }
 0xc9a   : > { %v6488_v41 = vpop.f32.mrf.mxu2 }
 0xc9b   : > { %v6489_v49 = vadd.f32 %v6488_v41, %v10485_v42  ;;  %v6195_v42 = vld [vmem:[%s10606_s17] sm:$0x7] }
 0xc9c   : > { %6388 = vperm.xlu2 %7268, %v6195_v42  }
 0xc9d   : > { %v6498_v16 = vmax.f32 %v6489_v49, 0.0 }
 0xc9f   : > { %v6501_v58 = vpack.c.bf16 %v6498_v16, %v6497_v8 }
 0xca2   : > { %v6491_v30 = vpop.f32.mrf.mxu2 }
 0xca3   : > { %v6492_v10 = vadd.f32 %v6491_v30, %v10524_v15  ;;  %v6495_v15 = vmax.f32 %v6482_v21, 0.0 }
 0xca5   : > { %v6499_v59 = vmax.f32 %v6492_v10, 0.0  ;;  %v6500_v46 = vpack.c.bf16 %v6496_v63, %v6495_v15 }
 0xca7   : > { %v6502_v62 = vpack.c.bf16 %v6499_v59, %v6499_v59 }
 0xca9   : > { %v6504_v38 = vsel %vm6312_vm5, %v6502_v62, 0 }
 0xcaa   : > { %6511 = vmatpush.bf16.msrb.mxu3 %v6504_v38  ;;  %v6493_v35 = vpop.f32.mrf.mxu2 }
 0xcae   : > { %6512 = vmatpush.bf16.msrb.mxu3 %v6501_v58 }
 0xcb2   : > { %6513 = vmatpush.bf16.msrb.mxu3 %v6500_v46 }
 0xcb5   : > { %7127 = vmatmul.msk.bf16.vlgmr.msrb.gmra.mxu3 %vm6362_vm7, %v7247_v57 }
 0xcf6   : > { %v6389_v18 = vpop.permute.xlu2 %6388 }
 0xd03   : > { %v6404_v9 = vpop.f32.mrf.mxu3 }
 0xd04   : > { %v6405_v44 = vadd.f32 %v6404_v9, %v6389_v18 }
 0xd06   : > { %7270 = vtanh.f32 %v6405_v44 }
 0xd0b   : > { %v6406_v0 = vpop.f32.mrf.mxu3 }
 0xd0c   : > { %v7271_v60 = vpop.eup %7270 }
 0xd0d   : > { %6409 = vst [vmem:[%s580_s20] sm:$0x7] %v7271_v60 }
 0xd38   : > { %v6515_v32 = vpop.f32.mrf.mxu3 }
 0xd39   : > { %v6516_v37 = vadd.f32 %v6515_v32, %v6350_v45 }
 0xd3b   : > { %v6520_v26 = vmax.f32 %v6516_v37, 0.0 }
 0xd40   : > { %v6517_v39 = vpop.f32.mrf.mxu3 }
 0xd41   : > { %v6518_v40 = vadd.f32 %v6517_v39, %v6355_v6 }
 0xd43   : > { %v6521_v5 = vmax.f32 %v6518_v40, 0.0 }
 0xd45   : > { %v6522_v14 = vpack.c.bf16 %v6521_v5, %v6520_v26 }
 0xd47   : > { %6530 = vmatpush.bf16.msra.mxu3 %v6522_v14 }
 0xd4a   : > { %7128 = vmatmul.msk.bf16.vlgmr.msra.gmra.mxu3 %vm6391_vm8, %v6187_v28 }
 0xdcd   : > { %v6532_v31 = vpop.f32.mrf.mxu3 }
 0xdce   : > { %v6533_v20 = vadd.f32 %v6532_v31, %v6389_v18 }
 0xdd0   : > { %7272 = vtanh.f32 %v6533_v20 }
 0xdd5   : > { %v6534_v27 = vpop.f32.mrf.mxu3 }
 0xdd6   : > { %v7273_v22 = vpop.eup %7272 }
 0xdd7   : > { %7129 = vst [vmem:[%s580_s20 + $0x4] sm:$0x7] %v7273_v22 }
 0xdd8 PF: > { %s28_s27 = sadd.s32 1, %s7331_s27  }
 0xdd9   : > { %p25_p4 = scmp.ge.s32.totalorder %s28_s27, 4  }
 0xddb   :  { %27 = sbr.rel (!%p25_p4) target bundleno = 4 (0x4), region = 124 }

</bundles_post_ra>
